<compile_context>
chip_gen: v7x
topology: tpu7x:2x2x1
jax: 0.10.0
libtpu: 0.0.40
codegen_flags: <defaults>
</compile_context>

<pallas_src>
import functools
import math

import jax
import jax.numpy as jnp
from jax import lax
from jax.experimental import pallas as pl
from jax.experimental.pallas import tpu as pltpu

LN_EPS = 1e-5  # PyTorch LayerNorm default


# --------------------------- per-generation config ---------------------------

@functools.lru_cache(maxsize=None)
def _tpu_cfg():
    """Tile caps / VMEM budgets per TPU generation (conservative default)."""
    kind = ""
    try:
        kind = jax.devices()[0].device_kind.lower()
    except Exception:
        pass
    if "v5 lite" in kind or "v5e" in kind:
        # 4x128^2 MXU, 128 MiB VMEM.
        return dict(mxu_align=128, max_tm=512, max_tn=512, max_tk=1024,
                    vmem_limit=96 * 1024 * 1024, attn_budget=24 * 1024 * 1024)
    if "v6" in kind:
        # 2x256^2 MXU, 128 MiB VMEM.
        return dict(mxu_align=256, max_tm=512, max_tn=512, max_tk=1024,
                    vmem_limit=96 * 1024 * 1024, attn_budget=24 * 1024 * 1024)
    # v7x (64 MiB VMEM, 32 MiB scoped default) and anything unknown.
    return dict(mxu_align=256, max_tm=256, max_tn=512, max_tk=512,
                vmem_limit=48 * 1024 * 1024, attn_budget=20 * 1024 * 1024)


def _round_up(x, m):
    return ((x + m - 1) // m) * m


def _tile(dim, align, cap):
    """Return (tile, padded_dim).  Dims <= cap use a full-extent block (which
    bypasses the (8,128) alignment rule); larger dims use an align-multiple
    tile and are padded up to a tile multiple (tail is sliced off after)."""
    if dim <= cap:
        return dim, dim
    tile = max(align, (cap // align) * align)
    return tile, _round_up(dim, tile)


# ------------------------- fused matmul (MXU, bf16) --------------------------

def _make_matmul_kernel(activation, fuse_ln):
    """Tiled matmul: bf16 MXU operands, f32 accumulator, fused bias (+ReLU)
    (+ residual-add + LayerNorm) epilogue on the last K step."""

    def kernel(*refs):
        if fuse_ln:
            x_ref, w_ref, b_ref, r_ref, g_ref, be_ref, o_ref, acc_ref = refs
        else:
            x_ref, w_ref, b_ref, o_ref, acc_ref = refs

        @pl.when(pl.program_id(2) == 0)
        def _():
            acc_ref[...] = jnp.zeros_like(acc_ref)

        acc_ref[...] += jnp.dot(x_ref[...].astype(jnp.bfloat16),
                                w_ref[...].astype(jnp.bfloat16),
                                preferred_element_type=jnp.float32)

        @pl.when(pl.program_id(2) == pl.num_programs(2) - 1)
        def _():
            y = acc_ref[...] + b_ref[...].astype(jnp.float32)
            if activation == "relu":
                y = jnp.maximum(y, 0.0)
            if fuse_ln:
                # LayerNorm(y + residual) over the full output row (tn == N).
                y = y + r_ref[...].astype(jnp.float32)
                mean = jnp.mean(y, axis=-1, keepdims=True)
                yc = y - mean
                var = jnp.mean(yc * yc, axis=-1, keepdims=True)
                y = yc * lax.rsqrt(var + LN_EPS)
                y = (y * g_ref[...].astype(jnp.float32)
                     + be_ref[...].astype(jnp.float32))
            o_ref[...] = y.astype(o_ref.dtype)

    return kernel


def fused_matmul(x, w, b, *, residual=None, gamma=None, beta=None,
                 activation=None, out_dtype=None):
    """x:(M,K) @ w:(K,N) + b, optional fused ReLU / LayerNorm(out + residual).
    Pads M/N/K to tile multiples so MXU tiles stay large at awkward shapes."""
    M, K = x.shape
    K2, N = w.shape
    assert K == K2
    out_dtype = out_dtype if out_dtype is not None else x.dtype
    cfg = _tpu_cfg()
    fuse_ln = residual is not None

    tm, Mp = _tile(M, 8, cfg["max_tm"])
    tk, Kp = _tile(K, cfg["mxu_align"], cfg["max_tk"])
    if fuse_ln:
        assert gamma is not None and beta is not None
        tn, Np = N, N                      # LN reduces over the full output row
    else:
        tn, Np = _tile(N, cfg["mxu_align"], cfg["max_tn"])

    if (Mp, Kp) != (M, K):
        x = jnp.pad(x, ((0, Mp - M), (0, Kp - K)))
    if (Kp, Np) != (K, N):
        w = jnp.pad(w, ((0, Kp - K), (0, Np - N)))
    b2 = b.reshape(1, N)
    if Np != N:
        b2 = jnp.pad(b2, ((0, 0), (0, Np - N)))

    in_specs = [
        pl.BlockSpec((tm, tk), lambda i, j, k: (i, k)),
        pl.BlockSpec((tk, tn), lambda i, j, k: (k, j)),
        pl.BlockSpec((1, tn), lambda i, j, k: (0, j)),
    ]
    args = [x, w, b2]
    if fuse_ln:
        r = residual if Mp == M else jnp.pad(residual, ((0, Mp - M), (0, 0)))
        in_specs += [
            pl.BlockSpec((tm, tn), lambda i, j, k: (i, j)),
            pl.BlockSpec((1, tn), lambda i, j, k: (0, j)),
            pl.BlockSpec((1, tn), lambda i, j, k: (0, j)),
        ]
        args += [r, gamma.reshape(1, N), beta.reshape(1, N)]

    grid = (Mp // tm, Np // tn, Kp // tk)          # reduction axis (K) last
    out = pl.pallas_call(
        _make_matmul_kernel(activation, fuse_ln),
        out_shape=jax.ShapeDtypeStruct((Mp, Np), out_dtype),
        grid=grid,
        in_specs=in_specs,
        out_specs=pl.BlockSpec((tm, tn), lambda i, j, k: (i, j)),
        scratch_shapes=[pltpu.VMEM((tm, tn), jnp.float32)],
        compiler_params=pltpu.CompilerParams(
            dimension_semantics=("parallel", "parallel", "arbitrary"),
            vmem_limit_bytes=cfg["vmem_limit"]),
    )(*args)
    if (Mp, Np) != (M, N):
        out = out[:M, :N]
    return out


# ------------------------------ attention kernel -----------------------------

def _attention_kernel(qkv_ref, o_ref, *, heads, dh, scale):
    """Self-attention over the S (image-batch) axis for a block of tokens.

    qkv block: (n_blk, S, 3D) with the attention-"batch" (token) axis leading,
    so both matmuls are canonical batched MXU einsums and the output block's
    last dim is the full D (lane-dense store)."""
    x = qkv_ref[...]                                    # bf16
    D = heads * dh
    outs = []
    for h in range(heads):
        q = x[:, :, h * dh:(h + 1) * dh]
        k = x[:, :, D + h * dh:D + (h + 1) * dh]
        v = x[:, :, 2 * D + h * dh:2 * D + (h + 1) * dh]
        s = jnp.einsum("bqd,bkd->bqk", q, k,
                       preferred_element_type=jnp.float32) * scale
        m = jnp.max(s, axis=-1, keepdims=True)          # softmax math in f32
        e = jnp.exp(s - m)
        denom = jnp.sum(e, axis=-1, keepdims=True)
        # approx reciprocal runs on the EUP slot; ~1e-6 relative deviation
        # from exact f32 division (fine for inference tolerances).
        p = e * pl.reciprocal(denom, approx=True)
        o = jnp.einsum("bqk,bkd->bqd", p.astype(x.dtype), v,
                       preferred_element_type=jnp.float32)
        outs.append(o)
    o_ref[...] = jnp.concatenate(outs, axis=-1).astype(o_ref.dtype)


def mha_attention(qkv, *, heads, scale, out_dtype):
    """qkv: (Ntok, S, 3D).  Attention runs over the S axis (the image-batch
    axis, reproducing the reference's batch_first=False feed); the token axis
    is the attention batch, tiled with a 'parallel' grid axis."""
    Ntok, S, threeD = qkv.shape
    D = threeD // 3
    dh = D // heads
    cfg = _tpu_cfg()

    def block_bytes(nb):
        io = 2 * nb * S * threeD * qkv.dtype.itemsize            # qkv (dbl-buf)
        io += 2 * nb * S * D * jnp.dtype(out_dtype).itemsize      # out (dbl-buf)
        inter = 3 * nb * S * S * 4                                # scores/e/p f32
        inter += 4 * nb * S * dh * 4                              # q/k/v/o f32
        return io + inter

    nb_max = 1
    for cand in range(1, Ntok + 1):
        if block_bytes(cand) <= cfg["attn_budget"]:
            nb_max = cand
    n_blocks = -(-Ntok // nb_max)
    nb = -(-Ntok // n_blocks)              # balanced blocks; pad < nb rows
    Np = nb * n_blocks
    if Np != Ntok:
        qkv = jnp.pad(qkv, ((0, Np - Ntok), (0, 0), (0, 0)))

    out = pl.pallas_call(
        functools.partial(_attention_kernel, heads=heads, dh=dh, scale=scale),
        out_shape=jax.ShapeDtypeStruct((Np, S, D), out_dtype),
        grid=(n_blocks,),
        in_specs=[pl.BlockSpec((nb, S, threeD), lambda j: (j, 0, 0))],
        out_specs=pl.BlockSpec((nb, S, D), lambda j: (j, 0, 0)),
        compiler_params=pltpu.CompilerParams(
            dimension_semantics=("parallel",),
            vmem_limit_bytes=cfg["vmem_limit"]),
    )(qkv)
    if Np != Ntok:
        out = out[:Ntok]
    return out


# --------------------------------- JAX glue -----------------------------------

def extract_patches_tokens_major(x, ps):
    """NCHW image -> (num_patches, B, 3*ps*ps), token-major so the whole
    transformer runs in the attention-friendly (token, image) row order.
    Per-patch features are channel-major, matching Conv2d weight flattening."""
    B, C, H, W = x.shape
    Hp, Wp = H // ps, W // ps
    x = x.reshape(B, C, Hp, ps, Wp, ps)
    x = x.transpose(2, 4, 0, 1, 3, 5)                  # (Hp, Wp, B, C, ps, ps)
    return x.reshape(Hp * Wp, B, C * ps * ps)


def init_params(key, *, img_size, patch_size, token_dim, num_classes, depth,
                heads, dim_ff):
    """Matmul weights stored pre-transposed in (K, N) layout and pre-cast to
    bf16 (no per-forward transpose/cast).  Biases / LN params stay f32."""
    num_patches = (img_size // patch_size) ** 2
    keys = jax.random.split(key, 6 + depth)

    def wmat(k, shape, scale=0.02):
        return (scale * jax.random.normal(k, shape)).astype(jnp.bfloat16)

    def fvec(k, shape, scale=0.02):
        return (scale * jax.random.normal(k, shape)).astype(jnp.float32)

    params = {
        # Conv2d(3, D, ps, stride=ps) == per-patch linear, weight (3*ps*ps, D).
        "patch_w": wmat(keys[0], (3 * patch_size * patch_size, token_dim)),
        "patch_b": fvec(keys[1], (token_dim,)),
        "cls_token": fvec(keys[2], (1, 1, token_dim), 1.0),
        # Stored (num_patches+1, 1, D): broadcasts over the token-major layout.
        "pos_embed": fvec(keys[3], (num_patches + 1, 1, token_dim), 1.0),
        "to_cls_w": wmat(keys[4], (token_dim, num_classes)),
        "to_cls_b": fvec(keys[5], (num_classes,)),
        "layers": [],
    }
    for l in range(depth):
        lk = jax.random.split(keys[6 + l], 8)
        params["layers"].append({
            "in_proj_w": wmat(lk[0], (token_dim, 3 * token_dim)),
            "in_proj_b": fvec(lk[1], (3 * token_dim,)),
            "out_proj_w": wmat(lk[2], (token_dim, token_dim)),
            "out_proj_b": fvec(lk[3], (token_dim,)),
            "lin1_w": wmat(lk[4], (token_dim, dim_ff)),
            "lin1_b": fvec(lk[5], (dim_ff,)),
            "lin2_w": wmat(lk[6], (dim_ff, token_dim)),
            "lin2_b": fvec(lk[7], (token_dim,)),
            "ln1_g": jnp.ones((token_dim,), jnp.float32),
            "ln1_b": jnp.zeros((token_dim,), jnp.float32),
            "ln2_g": jnp.ones((token_dim,), jnp.float32),
            "ln2_b": jnp.zeros((token_dim,), jnp.float32),
        })
    return params


def vit_forward(params, x, *, patch_size, heads):
    B = x.shape[0]
    D = params["patch_w"].shape[1]
    dh = D // heads
    scale = 1.0 / math.sqrt(dh)

    # Patch embedding (Conv2d with stride == kernel  ==  per-patch linear).
    patches = extract_patches_tokens_major(x, patch_size)          # (NP, B, Cpp)
    NP = patches.shape[0]
    tokens = fused_matmul(patches.reshape(NP * B, -1),
                          params["patch_w"], params["patch_b"],
                          out_dtype=jnp.bfloat16)
    tokens = tokens.reshape(NP, B, D)

    cls = jnp.broadcast_to(params["cls_token"], (1, B, D))
    # cls concat + pos-embed add are tiny layout ops: leave to XLA.
    seq = (jnp.concatenate([cls, tokens.astype(jnp.float32)], axis=0)
           + params["pos_embed"]).astype(jnp.bfloat16)              # (Ntok, B, D)
    Ntok = NP + 1

    # Residual stream in token-major row order (n, s): every dense op is
    # row-wise, and attention (over the image axis s, per token n — the
    # reference's batch_first=False semantics) needs no per-layer transposes.
    x2 = seq.reshape(Ntok * B, D)                                   # bf16

    for lp in params["layers"]:
        # ---- self-attention sub-block (post-norm) ----
        qkv = fused_matmul(x2, lp["in_proj_w"], lp["in_proj_b"],
                           out_dtype=jnp.bfloat16)                  # (Ntok*B, 3D)
        attn = mha_attention(qkv.reshape(Ntok, B, 3 * D),
                             heads=heads, scale=scale,
                             out_dtype=jnp.bfloat16)                # (Ntok, B, D)
        # out-proj + residual add + LayerNorm fused into one kernel.
        x2 = fused_matmul(attn.reshape(Ntok * B, D),
                          lp["out_proj_w"], lp["out_proj_b"],
                          residual=x2, gamma=lp["ln1_g"], beta=lp["ln1_b"],
                          out_dtype=jnp.bfloat16)

        # ---- feed-forward sub-block (post-norm, ReLU) ----
        h1 = fused_matmul(x2, lp["lin1_w"], lp["lin1_b"],
                          activation="relu", out_dtype=jnp.bfloat16)
        x2 = fused_matmul(h1, lp["lin2_w"], lp["lin2_b"],
                          residual=x2, gamma=lp["ln2_g"], beta=lp["ln2_b"],
                          out_dtype=jnp.bfloat16)

    # cls position (token 0) for every image: the first B rows in (n, s) order.
    cls_out = x2[:B]                                                # (B, D)
    logits = fused_matmul(cls_out, params["to_cls_w"], params["to_cls_b"],
                          out_dtype=jnp.float32)
    return logits


# ----------------------------------- main -------------------------------------

if __name__ == "__main__":
    IMG, PS, DIM, NCLS, DEPTH, HEADS = 16, 4, 32, 10, 2, 4
    DIM_FF = 2048   # nn.TransformerEncoderLayer default dim_feedforward

    key = jax.random.PRNGKey(0)
    pkey, xkey = jax.random.split(key)
    params = init_params(pkey, img_size=IMG, patch_size=PS, token_dim=DIM,
                         num_classes=NCLS, depth=DEPTH, heads=HEADS,
                         dim_ff=DIM_FF)
    x = jax.random.normal(xkey, (2, 3, IMG, IMG), dtype=jnp.float32)

    fwd = jax.jit(functools.partial(vit_forward, patch_size=PS, heads=HEADS))
    out = fwd(params, x)
    jax.block_until_ready(out)
    assert out.shape == (2, NCLS) and out.dtype == jnp.float32
    print("KERNEL_OK")
</pallas_src>

<mosaic_0001>
module attributes {stable_mosaic.version = 11 : i64} {
  func.func @kernel(%arg0: i32, %arg1: i32, %arg2: i32, %arg3: memref<32x48xf32, #tpu.memory_space<vmem>>, %arg4: memref<48x32xbf16, #tpu.memory_space<vmem>>, %arg5: memref<1x32xf32, #tpu.memory_space<vmem>>, %arg6: memref<32x32xbf16, #tpu.memory_space<vmem>>, %arg7: memref<32x32xf32, #tpu.memory_space<vmem>>) attributes {dimension_semantics = [#tpu.dimension_semantics<parallel>, #tpu.dimension_semantics<parallel>, #tpu.dimension_semantics<arbitrary>], iteration_bounds = array<i64: 1, 1, 1>, scalar_prefetch = 0 : i64, scratch_operands = 1 : i64, tpu.core_type = #tpu.core_type<tc>, window_params = [{transform_indices = @transform_0, window_bounds = array<i64: 32, 48>}, {transform_indices = @transform_1, window_bounds = array<i64: 48, 32>}, {transform_indices = @transform_2, window_bounds = array<i64: 1, 32>}, {transform_indices = @transform_3, window_bounds = array<i64: 32, 32>}]} {
    %c0_i32 = arith.constant 0 : i32
    %0 = arith.cmpi eq, %arg2, %c0_i32 : i32
    %1 = arith.extui %0 : i1 to i32
    %c0_i32_0 = arith.constant 0 : i32
    %2 = arith.cmpi ne, %1, %c0_i32_0 : i32
    scf.if %2 {
      %cst_10 = arith.constant 0.000000e+00 : f32
      %13 = vector.broadcast %cst_10 : f32 to vector<32x32xf32>
      %c0_11 = arith.constant 0 : index
      %c0_12 = arith.constant 0 : index
      %14 = vector.load %arg7[%c0_11, %c0_12] : memref<32x32xf32, #tpu.memory_space<vmem>>, vector<32x32xf32>
      tpu.vector_store %arg7[%c0_11, %c0_12], %13 {strides = array<i32>} : memref<32x32xf32, #tpu.memory_space<vmem>>, vector<32x32xf32>,
    } else {
    }
    %c0 = arith.constant 0 : index
    %c0_1 = arith.constant 0 : index
    %3 = vector.load %arg7[%c0, %c0_1] : memref<32x32xf32, #tpu.memory_space<vmem>>, vector<32x32xf32>
    %c0_2 = arith.constant 0 : index
    %c0_3 = arith.constant 0 : index
    %4 = vector.load %arg3[%c0_2, %c0_3] : memref<32x48xf32, #tpu.memory_space<vmem>>, vector<32x48xf32>
    %5 = arith.truncf %4 : vector<32x48xf32> to vector<32x48xbf16>
    %c0_4 = arith.constant 0 : index
    %c0_5 = arith.constant 0 : index
    %6 = vector.load %arg4[%c0_4, %c0_5] : memref<48x32xbf16, #tpu.memory_space<vmem>>, vector<48x32xbf16>
    %cst = arith.constant dense<0.000000e+00> : vector<32x32xf32>
    %7 = tpu.matmul %5, %6, %cst {dimension_numbers = #tpu.dot_dimension_numbers<[1], [0], [0], [1], [0, 0, 1, 1], [], []>} : vector<32x48xbf16>, vector<48x32xbf16>, vector<32x32xf32> -> vector<32x32xf32>
    %8 = arith.addf %3, %7 : vector<32x32xf32>
    %c0_6 = arith.constant 0 : index
    %c0_7 = arith.constant 0 : index
    %9 = vector.load %arg7[%c0_6, %c0_7] : memref<32x32xf32, #tpu.memory_space<vmem>>, vector<32x32xf32>
    tpu.vector_store %arg7[%c0_6, %c0_7], %8 {strides = array<i32>} : memref<32x32xf32, #tpu.memory_space<vmem>>, vector<32x32xf32>,
    %c0_i32_8 = arith.constant 0 : i32
    %10 = arith.cmpi eq, %arg2, %c0_i32_8 : i32
    %11 = arith.extui %10 : i1 to i32
    %c0_i32_9 = arith.constant 0 : i32
    %12 = arith.cmpi ne, %11, %c0_i32_9 : i32
    scf.if %12 {
      %c0_10 = arith.constant 0 : index
      %c0_11 = arith.constant 0 : index
      %13 = vector.load %arg7[%c0_10, %c0_11] : memref<32x32xf32, #tpu.memory_space<vmem>>, vector<32x32xf32>
      %c0_12 = arith.constant 0 : index
      %c0_13 = arith.constant 0 : index
      %14 = vector.load %arg5[%c0_12, %c0_13] : memref<1x32xf32, #tpu.memory_space<vmem>>, vector<1x32xf32>
      %15 = vector.broadcast %14 : vector<1x32xf32> to vector<32x32xf32>
      %16 = arith.addf %13, %15 : vector<32x32xf32>
      %17 = arith.truncf %16 : vector<32x32xf32> to vector<32x32xbf16>
      %c0_14 = arith.constant 0 : index
      %c0_15 = arith.constant 0 : index
      %18 = vector.load %arg6[%c0_14, %c0_15] : memref<32x32xbf16, #tpu.memory_space<vmem>>, vector<32x32xbf16>
      tpu.vector_store %arg6[%c0_14, %c0_15], %17 {strides = array<i32>} : memref<32x32xbf16, #tpu.memory_space<vmem>>, vector<32x32xbf16>,
    } else {
    }
    return
  }
  func.func @transform_0(%arg0: i32, %arg1: i32, %arg2: i32) -> (i32, i32) {
    %c0_i32 = arith.constant 0 : i32
    return %arg0, %arg2 : i32, i32
  }
  func.func @transform_1(%arg0: i32, %arg1: i32, %arg2: i32) -> (i32, i32) {
    %c0_i32 = arith.constant 0 : i32
    return %arg2, %arg1 : i32, i32
  }
  func.func @transform_2(%arg0: i32, %arg1: i32, %arg2: i32) -> (i32, i32) {
    %c0_i32 = arith.constant 0 : i32
    %c0_i32_0 = arith.constant 0 : i32
    return %c0_i32, %arg1 : i32, i32
  }
  func.func @transform_3(%arg0: i32, %arg1: i32, %arg2: i32) -> (i32, i32) {
    %c0_i32 = arith.constant 0 : i32
    return %arg0, %arg1 : i32, i32
  }
}

module attributes {stable_mosaic.version = 11 : i64} {
  func.func @kernel(%arg0: i32, %arg1: i32, %arg2: i32, %arg3: memref<34x32xbf16, #tpu.memory_space<vmem>>, %arg4: memref<32x96xbf16, #tpu.memory_space<vmem>>, %arg5: memref<1x96xf32, #tpu.memory_space<vmem>>, %arg6: memref<34x96xbf16, #tpu.memory_space<vmem>>, %arg7: memref<34x96xf32, #tpu.memory_space<vmem>>) attributes {dimension_semantics = [#tpu.dimension_semantics<parallel>, #tpu.dimension_semantics<parallel>, #tpu.dimension_semantics<arbitrary>], iteration_bounds = array<i64: 1, 1, 1>, scalar_prefetch = 0 : i64, scratch_operands = 1 : i64, tpu.core_type = #tpu.core_type<tc>, window_params = [{transform_indices = @transform_0, window_bounds = array<i64: 34, 32>}, {transform_indices = @transform_1, window_bounds = array<i64: 32, 96>}, {transform_indices = @transform_2, window_bounds = array<i64: 1, 96>}, {transform_indices = @transform_3, window_bounds = array<i64: 34, 96>}]} {
    %c0_i32 = arith.constant 0 : i32
    %0 = arith.cmpi eq, %arg2, %c0_i32 : i32
    %1 = arith.extui %0 : i1 to i32
    %c0_i32_0 = arith.constant 0 : i32
    %2 = arith.cmpi ne, %1, %c0_i32_0 : i32
    scf.if %2 {
      %cst_10 = arith.constant 0.000000e+00 : f32
      %12 = vector.broadcast %cst_10 : f32 to vector<34x96xf32>
      %c0_11 = arith.constant 0 : index
      %c0_12 = arith.constant 0 : index
      %13 = vector.load %arg7[%c0_11, %c0_12] : memref<34x96xf32, #tpu.memory_space<vmem>>, vector<34x96xf32>
      tpu.vector_store %arg7[%c0_11, %c0_12], %12 {strides = array<i32>} : memref<34x96xf32, #tpu.memory_space<vmem>>, vector<34x96xf32>,
    } else {
    }
    %c0 = arith.constant 0 : index
    %c0_1 = arith.constant 0 : index
    %3 = vector.load %arg7[%c0, %c0_1] : memref<34x96xf32, #tpu.memory_space<vmem>>, vector<34x96xf32>
    %c0_2 = arith.constant 0 : index
    %c0_3 = arith.constant 0 : index
    %4 = vector.load %arg3[%c0_2, %c0_3] : memref<34x32xbf16, #tpu.memory_space<vmem>>, vector<34x32xbf16>
    %c0_4 = arith.constant 0 : index
    %c0_5 = arith.constant 0 : index
    %5 = vector.load %arg4[%c0_4, %c0_5] : memref<32x96xbf16, #tpu.memory_space<vmem>>, vector<32x96xbf16>
    %cst = arith.constant dense<0.000000e+00> : vector<34x96xf32>
    %6 = tpu.matmul %4, %5, %cst {dimension_numbers = #tpu.dot_dimension_numbers<[1], [0], [0], [1], [0, 0, 1, 1], [], []>} : vector<34x32xbf16>, vector<32x96xbf16>, vector<34x96xf32> -> vector<34x96xf32>
    %7 = arith.addf %3, %6 : vector<34x96xf32>
    %c0_6 = arith.constant 0 : index
    %c0_7 = arith.constant 0 : index
    %8 = vector.load %arg7[%c0_6, %c0_7] : memref<34x96xf32, #tpu.memory_space<vmem>>, vector<34x96xf32>
    tpu.vector_store %arg7[%c0_6, %c0_7], %7 {strides = array<i32>} : memref<34x96xf32, #tpu.memory_space<vmem>>, vector<34x96xf32>,
    %c0_i32_8 = arith.constant 0 : i32
    %9 = arith.cmpi eq, %arg2, %c0_i32_8 : i32
    %10 = arith.extui %9 : i1 to i32
    %c0_i32_9 = arith.constant 0 : i32
    %11 = arith.cmpi ne, %10, %c0_i32_9 : i32
    scf.if %11 {
      %c0_10 = arith.constant 0 : index
      %c0_11 = arith.constant 0 : index
      %12 = vector.load %arg7[%c0_10, %c0_11] : memref<34x96xf32, #tpu.memory_space<vmem>>, vector<34x96xf32>
      %c0_12 = arith.constant 0 : index
      %c0_13 = arith.constant 0 : index
      %13 = vector.load %arg5[%c0_12, %c0_13] : memref<1x96xf32, #tpu.memory_space<vmem>>, vector<1x96xf32>
      %14 = vector.broadcast %13 : vector<1x96xf32> to vector<34x96xf32>
      %15 = arith.addf %12, %14 : vector<34x96xf32>
      %16 = arith.truncf %15 : vector<34x96xf32> to vector<34x96xbf16>
      %c0_14 = arith.constant 0 : index
      %c0_15 = arith.constant 0 : index
      %17 = vector.load %arg6[%c0_14, %c0_15] : memref<34x96xbf16, #tpu.memory_space<vmem>>, vector<34x96xbf16>
      tpu.vector_store %arg6[%c0_14, %c0_15], %16 {strides = array<i32>} : memref<34x96xbf16, #tpu.memory_space<vmem>>, vector<34x96xbf16>,
    } else {
    }
    return
  }
  func.func @transform_0(%arg0: i32, %arg1: i32, %arg2: i32) -> (i32, i32) {
    %c0_i32 = arith.constant 0 : i32
    return %arg0, %arg2 : i32, i32
  }
  func.func @transform_1(%arg0: i32, %arg1: i32, %arg2: i32) -> (i32, i32) {
    %c0_i32 = arith.constant 0 : i32
    return %arg2, %arg1 : i32, i32
  }
  func.func @transform_2(%arg0: i32, %arg1: i32, %arg2: i32) -> (i32, i32) {
    %c0_i32 = arith.constant 0 : i32
    %c0_i32_0 = arith.constant 0 : i32
    return %c0_i32, %arg1 : i32, i32
  }
  func.func @transform_3(%arg0: i32, %arg1: i32, %arg2: i32) -> (i32, i32) {
    %c0_i32 = arith.constant 0 : i32
    return %arg0, %arg1 : i32, i32
  }
}

module attributes {stable_mosaic.version = 11 : i64} {
  func.func @kernel(%arg0: i32, %arg1: i32, %arg2: i32, %arg3: memref<34x32xbf16, #tpu.memory_space<vmem>>, %arg4: memref<32x32xbf16, #tpu.memory_space<vmem>>, %arg5: memref<1x32xf32, #tpu.memory_space<vmem>>, %arg6: memref<34x32xbf16, #tpu.memory_space<vmem>>, %arg7: memref<1x32xf32, #tpu.memory_space<vmem>>, %arg8: memref<1x32xf32, #tpu.memory_space<vmem>>, %arg9: memref<34x32xbf16, #tpu.memory_space<vmem>>, %arg10: memref<34x32xf32, #tpu.memory_space<vmem>>) attributes {dimension_semantics = [#tpu.dimension_semantics<parallel>, #tpu.dimension_semantics<parallel>, #tpu.dimension_semantics<arbitrary>], iteration_bounds = array<i64: 1, 1, 1>, scalar_prefetch = 0 : i64, scratch_operands = 1 : i64, tpu.core_type = #tpu.core_type<tc>, window_params = [{transform_indices = @transform_0, window_bounds = array<i64: 34, 32>}, {transform_indices = @transform_1, window_bounds = array<i64: 32, 32>}, {transform_indices = @transform_2, window_bounds = array<i64: 1, 32>}, {transform_indices = @transform_3, window_bounds = array<i64: 34, 32>}, {transform_indices = @transform_4, window_bounds = array<i64: 1, 32>}, {transform_indices = @transform_5, window_bounds = array<i64: 1, 32>}, {transform_indices = @transform_6, window_bounds = array<i64: 34, 32>}]} {
    %c0_i32 = arith.constant 0 : i32
    %0 = arith.cmpi eq, %arg2, %c0_i32 : i32
    %1 = arith.extui %0 : i1 to i32
    %c0_i32_0 = arith.constant 0 : i32
    %2 = arith.cmpi ne, %1, %c0_i32_0 : i32
    scf.if %2 {
      %cst_10 = arith.constant 0.000000e+00 : f32
      %12 = vector.broadcast %cst_10 : f32 to vector<34x32xf32>
      %c0_11 = arith.constant 0 : index
      %c0_12 = arith.constant 0 : index
      %13 = vector.load %arg10[%c0_11, %c0_12] : memref<34x32xf32, #tpu.memory_space<vmem>>, vector<34x32xf32>
      tpu.vector_store %arg10[%c0_11, %c0_12], %12 {strides = array<i32>} : memref<34x32xf32, #tpu.memory_space<vmem>>, vector<34x32xf32>,
    } else {
    }
    %c0 = arith.constant 0 : index
    %c0_1 = arith.constant 0 : index
    %3 = vector.load %arg10[%c0, %c0_1] : memref<34x32xf32, #tpu.memory_space<vmem>>, vector<34x32xf32>
    %c0_2 = arith.constant 0 : index
    %c0_3 = arith.constant 0 : index
    %4 = vector.load %arg3[%c0_2, %c0_3] : memref<34x32xbf16, #tpu.memory_space<vmem>>, vector<34x32xbf16>
    %c0_4 = arith.constant 0 : index
    %c0_5 = arith.constant 0 : index
    %5 = vector.load %arg4[%c0_4, %c0_5] : memref<32x32xbf16, #tpu.memory_space<vmem>>, vector<32x32xbf16>
    %cst = arith.constant dense<0.000000e+00> : vector<34x32xf32>
    %6 = tpu.matmul %4, %5, %cst {dimension_numbers = #tpu.dot_dimension_numbers<[1], [0], [0], [1], [0, 0, 1, 1], [], []>} : vector<34x32xbf16>, vector<32x32xbf16>, vector<34x32xf32> -> vector<34x32xf32>
    %7 = arith.addf %3, %6 : vector<34x32xf32>
    %c0_6 = arith.constant 0 : index
    %c0_7 = arith.constant 0 : index
    %8 = vector.load %arg10[%c0_6, %c0_7] : memref<34x32xf32, #tpu.memory_space<vmem>>, vector<34x32xf32>
    tpu.vector_store %arg10[%c0_6, %c0_7], %7 {strides = array<i32>} : memref<34x32xf32, #tpu.memory_space<vmem>>, vector<34x32xf32>,
    %c0_i32_8 = arith.constant 0 : i32
    %9 = arith.cmpi eq, %arg2, %c0_i32_8 : i32
    %10 = arith.extui %9 : i1 to i32
    %c0_i32_9 = arith.constant 0 : i32
    %11 = arith.cmpi ne, %10, %c0_i32_9 : i32
    scf.if %11 {
      %c0_10 = arith.constant 0 : index
      %c0_11 = arith.constant 0 : index
      %12 = vector.load %arg10[%c0_10, %c0_11] : memref<34x32xf32, #tpu.memory_space<vmem>>, vector<34x32xf32>
      %c0_12 = arith.constant 0 : index
      %c0_13 = arith.constant 0 : index
      %13 = vector.load %arg5[%c0_12, %c0_13] : memref<1x32xf32, #tpu.memory_space<vmem>>, vector<1x32xf32>
      %14 = vector.broadcast %13 : vector<1x32xf32> to vector<34x32xf32>
      %15 = arith.addf %12, %14 : vector<34x32xf32>
      %c0_14 = arith.constant 0 : index
      %c0_15 = arith.constant 0 : index
      %16 = vector.load %arg6[%c0_14, %c0_15] : memref<34x32xbf16, #tpu.memory_space<vmem>>, vector<34x32xbf16>
      %17 = arith.extf %16 : vector<34x32xbf16> to vector<34x32xf32>
      %18 = arith.addf %15, %17 : vector<34x32xf32>
      %cst_16 = arith.constant dense<0.000000e+00> : vector<34xf32>
      %19 = vector.multi_reduction <add>, %18, %cst_16 [1] : vector<34x32xf32> to vector<34xf32>
      %20 = vector.shape_cast %19 : vector<34xf32> to vector<34x1xf32>
      %cst_17 = arith.constant 3.200000e+01 : f32
      %21 = vector.broadcast %cst_17 : f32 to vector<34x1xf32>
      %22 = arith.divf %20, %21 : vector<34x1xf32>
      %23 = vector.broadcast %22 : vector<34x1xf32> to vector<34x32xf32>
      %24 = arith.subf %18, %23 : vector<34x32xf32>
      %25 = arith.mulf %24, %24 : vector<34x32xf32>
      %cst_18 = arith.constant dense<0.000000e+00> : vector<34xf32>
      %26 = vector.multi_reduction <add>, %25, %cst_18 [1] : vector<34x32xf32> to vector<34xf32>
      %27 = vector.shape_cast %26 : vector<34xf32> to vector<34x1xf32>
      %cst_19 = arith.constant 3.200000e+01 : f32
      %28 = vector.broadcast %cst_19 : f32 to vector<34x1xf32>
      %29 = arith.divf %27, %28 : vector<34x1xf32>
      %cst_20 = arith.constant 9.99999974E-6 : f32
      %30 = vector.broadcast %cst_20 : f32 to vector<34x1xf32>
      %31 = arith.addf %29, %30 : vector<34x1xf32>
      %32 = math.rsqrt %31 : vector<34x1xf32>
      %33 = vector.broadcast %32 : vector<34x1xf32> to vector<34x32xf32>
      %34 = arith.mulf %24, %33 : vector<34x32xf32>
      %c0_21 = arith.constant 0 : index
      %c0_22 = arith.constant 0 : index
      %35 = vector.load %arg7[%c0_21, %c0_22] : memref<1x32xf32, #tpu.memory_space<vmem>>, vector<1x32xf32>
      %36 = vector.broadcast %35 : vector<1x32xf32> to vector<34x32xf32>
      %37 = arith.mulf %34, %36 : vector<34x32xf32>
      %c0_23 = arith.constant 0 : index
      %c0_24 = arith.constant 0 : index
      %38 = vector.load %arg8[%c0_23, %c0_24] : memref<1x32xf32, #tpu.memory_space<vmem>>, vector<1x32xf32>
      %39 = vector.broadcast %38 : vector<1x32xf32> to vector<34x32xf32>
      %40 = arith.addf %37, %39 : vector<34x32xf32>
      %41 = arith.truncf %40 : vector<34x32xf32> to vector<34x32xbf16>
      %c0_25 = arith.constant 0 : index
      %c0_26 = arith.constant 0 : index
      %42 = vector.load %arg9[%c0_25, %c0_26] : memref<34x32xbf16, #tpu.memory_space<vmem>>, vector<34x32xbf16>
      tpu.vector_store %arg9[%c0_25, %c0_26], %41 {strides = array<i32>} : memref<34x32xbf16, #tpu.memory_space<vmem>>, vector<34x32xbf16>,
    } else {
    }
    return
  }
  func.func @transform_0(%arg0: i32, %arg1: i32, %arg2: i32) -> (i32, i32) {
    %c0_i32 = arith.constant 0 : i32
    return %arg0, %arg2 : i32, i32
  }
  func.func @transform_1(%arg0: i32, %arg1: i32, %arg2: i32) -> (i32, i32) {
    %c0_i32 = arith.constant 0 : i32
    return %arg2, %arg1 : i32, i32
  }
  func.func @transform_2(%arg0: i32, %arg1: i32, %arg2: i32) -> (i32, i32) {
    %c0_i32 = arith.constant 0 : i32
    %c0_i32_0 = arith.constant 0 : i32
    return %c0_i32, %arg1 : i32, i32
  }
  func.func @transform_3(%arg0: i32, %arg1: i32, %arg2: i32) -> (i32, i32) {
    %c0_i32 = arith.constant 0 : i32
    return %arg0, %arg1 : i32, i32
  }
  func.func @transform_4(%arg0: i32, %arg1: i32, %arg2: i32) -> (i32, i32) {
    %c0_i32 = arith.constant 0 : i32
    %c0_i32_0 = arith.constant 0 : i32
    return %c0_i32, %arg1 : i32, i32
  }
  func.func @transform_5(%arg0: i32, %arg1: i32, %arg2: i32) -> (i32, i32) {
    %c0_i32 = arith.constant 0 : i32
    %c0_i32_0 = arith.constant 0 : i32
    return %c0_i32, %arg1 : i32, i32
  }
  func.func @transform_6(%arg0: i32, %arg1: i32, %arg2: i32) -> (i32, i32) {
    %c0_i32 = arith.constant 0 : i32
    return %arg0, %arg1 : i32, i32
  }
}

module attributes {stable_mosaic.version = 11 : i64} {
  func.func @_attention_kernel(%arg0: i32, %arg1: memref<17x2x96xbf16, #tpu.memory_space<vmem>>, %arg2: memref<17x2x32xbf16, #tpu.memory_space<vmem>>) attributes {dimension_semantics = [#tpu.dimension_semantics<parallel>], iteration_bounds = array<i64: 1>, scalar_prefetch = 0 : i64, scratch_operands = 0 : i64, tpu.core_type = #tpu.core_type<tc>, window_params = [{transform_indices = @transform_0, window_bounds = array<i64: 17, 2, 96>}, {transform_indices = @transform_1, window_bounds = array<i64: 17, 2, 32>}]} {
    %c0 = arith.constant 0 : index
    %c0_0 = arith.constant 0 : index
    %c0_1 = arith.constant 0 : index
    %0 = vector.load %arg1[%c0, %c0_0, %c0_1] : memref<17x2x96xbf16, #tpu.memory_space<vmem>>, vector<17x2x96xbf16>
    %1 = vector.extract_strided_slice %0 {offsets = [0, 0, 0], sizes = [17, 2, 8], strides = [1, 1, 1]} : vector<17x2x96xbf16> to vector<17x2x8xbf16>
    %2 = vector.extract_strided_slice %0 {offsets = [0, 0, 32], sizes = [17, 2, 8], strides = [1, 1, 1]} : vector<17x2x96xbf16> to vector<17x2x8xbf16>
    %3 = vector.extract_strided_slice %0 {offsets = [0, 0, 64], sizes = [17, 2, 8], strides = [1, 1, 1]} : vector<17x2x96xbf16> to vector<17x2x8xbf16>
    "tpu.trace_start"() <{level = 10 : i32, message = "bqd,bkd->bqk"}> : () -> ()
    %cst = arith.constant dense<0.000000e+00> : vector<17x2x2xf32>
    %4 = tpu.matmul %1, %2, %cst {dimension_numbers = #tpu.dot_dimension_numbers<[2], [2], [1], [1], [0, 0, 0, 1, 1, 1], [0], [0]>} : vector<17x2x8xbf16>, vector<17x2x8xbf16>, vector<17x2x2xf32> -> vector<17x2x2xf32>
    "tpu.trace_stop"() : () -> ()
    %cst_2 = arith.constant 0.353553385 : f32
    %5 = vector.broadcast %cst_2 : f32 to vector<17x2x2xf32>
    %6 = arith.mulf %4, %5 : vector<17x2x2xf32>
    %cst_3 = arith.constant dense<0xFF800000> : vector<17x2xf32>
    %7 = vector.multi_reduction <maximumf>, %6, %cst_3 [2] : vector<17x2x2xf32> to vector<17x2xf32>
    %8 = vector.shape_cast %7 : vector<17x2xf32> to vector<17x2x1xf32>
    %9 = vector.broadcast %8 : vector<17x2x1xf32> to vector<17x2x2xf32>
    %10 = arith.subf %6, %9 : vector<17x2x2xf32>
    %11 = math.exp %10 : vector<17x2x2xf32>
    %cst_4 = arith.constant dense<0.000000e+00> : vector<17x2xf32>
    %12 = vector.multi_reduction <add>, %11, %cst_4 [2] : vector<17x2x2xf32> to vector<17x2xf32>
    %13 = vector.shape_cast %12 : vector<17x2xf32> to vector<17x2x1xf32>
    %14 = tpu.reciprocal %13 {approx = true} : vector<17x2x1xf32> -> vector<17x2x1xf32>
    %15 = vector.broadcast %14 : vector<17x2x1xf32> to vector<17x2x2xf32>
    %16 = arith.mulf %11, %15 : vector<17x2x2xf32>
    %17 = arith.truncf %16 : vector<17x2x2xf32> to vector<17x2x2xbf16>
    "tpu.trace_start"() <{level = 10 : i32, message = "bqk,bkd->bqd"}> : () -> ()
    %cst_5 = arith.constant dense<0.000000e+00> : vector<17x2x8xf32>
    %18 = tpu.matmul %17, %3, %cst_5 {dimension_numbers = #tpu.dot_dimension_numbers<[2], [1], [1], [2], [0, 0, 0, 1, 1, 2], [0], [0]>} : vector<17x2x2xbf16>, vector<17x2x8xbf16>, vector<17x2x8xf32> -> vector<17x2x8xf32>
    "tpu.trace_stop"() : () -> ()
    %19 = vector.extract_strided_slice %0 {offsets = [0, 0, 8], sizes = [17, 2, 8], strides = [1, 1, 1]} : vector<17x2x96xbf16> to vector<17x2x8xbf16>
    %20 = vector.extract_strided_slice %0 {offsets = [0, 0, 40], sizes = [17, 2, 8], strides = [1, 1, 1]} : vector<17x2x96xbf16> to vector<17x2x8xbf16>
    %21 = vector.extract_strided_slice %0 {offsets = [0, 0, 72], sizes = [17, 2, 8], strides = [1, 1, 1]} : vector<17x2x96xbf16> to vector<17x2x8xbf16>
    "tpu.trace_start"() <{level = 10 : i32, message = "bqd,bkd->bqk"}> : () -> ()
    %cst_6 = arith.constant dense<0.000000e+00> : vector<17x2x2xf32>
    %22 = tpu.matmul %19, %20, %cst_6 {dimension_numbers = #tpu.dot_dimension_numbers<[2], [2], [1], [1], [0, 0, 0, 1, 1, 1], [0], [0]>} : vector<17x2x8xbf16>, vector<17x2x8xbf16>, vector<17x2x2xf32> -> vector<17x2x2xf32>
    "tpu.trace_stop"() : () -> ()
    %cst_7 = arith.constant 0.353553385 : f32
    %23 = vector.broadcast %cst_7 : f32 to vector<17x2x2xf32>
    %24 = arith.mulf %22, %23 : vector<17x2x2xf32>
    %cst_8 = arith.constant dense<0xFF800000> : vector<17x2xf32>
    %25 = vector.multi_reduction <maximumf>, %24, %cst_8 [2] : vector<17x2x2xf32> to vector<17x2xf32>
    %26 = vector.shape_cast %25 : vector<17x2xf32> to vector<17x2x1xf32>
    %27 = vector.broadcast %26 : vector<17x2x1xf32> to vector<17x2x2xf32>
    %28 = arith.subf %24, %27 : vector<17x2x2xf32>
    %29 = math.exp %28 : vector<17x2x2xf32>
    %cst_9 = arith.constant dense<0.000000e+00> : vector<17x2xf32>
    %30 = vector.multi_reduction <add>, %29, %cst_9 [2] : vector<17x2x2xf32> to vector<17x2xf32>
    %31 = vector.shape_cast %30 : vector<17x2xf32> to vector<17x2x1xf32>
    %32 = tpu.reciprocal %31 {approx = true} : vector<17x2x1xf32> -> vector<17x2x1xf32>
    %33 = vector.broadcast %32 : vector<17x2x1xf32> to vector<17x2x2xf32>
    %34 = arith.mulf %29, %33 : vector<17x2x2xf32>
    %35 = arith.truncf %34 : vector<17x2x2xf32> to vector<17x2x2xbf16>
    "tpu.trace_start"() <{level = 10 : i32, message = "bqk,bkd->bqd"}> : () -> ()
    %cst_10 = arith.constant dense<0.000000e+00> : vector<17x2x8xf32>
    %36 = tpu.matmul %35, %21, %cst_10 {dimension_numbers = #tpu.dot_dimension_numbers<[2], [1], [1], [2], [0, 0, 0, 1, 1, 2], [0], [0]>} : vector<17x2x2xbf16>, vector<17x2x8xbf16>, vector<17x2x8xf32> -> vector<17x2x8xf32>
    "tpu.trace_stop"() : () -> ()
    %37 = vector.extract_strided_slice %0 {offsets = [0, 0, 16], sizes = [17, 2, 8], strides = [1, 1, 1]} : vector<17x2x96xbf16> to vector<17x2x8xbf16>
    %38 = vector.extract_strided_slice %0 {offsets = [0, 0, 48], sizes = [17, 2, 8], strides = [1, 1, 1]} : vector<17x2x96xbf16> to vector<17x2x8xbf16>
    %39 = vector.extract_strided_slice %0 {offsets = [0, 0, 80], sizes = [17, 2, 8], strides = [1, 1, 1]} : vector<17x2x96xbf16> to vector<17x2x8xbf16>
    "tpu.trace_start"() <{level = 10 : i32, message = "bqd,bkd->bqk"}> : () -> ()
    %cst_11 = arith.constant dense<0.000000e+00> : vector<17x2x2xf32>
    %40 = tpu.matmul %37, %38, %cst_11 {dimension_numbers = #tpu.dot_dimension_numbers<[2], [2], [1], [1], [0, 0, 0, 1, 1, 1], [0], [0]>} : vector<17x2x8xbf16>, vector<17x2x8xbf16>, vector<17x2x2xf32> -> vector<17x2x2xf32>
    "tpu.trace_stop"() : () -> ()
    %cst_12 = arith.constant 0.353553385 : f32
    %41 = vector.broadcast %cst_12 : f32 to vector<17x2x2xf32>
    %42 = arith.mulf %40, %41 : vector<17x2x2xf32>
    %cst_13 = arith.constant dense<0xFF800000> : vector<17x2xf32>
    %43 = vector.multi_reduction <maximumf>, %42, %cst_13 [2] : vector<17x2x2xf32> to vector<17x2xf32>
    %44 = vector.shape_cast %43 : vector<17x2xf32> to vector<17x2x1xf32>
    %45 = vector.broadcast %44 : vector<17x2x1xf32> to vector<17x2x2xf32>
    %46 = arith.subf %42, %45 : vector<17x2x2xf32>
    %47 = math.exp %46 : vector<17x2x2xf32>
    %cst_14 = arith.constant dense<0.000000e+00> : vector<17x2xf32>
    %48 = vector.multi_reduction <add>, %47, %cst_14 [2] : vector<17x2x2xf32> to vector<17x2xf32>
    %49 = vector.shape_cast %48 : vector<17x2xf32> to vector<17x2x1xf32>
    %50 = tpu.reciprocal %49 {approx = true} : vector<17x2x1xf32> -> vector<17x2x1xf32>
    %51 = vector.broadcast %50 : vector<17x2x1xf32> to vector<17x2x2xf32>
    %52 = arith.mulf %47, %51 : vector<17x2x2xf32>
    %53 = arith.truncf %52 : vector<17x2x2xf32> to vector<17x2x2xbf16>
    "tpu.trace_start"() <{level = 10 : i32, message = "bqk,bkd->bqd"}> : () -> ()
    %cst_15 = arith.constant dense<0.000000e+00> : vector<17x2x8xf32>
    %54 = tpu.matmul %53, %39, %cst_15 {dimension_numbers = #tpu.dot_dimension_numbers<[2], [1], [1], [2], [0, 0, 0, 1, 1, 2], [0], [0]>} : vector<17x2x2xbf16>, vector<17x2x8xbf16>, vector<17x2x8xf32> -> vector<17x2x8xf32>
    "tpu.trace_stop"() : () -> ()
    %55 = vector.extract_strided_slice %0 {offsets = [0, 0, 24], sizes = [17, 2, 8], strides = [1, 1, 1]} : vector<17x2x96xbf16> to vector<17x2x8xbf16>
    %56 = vector.extract_strided_slice %0 {offsets = [0, 0, 56], sizes = [17, 2, 8], strides = [1, 1, 1]} : vector<17x2x96xbf16> to vector<17x2x8xbf16>
    %57 = vector.extract_strided_slice %0 {offsets = [0, 0, 88], sizes = [17, 2, 8], strides = [1, 1, 1]} : vector<17x2x96xbf16> to vector<17x2x8xbf16>
    "tpu.trace_start"() <{level = 10 : i32, message = "bqd,bkd->bqk"}> : () -> ()
    %cst_16 = arith.constant dense<0.000000e+00> : vector<17x2x2xf32>
    %58 = tpu.matmul %55, %56, %cst_16 {dimension_numbers = #tpu.dot_dimension_numbers<[2], [2], [1], [1], [0, 0, 0, 1, 1, 1], [0], [0]>} : vector<17x2x8xbf16>, vector<17x2x8xbf16>, vector<17x2x2xf32> -> vector<17x2x2xf32>
    "tpu.trace_stop"() : () -> ()
    %cst_17 = arith.constant 0.353553385 : f32
    %59 = vector.broadcast %cst_17 : f32 to vector<17x2x2xf32>
    %60 = arith.mulf %58, %59 : vector<17x2x2xf32>
    %cst_18 = arith.constant dense<0xFF800000> : vector<17x2xf32>
    %61 = vector.multi_reduction <maximumf>, %60, %cst_18 [2] : vector<17x2x2xf32> to vector<17x2xf32>
    %62 = vector.shape_cast %61 : vector<17x2xf32> to vector<17x2x1xf32>
    %63 = vector.broadcast %62 : vector<17x2x1xf32> to vector<17x2x2xf32>
    %64 = arith.subf %60, %63 : vector<17x2x2xf32>
    %65 = math.exp %64 : vector<17x2x2xf32>
    %cst_19 = arith.constant dense<0.000000e+00> : vector<17x2xf32>
    %66 = vector.multi_reduction <add>, %65, %cst_19 [2] : vector<17x2x2xf32> to vector<17x2xf32>
    %67 = vector.shape_cast %66 : vector<17x2xf32> to vector<17x2x1xf32>
    %68 = tpu.reciprocal %67 {approx = true} : vector<17x2x1xf32> -> vector<17x2x1xf32>
    %69 = vector.broadcast %68 : vector<17x2x1xf32> to vector<17x2x2xf32>
    %70 = arith.mulf %65, %69 : vector<17x2x2xf32>
    %71 = arith.truncf %70 : vector<17x2x2xf32> to vector<17x2x2xbf16>
    "tpu.trace_start"() <{level = 10 : i32, message = "bqk,bkd->bqd"}> : () -> ()
    %cst_20 = arith.constant dense<0.000000e+00> : vector<17x2x8xf32>
    %72 = tpu.matmul %71, %57, %cst_20 {dimension_numbers = #tpu.dot_dimension_numbers<[2], [1], [1], [2], [0, 0, 0, 1, 1, 2], [0], [0]>} : vector<17x2x2xbf16>, vector<17x2x8xbf16>, vector<17x2x8xf32> -> vector<17x2x8xf32>
    "tpu.trace_stop"() : () -> ()
    %73 = tpu.concatenate %18, %36, %54, %72 in 2 : vector<17x2x8xf32>, vector<17x2x8xf32>, vector<17x2x8xf32>, vector<17x2x8xf32> -> vector<17x2x32xf32>
    %74 = arith.truncf %73 : vector<17x2x32xf32> to vector<17x2x32xbf16>
    %c0_21 = arith.constant 0 : index
    %c0_22 = arith.constant 0 : index
    %c0_23 = arith.constant 0 : index
    %75 = vector.load %arg2[%c0_21, %c0_22, %c0_23] : memref<17x2x32xbf16, #tpu.memory_space<vmem>>, vector<17x2x32xbf16>
    tpu.vector_store %arg2[%c0_21, %c0_22, %c0_23], %74 {strides = array<i32>} : memref<17x2x32xbf16, #tpu.memory_space<vmem>>, vector<17x2x32xbf16>,
    return
  }
  func.func @transform_0(%arg0: i32) -> (i32, i32, i32) {
    %c0_i32 = arith.constant 0 : i32
    %c0_i32_0 = arith.constant 0 : i32
    %c0_i32_1 = arith.constant 0 : i32
    return %arg0, %c0_i32, %c0_i32_0 : i32, i32, i32
  }
  func.func @transform_1(%arg0: i32) -> (i32, i32, i32) {
    %c0_i32 = arith.constant 0 : i32
    %c0_i32_0 = arith.constant 0 : i32
    %c0_i32_1 = arith.constant 0 : i32
    return %arg0, %c0_i32, %c0_i32_0 : i32, i32, i32
  }
}

module attributes {stable_mosaic.version = 11 : i64} {
  func.func @kernel(%arg0: i32, %arg1: i32, %arg2: i32, %arg3: memref<34x512xbf16, #tpu.memory_space<vmem>>, %arg4: memref<512x32xbf16, #tpu.memory_space<vmem>>, %arg5: memref<1x32xf32, #tpu.memory_space<vmem>>, %arg6: memref<34x32xbf16, #tpu.memory_space<vmem>>, %arg7: memref<1x32xf32, #tpu.memory_space<vmem>>, %arg8: memref<1x32xf32, #tpu.memory_space<vmem>>, %arg9: memref<34x32xbf16, #tpu.memory_space<vmem>>, %arg10: memref<34x32xf32, #tpu.memory_space<vmem>>) attributes {dimension_semantics = [#tpu.dimension_semantics<parallel>, #tpu.dimension_semantics<parallel>, #tpu.dimension_semantics<arbitrary>], iteration_bounds = array<i64: 1, 1, 4>, scalar_prefetch = 0 : i64, scratch_operands = 1 : i64, tpu.core_type = #tpu.core_type<tc>, window_params = [{transform_indices = @transform_0, window_bounds = array<i64: 34, 512>}, {transform_indices = @transform_1, window_bounds = array<i64: 512, 32>}, {transform_indices = @transform_2, window_bounds = array<i64: 1, 32>}, {transform_indices = @transform_3, window_bounds = array<i64: 34, 32>}, {transform_indices = @transform_4, window_bounds = array<i64: 1, 32>}, {transform_indices = @transform_5, window_bounds = array<i64: 1, 32>}, {transform_indices = @transform_6, window_bounds = array<i64: 34, 32>}]} {
    %c0_i32 = arith.constant 0 : i32
    %0 = arith.cmpi eq, %arg2, %c0_i32 : i32
    %1 = arith.extui %0 : i1 to i32
    %c0_i32_0 = arith.constant 0 : i32
    %2 = arith.cmpi ne, %1, %c0_i32_0 : i32
    scf.if %2 {
      %cst_9 = arith.constant 0.000000e+00 : f32
      %12 = vector.broadcast %cst_9 : f32 to vector<34x32xf32>
      %c0_10 = arith.constant 0 : index
      %c0_11 = arith.constant 0 : index
      %13 = vector.load %arg10[%c0_10, %c0_11] : memref<34x32xf32, #tpu.memory_space<vmem>>, vector<34x32xf32>
      tpu.vector_store %arg10[%c0_10, %c0_11], %12 {strides = array<i32>} : memref<34x32xf32, #tpu.memory_space<vmem>>, vector<34x32xf32>,
    } else {
    }
    %c0 = arith.constant 0 : index
    %c0_1 = arith.constant 0 : index
    %3 = vector.load %arg10[%c0, %c0_1] : memref<34x32xf32, #tpu.memory_space<vmem>>, vector<34x32xf32>
    %c0_2 = arith.constant 0 : index
    %c0_3 = arith.constant 0 : index
    %4 = vector.load %arg3[%c0_2, %c0_3] : memref<34x512xbf16, #tpu.memory_space<vmem>>, vector<34x512xbf16>
    %c0_4 = arith.constant 0 : index
    %c0_5 = arith.constant 0 : index
    %5 = vector.load %arg4[%c0_4, %c0_5] : memref<512x32xbf16, #tpu.memory_space<vmem>>, vector<512x32xbf16>
    %cst = arith.constant dense<0.000000e+00> : vector<34x32xf32>
    %6 = tpu.matmul %4, %5, %cst {dimension_numbers = #tpu.dot_dimension_numbers<[1], [0], [0], [1], [0, 0, 1, 1], [], []>} : vector<34x512xbf16>, vector<512x32xbf16>, vector<34x32xf32> -> vector<34x32xf32>
    %7 = arith.addf %3, %6 : vector<34x32xf32>
    %c0_6 = arith.constant 0 : index
    %c0_7 = arith.constant 0 : index
    %8 = vector.load %arg10[%c0_6, %c0_7] : memref<34x32xf32, #tpu.memory_space<vmem>>, vector<34x32xf32>
    tpu.vector_store %arg10[%c0_6, %c0_7], %7 {strides = array<i32>} : memref<34x32xf32, #tpu.memory_space<vmem>>, vector<34x32xf32>,
    %c3_i32 = arith.constant 3 : i32
    %9 = arith.cmpi eq, %arg2, %c3_i32 : i32
    %10 = arith.extui %9 : i1 to i32
    %c0_i32_8 = arith.constant 0 : i32
    %11 = arith.cmpi ne, %10, %c0_i32_8 : i32
    scf.if %11 {
      %c0_9 = arith.constant 0 : index
      %c0_10 = arith.constant 0 : index
      %12 = vector.load %arg10[%c0_9, %c0_10] : memref<34x32xf32, #tpu.memory_space<vmem>>, vector<34x32xf32>
      %c0_11 = arith.constant 0 : index
      %c0_12 = arith.constant 0 : index
      %13 = vector.load %arg5[%c0_11, %c0_12] : memref<1x32xf32, #tpu.memory_space<vmem>>, vector<1x32xf32>
      %14 = vector.broadcast %13 : vector<1x32xf32> to vector<34x32xf32>
      %15 = arith.addf %12, %14 : vector<34x32xf32>
      %c0_13 = arith.constant 0 : index
      %c0_14 = arith.constant 0 : index
      %16 = vector.load %arg6[%c0_13, %c0_14] : memref<34x32xbf16, #tpu.memory_space<vmem>>, vector<34x32xbf16>
      %17 = arith.extf %16 : vector<34x32xbf16> to vector<34x32xf32>
      %18 = arith.addf %15, %17 : vector<34x32xf32>
      %cst_15 = arith.constant dense<0.000000e+00> : vector<34xf32>
      %19 = vector.multi_reduction <add>, %18, %cst_15 [1] : vector<34x32xf32> to vector<34xf32>
      %20 = vector.shape_cast %19 : vector<34xf32> to vector<34x1xf32>
      %cst_16 = arith.constant 3.200000e+01 : f32
      %21 = vector.broadcast %cst_16 : f32 to vector<34x1xf32>
      %22 = arith.divf %20, %21 : vector<34x1xf32>
      %23 = vector.broadcast %22 : vector<34x1xf32> to vector<34x32xf32>
      %24 = arith.subf %18, %23 : vector<34x32xf32>
      %25 = arith.mulf %24, %24 : vector<34x32xf32>
      %cst_17 = arith.constant dense<0.000000e+00> : vector<34xf32>
      %26 = vector.multi_reduction <add>, %25, %cst_17 [1] : vector<34x32xf32> to vector<34xf32>
      %27 = vector.shape_cast %26 : vector<34xf32> to vector<34x1xf32>
      %cst_18 = arith.constant 3.200000e+01 : f32
      %28 = vector.broadcast %cst_18 : f32 to vector<34x1xf32>
      %29 = arith.divf %27, %28 : vector<34x1xf32>
      %cst_19 = arith.constant 9.99999974E-6 : f32
      %30 = vector.broadcast %cst_19 : f32 to vector<34x1xf32>
      %31 = arith.addf %29, %30 : vector<34x1xf32>
      %32 = math.rsqrt %31 : vector<34x1xf32>
      %33 = vector.broadcast %32 : vector<34x1xf32> to vector<34x32xf32>
      %34 = arith.mulf %24, %33 : vector<34x32xf32>
      %c0_20 = arith.constant 0 : index
      %c0_21 = arith.constant 0 : index
      %35 = vector.load %arg7[%c0_20, %c0_21] : memref<1x32xf32, #tpu.memory_space<vmem>>, vector<1x32xf32>
      %36 = vector.broadcast %35 : vector<1x32xf32> to vector<34x32xf32>
      %37 = arith.mulf %34, %36 : vector<34x32xf32>
      %c0_22 = arith.constant 0 : index
      %c0_23 = arith.constant 0 : index
      %38 = vector.load %arg8[%c0_22, %c0_23] : memref<1x32xf32, #tpu.memory_space<vmem>>, vector<1x32xf32>
      %39 = vector.broadcast %38 : vector<1x32xf32> to vector<34x32xf32>
      %40 = arith.addf %37, %39 : vector<34x32xf32>
      %41 = arith.truncf %40 : vector<34x32xf32> to vector<34x32xbf16>
      %c0_24 = arith.constant 0 : index
      %c0_25 = arith.constant 0 : index
      %42 = vector.load %arg9[%c0_24, %c0_25] : memref<34x32xbf16, #tpu.memory_space<vmem>>, vector<34x32xbf16>
      tpu.vector_store %arg9[%c0_24, %c0_25], %41 {strides = array<i32>} : memref<34x32xbf16, #tpu.memory_space<vmem>>, vector<34x32xbf16>,
    } else {
    }
    return
  }
  func.func @transform_0(%arg0: i32, %arg1: i32, %arg2: i32) -> (i32, i32) {
    %c0_i32 = arith.constant 0 : i32
    return %arg0, %arg2 : i32, i32
  }
  func.func @transform_1(%arg0: i32, %arg1: i32, %arg2: i32) -> (i32, i32) {
    %c0_i32 = arith.constant 0 : i32
    return %arg2, %arg1 : i32, i32
  }
  func.func @transform_2(%arg0: i32, %arg1: i32, %arg2: i32) -> (i32, i32) {
    %c0_i32 = arith.constant 0 : i32
    %c0_i32_0 = arith.constant 0 : i32
    return %c0_i32, %arg1 : i32, i32
  }
  func.func @transform_3(%arg0: i32, %arg1: i32, %arg2: i32) -> (i32, i32) {
    %c0_i32 = arith.constant 0 : i32
    return %arg0, %arg1 : i32, i32
  }
  func.func @transform_4(%arg0: i32, %arg1: i32, %arg2: i32) -> (i32, i32) {
    %c0_i32 = arith.constant 0 : i32
    %c0_i32_0 = arith.constant 0 : i32
    return %c0_i32, %arg1 : i32, i32
  }
  func.func @transform_5(%arg0: i32, %arg1: i32, %arg2: i32) -> (i32, i32) {
    %c0_i32 = arith.constant 0 : i32
    %c0_i32_0 = arith.constant 0 : i32
    return %c0_i32, %arg1 : i32, i32
  }
  func.func @transform_6(%arg0: i32, %arg1: i32, %arg2: i32) -> (i32, i32) {
    %c0_i32 = arith.constant 0 : i32
    return %arg0, %arg1 : i32, i32
  }
}

module attributes {stable_mosaic.version = 11 : i64} {
  func.func @kernel(%arg0: i32, %arg1: i32, %arg2: i32, %arg3: memref<34x32xbf16, #tpu.memory_space<vmem>>, %arg4: memref<32x512xbf16, #tpu.memory_space<vmem>>, %arg5: memref<1x512xf32, #tpu.memory_space<vmem>>, %arg6: memref<34x512xbf16, #tpu.memory_space<vmem>>, %arg7: memref<34x512xf32, #tpu.memory_space<vmem>>) attributes {dimension_semantics = [#tpu.dimension_semantics<parallel>, #tpu.dimension_semantics<parallel>, #tpu.dimension_semantics<arbitrary>], iteration_bounds = array<i64: 1, 4, 1>, scalar_prefetch = 0 : i64, scratch_operands = 1 : i64, tpu.core_type = #tpu.core_type<tc>, window_params = [{transform_indices = @transform_0, window_bounds = array<i64: 34, 32>}, {transform_indices = @transform_1, window_bounds = array<i64: 32, 512>}, {transform_indices = @transform_2, window_bounds = array<i64: 1, 512>}, {transform_indices = @transform_3, window_bounds = array<i64: 34, 512>}]} {
    %c0_i32 = arith.constant 0 : i32
    %0 = arith.cmpi eq, %arg2, %c0_i32 : i32
    %1 = arith.extui %0 : i1 to i32
    %c0_i32_0 = arith.constant 0 : i32
    %2 = arith.cmpi ne, %1, %c0_i32_0 : i32
    scf.if %2 {
      %cst_10 = arith.constant 0.000000e+00 : f32
      %12 = vector.broadcast %cst_10 : f32 to vector<34x512xf32>
      %c0_11 = arith.constant 0 : index
      %c0_12 = arith.constant 0 : index
      %13 = vector.load %arg7[%c0_11, %c0_12] : memref<34x512xf32, #tpu.memory_space<vmem>>, vector<34x512xf32>
      tpu.vector_store %arg7[%c0_11, %c0_12], %12 {strides = array<i32>} : memref<34x512xf32, #tpu.memory_space<vmem>>, vector<34x512xf32>,
    } else {
    }
    %c0 = arith.constant 0 : index
    %c0_1 = arith.constant 0 : index
    %3 = vector.load %arg7[%c0, %c0_1] : memref<34x512xf32, #tpu.memory_space<vmem>>, vector<34x512xf32>
    %c0_2 = arith.constant 0 : index
    %c0_3 = arith.constant 0 : index
    %4 = vector.load %arg3[%c0_2, %c0_3] : memref<34x32xbf16, #tpu.memory_space<vmem>>, vector<34x32xbf16>
    %c0_4 = arith.constant 0 : index
    %c0_5 = arith.constant 0 : index
    %5 = vector.load %arg4[%c0_4, %c0_5] : memref<32x512xbf16, #tpu.memory_space<vmem>>, vector<32x512xbf16>
    %cst = arith.constant dense<0.000000e+00> : vector<34x512xf32>
    %6 = tpu.matmul %4, %5, %cst {dimension_numbers = #tpu.dot_dimension_numbers<[1], [0], [0], [1], [0, 0, 1, 1], [], []>} : vector<34x32xbf16>, vector<32x512xbf16>, vector<34x512xf32> -> vector<34x512xf32>
    %7 = arith.addf %3, %6 : vector<34x512xf32>
    %c0_6 = arith.constant 0 : index
    %c0_7 = arith.constant 0 : index
    %8 = vector.load %arg7[%c0_6, %c0_7] : memref<34x512xf32, #tpu.memory_space<vmem>>, vector<34x512xf32>
    tpu.vector_store %arg7[%c0_6, %c0_7], %7 {strides = array<i32>} : memref<34x512xf32, #tpu.memory_space<vmem>>, vector<34x512xf32>,
    %c0_i32_8 = arith.constant 0 : i32
    %9 = arith.cmpi eq, %arg2, %c0_i32_8 : i32
    %10 = arith.extui %9 : i1 to i32
    %c0_i32_9 = arith.constant 0 : i32
    %11 = arith.cmpi ne, %10, %c0_i32_9 : i32
    scf.if %11 {
      %c0_10 = arith.constant 0 : index
      %c0_11 = arith.constant 0 : index
      %12 = vector.load %arg7[%c0_10, %c0_11] : memref<34x512xf32, #tpu.memory_space<vmem>>, vector<34x512xf32>
      %c0_12 = arith.constant 0 : index
      %c0_13 = arith.constant 0 : index
      %13 = vector.load %arg5[%c0_12, %c0_13] : memref<1x512xf32, #tpu.memory_space<vmem>>, vector<1x512xf32>
      %14 = vector.broadcast %13 : vector<1x512xf32> to vector<34x512xf32>
      %15 = arith.addf %12, %14 : vector<34x512xf32>
      %cst_14 = arith.constant 0.000000e+00 : f32
      %16 = vector.broadcast %cst_14 : f32 to vector<34x512xf32>
      %17 = arith.maximumf %15, %16 : vector<34x512xf32>
      %18 = arith.truncf %17 : vector<34x512xf32> to vector<34x512xbf16>
      %c0_15 = arith.constant 0 : index
      %c0_16 = arith.constant 0 : index
      %19 = vector.load %arg6[%c0_15, %c0_16] : memref<34x512xbf16, #tpu.memory_space<vmem>>, vector<34x512xbf16>
      tpu.vector_store %arg6[%c0_15, %c0_16], %18 {strides = array<i32>} : memref<34x512xbf16, #tpu.memory_space<vmem>>, vector<34x512xbf16>,
    } else {
    }
    return
  }
  func.func @transform_0(%arg0: i32, %arg1: i32, %arg2: i32) -> (i32, i32) {
    %c0_i32 = arith.constant 0 : i32
    return %arg0, %arg2 : i32, i32
  }
  func.func @transform_1(%arg0: i32, %arg1: i32, %arg2: i32) -> (i32, i32) {
    %c0_i32 = arith.constant 0 : i32
    return %arg2, %arg1 : i32, i32
  }
  func.func @transform_2(%arg0: i32, %arg1: i32, %arg2: i32) -> (i32, i32) {
    %c0_i32 = arith.constant 0 : i32
    %c0_i32_0 = arith.constant 0 : i32
    return %c0_i32, %arg1 : i32, i32
  }
  func.func @transform_3(%arg0: i32, %arg1: i32, %arg2: i32) -> (i32, i32) {
    %c0_i32 = arith.constant 0 : i32
    return %arg0, %arg1 : i32, i32
  }
}

module attributes {stable_mosaic.version = 11 : i64} {
  func.func @kernel(%arg0: i32, %arg1: i32, %arg2: i32, %arg3: memref<2x32xbf16, #tpu.memory_space<vmem>>, %arg4: memref<32x10xbf16, #tpu.memory_space<vmem>>, %arg5: memref<1x10xf32, #tpu.memory_space<vmem>>, %arg6: memref<2x10xf32, #tpu.memory_space<vmem>>, %arg7: memref<2x10xf32, #tpu.memory_space<vmem>>) attributes {dimension_semantics = [#tpu.dimension_semantics<parallel>, #tpu.dimension_semantics<parallel>, #tpu.dimension_semantics<arbitrary>], iteration_bounds = array<i64: 1, 1, 1>, scalar_prefetch = 0 : i64, scratch_operands = 1 : i64, tpu.core_type = #tpu.core_type<tc>, window_params = [{transform_indices = @transform_0, window_bounds = array<i64: 2, 32>}, {transform_indices = @transform_1, window_bounds = array<i64: 32, 10>}, {transform_indices = @transform_2, window_bounds = array<i64: 1, 10>}, {transform_indices = @transform_3, window_bounds = array<i64: 2, 10>}]} {
    %c0_i32 = arith.constant 0 : i32
    %0 = arith.cmpi eq, %arg2, %c0_i32 : i32
    %1 = arith.extui %0 : i1 to i32
    %c0_i32_0 = arith.constant 0 : i32
    %2 = arith.cmpi ne, %1, %c0_i32_0 : i32
    scf.if %2 {
      %cst_10 = arith.constant 0.000000e+00 : f32
      %12 = vector.broadcast %cst_10 : f32 to vector<2x10xf32>
      %c0_11 = arith.constant 0 : index
      %c0_12 = arith.constant 0 : index
      %13 = vector.load %arg7[%c0_11, %c0_12] : memref<2x10xf32, #tpu.memory_space<vmem>>, vector<2x10xf32>
      tpu.vector_store %arg7[%c0_11, %c0_12], %12 {strides = array<i32>} : memref<2x10xf32, #tpu.memory_space<vmem>>, vector<2x10xf32>,
    } else {
    }
    %c0 = arith.constant 0 : index
    %c0_1 = arith.constant 0 : index
    %3 = vector.load %arg7[%c0, %c0_1] : memref<2x10xf32, #tpu.memory_space<vmem>>, vector<2x10xf32>
    %c0_2 = arith.constant 0 : index
    %c0_3 = arith.constant 0 : index
    %4 = vector.load %arg3[%c0_2, %c0_3] : memref<2x32xbf16, #tpu.memory_space<vmem>>, vector<2x32xbf16>
    %c0_4 = arith.constant 0 : index
    %c0_5 = arith.constant 0 : index
    %5 = vector.load %arg4[%c0_4, %c0_5] : memref<32x10xbf16, #tpu.memory_space<vmem>>, vector<32x10xbf16>
    %cst = arith.constant dense<0.000000e+00> : vector<2x10xf32>
    %6 = tpu.matmul %4, %5, %cst {dimension_numbers = #tpu.dot_dimension_numbers<[1], [0], [0], [1], [0, 0, 1, 1], [], []>} : vector<2x32xbf16>, vector<32x10xbf16>, vector<2x10xf32> -> vector<2x10xf32>
    %7 = arith.addf %3, %6 : vector<2x10xf32>
    %c0_6 = arith.constant 0 : index
    %c0_7 = arith.constant 0 : index
    %8 = vector.load %arg7[%c0_6, %c0_7] : memref<2x10xf32, #tpu.memory_space<vmem>>, vector<2x10xf32>
    tpu.vector_store %arg7[%c0_6, %c0_7], %7 {strides = array<i32>} : memref<2x10xf32, #tpu.memory_space<vmem>>, vector<2x10xf32>,
    %c0_i32_8 = arith.constant 0 : i32
    %9 = arith.cmpi eq, %arg2, %c0_i32_8 : i32
    %10 = arith.extui %9 : i1 to i32
    %c0_i32_9 = arith.constant 0 : i32
    %11 = arith.cmpi ne, %10, %c0_i32_9 : i32
    scf.if %11 {
      %c0_10 = arith.constant 0 : index
      %c0_11 = arith.constant 0 : index
      %12 = vector.load %arg7[%c0_10, %c0_11] : memref<2x10xf32, #tpu.memory_space<vmem>>, vector<2x10xf32>
      %c0_12 = arith.constant 0 : index
      %c0_13 = arith.constant 0 : index
      %13 = vector.load %arg5[%c0_12, %c0_13] : memref<1x10xf32, #tpu.memory_space<vmem>>, vector<1x10xf32>
      %14 = vector.broadcast %13 : vector<1x10xf32> to vector<2x10xf32>
      %15 = arith.addf %12, %14 : vector<2x10xf32>
      %c0_14 = arith.constant 0 : index
      %c0_15 = arith.constant 0 : index
      %16 = vector.load %arg6[%c0_14, %c0_15] : memref<2x10xf32, #tpu.memory_space<vmem>>, vector<2x10xf32>
      tpu.vector_store %arg6[%c0_14, %c0_15], %15 {strides = array<i32>} : memref<2x10xf32, #tpu.memory_space<vmem>>, vector<2x10xf32>,
    } else {
    }
    return
  }
  func.func @transform_0(%arg0: i32, %arg1: i32, %arg2: i32) -> (i32, i32) {
    %c0_i32 = arith.constant 0 : i32
    return %arg0, %arg2 : i32, i32
  }
  func.func @transform_1(%arg0: i32, %arg1: i32, %arg2: i32) -> (i32, i32) {
    %c0_i32 = arith.constant 0 : i32
    return %arg2, %arg1 : i32, i32
  }
  func.func @transform_2(%arg0: i32, %arg1: i32, %arg2: i32) -> (i32, i32) {
    %c0_i32 = arith.constant 0 : i32
    %c0_i32_0 = arith.constant 0 : i32
    return %c0_i32, %arg1 : i32, i32
  }
  func.func @transform_3(%arg0: i32, %arg1: i32, %arg2: i32) -> (i32, i32) {
    %c0_i32 = arith.constant 0 : i32
    return %arg0, %arg1 : i32, i32
  }
}

</mosaic_0001>

<bundles_post_ra>
// kernel: vit_forward.12
= control target key start
LH: loop header
LB: loop body
LE: loop exit
PB: predicated region body
PF: predicated region fallthrough
CT: control target
= control target key end

     0   :  { %vm19_vm0 = vcmask 261120   ;;  %v199_v1 = vmov 0.0   ;;  %vm58_vm1 = vcmask 392192   ;;  %vm157_vm2 = vcmask 257024   ;;  %s264_s1 = inlined_call_operand.vmem [shape: bf16[48,32], index: 1, kind: input, shape index: {}]   ;;  %s265_s0 = inlined_call_operand.vmem [shape: f32[32,48], index: 0, kind: input, shape index: {}]   ;;  %s266_s2 = inlined_call_operand.vmem [shape: f32[1,32], index: 2, kind: input, shape index: {}]   ;;  %s267_s3 = inlined_call_operand.vmem [shape: bf16[32,32], index: 3, kind: output, shape index: {}]  }
   0x1   :  { %v196_v0 = vld [vmem:[%s264_s1] sm:$0xff]   ;;  %22 = vst.msk [vmem:[#allocation2 + $0x10] sm:$0xff] %vm19_vm0, %v199_v1  ;;  %20 = vst.msk [vmem:[#allocation2] sm:$0xff] %vm19_vm0, %v199_v1  ;;  %v197_v2 = vld [vmem:[%s264_s1 + $0x8] sm:$0xff]  }
   0x2   :  { %21 = vst.msk [vmem:[#allocation2 + $0x8] sm:$0xff] %vm19_vm0, %v199_v1  ;;  %23 = vst.msk [vmem:[#allocation2 + $0x18] sm:$0xff] %vm19_vm0, %v199_v1  ;;  %185 = vmatprep.subr.bf16.mxu0 %v196_v0  ;;  %v28_v3 = vld [vmem:[%s265_s0] sm:$0xff]  ;;  %v29_v4 = vld [vmem:[%s265_s0 + $0x8] sm:$0xff] }
   0x3   :  { %186 = vmatpush3.bf16.msra.mxu0 %v196_v0  ;;  %v198_v5 = vld [vmem:[%s264_s1 + $0x10] sm:$0xff]   ;;  %v32_v6 = vpack.c.bf16 %v29_v4, %v28_v3  ;;  %v31_v8 = vld [vmem:[%s265_s0 + $0x18] sm:$0xff]  ;;  %v171_v22 = vld [vmem:[%s266_s2] ss:$0 sm:$0xff] }
   0x4   :  { %187 = vmatprep.subr.bf16.mxu0 %v197_v2  ;;  %v30_v7 = vld [vmem:[%s265_s0 + $0x10] sm:$0xff] }
   0x5   :  { %191 = vmatprep.mubr.msk.bf16.mxu0 %vm58_vm1, %v32_v6  ;;  %v33_v9 = vpack.c.bf16 %v31_v8, %v30_v7 }
   0x7   :  { %188 = vmatpush3.bf16.msra.mxu0 %v197_v2 }
   0x8   :  { %189 = vmatprep.subr.bf16.mxu0 %v198_v5  ;;  %v26_v10 = vld [vmem:[#allocation2 + $0x10] sm:$0xff]  ;;  %v24_v11 = vld [vmem:[#allocation2] sm:$0xff] }
   0x9   :  { %v27_v13 = vld [vmem:[#allocation2 + $0x18] sm:$0xff]  ;;  %v25_v16 = vld [vmem:[#allocation2 + $0x8] sm:$0xff] }
   0xb   :  { %190 = vmatpush3.bf16.msra.mxu0 %v198_v5 }
   0xe   :  { %192 = vmatmul.mubr.msk.bf16.vlgmr.msra.gmra.mrb[0].mxu0 %vm58_vm1, %v33_v9 }
  0xe1   :  { %v193_v12 = vpop.f32.mrb[0].mxu0 }
  0xe2   :  { %v116_v14 = vadd.f32 %v193_v12, %v26_v10  ;;  %v99_v15 = vpop.f32.mrb[1].mxu0 }
  0xe3   :  { %v114_v17 = vadd.f32 %v99_v15, %v24_v11  ;;  %v194_v18 = vpop.f32.mrb[2].mxu0 }
  0xe4   :  { %121 = vst.msk [vmem:[#allocation2 + $0x10] sm:$0xff] %vm19_vm0, %v116_v14  ;;  %v117_v19 = vadd.f32 %v194_v18, %v27_v13  ;;  %v102_v20 = vpop.f32.mrb[3].mxu0 }
  0xe5   :  { %119 = vst.msk [vmem:[#allocation2] sm:$0xff] %vm19_vm0, %v114_v17  ;;  %v115_v21 = vadd.f32 %v102_v20, %v25_v16 }
  0xe6   :  { %122 = vst.msk [vmem:[#allocation2 + $0x18] sm:$0xff] %vm19_vm0, %v117_v19 }
  0xe7   :  { %120 = vst.msk [vmem:[#allocation2 + $0x8] sm:$0xff] %vm19_vm0, %v115_v21 }
  0xeb   :  { %v128_v23 = vld [vmem:[#allocation2 + $0x10] sm:$0xff] }
  0xec   :  { %v139_v24 = vadd.f32 %v171_v22, %v128_v23  ;;  %v126_v25 = vld [vmem:[#allocation2] sm:$0xff] }
  0xed   :  { %v137_v26 = vadd.f32 %v171_v22, %v126_v25  ;;  %v129_v27 = vld [vmem:[#allocation2 + $0x18] sm:$0xff] }
  0xee   :  { %v178_v28 = vpack.c.bf16 %v139_v24, %v139_v24  ;;  %v140_v29 = vadd.f32 %v171_v22, %v129_v27  ;;  %v127_v30 = vld [vmem:[#allocation2 + $0x8] sm:$0xff] }
  0xef   :  { %v176_v31 = vpack.c.bf16 %v137_v26, %v137_v26  ;;  %v138_v32 = vadd.f32 %v171_v22, %v127_v30 }
  0xf0   :  { %160 = vst.msk [vmem:[%s267_s3 + $0x8] sm:$0xf] %vm157_vm2, %v178_v28  ;;  %v179_v33 = vpack.c.bf16 %v140_v29, %v140_v29 }
  0xf1   :  { %158 = vst.msk [vmem:[%s267_s3] sm:$0xf] %vm157_vm2, %v176_v31  ;;  %v177_v34 = vpack.c.bf16 %v138_v32, %v138_v32 }
  0xf2   :  { %161 = vst.msk [vmem:[%s267_s3 + $0xc] sm:$0xf] %vm157_vm2, %v179_v33 }
  0xf3   :  { %159 = vst.msk [vmem:[%s267_s3 + $0x4] sm:$0xf] %vm157_vm2, %v177_v34 }

// kernel: vit_forward.13
= control target key start
LH: loop header
LB: loop body
LE: loop exit
PB: predicated region body
PF: predicated region fallthrough
CT: control target
= control target key end

     0   :  { %vm19_vm0 = vcmask 785408   ;;  %v246_v0 = vmov 0.0   ;;  %vm247_vm1 = vmmov 0   ;;  %vm65_vm2 = vcmask 261120   ;;  %s314_s1 = inlined_call_operand.vmem [shape: bf16[32,96], index: 1, kind: input, shape index: {}]   ;;  %s315_s0 = inlined_call_operand.vmem [shape: bf16[34,32], index: 0, kind: input, shape index: {}]   ;;  %s316_s2 = inlined_call_operand.vmem [shape: f32[1,96], index: 2, kind: input, shape index: {}]   ;;  %s317_s3 = inlined_call_operand.vmem [shape: bf16[34,96], index: 3, kind: output, shape index: {}]  }
   0x1   :  { %235 = vmatprep.subr.bf16.mxu1 %v246_v0  ;;  %v241_v1 = vld [vmem:[%s314_s1] sm:$0xff]   ;;  %219 = vmatprep.subr.bf16.mxu0 %v246_v0  ;;  %22 = vst.msk [vmem:[#allocation2 + $0x10] sm:$0xff] %vm19_vm0, %v246_v0  ;;  %20 = vst.msk [vmem:[#allocation2] sm:$0xff] %vm19_vm0, %v246_v0  ;;  %v242_v2 = vld [vmem:[%s314_s1 + $0x8] sm:$0xff]   ;;  %vm24_vm3 = vcmask 779264   ;;  %vm184_vm4 = vcmask 781312  }
   0x2   :  { %21 = vst.msk [vmem:[#allocation2 + $0x8] sm:$0xff] %vm19_vm0, %v246_v0  ;;  %23 = vst.msk [vmem:[#allocation2 + $0x18] sm:$0xff] %vm19_vm0, %v246_v0  ;;  %227 = vmatprep.mubr.msk.bf16.mxu1 %vm247_vm1, %v246_v0  ;;  %223 = vmatprep.mubr.msk.bf16.mxu0 %vm247_vm1, %v246_v0  ;;  %v243_v3 = vld [vmem:[%s315_s0 + $0x8] sm:$0xff]   ;;  %v244_v4 = vld [vmem:[%s315_s0] sm:$0xff]   ;;  %vm189_vm5 = vcmask 778240  }
   0x3   :  { %237 = vmatpush3.bf16.msra.mxu1 %v241_v1  ;;  %220 = vmatpush3.bf16.msra.mxu0 %v241_v1  ;;  %v245_v5 = vld [vmem:[%s315_s0 + $0x10] ss:$0 sps:$4 sm:$0x11]   ;;  %25 = vst.msk [vmem:[#allocation2 + $0x20] sm:$0x3] %vm24_vm3, %v246_v0 }
   0x4   :  { %236 = vmatprep.subr.bf16.mxu1 %v246_v0  ;;  %221 = vmatprep.subr.bf16.mxu0 %v246_v0  ;;  %v203_v23 = vld [vmem:[%s316_s2] ss:$0 sm:$0xff] }
   0x7   :  { %238 = vmatpush3.bf16.msra.mxu1 %v242_v2  ;;  %222 = vmatpush3.bf16.msra.mxu0 %v242_v2 }
   0x8   :  { %v28_v6 = vld [vmem:[#allocation2 + $0x10] sm:$0xff]  ;;  %v26_v7 = vld [vmem:[#allocation2] sm:$0xff] }
   0x9   :  { %v29_v9 = vld [vmem:[#allocation2 + $0x18] sm:$0xff]  ;;  %v27_v11 = vld [vmem:[#allocation2 + $0x8] sm:$0xff] }
   0xa   :  { %228 = vmatmul.mubr.msk.bf16.vlgmr.msra.gmra.mrb[0].mxu1 %vm65_vm2, %v243_v3  ;;  %224 = vmatmul.mubr.msk.bf16.vlgmr.msra.gmra.mrb[0].mxu0 %vm65_vm2, %v244_v4  ;;  %v30_v22 = vld [vmem:[#allocation2 + $0x20] sm:$0x3] }
   0xb   :  { %231 = vmatprep.mubr.msk.bf16.mxu1 %vm247_vm1, %v246_v0 }
  0x12   :  { %232 = vmatmul.mubr.msk.bf16.gmra.mrb[4].mxu1 %vm65_vm2, %v245_v5 }
  0xdd   :  { %v117_v8 = vpop.f32.mrb[0].mxu1  ;;  %v109_v10 = vpop.f32.mrb[0].mxu0 }
  0xde   :  { %v133_v12 = vadd.f32 %v117_v8, %v28_v6  ;;  %v229_v13 = vpop.f32.mrb[1].mxu1  ;;  %v131_v14 = vadd.f32 %v109_v10, %v26_v7  ;;  %v225_v15 = vpop.f32.mrb[1].mxu0 }
  0xdf   :  { %v120_v16 = vpop.f32.mrb[2].mxu1  ;;  %v112_v17 = vpop.f32.mrb[2].mxu0 }
  0xe0   :  { %139 = vst.msk [vmem:[#allocation2 + $0x10] sm:$0xff] %vm19_vm0, %v133_v12  ;;  %v134_v18 = vadd.f32 %v120_v16, %v29_v9  ;;  %137 = vst.msk [vmem:[#allocation2] sm:$0xff] %vm19_vm0, %v131_v14  ;;  %v230_v19 = vpop.f32.mrb[3].mxu1  ;;  %v132_v20 = vadd.f32 %v112_v17, %v27_v11  ;;  %v226_v21 = vpop.f32.mrb[3].mxu0 }
  0xe2   :  { %140 = vst.msk [vmem:[#allocation2 + $0x18] sm:$0xff] %vm19_vm0, %v134_v18  ;;  %138 = vst.msk [vmem:[#allocation2 + $0x8] sm:$0xff] %vm19_vm0, %v132_v20 }
  0xe5   :  { %v125_v24 = vpop.f32.mrb[4].mxu1 }
  0xe6   :  { %v135_v25 = vadd.f32 %v125_v24, %v30_v22  ;;  %v233_v26 = vpop.f32.mrb[5].mxu1 }
  0xe7   :  { %v148_v27 = vld [vmem:[#allocation2 + $0x10] sm:$0xff]  ;;  %v146_v28 = vld [vmem:[#allocation2] sm:$0xff]  ;;  %v128_v29 = vpop.f32.mrb[6].mxu1 }
  0xe8   :  { %v160_v30 = vadd.f32 %v203_v23, %v148_v27  ;;  %v158_v31 = vadd.f32 %v203_v23, %v146_v28  ;;  %142 = vst.msk [vmem:[#allocation2 + $0x20] sm:$0x3] %vm24_vm3, %v135_v25  ;;  %v234_v32 = vpop.f32.mrb[7].mxu1 }
  0xe9   :  { %v149_v33 = vld [vmem:[#allocation2 + $0x18] sm:$0xff]  ;;  %v147_v34 = vld [vmem:[#allocation2 + $0x8] sm:$0xff] }
  0xea   :  { %v211_v35 = vpack.c.bf16 %v160_v30, %v160_v30  ;;  %v161_v36 = vadd.f32 %v203_v23, %v149_v33  ;;  %v209_v37 = vpack.c.bf16 %v158_v31, %v158_v31  ;;  %v159_v38 = vadd.f32 %v203_v23, %v147_v34 }
  0xec   :  { %187 = vst.msk [vmem:[%s317_s3 + $0x8] sm:$0xf] %vm184_vm4, %v211_v35  ;;  %v212_v39 = vpack.c.bf16 %v161_v36, %v161_v36  ;;  %185 = vst.msk [vmem:[%s317_s3] sm:$0xf] %vm184_vm4, %v209_v37  ;;  %v210_v40 = vpack.c.bf16 %v159_v38, %v159_v38 }
  0xee   :  { %188 = vst.msk [vmem:[%s317_s3 + $0xc] sm:$0xf] %vm184_vm4, %v212_v39  ;;  %186 = vst.msk [vmem:[%s317_s3 + $0x4] sm:$0xf] %vm184_vm4, %v210_v40 }
  0xef   :  { %v150_v41 = vld [vmem:[#allocation2 + $0x20] sm:$0x3] }
  0xf0   :  { %v162_v42 = vadd.f32 %v203_v23, %v150_v41 }
  0xf2   :  { %v213_v43 = vpack.c.bf16 %v162_v42, %v162_v42 }
  0xf4   :  { %190 = vst.msk [vmem:[%s317_s3 + $0x10] sm:$0x1] %vm189_vm5, %v213_v43 }

// kernel: vit_forward.15
= control target key start
LH: loop header
LB: loop body
LE: loop exit
PB: predicated region body
PF: predicated region fallthrough
CT: control target
= control target key end

     0   :  { %vm28_vm0 = vcmask 261120   ;;  %v380_v0 = vmov 0.0   ;;  %vm381_vm1 = vmmov 0   ;;  %vm33_vm2 = vcmask 254976   ;;  %s492_s1 = inlined_call_operand.vmem [shape: bf16[32,32], index: 1, kind: input, shape index: {}]   ;;  %s493_s0 = inlined_call_operand.vmem [shape: bf16[34,32], index: 0, kind: input, shape index: {}]   ;;  %s494_s3 = inlined_call_operand.vmem [shape: bf16[34,32], index: 3, kind: input, shape index: {}]   ;;  %s495_s2 = inlined_call_operand.vmem [shape: f32[1,32], index: 2, kind: input, shape index: {}]   ;;  %s496_s4 = inlined_call_operand.vmem [shape: f32[1,32], index: 4, kind: input, shape index: {}]   ;;  %s497_s5 = inlined_call_operand.vmem [shape: f32[1,32], index: 5, kind: input, shape index: {}]   ;;  %s498_s6 = inlined_call_operand.vmem [shape: bf16[34,32], index: 6, kind: output, shape index: {}]  }
   0x1   :  { %343 = vmatprep.subr.bf16.mxu0 %v380_v0  ;;  %359 = vmatprep.subr.bf16.mxu1 %v380_v0  ;;  %v365_v1 = vld [vmem:[%s492_s1] sm:$0xff]   ;;  %29 = vst.msk [vmem:[#allocation2] sm:$0xff] %vm28_vm0, %v380_v0  ;;  %30 = vst.msk [vmem:[#allocation2 + $0x8] sm:$0xff] %vm28_vm0, %v380_v0  ;;  %v366_v2 = vld [vmem:[%s492_s1 + $0x8] sm:$0xff]   ;;  %vm297_vm3 = vcmask 257024   ;;  %vm302_vm4 = vcmask 253952  }
   0x2   :  { %31 = vst.msk [vmem:[#allocation2 + $0x10] sm:$0xff] %vm28_vm0, %v380_v0  ;;  %32 = vst.msk [vmem:[#allocation2 + $0x18] sm:$0xff] %vm28_vm0, %v380_v0  ;;  %347 = vmatprep.mubr.msk.bf16.mxu0 %vm381_vm1, %v380_v0  ;;  %351 = vmatprep.mubr.msk.bf16.mxu1 %vm381_vm1, %v380_v0  ;;  %v367_v3 = vld [vmem:[%s493_s0] sm:$0xff]   ;;  %v368_v4 = vld [vmem:[%s493_s0 + $0x8] sm:$0xff]  }
   0x3   :  { %344 = vmatpush3.bf16.msra.mxu0 %v365_v1  ;;  %361 = vmatpush3.bf16.msra.mxu1 %v365_v1  ;;  %v369_v5 = vld [vmem:[%s493_s0 + $0x10] ss:$0 sps:$4 sm:$0x11]   ;;  %34 = vst.msk [vmem:[#allocation2 + $0x20] sm:$0x3] %vm33_vm2, %v380_v0  ;;  %v337_v23 = vld [vmem:[%s494_s3 + $0x8] sm:$0xff]  }
   0x4   :  { %345 = vmatprep.subr.bf16.mxu0 %v380_v0  ;;  %360 = vmatprep.subr.bf16.mxu1 %v380_v0  ;;  %v330_v24 = vld [vmem:[%s494_s3] sm:$0xff]   ;;  %v335_v29 = vunpack.c.l.bf16 %v337_v23  ;;  %v336_v37 = vunpack.c.h.bf16 %v337_v23  ;;  %v175_v45 = vld [vmem:[%s494_s3 + $0x10] sm:$0x1] }
   0x5   :  { %v316_v26 = vld [vmem:[%s495_s2] ss:$0 sm:$0xff]  ;;  %v331_v30 = vunpack.c.l.bf16 %v330_v24  ;;  %v332_v38 = vunpack.c.h.bf16 %v330_v24  ;;  %v180_v50 = vunpack.c.l.bf16 %v175_v45 }
   0x7   :  { %346 = vmatpush3.bf16.msra.mxu0 %v366_v2  ;;  %362 = vmatpush3.bf16.msra.mxu1 %v366_v2 }
   0x8   :  { %v35_v6 = vld [vmem:[#allocation2] sm:$0xff]  ;;  %v36_v10 = vld [vmem:[#allocation2 + $0x8] sm:$0xff] }
   0x9   :  { %v37_v7 = vld [vmem:[#allocation2 + $0x10] sm:$0xff]  ;;  %v38_v11 = vld [vmem:[#allocation2 + $0x18] sm:$0xff] }
   0xa   :  { %348 = vmatmul.mubr.msk.bf16.vlgmr.msra.gmra.mrb[0].mxu0 %vm28_vm0, %v367_v3  ;;  %352 = vmatmul.mubr.msk.bf16.vlgmr.msra.gmra.mrb[0].mxu1 %vm28_vm0, %v368_v4  ;;  %v39_v22 = vld [vmem:[#allocation2 + $0x20] sm:$0x3] }
   0xb   :  { %355 = vmatprep.mubr.msk.bf16.mxu1 %vm381_vm1, %v380_v0 }
  0x12   :  { %356 = vmatmul.mubr.msk.bf16.gmra.mrb[4].mxu1 %vm28_vm0, %v369_v5 }
  0xdd   :  { %v118_v8 = vpop.f32.mrb[0].mxu0  ;;  %v126_v9 = vpop.f32.mrb[0].mxu1 }
  0xde   :  { %v140_v12 = vadd.f32 %v118_v8, %v35_v6  ;;  %v142_v13 = vadd.f32 %v126_v9, %v37_v7  ;;  %v349_v14 = vpop.f32.mrb[1].mxu0  ;;  %v353_v15 = vpop.f32.mrb[1].mxu1 }
  0xdf   :  { %v121_v16 = vpop.f32.mrb[2].mxu0  ;;  %v129_v17 = vpop.f32.mrb[2].mxu1 }
  0xe0   :  { %145 = vst.msk [vmem:[#allocation2] sm:$0xff] %vm28_vm0, %v140_v12  ;;  %147 = vst.msk [vmem:[#allocation2 + $0x10] sm:$0xff] %vm28_vm0, %v142_v13  ;;  %v141_v18 = vadd.f32 %v121_v16, %v36_v10  ;;  %v143_v19 = vadd.f32 %v129_v17, %v38_v11  ;;  %v350_v20 = vpop.f32.mrb[3].mxu0  ;;  %v354_v21 = vpop.f32.mrb[3].mxu1 }
  0xe2   :  { %146 = vst.msk [vmem:[#allocation2 + $0x8] sm:$0xff] %vm28_vm0, %v141_v18  ;;  %148 = vst.msk [vmem:[#allocation2 + $0x18] sm:$0xff] %vm28_vm0, %v143_v19 }
  0xe5   :  { %v134_v25 = vpop.f32.mrb[4].mxu1 }
  0xe6   :  { %v144_v27 = vadd.f32 %v134_v25, %v39_v22  ;;  %v357_v28 = vpop.f32.mrb[5].mxu1 }
  0xe7   :  { %v137_v31 = vpop.f32.mrb[6].mxu1  ;;  %v156_v32 = vld [vmem:[#allocation2 + $0x10] sm:$0xff]  ;;  %v154_v33 = vld [vmem:[#allocation2] sm:$0xff] }
  0xe8   :  { %150 = vst.msk [vmem:[#allocation2 + $0x20] sm:$0x3] %vm33_vm2, %v144_v27  ;;  %v358_v34 = vpop.f32.mrb[7].mxu1  ;;  %v168_v35 = vadd.f32 %v316_v26, %v156_v32  ;;  %v166_v36 = vadd.f32 %v316_v26, %v154_v33 }
  0xe9   :  { %v157_v39 = vld [vmem:[#allocation2 + $0x18] sm:$0xff]  ;;  %v155_v40 = vld [vmem:[#allocation2 + $0x8] sm:$0xff]  ;;  %v317_v34 = vld [vmem:[%s496_s4] ss:$0 sm:$0xff] }
  0xea   :  { %v183_v41 = vadd.f32 %v335_v29, %v168_v35  ;;  %v181_v42 = vadd.f32 %v331_v30, %v166_v36  ;;  %v169_v43 = vadd.f32 %v316_v26, %v157_v39  ;;  %v167_v44 = vadd.f32 %v316_v26, %v155_v40  ;;  %v318_v36 = vld [vmem:[%s497_s5] ss:$0 sm:$0xff] }
  0xec   :  { %v192_v46 = vsel %vm28_vm0, %v183_v41, 0.0  ;;  %v186_v47 = vsel %vm28_vm0, %v181_v42, 0.0  ;;  %v184_v48 = vadd.f32 %v336_v37, %v169_v43  ;;  %v182_v49 = vadd.f32 %v332_v38, %v167_v44 }
  0xed   :  { %193 = vadd.xlane.f32.xlu1 %v192_v46  ;;  %187 = vadd.xlane.f32.xlu0 %v186_v47 }
  0xee   :  { %v195_v52 = vsel %vm28_vm0, %v184_v48, 0.0  ;;  %v189_v53 = vsel %vm28_vm0, %v182_v49, 0.0 }
  0xef   :  { %v158_v51 = vld [vmem:[#allocation2 + $0x20] sm:$0x3] }
  0xf0   :  { %v170_v54 = vadd.f32 %v316_v26, %v158_v51 }
  0xf1   :  { %196 = vadd.xlane.f32.xlu1 %v195_v52  ;;  %190 = vadd.xlane.f32.xlu0 %v189_v53 }
  0xf2   :  { %v185_v55 = vadd.f32 %v180_v50, %v170_v54 }
  0xf4   :  { %v198_v56 = vsel %vm33_vm2, %v185_v55, 0.0 }
  0xf5   :  { %199 = vadd.xlane.f32.xlu0 %v198_v56 }
 0x17a   :  { %v194_v57 = vpop.xlane.xlu1 %193  ;;  %v188_v58 = vpop.xlane.xlu0 %187 }
 0x17b   :  { %v204_v59 = vmul.f32 0.03125, %v194_v57  ;;  %v202_v60 = vmul.f32 0.03125, %v188_v58 }
 0x17d   :  { %v209_v61 = vsub.f32 %v183_v41, %v204_v59  ;;  %v207_v62 = vsub.f32 %v181_v42, %v202_v60 }
 0x17e   :  { %v197_v63 = vpop.xlane.xlu1 %196  ;;  %v191_v0 = vpop.xlane.xlu0 %190 }
 0x17f   :  { %v205_v1 = vmul.f32 0.03125, %v197_v63  ;;  %v203_v2 = vmul.f32 0.03125, %v191_v0  ;;  %v212_v3 = vmul.f32 %v207_v62, %v207_v62  ;;  %v214_v7 = vmul.f32 %v209_v61, %v209_v61 }
 0x181   :  { %v210_v4 = vsub.f32 %v184_v48, %v205_v1  ;;  %v208_v5 = vsub.f32 %v182_v49, %v203_v2  ;;  %v217_v6 = vsel %vm28_vm0, %v212_v3, 0.0  ;;  %v223_v12 = vsel %vm28_vm0, %v214_v7, 0.0 }
 0x182   :  { %218 = vadd.xlane.f32.xlu1 %v217_v6  ;;  %v200_v8 = vpop.xlane.xlu0 %199 }
 0x183   :  { %v206_v9 = vmul.f32 0.03125, %v200_v8  ;;  %v213_v10 = vmul.f32 %v208_v5, %v208_v5  ;;  %v215_v14 = vmul.f32 %v210_v4, %v210_v4 }
 0x185   :  { %v211_v11 = vsub.f32 %v185_v55, %v206_v9  ;;  %v220_v13 = vsel %vm28_vm0, %v213_v10, 0.0  ;;  %v226_v16 = vsel %vm28_vm0, %v215_v14, 0.0 }
 0x186   :  { %224 = vadd.xlane.f32.xlu1 %v223_v12  ;;  %221 = vadd.xlane.f32.xlu0 %v220_v13 }
 0x187   :  { %v216_v15 = vmul.f32 %v211_v11, %v211_v11 }
 0x189   :  { %v229_v17 = vsel %vm33_vm2, %v216_v15, 0.0 }
 0x18a   :  { %227 = vadd.xlane.f32.xlu0 %v226_v16  ;;  %230 = vadd.xlane.f32.xlu1 %v229_v17 }
 0x20f   :  { %v219_v18 = vpop.xlane.xlu1 %218 }
 0x210   :  { %v232_v19 = vmul.f32 0.03125, %v219_v18 }
 0x212   :  { %v237_v20 = vadd.f32 1e-05, %v232_v19 }
 0x213   :  { %v225_v21 = vpop.xlane.xlu1 %224  ;;  %v222_v22 = vpop.xlane.xlu0 %221 }
 0x214   :  { %370 = vrsqrt.f32 %v237_v20  ;;  %v234_v23 = vmul.f32 0.03125, %v225_v21  ;;  %v233_v24 = vmul.f32 0.03125, %v222_v22 }
 0x216   :  { %v239_v25 = vadd.f32 1e-05, %v234_v23  ;;  %v238_v26 = vadd.f32 1e-05, %v233_v24 }
 0x217   :  { %v231_v27 = vpop.xlane.xlu1 %230  ;;  %v228_v28 = vpop.xlane.xlu0 %227 }
 0x218   :  { %372 = vrsqrt.f32 %v239_v25  ;;  %v236_v29 = vmul.f32 0.03125, %v231_v27  ;;  %v235_v30 = vmul.f32 0.03125, %v228_v28 }
 0x219   :  { %374 = vrsqrt.f32 %v238_v26 }
 0x21a   :  { %v241_v31 = vadd.f32 1e-05, %v236_v29  ;;  %v240_v32 = vadd.f32 1e-05, %v235_v30 }
 0x21c   :  { %376 = vrsqrt.f32 %v241_v31 }
 0x21d   :  { %378 = vrsqrt.f32 %v240_v32 }
 0x21e   :  { %v371_v33 = vpop.eup %370 }
 0x21f   :  { %v247_v35 = vmul.f32 %v371_v33, %v207_v62 }
 0x221   :  { %v259_v37 = vmul.f32 %v317_v34, %v247_v35 }
 0x222   :  { %v373_v38 = vpop.eup %372 }
 0x223   :  { %v375_v39 = vpop.eup %374  ;;  %v271_v40 = vadd.f32 %v318_v36, %v259_v37  ;;  %v249_v41 = vmul.f32 %v373_v38, %v209_v61 }
 0x224   :  { %v248_v42 = vmul.f32 %v375_v39, %v208_v5 }
 0x225   :  { %v324_v43 = vpack.c.bf16 %v271_v40, %v271_v40  ;;  %v261_v44 = vmul.f32 %v317_v34, %v249_v41 }
 0x226   :  { %v377_v45 = vpop.eup %376  ;;  %v260_v46 = vmul.f32 %v317_v34, %v248_v42 }
 0x227   :  { %v379_v47 = vpop.eup %378  ;;  %298 = vst.msk [vmem:[%s498_s6] sm:$0xf] %vm297_vm3, %v324_v43  ;;  %v273_v48 = vadd.f32 %v318_v36, %v261_v44  ;;  %v251_v49 = vmul.f32 %v377_v45, %v211_v11 }
 0x228   :  { %v272_v50 = vadd.f32 %v318_v36, %v260_v46  ;;  %v250_v51 = vmul.f32 %v379_v47, %v210_v4 }
 0x229   :  { %v326_v52 = vpack.c.bf16 %v273_v48, %v273_v48  ;;  %v263_v53 = vmul.f32 %v317_v34, %v251_v49 }
 0x22a   :  { %v325_v54 = vpack.c.bf16 %v272_v50, %v272_v50  ;;  %v262_v55 = vmul.f32 %v317_v34, %v250_v51 }
 0x22b   :  { %300 = vst.msk [vmem:[%s498_s6 + $0x8] sm:$0xf] %vm297_vm3, %v326_v52  ;;  %v275_v56 = vadd.f32 %v318_v36, %v263_v53 }
 0x22c   :  { %299 = vst.msk [vmem:[%s498_s6 + $0x4] sm:$0xf] %vm297_vm3, %v325_v54  ;;  %v274_v57 = vadd.f32 %v318_v36, %v262_v55 }
 0x22d   :  { %v328_v58 = vpack.c.bf16 %v275_v56, %v275_v56 }
 0x22e   :  { %v327_v59 = vpack.c.bf16 %v274_v57, %v274_v57 }
 0x22f   :  { %303 = vst.msk [vmem:[%s498_s6 + $0x10] sm:$0x1] %vm302_vm4, %v328_v58 }
 0x230   :  { %301 = vst.msk [vmem:[%s498_s6 + $0xc] sm:$0xf] %vm297_vm3, %v327_v59 }

// kernel: vit_forward.17
= control target key start
LH: loop header
LB: loop body
LE: loop exit
PB: predicated region body
PF: predicated region fallthrough
CT: control target
= control target key end

     0   :  { %s1531_s21 = smov 0   ;;  %s1533_s22 = smov 0   ;;  %s1696_s0 = inlined_call_operand.vmem [shape: bf16[34,2048], index: 0, kind: input, shape index: {}]   ;;  %s1697_s1 = inlined_call_operand.vmem [shape: bf16[2048,32], index: 1, kind: input, shape index: {}]   ;;  %s1698_s2 = inlined_call_operand.vmem [shape: f32[1,32], index: 2, kind: input, shape index: {}]   ;;  %s1699_s3 = inlined_call_operand.vmem [shape: bf16[34,32], index: 3, kind: input, shape index: {}]   ;;  %s1700_s4 = inlined_call_operand.vmem [shape: f32[1,32], index: 4, kind: input, shape index: {}]   ;;  %s1701_s5 = inlined_call_operand.vmem [shape: f32[1,32], index: 5, kind: input, shape index: {}]   ;;  %s1702_s6 = inlined_call_operand.vmem [shape: bf16[34,32], index: 6, kind: output, shape index: {}]  }
   0x1   :  { %s1535_s23 = smov 0   ;;  %s1537_s24 = smov 0  }
   0x2   :  { %s1539_s25 = smov 0  }
   0x3 LB: > { %s28_s26 = sadd.s32 1, %s1489_s24  ;;  %p51_p1 = scmp.ne.s32.totalorder %s1481_s22, %s1477_s21  ;;  %s1493_s25 = sphi %s1539_s25, %s16_s25   ;;  %s1489_s24 = sphi %s1537_s24, %s1706_s24   ;;  %s1485_s23 = sphi %s1535_s23, %s1705_s23   ;;  %s1481_s22 = sphi %s1533_s22, %s1704_s22   ;;  %s1477_s21 = sphi %s1531_s21, %s1703_s21  }
   0x4   : > { %p29_p0 = scmp.ge.s32.totalorder %s28_s26, 4  ;;  %p52_p2 = scmp.eq.s32.totalorder %s1493_s25, 0 }
   0x5   : > { %s44_s28 = sadd.s32 1, %s1481_s22  ;;  %p1207_p5 = scmp.ge.s32.totalorder %s1493_s25, 4 }
   0x6   : > { %s1708_s26 = smov (%p29_p0, %s28_s26), 0  ;;  %p53_p3 = por %p52_p2, %p51_p1 }
   0x7   : > { %s40_s27 = ssub.s32 %s1489_s24, %s1708_s26  ;;  %269 = sbr.rel (%p1207_p5) target bundleno = 23 (0x17), region = 32 }
   0x8   : > { %p42_p4 = scmp.eq.s32.totalorder %s40_s27, 0 }
   0xa   : > { %s1566_s29 = scalar_select %p42_p4, %s1481_s22, %s44_s28  }
   0xe   : > { %272 = sbr.rel (!%p53_p3) target bundleno = 23 (0x17), region = 36  ;;  %s274_s30 = sand.u32 (%p53_p3), 1, %s1481_s22  }
   0xf   : > { %s1271_s7 = sshll.u32 (%p53_p3), %s1489_s24, 4  ;;  %s1354_s8 = smul.u32 (%p53_p3), 80, %s274_s30 }
  0x10   : > { %s282_s11 = scalar_lea.vmem (%p53_p3), %s1696_s0, %s1271_s7 }
  0x11   : > { %v295_v0 = vld [vmem:[%s282_s11] sm:$0xff] (%p53_p3)  ;;  %v297_v1 = vld [vmem:[%s282_s11 + $0x8] sm:$0xff] (%p53_p3)  ;;  %s276_s12 = scalar_lea.vmem (%p53_p3), [#allocation3], %s1354_s8 }
  0x12   : > { %v299_v2 = vld [vmem:[%s282_s11 + $0x40] sm:$0xff] (%p53_p3)  ;;  %v301_v3 = vld [vmem:[%s282_s11 + $0x48] sm:$0xff] (%p53_p3)  ;;  %296 = vst [vmem:[%s276_s12] sm:$0xff] (%p53_p3), %v295_v0  ;;  %298 = vst [vmem:[%s276_s12 + $0x8] sm:$0xff] (%p53_p3), %v297_v1 }
  0x13   : > { %v303_v4 = vld [vmem:[%s282_s11 + $0x80] sm:$0xff] (%p53_p3)  ;;  %v305_v5 = vld [vmem:[%s282_s11 + $0x88] sm:$0xff] (%p53_p3)  ;;  %300 = vst [vmem:[%s276_s12 + $0x10] sm:$0xff] (%p53_p3), %v299_v2  ;;  %302 = vst [vmem:[%s276_s12 + $0x18] sm:$0xff] (%p53_p3), %v301_v3 }
  0x14   : > { %304 = vst [vmem:[%s276_s12 + $0x20] sm:$0xff] (%p53_p3), %v303_v4  ;;  %306 = vst [vmem:[%s276_s12 + $0x28] sm:$0xff] (%p53_p3), %v305_v5  ;;  %v307_v6 = vld [vmem:[%s282_s11 + $0xc0] sm:$0xff] (%p53_p3)  ;;  %v309_v7 = vld [vmem:[%s282_s11 + $0xc8] sm:$0xff] (%p53_p3) }
  0x15   : > { %v311_v8 = vld [vmem:[%s282_s11 + $0x100] sm:$0xff]  ;;  %308 = vst [vmem:[%s276_s12 + $0x30] sm:$0xff] %v307_v6  ;;  %310 = vst [vmem:[%s276_s12 + $0x38] sm:$0xff] %v309_v7  ;;  %v313_v9 = vld [vmem:[%s282_s11 + $0x108] sm:$0xff] }
  0x16   : > { %312 = vst [vmem:[%s276_s12 + $0x40] sm:$0xff] %v311_v8  ;;  %314 = vst [vmem:[%s276_s12 + $0x48] sm:$0xff] %v313_v9 }
  0x17 PF: > { %p1210_p6 = scmp.ge.s32.totalorder %s1493_s25, 1  ;;  %p331_p7 = scmp.lt.s32.totalorder %s1493_s25, 5 }
  0x19   : > { %p332_p8 = pnand %p1210_p6, %p331_p7 }
  0x1a   : > { %s338_s13 = sand.u32 (!%p332_p8), 1, %s1477_s21   ;;  %s1211_s14 = sshll.u32 (!%p332_p8), %s1485_s23, 6 }
  0x1b   : > { %335 = sbr.rel (%p332_p8) target bundleno = 640 (0x280), region = 63  ;;  %p398_p9 = scmp.lt.s32.totalorder (!%p332_p8), %s1211_s14, 255 }
  0x1c   : > { %s1355_s15 = smul.u32 (!%p332_p8), 80, %s338_s13  ;;  %p1213_p10 = scmp.ne.s32.totalorder (!%p332_p8), %s1485_s23, 0 }
  0x1e   : > { %s1583_s20 = scalar_lea.vmem (!%p332_p8), [#allocation3], %s1355_s15 }
  0x22   : > { %s1710_s14 = smov (!%p398_p9, %s1211_s14), 255  ;;  %437 = sbr.rel (%p1213_p10) target bundleno = 41 (0x29), region = 71 }
  0x23   : > { %s1212_s16 = sshll.u32 %s1710_s14, 2  ;;  %vm438_vm0 = vcmask (!%p1213_p10), 261120   ;;  %vm443_vm1 = vcmask (!%p1213_p10), 254976   ;;  %v1495_v10 = vmov (!%p1213_p10), 0.0  }
  0x24   : > { %s1581_s19 = scalar_lea.vmem %s1697_s1, %s1212_s16  ;;  %439 = vst.msk [vmem:[#allocation2] sm:$0xff] (!%p1213_p10), %vm438_vm0, %v1495_v10  ;;  %440 = vst.msk [vmem:[#allocation2 + $0x8] sm:$0xff] (!%p1213_p10), %vm438_vm0, %v1495_v10 }
  0x25   : > { %441 = vst.msk [vmem:[#allocation2 + $0x10] sm:$0xff] (!%p1213_p10), %vm438_vm0, %v1495_v10  ;;  %442 = vst.msk [vmem:[#allocation2 + $0x18] sm:$0xff] (!%p1213_p10), %vm438_vm0, %v1495_v10 }
  0x26   : > { %444 = vst.msk [vmem:[#allocation2 + $0x20] sm:$0x3] (!%p1213_p10), %vm443_vm1, %v1495_v10 }
  0x29 PF: > { %v1397_v11 = vld [vmem:[%s1581_s19 + $0x40] sm:$0xff]   ;;  %v1401_v15 = vld [vmem:[%s1581_s19 + $0x48] sm:$0xff]   ;;  %v1405_v19 = vld [vmem:[%s1581_s19 + $0x50] sm:$0xff]   ;;  %vm887_vm2 = vcmask 261120   ;;  %vm892_vm3 = vcmask 254976   ;;  %p1258_p11 = scmp.ne.s32.totalorder %s1485_s23, 3 }
  0x2a   : > { %v1398_v12 = vld [vmem:[%s1581_s19 + $0xc0] sm:$0xff]   ;;  %1286 = vmatprep.subr.bf16.mxu0 %v1397_v11  ;;  %v1402_v16 = vld [vmem:[%s1581_s19 + $0xc8] sm:$0xff]   ;;  %v1406_v20 = vld [vmem:[%s1581_s19 + $0xd0] sm:$0xff]   ;;  %vm1041_vm4 = vcmask (!%p1258_p11), 257024   ;;  %vm1046_vm5 = vcmask (!%p1258_p11), 253952  }
  0x2b   : > { %v1399_v13 = vld [vmem:[%s1581_s19] sm:$0xff]   ;;  %1320 = vmatprep.subr.bf16.mxu1 %v1398_v12  ;;  %v1403_v17 = vld [vmem:[%s1581_s19 + $0x8] sm:$0xff]   ;;  %v1407_v21 = vld [vmem:[%s1581_s19 + $0x10] sm:$0xff]  }
  0x2c   : > { %v1400_v14 = vld [vmem:[%s1581_s19 + $0x80] sm:$0xff]   ;;  %1287 = vmatpush3.bf16.msra.mxu0 %v1399_v13  ;;  %v1404_v18 = vld [vmem:[%s1581_s19 + $0x88] sm:$0xff]   ;;  %v1408_v22 = vld [vmem:[%s1581_s19 + $0x90] sm:$0xff]  }
  0x2d   : > { %1321 = vmatpush3.bf16.msra.mxu1 %v1400_v14  ;;  %1288 = vmatprep.subr.bf16.mxu0 %v1401_v15  ;;  %v1409_v23 = vld [vmem:[%s1581_s19 + $0x58] sm:$0xff]   ;;  %v1413_v27 = vld [vmem:[%s1581_s19 + $0x60] sm:$0xff]   ;;  %v1417_v31 = vld [vmem:[%s1581_s19 + $0x68] sm:$0xff]  }
  0x2e   : > { %1322 = vmatprep.subr.bf16.mxu1 %v1402_v16  ;;  %v1410_v24 = vld [vmem:[%s1581_s19 + $0xd8] sm:$0xff]   ;;  %v1414_v28 = vld [vmem:[%s1581_s19 + $0xe0] sm:$0xff]   ;;  %v1418_v32 = vld [vmem:[%s1581_s19 + $0xe8] sm:$0xff]  }
  0x2f   : > { %v1411_v25 = vld [vmem:[%s1581_s19 + $0x18] sm:$0xff]   ;;  %v1415_v29 = vld [vmem:[%s1581_s19 + $0x20] sm:$0xff]   ;;  %v1419_v33 = vld [vmem:[%s1581_s19 + $0x28] sm:$0xff]  }
  0x30   : > { %1289 = vmatpush3.bf16.msra.mxu0 %v1403_v17  ;;  %v1412_v26 = vld [vmem:[%s1581_s19 + $0x98] sm:$0xff]   ;;  %v1416_v30 = vld [vmem:[%s1581_s19 + $0xa0] sm:$0xff]   ;;  %v1420_v34 = vld [vmem:[%s1581_s19 + $0xa8] sm:$0xff]  }
  0x31   : > { %1323 = vmatpush3.bf16.msra.mxu1 %v1404_v18  ;;  %1290 = vmatprep.subr.bf16.mxu0 %v1405_v19  ;;  %v1421_v35 = vld [vmem:[%s1581_s19 + $0x70] sm:$0xff]   ;;  %v1425_v39 = vld [vmem:[%s1581_s19 + $0x78] sm:$0xff]   ;;  %v445_v2 = vld [vmem:[#allocation2] sm:$0xff] }
  0x32   : > { %1324 = vmatprep.subr.bf16.mxu1 %v1406_v20  ;;  %v1422_v36 = vld [vmem:[%s1581_s19 + $0xf0] sm:$0xff]   ;;  %v1426_v40 = vld [vmem:[%s1581_s19 + $0xf8] sm:$0xff]   ;;  %v446_v7 = vld [vmem:[#allocation2 + $0x8] sm:$0xff] }
  0x33   : > { %v1423_v37 = vld [vmem:[%s1581_s19 + $0x30] sm:$0xff]   ;;  %v1427_v41 = vld [vmem:[%s1581_s19 + $0x38] sm:$0xff]  }
  0x34   : > { %1291 = vmatpush3.bf16.msra.mxu0 %v1407_v21  ;;  %v1424_v38 = vld [vmem:[%s1581_s19 + $0xb0] sm:$0xff]   ;;  %v1428_v42 = vld [vmem:[%s1581_s19 + $0xb8] sm:$0xff]  }
  0x35   : > { %1325 = vmatpush3.bf16.msra.mxu1 %v1408_v22  ;;  %1292 = vmatprep.subr.bf16.mxu0 %v1409_v23  ;;  %v1429_v43 = vld [vmem:[%s1583_s20] ss:$16 sps:$4 sm:$0xff]   ;;  %v1431_v44 = vld [vmem:[%s1583_s20 + $0x4] ss:$16 sps:$4 sm:$0xff]   ;;  %v1432_v45 = vld [vmem:[%s1583_s20 + $0x8] ss:$16 sps:$4 sm:$0xff]  }
  0x36   : > { %1326 = vmatprep.subr.bf16.mxu1 %v1410_v24  ;;  %v1434_v46 = vld [vmem:[%s1583_s20 + $0xc] ss:$16 sps:$4 sm:$0xff]   ;;  %802 = vmatprep.mubr.bf16.mxu0 %v1431_v44  ;;  %v1435_v47 = vld [vmem:[%s1583_s20 + $0x24] ss:$16 sps:$4 sm:$0xff]   ;;  %v1439_v51 = vld [vmem:[%s1583_s20 + $0x20] ss:$16 sps:$4 sm:$0xff]  }
  0x37   : > { %858 = vmatprep.mubr.bf16.mxu1 %v1434_v46  ;;  %v1437_v48 = vld [vmem:[%s1583_s20 + $0x2c] ss:$16 sps:$4 sm:$0xff]   ;;  %v458_v49 = vld [vmem:[%s1583_s20 + $0x40] sm:$0x11]  ;;  %v1440_v52 = vld [vmem:[%s1583_s20 + $0x28] ss:$16 sps:$4 sm:$0xff]  }
  0x38   : > { %1293 = vmatpush3.bf16.msra.mxu0 %v1411_v25  ;;  %v459_v50 = vld [vmem:[%s1583_s20 + $0x48] sm:$0x11]  ;;  %v1223_v53 = vcombine.high %v458_v49, %v458_v49  ;;  %v1222_v55 = vcombine.low %v458_v49, %v458_v49  ;;  %v448_v25 = vld [vmem:[#allocation2 + $0x18] sm:$0xff] }
  0x39   : > { %1327 = vmatpush3.bf16.msra.mxu1 %v1412_v26  ;;  %1294 = vmatprep.subr.bf16.mxu0 %v1413_v27  ;;  %v1225_v54 = vcombine.high %v459_v50, %v459_v50  ;;  %v1224_v56 = vcombine.low %v459_v50, %v459_v50  ;;  %v447_v20 = vld [vmem:[#allocation2 + $0x10] sm:$0xff]  ;;  %v1278_v44 = vld [vmem:[%s1699_s3] sm:$0xff] (!%p1258_p11)  }
  0x3a   : > { %1328 = vmatprep.subr.bf16.mxu1 %v1414_v28  ;;  %v1279_v46 = vunpack.c.l.bf16 (!%p1258_p11), %v1278_v44  ;;  %v1280_v50 = vunpack.c.h.bf16 (!%p1258_p11), %v1278_v44 }
  0x3c   : > { %1295 = vmatpush3.bf16.msra.mxu0 %v1415_v29 }
  0x3d   : > { %1329 = vmatpush3.bf16.msra.mxu1 %v1416_v30  ;;  %1296 = vmatprep.subr.bf16.mxu0 %v1417_v31 }
  0x3e   : > { %1330 = vmatprep.subr.bf16.mxu1 %v1418_v32 }
  0x40   : > { %1297 = vmatpush3.bf16.msra.mxu0 %v1419_v33 }
  0x41   : > { %1331 = vmatpush3.bf16.msra.mxu1 %v1420_v34  ;;  %1298 = vmatprep.subr.bf16.mxu0 %v1421_v35 }
  0x42   : > { %1332 = vmatprep.subr.bf16.mxu1 %v1422_v36 }
  0x44   : > { %1299 = vmatpush3.bf16.msra.mxu0 %v1423_v37 }
  0x45   : > { %1333 = vmatpush3.bf16.msra.mxu1 %v1424_v38  ;;  %1300 = vmatprep.subr.bf16.mxu0 %v1425_v39  ;;  %v449_v38 = vld [vmem:[#allocation2 + $0x20] sm:$0x3] }
  0x46   : > { %1334 = vmatprep.subr.bf16.mxu1 %v1426_v40 }
  0x48   : > { %1301 = vmatpush3.bf16.msra.mxu0 %v1427_v41 }
  0x49   : > { %1335 = vmatpush3.bf16.msra.mxu1 %v1428_v42 }
  0x4b   : > { %803 = vmatmul.mubr.bf16.vlgmr.msra.gmra.mrb[0].mxu0 %v1429_v43  ;;  %v1259_v43 = vld [vmem:[%s1698_s2] ss:$0 sm:$0xff] (!%p1258_p11) }
  0x4c   : > { %859 = vmatmul.mubr.bf16.vlgmr.msra.gmra.mrb[0].mxu1 %v1432_v45  ;;  %810 = vmatprep.mubr.bf16.mxu0 %v1435_v47 }
  0x4d   : > { %866 = vmatprep.mubr.bf16.mxu1 %v1437_v48  ;;  %v1285_v48 = vld [vmem:[%s1699_s3 + $0x8] sm:$0xff] (!%p1258_p11)  }
  0x53   : > { %811 = vmatmul.mubr.bf16.gmra.mrb[4].mxu0 %v1439_v51 }
  0x54   : > { %867 = vmatmul.mubr.bf16.gmra.mrb[4].mxu1 %v1440_v52  ;;  %818 = vmatprep.mubr.bf16.mxu0 %v1223_v53  ;;  %v1283_v52 = vunpack.c.l.bf16 (!%p1258_p11), %v1285_v48 }
  0x55   : > { %874 = vmatprep.mubr.bf16.mxu1 %v1225_v54 }
  0x5b   : > { %819 = vmatmul.mubr.bf16.gmra.mrb[8].mxu0 %v1222_v55  ;;  %v1284_v55 = vunpack.c.h.bf16 (!%p1258_p11), %v1285_v48  ;;  %v1260_v48 = vld [vmem:[%s1700_s4] ss:$0 sm:$0xff] (!%p1258_p11) }
  0x5c   : > { %875 = vmatmul.mubr.bf16.gmra.mrb[8].mxu1 %v1224_v56 }
 0x11e   : > { %v1302_v57 = vpop.f32.mrb[0].mxu0 }
 0x11f   : > { %v1336_v58 = vpop.f32.mrb[0].mxu1  ;;  %v1303_v59 = vpop.f32.mrb[1].mxu0 }
 0x120   : > { %v1304_v60 = vadd.f32 %v1303_v59, %v1302_v57  ;;  %v1337_v61 = vpop.f32.mrb[1].mxu1  ;;  %v1305_v62 = vpop.f32.mrb[2].mxu0  ;;  %v919_v57 = vld [vmem:[%s1699_s3 + $0x10] sm:$0x1] (!%p1258_p11) }
 0x121   : > { %v1338_v63 = vadd.f32 %v1337_v61, %v1336_v58  ;;  %v1339_v0 = vpop.f32.mrb[2].mxu1  ;;  %v1306_v1 = vpop.f32.mrb[3].mxu0  ;;  %v924_v61 = vunpack.c.l.bf16 (!%p1258_p11), %v919_v57 }
 0x122   : > { %v1307_v3 = vadd.f32 %v1306_v1, %v1305_v62  ;;  %v1340_v4 = vpop.f32.mrb[3].mxu1 }
 0x123   : > { %v861_v5 = vadd.f32 %v1338_v63, %v1304_v60  ;;  %v1341_v6 = vadd.f32 %v1340_v4, %v1339_v0 }
 0x125   : > { %v882_v8 = vadd.f32 %v861_v5, %v445_v2  ;;  %v864_v9 = vadd.f32 %v1341_v6, %v1307_v3 }
 0x126   : > { %v1308_v10 = vpop.f32.mrb[4].mxu0 }
 0x127   : > { %888 = vst.msk [vmem:[#allocation2] sm:$0xff] %vm887_vm2, %v882_v8  ;;  %v883_v11 = vadd.f32 %v864_v9, %v446_v7  ;;  %v1342_v12 = vpop.f32.mrb[4].mxu1  ;;  %v1309_v13 = vpop.f32.mrb[5].mxu0 }
 0x128   : > { %v1310_v14 = vadd.f32 %v1309_v13, %v1308_v10  ;;  %v1343_v15 = vpop.f32.mrb[5].mxu1  ;;  %v1311_v16 = vpop.f32.mrb[6].mxu0 }
 0x129   : > { %889 = vst.msk [vmem:[#allocation2 + $0x8] sm:$0xff] %vm887_vm2, %v883_v11  ;;  %v1344_v17 = vadd.f32 %v1343_v15, %v1342_v12  ;;  %v1345_v18 = vpop.f32.mrb[6].mxu1  ;;  %v1312_v19 = vpop.f32.mrb[7].mxu0 }
 0x12a   : > { %v1313_v21 = vadd.f32 %v1312_v19, %v1311_v16  ;;  %v1346_v22 = vpop.f32.mrb[7].mxu1 }
 0x12b   : > { %v869_v23 = vadd.f32 %v1344_v17, %v1310_v14  ;;  %v1347_v24 = vadd.f32 %v1346_v22, %v1345_v18 }
 0x12d   : > { %v884_v26 = vadd.f32 %v869_v23, %v447_v20  ;;  %v872_v27 = vadd.f32 %v1347_v24, %v1313_v21 }
 0x12e   : > { %v1314_v28 = vpop.f32.mrb[8].mxu0  ;;  %v898_v42 = vld [vmem:[#allocation2] sm:$0xff] (!%p1258_p11) }
 0x12f   : > { %890 = vst.msk [vmem:[#allocation2 + $0x10] sm:$0xff] %vm887_vm2, %v884_v26  ;;  %v885_v29 = vadd.f32 %v872_v27, %v448_v25  ;;  %v1348_v30 = vpop.f32.mrb[8].mxu1  ;;  %v1315_v31 = vpop.f32.mrb[9].mxu0  ;;  %v910_v45 = vadd.f32 (!%p1258_p11), %v1259_v43, %v898_v42 }
 0x130   : > { %v1316_v32 = vadd.f32 %v1315_v31, %v1314_v28  ;;  %v1349_v33 = vpop.f32.mrb[9].mxu1  ;;  %v1317_v34 = vpop.f32.mrb[10].mxu0  ;;  %v899_v49 = vld [vmem:[#allocation2 + $0x8] sm:$0xff] (!%p1258_p11) }
 0x131   : > { %891 = vst.msk [vmem:[#allocation2 + $0x18] sm:$0xff] %vm887_vm2, %v885_v29  ;;  %v1350_v35 = vadd.f32 %v1349_v33, %v1348_v30  ;;  %v1351_v36 = vpop.f32.mrb[10].mxu1  ;;  %v1318_v37 = vpop.f32.mrb[11].mxu0  ;;  %897 = sbr.rel (%p1258_p11) target bundleno = 640 (0x280), region = 75  ;;  %v911_v53 = vadd.f32 (!%p1258_p11), %v1259_v43, %v899_v49  ;;  %v925_v58 = vadd.f32 (!%p1258_p11), %v1279_v46, %v910_v45 }
 0x132   : > { %v1352_v39 = vpop.f32.mrb[11].mxu1 }
 0x133   : > { %v877_v40 = vadd.f32 %v1350_v35, %v1316_v32  ;;  %v926_v63 = vadd.f32 (!%p1258_p11), %v1280_v50, %v911_v53  ;;  %v930_v0 = vsel (!%p1258_p11), %vm887_vm2, %v925_v58, 0.0  ;;  %v1261_v50 = vld [vmem:[%s1701_s5] ss:$0 sm:$0xff] (!%p1258_p11) }
 0x134   : > { %931 = vadd.xlane.f32.xlu0 (!%p1258_p11), %v930_v0 }
 0x135   : > { %v886_v41 = vadd.f32 %v877_v40, %v449_v38  ;;  %v933_v3 = vsel (!%p1258_p11), %vm887_vm2, %v926_v63, 0.0 }
 0x136   : > { %v900_v47 = vld [vmem:[#allocation2 + $0x10] sm:$0xff] (!%p1258_p11) }
 0x137   : > { %893 = vst.msk [vmem:[#allocation2 + $0x20] sm:$0x3] %vm892_vm3, %v886_v41  ;;  %v912_v51 = vadd.f32 (!%p1258_p11), %v1259_v43, %v900_v47 }
 0x138   : > { %v901_v54 = vld [vmem:[#allocation2 + $0x18] sm:$0xff]  ;;  %934 = vadd.xlane.f32.xlu0 %v933_v3 }
 0x139   : > { %v913_v59 = vadd.f32 %v1259_v43, %v901_v54  ;;  %v927_v62 = vadd.f32 %v1283_v52, %v912_v51 }
 0x13b   : > { %v928_v1 = vadd.f32 %v1284_v55, %v913_v59  ;;  %v936_v2 = vsel %vm887_vm2, %v927_v62, 0.0 }
 0x13c   : > { %937 = vadd.xlane.f32.xlu1 %v936_v2 }
 0x13d   : > { %v939_v5 = vsel %vm887_vm2, %v928_v1, 0.0 }
 0x13e   : > { %v902_v56 = vld [vmem:[#allocation2 + $0x20] sm:$0x3] }
 0x13f   : > { %v914_v60 = vadd.f32 %v1259_v43, %v902_v56 }
 0x140   : > { %940 = vadd.xlane.f32.xlu1 %v939_v5 }
 0x141   : > { %v929_v4 = vadd.f32 %v924_v61, %v914_v60 }
 0x143   : > { %v942_v6 = vsel %vm892_vm3, %v929_v4, 0.0 }
 0x144   : > { %943 = vadd.xlane.f32.xlu0 %v942_v6 }
 0x1c1   : > { %v932_v7 = vpop.xlane.xlu0 %931 }
 0x1c2   : > { %v946_v8 = vmul.f32 0.03125, %v932_v7 }
 0x1c4   : > { %v951_v11 = vsub.f32 %v925_v58, %v946_v8 }
 0x1c5   : > { %v935_v13 = vpop.xlane.xlu0 %934 }
 0x1c6   : > { %v947_v14 = vmul.f32 0.03125, %v935_v13  ;;  %v956_v16 = vmul.f32 %v951_v11, %v951_v11 }
 0x1c8   : > { %v952_v19 = vsub.f32 %v926_v63, %v947_v14  ;;  %v961_v20 = vsel %vm887_vm2, %v956_v16, 0.0 }
 0x1c9   : > { %v938_v9 = vpop.xlane.xlu1 %937  ;;  %962 = vadd.xlane.f32.xlu1 %v961_v20 }
 0x1ca   : > { %v948_v10 = vmul.f32 0.03125, %v938_v9  ;;  %v957_v25 = vmul.f32 %v952_v19, %v952_v19 }
 0x1cc   : > { %v953_v12 = vsub.f32 %v927_v62, %v948_v10  ;;  %v964_v28 = vsel %vm887_vm2, %v957_v25, 0.0 }
 0x1cd   : > { %v941_v15 = vpop.xlane.xlu1 %940  ;;  %965 = vadd.xlane.f32.xlu0 %v964_v28 }
 0x1ce   : > { %v949_v17 = vmul.f32 0.03125, %v941_v15  ;;  %v958_v18 = vmul.f32 %v953_v12, %v953_v12 }
 0x1d0   : > { %v954_v21 = vsub.f32 %v928_v1, %v949_v17  ;;  %v967_v24 = vsel %vm887_vm2, %v958_v18, 0.0 }
 0x1d1   : > { %v944_v22 = vpop.xlane.xlu0 %943  ;;  %968 = vadd.xlane.f32.xlu1 %v967_v24 }
 0x1d2   : > { %v950_v23 = vmul.f32 0.03125, %v944_v22  ;;  %v959_v26 = vmul.f32 %v954_v21, %v954_v21 }
 0x1d4   : > { %v955_v27 = vsub.f32 %v929_v4, %v950_v23  ;;  %v970_v29 = vsel %vm887_vm2, %v959_v26, 0.0 }
 0x1d5   : > { %971 = vadd.xlane.f32.xlu0 %v970_v29 }
 0x1d6   : > { %v960_v30 = vmul.f32 %v955_v27, %v955_v27 }
 0x1d8   : > { %v973_v31 = vsel %vm892_vm3, %v960_v30, 0.0 }
 0x1d9   : > { %974 = vadd.xlane.f32.xlu1 %v973_v31 }
 0x256   : > { %v963_v32 = vpop.xlane.xlu1 %962 }
 0x257   : > { %v976_v33 = vmul.f32 0.03125, %v963_v32 }
 0x259   : > { %v981_v34 = vadd.f32 1e-05, %v976_v33 }
 0x25a   : > { %v966_v36 = vpop.xlane.xlu0 %965 }
 0x25b   : > { %1445 = vrsqrt.f32 %v981_v34  ;;  %v977_v38 = vmul.f32 0.03125, %v966_v36 }
 0x25d   : > { %v982_v40 = vadd.f32 1e-05, %v977_v38 }
 0x25e   : > { %v969_v35 = vpop.xlane.xlu1 %968 }
 0x25f   : > { %v978_v37 = vmul.f32 0.03125, %v969_v35 }
 0x261   : > { %v983_v39 = vadd.f32 1e-05, %v978_v37 }
 0x262   : > { %v972_v42 = vpop.xlane.xlu0 %971 }
 0x263   : > { %1447 = vrsqrt.f32 %v983_v39  ;;  %v979_v44 = vmul.f32 0.03125, %v972_v42 }
 0x264   : > { %1449 = vrsqrt.f32 %v982_v40 }
 0x265   : > { %v984_v46 = vadd.f32 1e-05, %v979_v44  ;;  %v1446_v47 = vpop.eup %1445 }
 0x266   : > { %v975_v41 = vpop.xlane.xlu1 %974  ;;  %v991_v49 = vmul.f32 %v1446_v47, %v951_v11 }
 0x267   : > { %v980_v43 = vmul.f32 0.03125, %v975_v41 }
 0x268   : > { %v1003_v51 = vmul.f32 %v1260_v48, %v991_v49 }
 0x269   : > { %v985_v45 = vadd.f32 1e-05, %v980_v43 }
 0x26a   : > { %v1015_v54 = vadd.f32 %v1261_v50, %v1003_v51 }
 0x26b   : > { %1451 = vrsqrt.f32 %v985_v45 }
 0x26c   : > { %1453 = vrsqrt.f32 %v984_v46  ;;  %v1272_v57 = vpack.c.bf16 %v1015_v54, %v1015_v54 }
 0x26d   : > { %v1448_v52 = vpop.eup %1447 }
 0x26e   : > { %v1450_v53 = vpop.eup %1449  ;;  %v993_v55 = vmul.f32 %v1448_v52, %v953_v12  ;;  %1042 = vst.msk [vmem:[%s1702_s6] sm:$0xf] %vm1041_vm4, %v1272_v57 }
 0x26f   : > { %v992_v56 = vmul.f32 %v1450_v53, %v952_v19 }
 0x270   : > { %v1005_v58 = vmul.f32 %v1260_v48, %v993_v55 }
 0x271   : > { %v1004_v60 = vmul.f32 %v1260_v48, %v992_v56 }
 0x272   : > { %v1017_v62 = vadd.f32 %v1261_v50, %v1005_v58 }
 0x273   : > { %v1016_v0 = vadd.f32 %v1261_v50, %v1004_v60 }
 0x274   : > { %v1274_v2 = vpack.c.bf16 %v1017_v62, %v1017_v62 }
 0x275   : > { %v1452_v59 = vpop.eup %1451  ;;  %v1273_v4 = vpack.c.bf16 %v1016_v0, %v1016_v0 }
 0x276   : > { %v1454_v61 = vpop.eup %1453  ;;  %v995_v63 = vmul.f32 %v1452_v59, %v955_v27  ;;  %1044 = vst.msk [vmem:[%s1702_s6 + $0x8] sm:$0xf] %vm1041_vm4, %v1274_v2 }
 0x277   : > { %v994_v1 = vmul.f32 %v1454_v61, %v954_v21  ;;  %1043 = vst.msk [vmem:[%s1702_s6 + $0x4] sm:$0xf] %vm1041_vm4, %v1273_v4 }
 0x278   : > { %v1007_v3 = vmul.f32 %v1260_v48, %v995_v63 }
 0x279   : > { %v1006_v5 = vmul.f32 %v1260_v48, %v994_v1 }
 0x27a   : > { %v1019_v6 = vadd.f32 %v1261_v50, %v1007_v3 }
 0x27b   : > { %v1018_v7 = vadd.f32 %v1261_v50, %v1006_v5 }
 0x27c   : > { %v1276_v8 = vpack.c.bf16 %v1019_v6, %v1019_v6 }
 0x27d   : > { %v1275_v9 = vpack.c.bf16 %v1018_v7, %v1018_v7 }
 0x27e   : > { %1047 = vst.msk [vmem:[%s1702_s6 + $0x10] sm:$0x1] %vm1046_vm5, %v1276_v8 }
 0x27f   : > { %1045 = vst.msk [vmem:[%s1702_s6 + $0xc] sm:$0xf] %vm1041_vm4, %v1275_v9 }
 0x280 PF: > { %s16_s25 = sadd.s32 1, %s1493_s25   ;;  %s1703_s21 = smov %s1481_s22 }
 0x281   : > { %p13_p12 = scmp.ge.s32.totalorder %s16_s25, 6   ;;  %s1704_s22 = smov %s1566_s29 }
 0x282   : > { %s1705_s23 = smov %s1489_s24  ;;  %s1706_s24 = smov %s1708_s26 }
 0x283   :  { %15 = sbr.rel (!%p13_p12) target bundleno = 3 (0x3), region = 125 }

// kernel: vit_forward.16
= control target key start
LH: loop header
LB: loop body
LE: loop exit
PB: predicated region body
PF: predicated region fallthrough
CT: control target
= control target key end

     0   :  { %s1046_s12 = smov 0   ;;  %s1048_s13 = smov 0   ;;  %s1185_s0 = inlined_call_operand.vmem [shape: bf16[34,32], index: 0, kind: input, shape index: {}]   ;;  %s1186_s1 = inlined_call_operand.vmem [shape: bf16[32,2048], index: 1, kind: input, shape index: {}]   ;;  %s1187_s2 = inlined_call_operand.vmem [shape: f32[1,2048], index: 2, kind: input, shape index: {}]   ;;  %s1188_s3 = inlined_call_operand.vmem [shape: bf16[34,2048], index: 3, kind: output, shape index: {}]  }
   0x1   :  { %s1050_s14 = smov 0   ;;  %s1052_s15 = smov 0  }
   0x2   :  { %s1054_s16 = smov 0  }
   0x3 LB: > { %s28_s17 = sadd.s32 1, %s1018_s15  ;;  %s872_s18 = sadd.s32 4294967295, %s1022_s16   ;;  %s1022_s16 = sphi %s1054_s16, %s13_s16   ;;  %s1018_s15 = sphi %s1052_s15, %s1193_s15   ;;  %s1014_s14 = sphi %s1050_s14, %s1192_s14   ;;  %s1010_s13 = sphi %s1048_s13, %s1191_s13   ;;  %s1006_s12 = sphi %s1046_s12, %s1190_s12  }
   0x4   : > { %p30_p0 = scmp.ge.s32.totalorder %s28_s17, 4  ;;  %p76_p1 = scmp.ne.s32.totalorder %s1010_s13, %s1006_s12 }
   0x5   : > { %p77_p2 = scmp.eq.s32.totalorder %s1022_s16, 0  ;;  %p134_p4 = scmp.eq.s32.totalorder %s872_s18, 3 }
   0x6   : > { %s1195_s17 = smov (%p30_p0, %s28_s17), 0  ;;  %s69_s20 = sadd.s32 1, %s1010_s13 }
   0x7   : > { %p78_p3 = por %p77_p2, %p76_p1  ;;  %s65_s19 = ssub.s32 %s1018_s15, %s1195_s17 }
   0x8   : > { %p67_p5 = scmp.eq.s32.totalorder %s65_s19, 0  ;;  %p1081_p6 = por %p134_p4, %p76_p1 }
   0x9   : > { %p876_p7 = scmp.ge.s32.totalorder %s1022_s16, 4 }
   0xa   : > { %s1086_s22 = scalar_select %p67_p5, %s1010_s13, %s69_s20  }
   0xb   : > { %168 = sbr.rel (%p876_p7) target bundleno = 26 (0x1a), region = 20 }
  0x12   : > { %171 = sbr.rel (!%p78_p3) target bundleno = 26 (0x1a), region = 24  ;;  %s173_s23 = sand.u32 (%p78_p3), 1, %s1010_s13  }
  0x13   : > { %s914_s24 = sshll.u32 (%p78_p3), %s1018_s15, 4  ;;  %s877_s25 = sshll.u32 (%p78_p3), %s173_s23, 6 }
  0x14   : > { %s181_s28 = scalar_lea.vmem (%p78_p3), %s1186_s1, %s914_s24  ;;  %s175_s29 = scalar_lea.vmem (%p78_p3), [#allocation3], %s877_s25 }
  0x15   : > { %v194_v0 = vld [vmem:[%s181_s28] sm:$0xff] (%p78_p3)  ;;  %v196_v1 = vld [vmem:[%s181_s28 + $0x8] sm:$0xff] (%p78_p3) }
  0x16   : > { %v198_v2 = vld [vmem:[%s181_s28 + $0x40] sm:$0xff] (%p78_p3)  ;;  %195 = vst [vmem:[%s175_s29] sm:$0xff] (%p78_p3), %v194_v0  ;;  %197 = vst [vmem:[%s175_s29 + $0x8] sm:$0xff] (%p78_p3), %v196_v1  ;;  %v200_v3 = vld [vmem:[%s181_s28 + $0x48] sm:$0xff] (%p78_p3) }
  0x17   : > { %199 = vst [vmem:[%s175_s29 + $0x10] sm:$0xff] (%p78_p3), %v198_v2  ;;  %v202_v4 = vld [vmem:[%s181_s28 + $0x80] sm:$0xff] (%p78_p3)  ;;  %v204_v5 = vld [vmem:[%s181_s28 + $0x88] sm:$0xff] (%p78_p3)  ;;  %201 = vst [vmem:[%s175_s29 + $0x18] sm:$0xff] (%p78_p3), %v200_v3 }
  0x18   : > { %203 = vst [vmem:[%s175_s29 + $0x20] sm:$0xff] (%p78_p3), %v202_v4  ;;  %205 = vst [vmem:[%s175_s29 + $0x28] sm:$0xff] (%p78_p3), %v204_v5  ;;  %v206_v6 = vld [vmem:[%s181_s28 + $0xc0] sm:$0xff] (%p78_p3)  ;;  %v208_v7 = vld [vmem:[%s181_s28 + $0xc8] sm:$0xff] (%p78_p3) }
  0x19   : > { %207 = vst [vmem:[%s175_s29 + $0x30] sm:$0xff] %v206_v6  ;;  %209 = vst [vmem:[%s175_s29 + $0x38] sm:$0xff] %v208_v7 }
  0x1a PF: > { %p880_p8 = scmp.ge.s32.totalorder %s1022_s16, 1  ;;  %p222_p9 = scmp.lt.s32.totalorder %s1022_s16, 5 }
  0x1c   : > { %p223_p10 = pnand %p880_p8, %p222_p9 }
  0x1d   : > { %s229_s30 = sand.u32 (!%p223_p10), 1, %s1006_s12   ;;  %v1024_v8 = vmov (!%p223_p10), 0   ;;  %v1025_v13 = vmov (!%p223_p10), 0.0   ;;  %v981_v18 = vld [vmem:[%s1185_s0] sm:$0xff] (!%p223_p10)   ;;  %vm392_vm0 = vcmask (!%p223_p10), 261120   ;;  %v982_v19 = vld [vmem:[%s1185_s0 + $0x8] sm:$0xff] (!%p223_p10)   ;;  %v589_v21 = vlaneseq (!%p223_p10) }
  0x1e   : > { %226 = sbr.rel (%p223_p10) target bundleno = 295 (0x127), region = 51  ;;  %s881_s4 = sshll.u32 (!%p223_p10), %s229_s30, 6  ;;  %434 = vmatprep.mubr.bf16.mxu0 (!%p223_p10), %v1024_v8  ;;  %495 = vmatprep.mubr.bf16.mxu1 (!%p223_p10), %v1024_v8  ;;  %302 = vst [vmem:[#allocation2 + $0x80] sm:$0x3] (!%p223_p10), %v1025_v13  ;;  %303 = vst [vmem:[#allocation2 + $0x88] sm:$0x3] (!%p223_p10), %v1025_v13 }
  0x1f   : > { %s231_s5 = scalar_lea.vmem (!%p223_p10), [#allocation3], %s881_s4  ;;  %304 = vst [vmem:[#allocation2 + $0x90] sm:$0x3] (!%p223_p10), %v1025_v13  ;;  %305 = vst [vmem:[#allocation2 + $0x98] sm:$0x3] (!%p223_p10), %v1025_v13  ;;  %s882_s18 = sshll.u32 (!%p223_p10), %s1014_s14, 2 }
  0x20   : > { %v969_v9 = vld [vmem:[%s231_s5 + $0x4] ss:$16 sps:$4 sm:$0xff] (!%p223_p10)   ;;  %v971_v10 = vld [vmem:[%s231_s5 + $0xc] ss:$16 sps:$4 sm:$0xff] (!%p223_p10)   ;;  %v973_v11 = vld [vmem:[%s231_s5] ss:$16 sps:$4 sm:$0xff] (!%p223_p10)  }
  0x21   : > { %402 = vmatprep.subr.bf16.mxu0 (!%p223_p10), %v969_v9  ;;  %v974_v12 = vld [vmem:[%s231_s5 + $0x8] ss:$16 sps:$4 sm:$0xff] (!%p223_p10)   ;;  %463 = vmatprep.subr.bf16.mxu1 (!%p223_p10), %v971_v10  ;;  %v975_v14 = vld [vmem:[%s231_s5 + $0x24] ss:$16 sps:$4 sm:$0xff] (!%p223_p10)   ;;  %v977_v15 = vld [vmem:[%s231_s5 + $0x2c] ss:$16 sps:$4 sm:$0xff] (!%p223_p10)  }
  0x22   : > { %403 = vmatpush1.bf16.msra.mxu0 (!%p223_p10), %v973_v11  ;;  %464 = vmatpush1.bf16.msra.mxu1 (!%p223_p10), %v974_v12  ;;  %v979_v16 = vld [vmem:[%s231_s5 + $0x20] ss:$16 sps:$4 sm:$0xff] (!%p223_p10)   ;;  %v980_v17 = vld [vmem:[%s231_s5 + $0x28] ss:$16 sps:$4 sm:$0xff] (!%p223_p10)   ;;  %p275_p11 = scmp.lt.s32.totalorder (!%p223_p10), %s882_s18, 15  ;;  %v590_v22 = vshrl.u32 (!%p223_p10), %v589_v21, 7 }
  0x23   : > { %404 = vmatprep.subr.bf16.mxu0 (!%p223_p10), %v975_v14  ;;  %465 = vmatprep.subr.bf16.mxu1 (!%p223_p10), %v977_v15  ;;  %v983_v20 = vld [vmem:[%s1185_s0 + $0x10] ss:$0 sps:$4 sm:$0x11] (!%p223_p10)   ;;  %s926_s24 = smul.u32 (!%p223_p10), 80, %s229_s30 }
  0x24   : > { %v591_v23 = vsub.s32 (!%p223_p10), 0, %v590_v22  ;;  %v599_v24 = vsub.s32 (!%p223_p10), 2, %v590_v22  ;;  %v595_v26 = vsub.s32 (!%p223_p10), 1, %v590_v22  ;;  %v603_v27 = vsub.s32 (!%p223_p10), 3, %v590_v22 }
  0x25   : > { %s1197_s18 = smov (!%p275_p11, %s882_s18), 15  ;;  %s1130_s12 = scalar_lea.vmem [#allocation4], %s926_s24 }
  0x26   : > { %405 = vmatpush1.bf16.msra.mxu0 %v979_v16  ;;  %466 = vmatpush1.bf16.msra.mxu1 %v980_v17  ;;  %s277_s23 = scalar_lea.vmem %s1187_s2, %s1197_s18  ;;  %v322_v16 = vld [vmem:[#allocation2 + $0x80] sm:$0x3]  ;;  %v324_v17 = vld [vmem:[#allocation2 + $0x90] sm:$0x3]  ;;  %v325_v21 = vld [vmem:[#allocation2 + $0x98] sm:$0x3] }
  0x27   : > { %v587_v25 = vld [vmem:[%s277_s23] sm:$0xf]  ;;  %s925_s25 = sshll.u32 (%p1081_p6), %s1014_s14, 4 }
  0x28   : > { %v1112_v28 = vrot.slane %v587_v25, %v591_v23  ;;  %v1114_v29 = vrot.slane %v587_v25, %v599_v24  ;;  %v1116_v32 = vrot.slane %v587_v25, %v595_v26  ;;  %v1118_v33 = vrot.slane %v587_v25, %v603_v27  ;;  %s735_s28 = scalar_lea.vmem (%p1081_p6), %s1188_s3, %s925_s25 }
  0x29   : > { %894 = vmatmul.mubr.msk.bf16.vlgmr.msra.gmra.mrb[0].mxu0 %vm392_vm0, %v981_v18  ;;  %897 = vmatmul.mubr.msk.bf16.vlgmr.msra.gmra.mrb[0].mxu1 %vm392_vm0, %v981_v18 }
  0x2a   : > { %444 = vmatprep.mubr.bf16.mxu0 %v1024_v8  ;;  %505 = vmatprep.mubr.bf16.mxu1 %v1024_v8 }
  0x31   : > { %895 = vmatmul.mubr.msk.bf16.gmra.mrb[4].mxu0 %vm392_vm0, %v982_v19  ;;  %898 = vmatmul.mubr.msk.bf16.gmra.mrb[4].mxu1 %vm392_vm0, %v982_v19 }
  0x32   : > { %454 = vmatprep.mubr.bf16.mxu0 %v1024_v8  ;;  %515 = vmatprep.mubr.bf16.mxu1 %v1024_v8 }
  0x39   : > { %896 = vmatmul.mubr.msk.bf16.gmra.mrb[8].mxu0 %vm392_vm0, %v983_v20  ;;  %899 = vmatmul.mubr.msk.bf16.gmra.mrb[8].mxu1 %vm392_vm0, %v983_v20  ;;  %v323_v20 = vld [vmem:[#allocation2 + $0x88] sm:$0x3] }
  0xfc   : > { %v436_v30 = vpop.f32.mrb[0].mxu0  ;;  %v497_v31 = vpop.f32.mrb[0].mxu1 }
  0xfd   : > { %v438_v34 = vpop.f32.mrb[1].mxu0  ;;  %v499_v35 = vpop.f32.mrb[1].mxu1  ;;  %v609_v38 = vadd.f32 %v1112_v28, %v436_v30  ;;  %v611_v39 = vadd.f32 %v1114_v29, %v497_v31 }
  0xfe   : > { %v440_v36 = vpop.f32.mrb[2].mxu0  ;;  %v501_v37 = vpop.f32.mrb[2].mxu1  ;;  %v610_v42 = vadd.f32 %v1116_v32, %v438_v34  ;;  %v612_v43 = vadd.f32 %v1118_v33, %v499_v35 }
  0xff   : > { %v442_v40 = vpop.f32.mrb[3].mxu0  ;;  %v503_v41 = vpop.f32.mrb[3].mxu1  ;;  %v629_v44 = vmax.f32 %v609_v38, 0.0  ;;  %v631_v45 = vmax.f32 %v611_v39, 0.0  ;;  %v613_v46 = vadd.f32 %v1112_v28, %v440_v36  ;;  %v615_v47 = vadd.f32 %v1114_v29, %v501_v37 }
 0x100   : > { %v630_v48 = vmax.f32 %v610_v42, 0.0  ;;  %v632_v49 = vmax.f32 %v612_v43, 0.0  ;;  %v614_v50 = vadd.f32 %v1116_v32, %v442_v40  ;;  %v616_v51 = vadd.f32 %v1118_v33, %v503_v41 }
 0x101   : > { %v633_v52 = vmax.f32 %v613_v46, 0.0  ;;  %v635_v53 = vmax.f32 %v615_v47, 0.0 }
 0x102   : > { %v915_v54 = vpack.c.bf16 %v630_v48, %v629_v44  ;;  %v916_v55 = vpack.c.bf16 %v632_v49, %v631_v45  ;;  %v634_v56 = vmax.f32 %v614_v50, 0.0  ;;  %v636_v57 = vmax.f32 %v616_v51, 0.0 }
 0x104   : > { %v446_v58 = vpop.f32.mrb[4].mxu0  ;;  %v507_v59 = vpop.f32.mrb[4].mxu1  ;;  %713 = vst [vmem:[%s1130_s12] sm:$0xff] %v915_v54  ;;  %714 = vst [vmem:[%s1130_s12 + $0x8] sm:$0xff] %v916_v55  ;;  %v917_v62 = vpack.c.bf16 %v634_v56, %v633_v52  ;;  %v918_v63 = vpack.c.bf16 %v636_v57, %v635_v53 }
 0x105   : > { %v448_v60 = vpop.f32.mrb[5].mxu0  ;;  %v509_v61 = vpop.f32.mrb[5].mxu1  ;;  %v617_v2 = vadd.f32 %v1112_v28, %v446_v58  ;;  %v619_v3 = vadd.f32 %v1114_v29, %v507_v59 }
 0x106   : > { %v450_v0 = vpop.f32.mrb[6].mxu0  ;;  %v511_v1 = vpop.f32.mrb[6].mxu1  ;;  %715 = vst [vmem:[%s1130_s12 + $0x10] sm:$0xff] %v917_v62  ;;  %716 = vst [vmem:[%s1130_s12 + $0x18] sm:$0xff] %v918_v63  ;;  %v618_v6 = vadd.f32 %v1116_v32, %v448_v60  ;;  %v620_v7 = vadd.f32 %v1118_v33, %v509_v61 }
 0x107   : > { %v452_v4 = vpop.f32.mrb[7].mxu0  ;;  %v513_v5 = vpop.f32.mrb[7].mxu1  ;;  %v637_v8 = vmax.f32 %v617_v2, 0.0  ;;  %v639_v9 = vmax.f32 %v619_v3, 0.0  ;;  %v621_v10 = vadd.f32 %v1112_v28, %v450_v0  ;;  %v623_v11 = vadd.f32 %v1114_v29, %v511_v1 }
 0x108   : > { %v638_v12 = vmax.f32 %v618_v6, 0.0  ;;  %v640_v13 = vmax.f32 %v620_v7, 0.0  ;;  %v622_v14 = vadd.f32 %v1116_v32, %v452_v4  ;;  %v624_v15 = vadd.f32 %v1118_v33, %v513_v5 }
 0x109   : > { %v641_v18 = vmax.f32 %v621_v10, 0.0  ;;  %v643_v19 = vmax.f32 %v623_v11, 0.0 }
 0x10a   : > { %v919_v22 = vpack.c.bf16 %v638_v12, %v637_v8  ;;  %v920_v23 = vpack.c.bf16 %v640_v13, %v639_v9  ;;  %v642_v24 = vmax.f32 %v622_v14, 0.0  ;;  %v644_v25 = vmax.f32 %v624_v15, 0.0 }
 0x10c   : > { %v456_v26 = vpop.f32.mrb[8].mxu0  ;;  %v517_v27 = vpop.f32.mrb[8].mxu1  ;;  %717 = vst [vmem:[%s1130_s12 + $0x20] sm:$0xff] %v919_v22  ;;  %718 = vst [vmem:[%s1130_s12 + $0x28] sm:$0xff] %v920_v23  ;;  %v921_v36 = vpack.c.bf16 %v642_v24, %v641_v18  ;;  %v922_v37 = vpack.c.bf16 %v644_v25, %v643_v19 }
 0x10d   : > { %v540_v30 = vadd.f32 %v456_v26, %v322_v16  ;;  %v542_v31 = vadd.f32 %v517_v27, %v324_v17  ;;  %v458_v34 = vpop.f32.mrb[9].mxu0  ;;  %v519_v35 = vpop.f32.mrb[9].mxu1 }
 0x10e   : > { %v541_v38 = vadd.f32 %v458_v34, %v323_v20  ;;  %v543_v39 = vadd.f32 %v519_v35, %v325_v21  ;;  %v460_v40 = vpop.f32.mrb[10].mxu0  ;;  %v521_v41 = vpop.f32.mrb[10].mxu1  ;;  %719 = vst [vmem:[%s1130_s12 + $0x30] sm:$0xff] %v921_v36  ;;  %720 = vst [vmem:[%s1130_s12 + $0x38] sm:$0xff] %v922_v37 }
 0x10f   : > { %560 = vst [vmem:[#allocation2 + $0x80] sm:$0x3] %v540_v30  ;;  %562 = vst [vmem:[#allocation2 + $0x90] sm:$0x3] %v542_v31  ;;  %v461_v42 = vpop.f32.mrb[11].mxu0  ;;  %v522_v43 = vpop.f32.mrb[11].mxu1 }
 0x110   : > { %561 = vst [vmem:[#allocation2 + $0x88] sm:$0x3] %v541_v38  ;;  %563 = vst [vmem:[#allocation2 + $0x98] sm:$0x3] %v543_v39 }
 0x113   : > { %v756_v58 = vld [vmem:[%s1130_s12 + $0x20] sm:$0xff] (%p1081_p6)  ;;  %v758_v59 = vld [vmem:[%s1130_s12 + $0x28] sm:$0xff] (%p1081_p6) }
 0x114   : > { %757 = vst [vmem:[%s735_s28 + $0x80] sm:$0xff] (%p1081_p6), %v756_v58  ;;  %759 = vst [vmem:[%s735_s28 + $0x88] sm:$0xff] (%p1081_p6), %v758_v59 }
 0x115   : > { %v760_v60 = vld [vmem:[%s1130_s12 + $0x30] sm:$0xff] (%p1081_p6)  ;;  %v762_v61 = vld [vmem:[%s1130_s12 + $0x38] sm:$0xff] (%p1081_p6) }
 0x116   : > { %v583_v44 = vld [vmem:[#allocation2 + $0x80] sm:$0x3]  ;;  %v585_v45 = vld [vmem:[#allocation2 + $0x90] sm:$0x3]  ;;  %761 = vst [vmem:[%s735_s28 + $0xc0] sm:$0xff] (%p1081_p6), %v760_v60  ;;  %763 = vst [vmem:[%s735_s28 + $0xc8] sm:$0xff] (%p1081_p6), %v762_v61 }
 0x117   : > { %v625_v46 = vadd.f32 %v1112_v28, %v583_v44  ;;  %v627_v47 = vadd.f32 %v1114_v29, %v585_v45  ;;  %v584_v48 = vld [vmem:[#allocation2 + $0x88] sm:$0x3]  ;;  %v586_v49 = vld [vmem:[#allocation2 + $0x98] sm:$0x3]  ;;  %v748_v28 = vld [vmem:[%s1130_s12] sm:$0xff] (%p1081_p6) }
 0x118   : > { %v626_v50 = vadd.f32 %v1116_v32, %v584_v48  ;;  %v628_v51 = vadd.f32 %v1118_v33, %v586_v49  ;;  %729 = sbr.rel (!%p1081_p6) target bundleno = 295 (0x127), region = 67  ;;  %v750_v29 = vld [vmem:[%s1130_s12 + $0x8] sm:$0xff] (%p1081_p6)  ;;  %v752_v32 = vld [vmem:[%s1130_s12 + $0x10] sm:$0xff] (%p1081_p6)  ;;  %v754_v33 = vld [vmem:[%s1130_s12 + $0x18] sm:$0xff] (%p1081_p6)  ;;  %749 = vst [vmem:[%s735_s28] sm:$0xff] (%p1081_p6), %v748_v28 }
 0x119   : > { %v645_v52 = vmax.f32 %v625_v46, 0.0  ;;  %v647_v53 = vmax.f32 %v627_v47, 0.0  ;;  %751 = vst [vmem:[%s735_s28 + $0x8] sm:$0xff] (%p1081_p6), %v750_v29  ;;  %753 = vst [vmem:[%s735_s28 + $0x40] sm:$0xff] (%p1081_p6), %v752_v32 }
 0x11a   : > { %v646_v54 = vmax.f32 %v626_v50, 0.0  ;;  %v648_v55 = vmax.f32 %v628_v51, 0.0  ;;  %755 = vst [vmem:[%s735_s28 + $0x48] sm:$0xff] (%p1081_p6), %v754_v33 }
 0x11c   : > { %v923_v56 = vpack.c.bf16 %v646_v54, %v645_v52  ;;  %v924_v57 = vpack.c.bf16 %v648_v55, %v647_v53 }
 0x11e   : > { %721 = vst [vmem:[%s1130_s12 + $0x40] sm:$0x11] %v923_v56  ;;  %722 = vst [vmem:[%s1130_s12 + $0x48] sm:$0x11] %v924_v57 }
 0x125   : > { %v764_v62 = vld [vmem:[%s1130_s12 + $0x40] sm:$0xff]  ;;  %v766_v63 = vld [vmem:[%s1130_s12 + $0x48] sm:$0xff] }
 0x126   : > { %765 = vst [vmem:[%s735_s28 + $0x100] sm:$0xff] %v764_v62  ;;  %767 = vst [vmem:[%s735_s28 + $0x108] sm:$0xff] %v766_v63 }
 0x127 PF: > { %s13_s16 = sadd.s32 1, %s1022_s16   ;;  %s1190_s12 = smov %s1010_s13 }
 0x128   : > { %p10_p12 = scmp.ge.s32.totalorder %s13_s16, 6   ;;  %s1191_s13 = smov %s1086_s22 }
 0x129   : > { %s1192_s14 = smov %s1018_s15  ;;  %s1193_s15 = smov %s1195_s17 }
 0x12a   :  { %12 = sbr.rel (!%p10_p12) target bundleno = 3 (0x3), region = 127 }

// kernel: vit_forward.23
= control target key start
LH: loop header
LB: loop body
LE: loop exit
PB: predicated region body
PF: predicated region fallthrough
CT: control target
= control target key end

     0   :  { %v158_v1 = vmov 0.0   ;;  %vm159_vm0 = vmmov 0   ;;  %vm20_vm1 = vcmask 74752   ;;  %s208_s0 = inlined_call_operand.vmem [shape: bf16[2,32], index: 0, kind: input, shape index: {}]   ;;  %s209_s1 = inlined_call_operand.vmem [shape: bf16[32,10], index: 1, kind: input, shape index: {}]   ;;  %s210_s2 = inlined_call_operand.vmem [shape: f32[1,10], index: 2, kind: input, shape index: {}]   ;;  %s211_s3 = inlined_call_operand.hbm [shape: f32[2,10], index: 3, kind: output, shape index: {}]  }
   0x1   :  { %v132_v0 = vld [vmem:[%s209_s1] sm:$0xff]   ;;  %121 = vmatprep.subr.bf16.mxu0 %v158_v1  ;;  %v133_v2 = vld [vmem:[%s209_s1 + $0x8] sm:$0xff]   ;;  %125 = vmatprep.mubr.msk.bf16.mxu0 %vm159_vm0, %v158_v1 }
   0x2   :  { %122 = vmatpush3.bf16.msra.mxu0 %v132_v0 }
   0x3   :  { %8 = vsyncpa [#allocation4], 0  ;;  %123 = vmatprep.subr.bf16.mxu0 %v158_v1  ;;  %21 = vst.msk [vmem:[#allocation2] sm:$0x3] %vm20_vm1, %v158_v1  ;;  %v23_v3 = vld [vmem:[%s208_s0] sm:$0x1] }
   0x4   :  { %vm40_vm2 = vcmask 261120   ;;  %v117_v10 = vld [vmem:[%s210_s2] ss:$0 sm:$0xff]  ;;  %s160_s19 = smov [#allocation3]  }
   0x5   :  { %s106_s20 = sshll.u32 %s160_s19, 4  ;;  %s107_s20 = int_to_ptr.vmem [resolvable:$true] %s106_s20 }
   0x6   :  { %124 = vmatpush3.bf16.msra.mxu0 %v133_v2  ;;  %s134_s0 = scalar_lea.vmem %s107_s20, 32  ;;  %p139_p1 = scmp.lt.s32.totalorder %s107_s20, %s107_s20 }
   0x7   :  { %p135_p0 = scmp.ne.s32.totalorder %s107_s20, %s134_s0  ;;  %p140_p2 = scmp.lt.s32.totalorder %s134_s0, %s134_s0 }
   0x9   :  { %126 = vmatmul.mubr.msk.bf16.vlgmr.msra.gmra.mrb[0].mxu0 %vm40_vm2, %v23_v3  ;;  %p141_p3 = por %p140_p2, %p139_p1 }
   0xa   :  { %v22_v4 = vld [vmem:[#allocation2] sm:$0x3] }
   0xb   :  { %p142_p4 = pnand %p141_p3, %p135_p0 }
  0xdc   :  { %v78_v5 = vpop.f32.mrb[0].mxu0 }
  0xdd   :  { %v84_v6 = vadd.f32 %v78_v5, %v22_v4  ;;  %v127_v7 = vpop.f32.mrb[1].mxu0 }
  0xde   :  { %v81_v8 = vpop.f32.mrb[2].mxu0 }
  0xdf   :  { %86 = vst.msk [vmem:[#allocation2] sm:$0x3] %vm20_vm1, %v84_v6  ;;  %v128_v9 = vpop.f32.mrb[3].mxu0 }
  0xe6   :  { %v90_v11 = vld [vmem:[#allocation2] sm:$0x3] }
  0xe7   :  { %v98_v12 = vadd.f32 %v117_v10, %v90_v11 }
  0xe9   :  { %99 = vst.msk [vmem:[#allocation3] sm:$0x3] %vm20_vm1, %v98_v12 }
  0xea   :  { %145 = shalt.err (!%p142_p4)
}
  0xeb   :  { %s146_s23 = scalar_lea.hbm %s211_s3, 32 }
  0xec   :  { %p147_p5 = scmp.ne.s32.totalorder %s211_s3, %s146_s23  ;;  %p150_p6 = scmp.lt.u32.totalorder %s146_s23, %s211_s3 }
  0xee   :  { %p152_p7 = pnand %p150_p6, %p147_p5 }
  0xf0   :  { %155 = shalt.err (!%p152_p7)
}
  0xf1   :  { %109 = dma.vmem_to_hbm [thread:$0]  %s107_s20, 32, %s211_s3, [#allocation4]  }
  0xf2   :  { %156 = dma.done.wait [#allocation4], 32  }
  0xf3   :  { %157 = vsyncadd [#allocation4], 4294967264 }
  0xf4   :  { %113 = vsyncpa [#allocation4], 1 }

// kernel: vit_forward.14
= control target key start
LH: loop header
LB: loop body
LE: loop exit
PB: predicated region body
PF: predicated region fallthrough
CT: control target
= control target key end

     0   :  { %v30_v0 = vlaneseq  ;;  %v9728_v1 = vmov 1966171168   ;;  %v12205_v3 = vmov 0.0   ;;  %s9730_s18 = smov 96   ;;  %vm9731_vm0 = vmmov 0   ;;  %s9733_s12 = smov 120   ;;  %s12203_s0 = inlined_call_operand.vmem [shape: bf16[17,2,96], index: 0, kind: input, shape index: {}]   ;;  %s12204_s1 = inlined_call_operand.vmem [shape: bf16[17,2,32], index: 1, kind: output, shape index: {}]  }
   0x1   :  { %v28_v2 = vunpack.c.l.s4 %v9728_v1  ;;  %8503 = vmatprep.subr.bf16.mxu0 %v12205_v3  ;;  %8509 = vmatprep.subr.bf16.mxu1 %v12205_v3  ;;  %v9760_v5 = vld [vmem:[%s12203_s0] sm:$0x1]  ;;  %v9765_v7 = vld [vmem:[%s12203_s0 + $0x1] sm:$0x1]  ;;  %v9770_v8 = vld [vmem:[%s12203_s0 + $0x2] sm:$0x1] }
   0x2   :  { %v31_v4 = vshrl.u32 %v30_v0, 7  ;;  %v9775_v9 = vld [vmem:[%s12203_s0 + $0x3] sm:$0x1]  ;;  %v9790_v15 = vld [vmem:[%s12203_s0 + $0x4] sm:$0x1]  ;;  %8505 = vmatprep.mubr.msk.bf16.mxu0 %vm9731_vm0, %v12205_v3  ;;  %8511 = vmatprep.mubr.msk.bf16.mxu1 %vm9731_vm0, %v12205_v3  ;;  %vm43_vm1 = vcmask 64512  }
   0x3   :  { %v29_v6 = vunpack.c.0.s8 %v28_v2  ;;  %v9795_v16 = vld [vmem:[%s12203_s0 + $0x5] sm:$0x1]  ;;  %v9820_v23 = vld [vmem:[%s12203_s0 + $0x6] sm:$0x1]  ;;  %v9825_v24 = vld [vmem:[%s12203_s0 + $0x7] sm:$0x1] }
   0x4   :  { %v9848_v29 = vld [vmem:[%s12203_s0 + $0x8] sm:$0x1]  ;;  %v9853_v30 = vld [vmem:[%s12203_s0 + $0x9] sm:$0x1]  ;;  %v9872_v35 = vld [vmem:[%s12203_s0 + $0xa] sm:$0x1] }
   0x5   :  { %v9777_v10 = vsub.s32 %v29_v6, %v31_v4  ;;  %v9877_v36 = vld [vmem:[%s12203_s0 + $0xb] sm:$0x1]  ;;  %v9896_v41 = vld [vmem:[%s12203_s0 + $0xc] sm:$0x1]  ;;  %v9901_v42 = vld [vmem:[%s12203_s0 + $0xd] sm:$0x1] }
   0x6   :  { %v9920_v47 = vld [vmem:[%s12203_s0 + $0xe] sm:$0x1]  ;;  %v9925_v48 = vld [vmem:[%s12203_s0 + $0xf] sm:$0x1]  ;;  %v9944_v53 = vld [vmem:[%s12203_s0 + $0x10] sm:$0x1] }
   0x7   :  { %v33_v11 = vrot.slane %v9760_v5, %v9777_v10  ;;  %v97_v12 = vrot.slane %v9765_v7, %v9777_v10  ;;  %v160_v13 = vrot.slane %v9770_v8, %v9777_v10  ;;  %v223_v14 = vrot.slane %v9775_v9, %v9777_v10  ;;  %s9732_s0 = smov 64   ;;  %s9734_s13 = smov 88  }
   0x8   :  { %v286_v19 = vrot.slane %v9790_v15, %v9777_v10  ;;  %v349_v22 = vrot.slane %v9795_v16, %v9777_v10  ;;  %v412_v25 = vrot.slane %v9820_v23, %v9777_v10  ;;  %v475_v28 = vrot.slane %v9825_v24, %v9777_v10  ;;  %s9735_s14 = smov 56   ;;  %s9736_s15 = smov 80  }
   0x9   :  { %v9798_v17 = vrot.slane %v33_v11, %v9777_v10  ;;  %v9801_v18 = vrot.slane %v160_v13, %v9777_v10  ;;  %v9808_v20 = vrot.slane %v97_v12, %v9777_v10  ;;  %v9813_v21 = vrot.slane %v223_v14, %v9777_v10  ;;  %s9737_s16 = smov 112   ;;  %s9738_s17 = smov 48  }
   0xa   :  { %v9838_v26 = vrot.slane %v286_v19, %v9777_v10  ;;  %v9841_v27 = vrot.slane %v349_v22, %v9777_v10  ;;  %v9856_v31 = vrot.slane %v412_v25, %v9777_v10  ;;  %v9863_v32 = vrot.slane %v475_v28, %v9777_v10  ;;  %s9740_s19 = smov 104   ;;  %s9741_s20 = smov 40  }
   0xb   :  { %41 = vrot.lane.b32.xlu0 %v9798_v17, %s9730_s18  ;;  %168 = vrot.lane.b32.xlu1 %v9801_v18, %s9730_s18  ;;  %v538_v33 = vrot.slane %v9848_v29, %v9777_v10  ;;  %v601_v34 = vrot.slane %v9853_v30, %v9777_v10  ;;  %v664_v37 = vrot.slane %v9872_v35, %v9777_v10  ;;  %vm1326_vm2 = vcmask 1040384   ;;  %s9742_s21 = smov 8   ;;  %s9743_s22 = smov 16  }
   0xc   :  { %v727_v40 = vrot.slane %v9877_v36, %v9777_v10  ;;  %v790_v43 = vrot.slane %v9896_v41, %v9777_v10  ;;  %v853_v46 = vrot.slane %v9901_v42, %v9777_v10  ;;  %v916_v49 = vrot.slane %v9920_v47, %v9777_v10  ;;  %s9744_s23 = smov 24  }
   0xd   :  { %v9886_v38 = vrot.slane %v538_v33, %v9777_v10  ;;  %v9889_v39 = vrot.slane %v601_v34, %v9777_v10  ;;  %v9910_v44 = vrot.slane %v664_v37, %v9777_v10  ;;  %v979_v52 = vrot.slane %v9925_v48, %v9777_v10 }
   0xe   :  { %v9913_v45 = vrot.slane %v727_v40, %v9777_v10  ;;  %v9934_v50 = vrot.slane %v790_v43, %v9777_v10  ;;  %v9937_v51 = vrot.slane %v853_v46, %v9777_v10  ;;  %v9951_v54 = vrot.slane %v916_v49, %v9777_v10 }
   0xf   :  { %105 = vrot.lane.b32.xlu0 %v9808_v20, %s9730_s18  ;;  %231 = vrot.lane.b32.xlu1 %v9813_v21, %s9730_s18  ;;  %v9954_v55 = vrot.slane %v979_v52, %v9777_v10  ;;  %v1042_v56 = vrot.slane %v9944_v53, %v9777_v10  ;;  %vm1115_vm3 = vcmask 9216   ;;  %vm1322_vm4 = vcmask 15360  }
  0x10   :  { %vm8020_vm5 = vcmask 130048   ;;  %vm8038_vm6 = vcmask 195584   ;;  %vm8073_vm7 = vcmask 253952  }
  0x11   :  { %v9963_v57 = vrot.slane %v1042_v56, %v9777_v10 }
  0x13   :  { %294 = vrot.lane.b32.xlu0 %v9838_v26, %s9730_s18  ;;  %357 = vrot.lane.b32.xlu1 %v9841_v27, %s9730_s18 }
  0x17   :  { %420 = vrot.lane.b32.xlu0 %v9856_v31, %s9730_s18  ;;  %483 = vrot.lane.b32.xlu1 %v9863_v32, %s9730_s18 }
  0x1b   :  { %546 = vrot.lane.b32.xlu0 %v9886_v38, %s9730_s18  ;;  %609 = vrot.lane.b32.xlu1 %v9889_v39, %s9730_s18 }
  0x1f   :  { %672 = vrot.lane.b32.xlu0 %v9910_v44, %s9730_s18  ;;  %735 = vrot.lane.b32.xlu1 %v9913_v45, %s9730_s18 }
  0x23   :  { %798 = vrot.lane.b32.xlu0 %v9934_v50, %s9730_s18  ;;  %861 = vrot.lane.b32.xlu1 %v9937_v51, %s9730_s18 }
  0x27   :  { %924 = vrot.lane.b32.xlu0 %v9951_v54, %s9730_s18  ;;  %987 = vrot.lane.b32.xlu1 %v9954_v55, %s9730_s18 }
  0x2b   :  { %1050 = vrot.lane.b32.xlu0 %v9963_v57, %s9730_s18  ;;  %1320 = vrot.lane.b32.xlu1 %v9798_v17, %s9732_s0  ;;  %s9739_s18 = smov 72  }
  0x2f   :  { %1370 = vrot.lane.b32.xlu0 %v9808_v20, %s9732_s0  ;;  %1418 = vrot.lane.b32.xlu1 %v9801_v18, %s9732_s0 }
  0x33   :  { %1466 = vrot.lane.b32.xlu0 %v9813_v21, %s9732_s0  ;;  %1514 = vrot.lane.b32.xlu1 %v9838_v26, %s9732_s0 }
  0x37   :  { %1562 = vrot.lane.b32.xlu0 %v9841_v27, %s9732_s0 }
  0x7d   :  { %v42_v58 = vpop.permute.xlu0 %41  ;;  %v169_v60 = vpop.permute.xlu1 %168 }
  0x7e   :  { %v48_v59 = vsel %vm43_vm1, %v42_v58, 0  ;;  %v174_v63 = vsel %vm43_vm1, %v169_v60, 0 }
  0x7f   :  { %8504 = vmatpush3.bf16.xpose.msra.mxu0 %v48_v59 }
  0x80   :  { %8515 = vmatprep.subr.bf16.mxu0 %v12205_v3 }
  0x81   :  { %v106_v61 = vpop.permute.xlu0 %105  ;;  %v232_v0 = vpop.permute.xlu1 %231 }
  0x82   :  { %v111_v62 = vsel %vm43_vm1, %v106_v61, 0  ;;  %v237_v1 = vsel %vm43_vm1, %v232_v0, 0 }
  0x83   :  { %8510 = vmatpush3.bf16.xpose.msra.mxu1 %v111_v62 }
  0x84   :  { %8521 = vmatprep.subr.bf16.mxu1 %v12205_v3 }
  0x85   :  { %v295_v2 = vpop.permute.xlu0 %294 }
  0x86   :  { %8506 = vmatmul.mubr.msk.bf16.vlgmr.msra.gmra.mrb[0].mxu0 %vm43_vm1, %v9760_v5  ;;  %v300_v4 = vsel %vm43_vm1, %v295_v2, 0  ;;  %v358_v5 = vpop.permute.xlu1 %357 }
  0x87   :  { %8516 = vmatpush3.bf16.xpose.msra.mxu0 %v174_v63  ;;  %8517 = vmatprep.mubr.msk.bf16.mxu0 %vm9731_vm0, %v12205_v3  ;;  %v363_v6 = vsel %vm43_vm1, %v358_v5, 0 }
  0x88   :  { %8527 = vmatprep.subr.bf16.mxu0 %v12205_v3 }
  0x8a   :  { %8512 = vmatmul.mubr.msk.bf16.vlgmr.msra.gmra.mrb[0].mxu1 %vm43_vm1, %v9765_v7  ;;  %v421_v7 = vpop.permute.xlu0 %420 }
  0x8b   :  { %8522 = vmatpush3.bf16.xpose.msra.mxu1 %v237_v1  ;;  %8523 = vmatprep.mubr.msk.bf16.mxu1 %vm9731_vm0, %v12205_v3  ;;  %v426_v10 = vsel %vm43_vm1, %v421_v7, 0 }
  0x8c   :  { %8533 = vmatprep.subr.bf16.mxu1 %v12205_v3 }
  0x8e   :  { %8518 = vmatmul.mubr.msk.bf16.vlgmr.msra.gmra.mrb[4].mxu0 %vm43_vm1, %v9770_v8  ;;  %v484_v8 = vpop.permute.xlu1 %483 }
  0x8f   :  { %8528 = vmatpush3.bf16.xpose.msra.mxu0 %v300_v4  ;;  %8529 = vmatprep.mubr.msk.bf16.mxu0 %vm9731_vm0, %v12205_v3  ;;  %v489_v11 = vsel %vm43_vm1, %v484_v8, 0 }
  0x90   :  { %8539 = vmatprep.subr.bf16.mxu0 %v12205_v3 }
  0x92   :  { %8524 = vmatmul.mubr.msk.bf16.vlgmr.msra.gmra.mrb[4].mxu1 %vm43_vm1, %v9775_v9  ;;  %v547_v9 = vpop.permute.xlu0 %546  ;;  %v610_v13 = vpop.permute.xlu1 %609 }
  0x93   :  { %8534 = vmatpush3.bf16.xpose.msra.mxu1 %v363_v6  ;;  %8535 = vmatprep.mubr.msk.bf16.mxu1 %vm9731_vm0, %v12205_v3  ;;  %v552_v12 = vsel %vm43_vm1, %v547_v9, 0  ;;  %v615_v14 = vsel %vm43_vm1, %v610_v13, 0 }
  0x94   :  { %8545 = vmatprep.subr.bf16.mxu1 %v12205_v3 }
  0x96   :  { %8530 = vmatmul.mubr.msk.bf16.vlgmr.msra.gmra.mrb[8].mxu0 %vm43_vm1, %v9790_v15  ;;  %v673_v15 = vpop.permute.xlu0 %672  ;;  %v736_v19 = vpop.permute.xlu1 %735 }
  0x97   :  { %8540 = vmatpush3.bf16.xpose.msra.mxu0 %v426_v10  ;;  %8541 = vmatprep.mubr.msk.bf16.mxu0 %vm9731_vm0, %v12205_v3  ;;  %v741_v22 = vsel %vm43_vm1, %v736_v19, 0 }
  0x98   :  { %8551 = vmatprep.subr.bf16.mxu0 %v12205_v3 }
  0x9a   :  { %8536 = vmatmul.mubr.msk.bf16.vlgmr.msra.gmra.mrb[8].mxu1 %vm43_vm1, %v9795_v16  ;;  %v678_v16 = vsel %vm43_vm1, %v673_v15, 0  ;;  %v862_v25 = vpop.permute.xlu1 %861 }
  0x9b   :  { %8546 = vmatpush3.bf16.xpose.msra.mxu1 %v489_v11  ;;  %8547 = vmatprep.mubr.msk.bf16.mxu1 %vm9731_vm0, %v12205_v3  ;;  %v867_v28 = vsel %vm43_vm1, %v862_v25, 0 }
  0x9c   :  { %8557 = vmatprep.subr.bf16.mxu1 %v12205_v3 }
  0x9e   :  { %8542 = vmatmul.mubr.msk.bf16.vlgmr.msra.gmra.mrb[12].mxu0 %vm43_vm1, %v9820_v23  ;;  %v799_v23 = vpop.permute.xlu0 %798  ;;  %v988_v33 = vpop.permute.xlu1 %987 }
  0x9f   :  { %8552 = vmatpush3.bf16.xpose.msra.mxu0 %v552_v12  ;;  %8553 = vmatprep.mubr.msk.bf16.mxu0 %vm9731_vm0, %v12205_v3  ;;  %v993_v34 = vsel %vm43_vm1, %v988_v33, 0 }
  0xa0   :  { %8563 = vmatprep.subr.bf16.mxu0 %v12205_v3 }
  0xa2   :  { %8548 = vmatmul.mubr.msk.bf16.vlgmr.msra.gmra.mrb[12].mxu1 %vm43_vm1, %v9825_v24  ;;  %v804_v24 = vsel %vm43_vm1, %v799_v23, 0  ;;  %v1321_v37 = vpop.permute.xlu1 %1320 }
  0xa3   :  { %8558 = vmatpush3.bf16.xpose.msra.mxu1 %v615_v14  ;;  %8559 = vmatprep.mubr.msk.bf16.mxu1 %vm9731_vm0, %v12205_v3 }
  0xa4   :  { %8569 = vmatprep.subr.bf16.mxu1 %v12205_v3 }
  0xa6   :  { %8554 = vmatmul.mubr.msk.bf16.vlgmr.msra.gmra.mrb[16].mxu0 %vm43_vm1, %v9848_v29  ;;  %v925_v29 = vpop.permute.xlu0 %924 }
  0xa7   :  { %8564 = vmatpush3.bf16.xpose.msra.mxu0 %v678_v16  ;;  %8565 = vmatprep.mubr.msk.bf16.mxu0 %vm9731_vm0, %v12205_v3 }
  0xa8   :  { %8575 = vmatprep.subr.bf16.mxu0 %v12205_v3 }
  0xaa   :  { %8560 = vmatmul.mubr.msk.bf16.vlgmr.msra.gmra.mrb[16].mxu1 %vm43_vm1, %v9853_v30  ;;  %v930_v30 = vsel %vm43_vm1, %v925_v29, 0 }
  0xab   :  { %8570 = vmatpush3.bf16.xpose.msra.mxu1 %v741_v22  ;;  %8571 = vmatprep.mubr.msk.bf16.mxu1 %vm9731_vm0, %v12205_v3 }
  0xac   :  { %8581 = vmatprep.subr.bf16.mxu1 %v12205_v3 }
  0xae   :  { %8566 = vmatmul.mubr.msk.bf16.vlgmr.msra.gmra.mrb[20].mxu0 %vm43_vm1, %v9872_v35  ;;  %v1051_v35 = vpop.permute.xlu0 %1050 }
  0xaf   :  { %8576 = vmatpush3.bf16.xpose.msra.mxu0 %v804_v24  ;;  %8577 = vmatprep.mubr.msk.bf16.mxu0 %vm9731_vm0, %v12205_v3 }
  0xb0   :  { %8587 = vmatprep.subr.bf16.mxu0 %v12205_v3 }
  0xb2   :  { %8572 = vmatmul.mubr.msk.bf16.vlgmr.msra.gmra.mrb[20].mxu1 %vm43_vm1, %v9877_v36  ;;  %v1056_v36 = vsel %vm43_vm1, %v1051_v35, 0  ;;  %v1371_v40 = vpop.permute.xlu0 %1370 }
  0xb3   :  { %8582 = vmatpush3.bf16.xpose.msra.mxu1 %v867_v28  ;;  %8583 = vmatprep.mubr.msk.bf16.mxu1 %vm9731_vm0, %v12205_v3 }
  0xb4   :  { %8593 = vmatprep.subr.bf16.mxu1 %v12205_v3 }
  0xb6   :  { %8578 = vmatmul.mubr.msk.bf16.vlgmr.msra.gmra.mrb[24].mxu0 %vm43_vm1, %v9896_v41  ;;  %v1328_v41 = vsel %vm1326_vm2, %v1321_v37, 0 }
  0xb7   :  { %8588 = vmatpush3.bf16.xpose.msra.mxu0 %v930_v30  ;;  %8589 = vmatprep.mubr.msk.bf16.mxu0 %vm9731_vm0, %v12205_v3 }
  0xb8   :  { %8599 = vmatprep.subr.bf16.mxu0 %v12205_v3 }
  0xba   :  { %8584 = vmatmul.mubr.msk.bf16.vlgmr.msra.gmra.mrb[24].mxu1 %vm43_vm1, %v9901_v42  ;;  %v1376_v42 = vsel %vm1326_vm2, %v1371_v40, 0 }
  0xbb   :  { %8594 = vmatpush3.bf16.xpose.msra.mxu1 %v993_v34  ;;  %8595 = vmatprep.mubr.msk.bf16.mxu1 %vm9731_vm0, %v12205_v3 }
  0xbc   :  { %8605 = vmatprep.subr.bf16.mxu1 %v12205_v3 }
  0xbe   :  { %8590 = vmatmul.mubr.msk.bf16.vlgmr.msra.gmra.mrb[28].mxu0 %vm43_vm1, %v9920_v47 }
  0xbf   :  { %8600 = vmatpush3.bf16.xpose.msra.mxu0 %v1056_v36  ;;  %8601 = vmatprep.mubr.msk.bf16.mxu0 %vm9731_vm0, %v12205_v3 }
  0xc0   :  { %8611 = vmatprep.subr.bf16.mxu0 %v12205_v3 }
  0xc2   :  { %8596 = vmatmul.mubr.msk.bf16.vlgmr.msra.gmra.mrb[28].mxu1 %vm43_vm1, %v9925_v48 }
  0xc3   :  { %8607 = vmatprep.mubr.msk.bf16.mxu1 %vm9731_vm0, %v12205_v3  ;;  %8606 = vmatpush3.bf16.msra.mxu1 %v1328_v41 }
  0xc4   :  { %8617 = vmatprep.subr.bf16.mxu1 %v12205_v3 }
  0xc6   :  { %8602 = vmatmul.mubr.msk.bf16.vlgmr.msra.gmra.mrb[32].mxu0 %vm43_vm1, %v9944_v53 }
  0xc7   :  { %8613 = vmatprep.mubr.msk.bf16.mxu0 %vm9731_vm0, %v12205_v3  ;;  %8612 = vmatpush3.bf16.msra.mxu0 %v1376_v42 }
  0xc8   :  { %8623 = vmatprep.subr.bf16.mxu0 %v12205_v3 }
 0x159   :  { %v84_v43 = vpop.f32.mrb[0].mxu0 }
 0x15a   :  { %v10085_v46 = vmul.f32 0.35355338, %v84_v43  ;;  %v8507_v47 = vpop.f32.mrb[1].mxu0 }
 0x15b   :  { %v87_v48 = vpop.f32.mrb[2].mxu0 }
 0x15c   :  { %v1116_v49 = vsel %vm1115_vm3, %v10085_v46, -inf  ;;  %v8508_v52 = vpop.f32.mrb[3].mxu0 }
 0x15d   :  { %1117 = vmax.xlane.f32.xlu1 %v1116_v49  ;;  %v147_v53 = vpop.f32.mrb[0].mxu1 }
 0x15e   :  { %v8513_v56 = vpop.f32.mrb[1].mxu1  ;;  %v10089_v58 = vmul.f32 0.35355338, %v147_v53 }
 0x15f   :  { %v150_v59 = vpop.f32.mrb[2].mxu1 }
 0x160   :  { %v8514_v60 = vpop.f32.mrb[3].mxu1  ;;  %v1119_v61 = vsel %vm1115_vm3, %v10089_v58, -inf }
 0x161   :  { %v210_v62 = vpop.f32.mrb[4].mxu0  ;;  %1120 = vmax.xlane.f32.xlu0 %v1119_v61 }
 0x162   :  { %v10093_v63 = vmul.f32 0.35355338, %v210_v62  ;;  %v8519_v0 = vpop.f32.mrb[5].mxu0 }
 0x163   :  { %v213_v1 = vpop.f32.mrb[6].mxu0 }
 0x164   :  { %v1122_v2 = vsel %vm1115_vm3, %v10093_v63, -inf  ;;  %v8520_v4 = vpop.f32.mrb[7].mxu0 }
 0x165   :  { %1123 = vmax.xlane.f32.xlu0 %v1122_v2  ;;  %v273_v5 = vpop.f32.mrb[4].mxu1 }
 0x166   :  { %v8525_v6 = vpop.f32.mrb[5].mxu1  ;;  %v10097_v7 = vmul.f32 0.35355338, %v273_v5 }
 0x167   :  { %v276_v10 = vpop.f32.mrb[6].mxu1 }
 0x168   :  { %v8526_v8 = vpop.f32.mrb[7].mxu1  ;;  %v1125_v11 = vsel %vm1115_vm3, %v10097_v7, -inf }
 0x169   :  { %1126 = vmax.xlane.f32.xlu1 %v1125_v11  ;;  %v336_v9 = vpop.f32.mrb[8].mxu0 }
 0x16a   :  { %v10101_v12 = vmul.f32 0.35355338, %v336_v9  ;;  %v8531_v13 = vpop.f32.mrb[9].mxu0 }
 0x16b   :  { %v339_v14 = vpop.f32.mrb[10].mxu0 }
 0x16c   :  { %v1128_v15 = vsel %vm1115_vm3, %v10101_v12, -inf  ;;  %v8532_v16 = vpop.f32.mrb[11].mxu0 }
 0x16d   :  { %v399_v19 = vpop.f32.mrb[8].mxu1  ;;  %1129 = vmax.xlane.f32.xlu0 %v1128_v15 }
 0x16e   :  { %v8537_v22 = vpop.f32.mrb[9].mxu1  ;;  %v10105_v23 = vmul.f32 0.35355338, %v399_v19 }
 0x16f   :  { %v402_v24 = vpop.f32.mrb[10].mxu1 }
 0x170   :  { %v8538_v25 = vpop.f32.mrb[11].mxu1  ;;  %v1131_v28 = vsel %vm1115_vm3, %v10105_v23, -inf }
 0x171   :  { %1132 = vmax.xlane.f32.xlu1 %v1131_v28  ;;  %v462_v29 = vpop.f32.mrb[12].mxu0 }
 0x172   :  { %v10109_v30 = vmul.f32 0.35355338, %v462_v29  ;;  %v8543_v33 = vpop.f32.mrb[13].mxu0 }
 0x173   :  { %v465_v34 = vpop.f32.mrb[14].mxu0 }
 0x174   :  { %v1134_v35 = vsel %vm1115_vm3, %v10109_v30, -inf  ;;  %v8544_v36 = vpop.f32.mrb[15].mxu0 }
 0x175   :  { %v525_v37 = vpop.f32.mrb[12].mxu1  ;;  %1135 = vmax.xlane.f32.xlu0 %v1134_v35 }
 0x176   :  { %v8549_v40 = vpop.f32.mrb[13].mxu1  ;;  %v10113_v41 = vmul.f32 0.35355338, %v525_v37 }
 0x177   :  { %v528_v42 = vpop.f32.mrb[14].mxu1 }
 0x178   :  { %v8550_v43 = vpop.f32.mrb[15].mxu1  ;;  %v1137_v47 = vsel %vm1115_vm3, %v10113_v41, -inf }
 0x179   :  { %1138 = vmax.xlane.f32.xlu1 %v1137_v47  ;;  %v588_v48 = vpop.f32.mrb[16].mxu0 }
 0x17a   :  { %v10117_v49 = vmul.f32 0.35355338, %v588_v48  ;;  %v8555_v52 = vpop.f32.mrb[17].mxu0 }
 0x17b   :  { %v591_v53 = vpop.f32.mrb[18].mxu0 }
 0x17c   :  { %v1140_v56 = vsel %vm1115_vm3, %v10117_v49, -inf  ;;  %v8556_v59 = vpop.f32.mrb[19].mxu0 }
 0x17d   :  { %v651_v60 = vpop.f32.mrb[16].mxu1  ;;  %1141 = vmax.xlane.f32.xlu0 %v1140_v56 }
 0x17e   :  { %v10121_v61 = vmul.f32 0.35355338, %v651_v60  ;;  %v8561_v62 = vpop.f32.mrb[17].mxu1 }
 0x17f   :  { %v654_v0 = vpop.f32.mrb[18].mxu1 }
 0x180   :  { %v8562_v1 = vpop.f32.mrb[19].mxu1  ;;  %v1143_v2 = vsel %vm1115_vm3, %v10121_v61, -inf }
 0x181   :  { %1144 = vmax.xlane.f32.xlu1 %v1143_v2  ;;  %v714_v4 = vpop.f32.mrb[20].mxu0 }
 0x182   :  { %v10125_v5 = vmul.f32 0.35355338, %v714_v4  ;;  %v8567_v6 = vpop.f32.mrb[21].mxu0 }
 0x183   :  { %v717_v10 = vpop.f32.mrb[22].mxu0 }
 0x184   :  { %v1146_v8 = vsel %vm1115_vm3, %v10125_v5, -inf  ;;  %v8568_v11 = vpop.f32.mrb[23].mxu0 }
 0x185   :  { %v777_v9 = vpop.f32.mrb[20].mxu1  ;;  %1147 = vmax.xlane.f32.xlu0 %v1146_v8 }
 0x186   :  { %v10129_v13 = vmul.f32 0.35355338, %v777_v9  ;;  %v8573_v14 = vpop.f32.mrb[21].mxu1 }
 0x187   :  { %v780_v15 = vpop.f32.mrb[22].mxu1  ;;  %v10157_v14 = vpop.permute.xlu1 %1418 }
 0x188   :  { %v8574_v16 = vpop.f32.mrb[23].mxu1  ;;  %v1149_v19 = vsel %vm1115_vm3, %v10129_v13, -inf  ;;  %v10159_v15 = vpop.permute.xlu0 %1466 }
 0x189   :  { %1150 = vmax.xlane.f32.xlu1 %v1149_v19  ;;  %v840_v22 = vpop.f32.mrb[24].mxu0 }
 0x18a   :  { %v10133_v24 = vmul.f32 0.35355338, %v840_v22  ;;  %v8579_v25 = vpop.f32.mrb[25].mxu0 }
 0x18b   :  { %v843_v28 = vpop.f32.mrb[26].mxu0  ;;  %v10161_v16 = vpop.permute.xlu1 %1514 }
 0x18c   :  { %v1152_v29 = vsel %vm1115_vm3, %v10133_v24, -inf  ;;  %v8580_v33 = vpop.f32.mrb[27].mxu0  ;;  %v10163_v19 = vpop.permute.xlu0 %1562 }
 0x18d   :  { %v903_v34 = vpop.f32.mrb[24].mxu1  ;;  %1153 = vmax.xlane.f32.xlu0 %v1152_v29 }
 0x18e   :  { %v10137_v35 = vmul.f32 0.35355338, %v903_v34  ;;  %v8585_v36 = vpop.f32.mrb[25].mxu1 }
 0x18f   :  { %v906_v37 = vpop.f32.mrb[26].mxu1 }
 0x190   :  { %v1155_v40 = vsel %vm1115_vm3, %v10137_v35, -inf  ;;  %v8586_v42 = vpop.f32.mrb[27].mxu1 }
 0x191   :  { %1156 = vmax.xlane.f32.xlu1 %v1155_v40  ;;  %v966_v43 = vpop.f32.mrb[28].mxu0 }
 0x192   :  { %v10141_v47 = vmul.f32 0.35355338, %v966_v43  ;;  %v8591_v48 = vpop.f32.mrb[29].mxu0 }
 0x193   :  { %v969_v52 = vpop.f32.mrb[30].mxu0 }
 0x194   :  { %v1158_v53 = vsel %vm1115_vm3, %v10141_v47, -inf  ;;  %v8592_v56 = vpop.f32.mrb[31].mxu0 }
 0x195   :  { %v1029_v59 = vpop.f32.mrb[28].mxu1  ;;  %1159 = vmax.xlane.f32.xlu0 %v1158_v53 }
 0x196   :  { %v10145_v60 = vmul.f32 0.35355338, %v1029_v59  ;;  %v8597_v62 = vpop.f32.mrb[29].mxu1 }
 0x197   :  { %v1032_v0 = vpop.f32.mrb[30].mxu1 }
 0x198   :  { %v1161_v1 = vsel %vm1115_vm3, %v10145_v60, -inf  ;;  %v8598_v2 = vpop.f32.mrb[31].mxu1 }
 0x199   :  { %1162 = vmax.xlane.f32.xlu1 %v1161_v1  ;;  %v1092_v4 = vpop.f32.mrb[32].mxu0 }
 0x19a   :  { %v8603_v6 = vpop.f32.mrb[33].mxu0  ;;  %v10153_v11 = vmul.f32 0.35355338, %v1092_v4 }
 0x19b   :  { %v1095_v10 = vpop.f32.mrb[34].mxu0 }
 0x19c   :  { %v8604_v8 = vpop.f32.mrb[35].mxu0  ;;  %v1164_v9 = vsel %vm1115_vm3, %v10153_v11, -inf }
 0x1aa   :  { %1610 = vrot.lane.b32.xlu1 %v9856_v31, %s9732_s0 }
 0x1ab   :  { %1658 = vrot.lane.b32.xlu0 %v9863_v32, %s9732_s0 }
 0x1ca   :  { %1165 = vmax.xlane.f32.xlu0 %v1164_v9 }
 0x1ea   :  { %v1118_v22 = vpop.xlane.xlu1 %1117 }
 0x1eb   :  { %v1167_v25 = vsub.f32 %v10085_v46, %v1118_v22 }
 0x1ed   :  { %v1184_v28 = vmul.f32 1.442695, %v1167_v25 }
 0x1ee   :  { %v1121_v29 = vpop.xlane.xlu0 %1120 }
 0x1ef   :  { %9456 = vpow2.f32 %v1184_v28  ;;  %v1168_v33 = vsub.f32 %v10089_v58, %v1121_v29 }
 0x1f1   :  { %v1186_v34 = vmul.f32 1.442695, %v1168_v33 }
 0x1f2   :  { %v1124_v36 = vpop.xlane.xlu0 %1123 }
 0x1f3   :  { %9458 = vpow2.f32 %v1186_v34  ;;  %v1169_v37 = vsub.f32 %v10093_v63, %v1124_v36 }
 0x1f5   :  { %v1188_v40 = vmul.f32 1.442695, %v1169_v37 }
 0x1f6   :  { %v1127_v42 = vpop.xlane.xlu1 %1126 }
 0x1f7   :  { %9460 = vpow2.f32 %v1188_v40  ;;  %v1170_v43 = vsub.f32 %v10097_v7, %v1127_v42 }
 0x1f9   :  { %v10169_v48 = vpop.eup %9456  ;;  %v1190_v52 = vmul.f32 1.442695, %v1170_v43 }
 0x1fa   :  { %v1130_v53 = vpop.xlane.xlu0 %1129  ;;  %v1218_v46 = vsel %vm1115_vm3, %v10169_v48, 0.0 }
 0x1fb   :  { %9462 = vpow2.f32 %v1190_v52  ;;  %v1171_v58 = vsub.f32 %v10101_v12, %v1130_v53  ;;  %1219 = vadd.xlane.f32.xlu1 %v1218_v46 }
 0x1fd   :  { %v10174_v56 = vpop.eup %9458  ;;  %v1192_v59 = vmul.f32 1.442695, %v1171_v58 }
 0x1fe   :  { %v1133_v63 = vpop.xlane.xlu1 %1132  ;;  %v1221_v62 = vsel %vm1115_vm3, %v10174_v56, 0.0 }
 0x1ff   :  { %9464 = vpow2.f32 %v1192_v59  ;;  %v1172_v7 = vsub.f32 %v10105_v23, %v1133_v63  ;;  %1222 = vadd.xlane.f32.xlu0 %v1221_v62 }
 0x201   :  { %v10179_v0 = vpop.eup %9460  ;;  %v1194_v1 = vmul.f32 1.442695, %v1172_v7 }
 0x202   :  { %v1136_v2 = vpop.xlane.xlu0 %1135  ;;  %v1224_v4 = vsel %vm1115_vm3, %v10179_v0, 0.0 }
 0x203   :  { %9466 = vpow2.f32 %v1194_v1  ;;  %v1173_v12 = vsub.f32 %v10109_v30, %v1136_v2  ;;  %1225 = vadd.xlane.f32.xlu1 %v1224_v4 }
 0x205   :  { %v10184_v6 = vpop.eup %9462  ;;  %v1196_v10 = vmul.f32 1.442695, %v1173_v12 }
 0x206   :  { %v1139_v8 = vpop.xlane.xlu1 %1138  ;;  %v1227_v9 = vsel %vm1115_vm3, %v10184_v6, 0.0 }
 0x207   :  { %9468 = vpow2.f32 %v1196_v10  ;;  %v1174_v23 = vsub.f32 %v10113_v41, %v1139_v8  ;;  %1228 = vadd.xlane.f32.xlu0 %v1227_v9 }
 0x209   :  { %v10189_v22 = vpop.eup %9464  ;;  %v1198_v25 = vmul.f32 1.442695, %v1174_v23 }
 0x20a   :  { %v1142_v28 = vpop.xlane.xlu0 %1141  ;;  %v1230_v29 = vsel %vm1115_vm3, %v10189_v22, 0.0 }
 0x20b   :  { %9470 = vpow2.f32 %v1198_v25  ;;  %v1175_v30 = vsub.f32 %v10117_v49, %v1142_v28  ;;  %1231 = vadd.xlane.f32.xlu1 %v1230_v29 }
 0x20d   :  { %v10194_v33 = vpop.eup %9466  ;;  %v1200_v34 = vmul.f32 1.442695, %v1175_v30 }
 0x20e   :  { %v1145_v36 = vpop.xlane.xlu1 %1144  ;;  %v1233_v37 = vsel %vm1115_vm3, %v10194_v33, 0.0 }
 0x20f   :  { %9472 = vpow2.f32 %v1200_v34  ;;  %v1176_v41 = vsub.f32 %v10121_v61, %v1145_v36  ;;  %1234 = vadd.xlane.f32.xlu0 %v1233_v37 }
 0x211   :  { %v10199_v40 = vpop.eup %9468  ;;  %v1202_v42 = vmul.f32 1.442695, %v1176_v41 }
 0x212   :  { %v1148_v43 = vpop.xlane.xlu0 %1147  ;;  %v1236_v52 = vsel %vm1115_vm3, %v10199_v40, 0.0 }
 0x213   :  { %9474 = vpow2.f32 %v1202_v42  ;;  %v1177_v49 = vsub.f32 %v10125_v5, %v1148_v43  ;;  %1237 = vadd.xlane.f32.xlu1 %v1236_v52 }
 0x215   :  { %v10204_v53 = vpop.eup %9470  ;;  %v1204_v46 = vmul.f32 1.442695, %v1177_v49 }
 0x216   :  { %v1151_v58 = vpop.xlane.xlu1 %1150  ;;  %v1239_v59 = vsel %vm1115_vm3, %v10204_v53, 0.0 }
 0x217   :  { %9476 = vpow2.f32 %v1204_v46  ;;  %v1178_v61 = vsub.f32 %v10129_v13, %v1151_v58  ;;  %1240 = vadd.xlane.f32.xlu0 %v1239_v59 }
 0x219   :  { %v10209_v63 = vpop.eup %9472  ;;  %v1206_v62 = vmul.f32 1.442695, %v1178_v61 }
 0x21a   :  { %v1154_v7 = vpop.xlane.xlu0 %1153  ;;  %v1242_v1 = vsel %vm1115_vm3, %v10209_v63, 0.0 }
 0x21b   :  { %9478 = vpow2.f32 %v1206_v62  ;;  %v1179_v5 = vsub.f32 %v10133_v24, %v1154_v7  ;;  %1243 = vadd.xlane.f32.xlu1 %v1242_v1 }
 0x21d   :  { %v10214_v2 = vpop.eup %9474  ;;  %v1208_v4 = vmul.f32 1.442695, %v1179_v5 }
 0x21e   :  { %v1245_v12 = vsel %vm1115_vm3, %v10214_v2, 0.0  ;;  %v1157_v41 = vpop.xlane.xlu1 %1156 }
 0x21f   :  { %9480 = vpow2.f32 %v1208_v4  ;;  %1246 = vadd.xlane.f32.xlu0 %v1245_v12  ;;  %v1180_v43 = vsub.f32 %v10137_v35, %v1157_v41 }
 0x221   :  { %v10218_v13 = vpop.eup %9476  ;;  %v1210_v49 = vmul.f32 1.442695, %v1180_v43 }
 0x222   :  { %v1248_v10 = vsel %vm1115_vm3, %v10218_v13, 0.0  ;;  %v1160_v25 = vpop.xlane.xlu0 %1159 }
 0x223   :  { %1249 = vadd.xlane.f32.xlu1 %v1248_v10  ;;  %v1181_v28 = vsub.f32 %v10141_v47, %v1160_v25 }
 0x225   :  { %v10222_v8 = vpop.eup %9478  ;;  %v1212_v29 = vmul.f32 1.442695, %v1181_v28 }
 0x226   :  { %v1251_v24 = vsel %vm1115_vm3, %v10222_v8, 0.0  ;;  %v10245_v30 = vpop.permute.xlu0 %1658  ;;  %v1163_v35 = vpop.xlane.xlu1 %1162 }
 0x227   :  { %1252 = vadd.xlane.f32.xlu0 %v1251_v24  ;;  %9482 = vpow2.f32 %v1212_v29  ;;  %v1182_v24 = vsub.f32 %v10145_v60, %v1163_v35 }
 0x229   :  { %v10226_v9 = vpop.eup %9480  ;;  %v1214_v29 = vmul.f32 1.442695, %v1182_v24 }
 0x22a   :  { %v1254_v23 = vsel %vm1115_vm3, %v10226_v9, 0.0  ;;  %v10271_v59 = vpop.permute.xlu1 %1610 }
 0x22b   :  { %1255 = vadd.xlane.f32.xlu1 %v1254_v23  ;;  %v1424_v23 = vsel %vm1326_vm2, %v10157_v14, 0  ;;  %v1472_v14 = vsel %vm1326_vm2, %v10159_v15, 0  ;;  %v1520_v15 = vsel %vm1326_vm2, %v10161_v16, 0  ;;  %v1568_v16 = vsel %vm1326_vm2, %v10163_v19, 0 }
 0x231   :  { %v10252_v37 = vpop.eup %9482 }
 0x232   :  { %v1260_v42 = vsel %vm1115_vm3, %v10252_v37, 0.0 }
 0x23c   :  { %1706 = vrot.lane.b32.xlu1 %v9886_v38, %s9732_s0 }
 0x23d   :  { %1754 = vrot.lane.b32.xlu0 %v9889_v39, %s9732_s0 }
 0x241   :  { %1802 = vrot.lane.b32.xlu0 %v9910_v44, %s9732_s0 }
 0x245   :  { %1850 = vrot.lane.b32.xlu0 %v9913_v45, %s9732_s0 }
 0x249   :  { %1946 = vrot.lane.b32.xlu0 %v9937_v51, %s9732_s0 }
 0x24d   :  { %1898 = vrot.lane.b32.xlu0 %v9934_v50, %s9732_s0 }
 0x251   :  { %2042 = vrot.lane.b32.xlu0 %v9954_v55, %s9732_s0 }
 0x255   :  { %1994 = vrot.lane.b32.xlu0 %v9951_v54, %s9732_s0 }
 0x257   :  { %v1166_v34 = vpop.xlane.xlu0 %1165 }
 0x258   :  { %v1183_v36 = vsub.f32 %v10153_v11, %v1166_v34 }
 0x259   :  { %2090 = vrot.lane.b32.xlu0 %v9963_v57, %s9732_s0 }
 0x25a   :  { %v1216_v47 = vmul.f32 1.442695, %v1183_v36 }
 0x25c   :  { %9484 = vpow2.f32 %v1216_v47 }
 0x25d   :  { %9486 = vpow2.f32 %v1210_v49 }
 0x260   :  { %1261 = vadd.xlane.f32.xlu1 %v1260_v42 }
 0x266   :  { %v10257_v52 = vpop.eup %9484 }
 0x267   :  { %v1266_v11 = vsel %vm1115_vm3, %v10257_v52, 0.0  ;;  %v10261_v46 = vpop.eup %9486 }
 0x268   :  { %1267 = vadd.xlane.f32.xlu1 %v1266_v11  ;;  %v1257_v58 = vsel %vm1115_vm3, %v10261_v46, 0.0  ;;  %v1616_v11 = vsel %vm1326_vm2, %v10271_v59, 0 }
 0x278   :  { %1258 = vadd.xlane.f32.xlu0 %v1257_v58 }
 0x279   :  { %2138 = vrot.lane.b32.xlu1 %v9798_v17, %s9733_s12 }
 0x27d   :  { %2290 = vrot.lane.b32.xlu1 %v9813_v21, %s9734_s13 }
 0x281   :  { %2288 = vrot.lane.b32.xlu1 %v9813_v21, %s9733_s12 }
 0x285   :  { %2390 = vrot.lane.b32.xlu1 %v9841_v27, %s9734_s13 }
 0x288   :  { %v1220_v61 = vpop.xlane.xlu1 %1219 }
 0x289   :  { %9488 = vrcp.f32 %v1220_v61  ;;  %2388 = vrot.lane.b32.xlu1 %v9841_v27, %s9733_s12 }
 0x28c   :  { %v1223_v62 = vpop.xlane.xlu0 %1222 }
 0x28d   :  { %9490 = vrcp.f32 %v1223_v62  ;;  %2490 = vrot.lane.b32.xlu1 %v9863_v32, %s9734_s13 }
 0x28e   :  { %2140 = vrot.lane.b32.xlu0 %v9798_v17, %s9734_s13 }
 0x290   :  { %v1226_v7 = vpop.xlane.xlu1 %1225 }
 0x291   :  { %9492 = vrcp.f32 %v1226_v7  ;;  %2488 = vrot.lane.b32.xlu1 %v9863_v32, %s9733_s12  ;;  %v1664_v7 = vsel %vm1326_vm2, %v10245_v30, 0 }
 0x293   :  { %v9489_v1 = vpop.eup %9488 }
 0x294   :  { %v1229_v5 = vpop.xlane.xlu0 %1228  ;;  %v1286_v4 = vmul.f32 %v9489_v1, %v10169_v48 }
 0x295   :  { %9494 = vrcp.f32 %v1229_v5  ;;  %2590 = vrot.lane.b32.xlu1 %v9889_v39, %s9734_s13 }
 0x296   :  { %v1303_v12 = vpack.c.bf16 %v1286_v4, %v1286_v4 }
 0x297   :  { %v9491_v10 = vpop.eup %9490 }
 0x298   :  { %8608 = vmatmul.mubr.msk.bf16.vlgmr.msra.gmra.mrb[32].mxu1 %vm1322_vm4, %v1303_v12  ;;  %v1232_v25 = vpop.xlane.xlu1 %1231  ;;  %v1287_v28 = vmul.f32 %v9491_v10, %v10174_v56 }
 0x299   :  { %8618 = vmatpush3.bf16.msra.mxu1 %v1424_v23  ;;  %9496 = vrcp.f32 %v1232_v25  ;;  %8619 = vmatprep.mubr.msk.bf16.mxu1 %vm9731_vm0, %v12205_v3 }
 0x29a   :  { %v1304_v48 = vpack.c.bf16 %v1287_v28, %v1287_v28  ;;  %8629 = vmatprep.subr.bf16.mxu1 %v12205_v3  ;;  %2588 = vrot.lane.b32.xlu1 %v9889_v39, %s9733_s12 }
 0x29b   :  { %v9493_v60 = vpop.eup %9492 }
 0x29c   :  { %8614 = vmatmul.mubr.msk.bf16.vlgmr.msra.gmra.mrb[36].mxu0 %vm1322_vm4, %v1304_v48  ;;  %v1235_v34 = vpop.xlane.xlu0 %1234  ;;  %v1288_v56 = vmul.f32 %v9493_v60, %v10179_v0 }
 0x29d   :  { %8624 = vmatpush3.bf16.msra.mxu0 %v1472_v14  ;;  %9498 = vrcp.f32 %v1235_v34  ;;  %8625 = vmatprep.mubr.msk.bf16.mxu0 %vm9731_vm0, %v12205_v3 }
 0x29e   :  { %v1305_v36 = vpack.c.bf16 %v1288_v56, %v1288_v56  ;;  %8635 = vmatprep.subr.bf16.mxu0 %v12205_v3  ;;  %2690 = vrot.lane.b32.xlu1 %v9913_v45, %s9734_s13  ;;  %9500 = vpow2.f32 %v1214_v29 }
 0x29f   :  { %v9495_v47 = vpop.eup %9494 }
 0x2a0   :  { %8620 = vmatmul.mubr.msk.bf16.vlgmr.msra.gmra.mrb[36].mxu1 %vm1322_vm4, %v1305_v36  ;;  %v1238_v41 = vpop.xlane.xlu1 %1237  ;;  %v1289_v0 = vmul.f32 %v9495_v47, %v10184_v6 }
 0x2a1   :  { %8630 = vmatpush3.bf16.msra.mxu1 %v1520_v15  ;;  %9502 = vrcp.f32 %v1238_v41  ;;  %8631 = vmatprep.mubr.msk.bf16.mxu1 %vm9731_vm0, %v12205_v3 }
 0x2a2   :  { %v1306_v42 = vpack.c.bf16 %v1289_v0, %v1289_v0  ;;  %8641 = vmatprep.subr.bf16.mxu1 %v12205_v3  ;;  %2688 = vrot.lane.b32.xlu1 %v9913_v45, %s9733_s12 }
 0x2a3   :  { %v9497_v43 = vpop.eup %9496 }
 0x2a4   :  { %8626 = vmatmul.mubr.msk.bf16.vlgmr.msra.gmra.mrb[40].mxu0 %vm1322_vm4, %v1306_v42  ;;  %v1241_v49 = vpop.xlane.xlu0 %1240  ;;  %v1290_v6 = vmul.f32 %v9497_v43, %v10189_v22 }
 0x2a5   :  { %8636 = vmatpush3.bf16.msra.mxu0 %v1568_v16  ;;  %9504 = vrcp.f32 %v1241_v49  ;;  %8637 = vmatprep.mubr.msk.bf16.mxu0 %vm9731_vm0, %v12205_v3 }
 0x2a6   :  { %v1307_v58 = vpack.c.bf16 %v1290_v6, %v1290_v6  ;;  %8647 = vmatprep.subr.bf16.mxu0 %v12205_v3  ;;  %2790 = vrot.lane.b32.xlu1 %v9937_v51, %s9734_s13 }
 0x2a7   :  { %v9499_v19 = vpop.eup %9498 }
 0x2a8   :  { %8632 = vmatmul.mubr.msk.bf16.vlgmr.msra.gmra.mrb[40].mxu1 %vm1322_vm4, %v1307_v58  ;;  %v1291_v35 = vmul.f32 %v9499_v19, %v10194_v33  ;;  %v10327_v22 = vpop.eup %9500  ;;  %v1244_v62 = vpop.xlane.xlu1 %1243 }
 0x2a9   :  { %8642 = vmatpush3.bf16.msra.mxu1 %v1616_v11  ;;  %8643 = vmatprep.mubr.msk.bf16.mxu1 %vm9731_vm0, %v12205_v3  ;;  %v1263_v1 = vsel %vm1115_vm3, %v10327_v22, 0.0 }
 0x2aa   :  { %v1308_v61 = vpack.c.bf16 %v1291_v35, %v1291_v35  ;;  %8653 = vmatprep.subr.bf16.mxu1 %v12205_v3  ;;  %2788 = vrot.lane.b32.xlu1 %v9937_v51, %s9733_s12 }
 0x2ab   :  { %v9503_v59 = vpop.eup %9502 }
 0x2ac   :  { %8638 = vmatmul.mubr.msk.bf16.vlgmr.msra.gmra.mrb[44].mxu0 %vm1322_vm4, %v1308_v61  ;;  %v1247_v33 = vpop.xlane.xlu0 %1246  ;;  %v1292_v5 = vmul.f32 %v9503_v59, %v10199_v40 }
 0x2ad   :  { %8648 = vmatpush3.bf16.msra.mxu0 %v1664_v7  ;;  %9506 = vrcp.f32 %v1247_v33  ;;  %1264 = vadd.xlane.f32.xlu0 %v1263_v1 }
 0x2ae   :  { %9508 = vrcp.f32 %v1244_v62  ;;  %v1309_v4 = vpack.c.bf16 %v1292_v5, %v1292_v5  ;;  %8649 = vmatprep.mubr.msk.bf16.mxu0 %vm9731_vm0, %v12205_v3  ;;  %8659 = vmatprep.subr.bf16.mxu0 %v12205_v3 }
 0x2af   :  { %v9505_v12 = vpop.eup %9504  ;;  %2890 = vrot.lane.b32.xlu1 %v9954_v55, %s9734_s13 }
 0x2b0   :  { %8644 = vmatmul.mubr.msk.bf16.vlgmr.msra.gmra.mrb[44].mxu1 %vm1322_vm4, %v1309_v4  ;;  %v1293_v30 = vmul.f32 %v9505_v12, %v10204_v53  ;;  %v1250_v10 = vpop.xlane.xlu1 %1249 }
 0x2b1   :  { %8655 = vmatprep.mubr.msk.bf16.mxu1 %vm9731_vm0, %v12205_v3 }
 0x2b2   :  { %v1310_v40 = vpack.c.bf16 %v1293_v30, %v1293_v30 }
 0x2b3   :  { %2888 = vrot.lane.b32.xlu1 %v9954_v55, %s9733_s12 }
 0x2b4   :  { %8650 = vmatmul.mubr.msk.bf16.vlgmr.msra.gmra.mrb[48].mxu0 %vm1322_vm4, %v1310_v40  ;;  %v1253_v24 = vpop.xlane.xlu0 %1252 }
 0x2b5   :  { %9510 = vrcp.f32 %v1253_v24  ;;  %8661 = vmatprep.mubr.msk.bf16.mxu0 %vm9731_vm0, %v12205_v3 }
 0x2b6   :  { %9512 = vrcp.f32 %v1250_v10 }
 0x2b7   :  { %v9507_v23 = vpop.eup %9506  ;;  %3257 = vrot.lane.b32.xlu1 %v9808_v20, %s9735_s14 }
 0x2b8   :  { %v9509_v25 = vpop.eup %9508  ;;  %v1256_v28 = vpop.xlane.xlu1 %1255  ;;  %v1295_v48 = vmul.f32 %v9507_v23, %v10214_v2 }
 0x2b9   :  { %v1755_v53 = vpop.permute.xlu0 %1754  ;;  %v1294_v14 = vmul.f32 %v9509_v25, %v10209_v63  ;;  %9514 = vrcp.f32 %v1256_v28 }
 0x2ba   :  { %v1760_v60 = vsel %vm1326_vm2, %v1755_v53, 0  ;;  %v1312_v29 = vpack.c.bf16 %v1295_v48, %v1295_v48 }
 0x2bb   :  { %8660 = vmatpush3.bf16.msra.mxu0 %v1760_v60  ;;  %v1311_v47 = vpack.c.bf16 %v1294_v14, %v1294_v14  ;;  %3401 = vrot.lane.b32.xlu1 %v9838_v26, %s9735_s14 }
 0x2bc   :  { %8671 = vmatprep.subr.bf16.mxu0 %v12205_v3  ;;  %v1707_v34 = vpop.permute.xlu1 %1706 }
 0x2bd   :  { %v1803_v56 = vpop.permute.xlu0 %1802  ;;  %v1712_v36 = vsel %vm1326_vm2, %v1707_v34, 0 }
 0x2be   :  { %8662 = vmatmul.mubr.msk.bf16.vlgmr.msra.gmra.mrb[52].mxu0 %vm1322_vm4, %v1312_v29  ;;  %8654 = vmatpush3.bf16.msra.mxu1 %v1712_v36  ;;  %v1808_v0 = vsel %vm1326_vm2, %v1803_v56, 0 }
 0x2bf   :  { %8673 = vmatprep.mubr.msk.bf16.mxu0 %vm9731_vm0, %v12205_v3  ;;  %v9511_v2 = vpop.eup %9510  ;;  %8665 = vmatprep.subr.bf16.mxu1 %v12205_v3 }
 0x2c0   :  { %v9513_v15 = vpop.eup %9512  ;;  %v1297_v63 = vmul.f32 %v9511_v2, %v10222_v8  ;;  %3497 = vrot.lane.b32.xlu1 %v9856_v31, %s9735_s14 }
 0x2c1   :  { %v1851_v41 = vpop.permute.xlu0 %1850  ;;  %8656 = vmatmul.mubr.msk.bf16.vlgmr.msra.gmra.mrb[48].mxu1 %vm1322_vm4, %v1311_v47  ;;  %v1296_v16 = vmul.f32 %v9513_v15, %v10218_v13 }
 0x2c2   :  { %v1856_v42 = vsel %vm1326_vm2, %v1851_v41, 0  ;;  %8666 = vmatpush3.bf16.msra.mxu1 %v1808_v0  ;;  %v1314_v43 = vpack.c.bf16 %v1297_v63, %v1297_v63  ;;  %8667 = vmatprep.mubr.msk.bf16.mxu1 %vm9731_vm0, %v12205_v3 }
 0x2c3   :  { %8672 = vmatpush3.bf16.msra.mxu0 %v1856_v42  ;;  %8677 = vmatprep.subr.bf16.mxu1 %v12205_v3  ;;  %v1313_v6 = vpack.c.bf16 %v1296_v16, %v1296_v16  ;;  %v9515_v11 = vpop.eup %9514 }
 0x2c4   :  { %8683 = vmatprep.subr.bf16.mxu0 %v12205_v3  ;;  %2190 = vrot.lane.b32.xlu0 %v9808_v20, %s9734_s13  ;;  %v1298_v19 = vmul.f32 %v9515_v11, %v10226_v9 }
 0x2c5   :  { %v1947_v49 = vpop.permute.xlu0 %1946  ;;  %3593 = vrot.lane.b32.xlu1 %v9886_v38, %s9735_s14 }
 0x2c6   :  { %v1952_v8 = vsel %vm1326_vm2, %v1947_v49, 0  ;;  %8674 = vmatmul.mubr.msk.bf16.vlgmr.msra.gmra.mrb[56].mxu0 %vm1322_vm4, %v1314_v43  ;;  %v1315_v61 = vpack.c.bf16 %v1298_v19, %v1298_v19 }
 0x2c7   :  { %8684 = vmatpush3.bf16.msra.mxu0 %v1952_v8  ;;  %8685 = vmatprep.mubr.msk.bf16.mxu0 %vm9731_vm0, %v12205_v3 }
 0x2c8   :  { %8695 = vmatprep.subr.bf16.mxu0 %v12205_v3  ;;  %2240 = vrot.lane.b32.xlu0 %v9801_v18, %s9734_s13 }
 0x2c9   :  { %v1899_v58 = vpop.permute.xlu0 %1898  ;;  %8668 = vmatmul.mubr.msk.bf16.vlgmr.msra.gmra.mrb[52].mxu1 %vm1322_vm4, %v1313_v6  ;;  %3689 = vrot.lane.b32.xlu1 %v9910_v44, %s9735_s14 }
 0x2ca   :  { %v1904_v13 = vsel %vm1326_vm2, %v1899_v58, 0  ;;  %8679 = vmatprep.mubr.msk.bf16.mxu1 %vm9731_vm0, %v12205_v3 }
 0x2cb   :  { %8678 = vmatpush3.bf16.msra.mxu1 %v1904_v13 }
 0x2cc   :  { %8689 = vmatprep.subr.bf16.mxu1 %v12205_v3  ;;  %2188 = vrot.lane.b32.xlu0 %v9808_v20, %s9733_s12 }
 0x2cd   :  { %v2043_v35 = vpop.permute.xlu0 %2042  ;;  %3785 = vrot.lane.b32.xlu1 %v9934_v50, %s9735_s14 }
 0x2d0   :  { %2238 = vrot.lane.b32.xlu0 %v9801_v18, %s9733_s12 }
 0x2d1   :  { %v1995_v59 = vpop.permute.xlu0 %1994  ;;  %8680 = vmatmul.mubr.msk.bf16.vlgmr.msra.gmra.mrb[56].mxu1 %vm1322_vm4, %v1315_v61 }
 0x2d2   :  { %v2000_v62 = vsel %vm1326_vm2, %v1995_v59, 0  ;;  %8691 = vmatprep.mubr.msk.bf16.mxu1 %vm9731_vm0, %v12205_v3 }
 0x2d3   :  { %8690 = vmatpush3.bf16.msra.mxu1 %v2000_v62 }
 0x2d4   :  { %8701 = vmatprep.subr.bf16.mxu1 %v12205_v3  ;;  %2340 = vrot.lane.b32.xlu0 %v9838_v26, %s9734_s13 }
 0x2d5   :  { %v2091_v5 = vpop.permute.xlu0 %2090 }
 0x2d6   :  { %v2096_v12 = vsel %vm1326_vm2, %v2091_v5, 0 }
 0x2d8   :  { %2338 = vrot.lane.b32.xlu0 %v9838_v26, %s9733_s12 }
 0x2dc   :  { %2440 = vrot.lane.b32.xlu0 %v9856_v31, %s9734_s13 }
 0x2e0   :  { %2438 = vrot.lane.b32.xlu0 %v9856_v31, %s9733_s12 }
 0x2e4   :  { %2540 = vrot.lane.b32.xlu0 %v9886_v38, %s9734_s13 }
 0x2e8   :  { %2538 = vrot.lane.b32.xlu0 %v9886_v38, %s9733_s12 }
 0x2ec   :  { %2640 = vrot.lane.b32.xlu0 %v9910_v44, %s9734_s13 }
 0x2ed   :  { %v1262_v9 = vpop.xlane.xlu1 %1261 }
 0x2ee   :  { %9516 = vrcp.f32 %v1262_v9 }
 0x2f0   :  { %2638 = vrot.lane.b32.xlu0 %v9910_v44, %s9733_s12 }
 0x2f4   :  { %2740 = vrot.lane.b32.xlu0 %v9934_v50, %s9734_s13 }
 0x2f5   :  { %v1268_v7 = vpop.xlane.xlu1 %1267 }
 0x2f6   :  { %9518 = vrcp.f32 %v1268_v7 }
 0x2f8   :  { %v9517_v33 = vpop.eup %9516  ;;  %2738 = vrot.lane.b32.xlu0 %v9934_v50, %s9733_s12 }
 0x2f9   :  { %v1300_v1 = vmul.f32 %v9517_v33, %v10252_v37  ;;  %v2139_v28 = vpop.permute.xlu1 %2138 }
 0x2fb   :  { %v1317_v4 = vpack.c.bf16 %v1300_v1, %v1300_v1 }
 0x2fc   :  { %2840 = vrot.lane.b32.xlu0 %v9951_v54, %s9734_s13 }
 0x2fd   :  { %8692 = vmatmul.mubr.msk.bf16.vlgmr.msra.gmra.mrb[60].mxu1 %vm1322_vm4, %v1317_v4  ;;  %v2291_v53 = vpop.permute.xlu1 %2290 }
 0x2fe   :  { %8702 = vmatpush3.bf16.msra.mxu1 %v2096_v12  ;;  %8703 = vmatprep.mubr.msk.bf16.mxu1 %vm9731_vm0, %v12205_v3  ;;  %v2296_v15 = vsel %vm43_vm1, %v2291_v53, 0 }
 0x2ff   :  { %8713 = vmatprep.subr.bf16.mxu1 %v12205_v3 }
 0x300   :  { %v9519_v30 = vpop.eup %9518  ;;  %2838 = vrot.lane.b32.xlu0 %v9951_v54, %s9733_s12 }
 0x301   :  { %v1302_v37 = vmul.f32 %v9519_v30, %v10257_v52  ;;  %v2048_v52 = vsel %vm1326_vm2, %v2043_v35, 0  ;;  %v2289_v48 = vpop.permute.xlu1 %2288 }
 0x303   :  { %v1319_v40 = vpack.c.bf16 %v1302_v37, %v1302_v37 }
 0x304   :  { %2940 = vrot.lane.b32.xlu0 %v9963_v57, %s9734_s13 }
 0x305   :  { %8704 = vmatmul.mubr.msk.bf16.vlgmr.msra.gmra.mrb[64].mxu1 %vm1322_vm4, %v1319_v40  ;;  %v1259_v10 = vpop.xlane.xlu0 %1258  ;;  %v2391_v29 = vpop.permute.xlu1 %2390 }
 0x306   :  { %9520 = vrcp.f32 %v1259_v10  ;;  %8715 = vmatprep.mubr.msk.bf16.mxu1 %vm9731_vm0, %v12205_v3 }
 0x308   :  { %2938 = vrot.lane.b32.xlu0 %v9963_v57, %s9733_s12 }
 0x309   :  { %v2141_v60 = vpop.permute.xlu0 %2140  ;;  %v2389_v34 = vpop.permute.xlu1 %2388 }
 0x30a   :  { %v2146_v43 = vsel %vm43_vm1, %v2141_v60, 0 }
 0x30c   :  { %3209 = vrot.lane.b32.xlu0 %v9798_v17, %s9735_s14 }
 0x30d   :  { %v2491_v2 = vpop.permute.xlu1 %2490 }
 0x30e   :  { %v2496_v13 = vsel %vm43_vm1, %v2491_v2, 0 }
 0x310   :  { %v9521_v24 = vpop.eup %9520  ;;  %3305 = vrot.lane.b32.xlu0 %v9801_v18, %s9735_s14 }
 0x311   :  { %v1299_v23 = vmul.f32 %v9521_v24, %v10261_v46  ;;  %v2489_v42 = vpop.permute.xlu1 %2488 }
 0x313   :  { %v1316_v25 = vpack.c.bf16 %v1299_v23, %v1299_v23 }
 0x314   :  { %3353 = vrot.lane.b32.xlu0 %v9813_v21, %s9735_s14 }
 0x315   :  { %8686 = vmatmul.mubr.msk.bf16.vlgmr.msra.gmra.mrb[60].mxu0 %vm1322_vm4, %v1316_v25  ;;  %v2591_v8 = vpop.permute.xlu1 %2590 }
 0x316   :  { %8696 = vmatpush3.bf16.msra.mxu0 %v2048_v52  ;;  %8697 = vmatprep.mubr.msk.bf16.mxu0 %vm9731_vm0, %v12205_v3  ;;  %v2596_v62 = vsel %vm43_vm1, %v2591_v8, 0 }
 0x317   :  { %8707 = vmatprep.subr.bf16.mxu0 %v12205_v3 }
 0x318   :  { %3449 = vrot.lane.b32.xlu0 %v9841_v27, %s9735_s14 }
 0x319   :  { %v2589_v58 = vpop.permute.xlu1 %2588 }
 0x31c   :  { %3545 = vrot.lane.b32.xlu0 %v9863_v32, %s9735_s14 }
 0x31d   :  { %v2691_v59 = vpop.permute.xlu1 %2690 }
 0x31e   :  { %v2696_v5 = vsel %vm43_vm1, %v2691_v59, 0 }
 0x320   :  { %3641 = vrot.lane.b32.xlu0 %v9889_v39, %s9735_s14 }
 0x321   :  { %v2689_v33 = vpop.permute.xlu1 %2688 }
 0x324   :  { %3737 = vrot.lane.b32.xlu0 %v9913_v45, %s9735_s14 }
 0x325   :  { %v2791_v4 = vpop.permute.xlu1 %2790 }
 0x326   :  { %v2796_v25 = vsel %vm43_vm1, %v2791_v4, 0 }
 0x329   :  { %v2789_v24 = vpop.permute.xlu1 %2788 }
 0x33a   :  { %v1265_v14 = vpop.xlane.xlu0 %1264 }
 0x33b   :  { %9522 = vrcp.f32 %v1265_v14 }
 0x33e   :  { %v2191_v46 = vpop.permute.xlu0 %2190 }
 0x33f   :  { %v2196_v56 = vsel %vm43_vm1, %v2191_v46, 0 }
 0x340   :  { %8714 = vmatpush3.bf16.xpose.msra.mxu1 %v2196_v56 }
 0x341   :  { %8725 = vmatprep.subr.bf16.mxu1 %v12205_v3 }
 0x342   :  { %v2241_v36 = vpop.permute.xlu0 %2240 }
 0x343   :  { %v2246_v6 = vsel %vm43_vm1, %v2241_v36, 0 }
 0x345   :  { %v9523_v47 = vpop.eup %9522 }
 0x346   :  { %v2189_v41 = vpop.permute.xlu0 %2188  ;;  %v1301_v63 = vmul.f32 %v9523_v47, %v10327_v22  ;;  %v2396_v22 = vsel %vm43_vm1, %v2391_v29, 0 }
 0x347   :  { %8716 = vmatmul.mubr.msk.bf16.vlgmr.msra.gmra.mrb[68].mxu1 %vm43_vm1, %v2189_v41 }
 0x348   :  { %8726 = vmatpush3.bf16.xpose.msra.mxu1 %v2296_v15  ;;  %v1318_v0 = vpack.c.bf16 %v1301_v63, %v1301_v63  ;;  %8727 = vmatprep.mubr.msk.bf16.mxu1 %vm9731_vm0, %v12205_v3 }
 0x349   :  { %8737 = vmatprep.subr.bf16.mxu1 %v12205_v3 }
 0x34a   :  { %8698 = vmatmul.mubr.msk.bf16.vlgmr.msra.gmra.mrb[64].mxu0 %vm1322_vm4, %v1318_v0  ;;  %v2239_v16 = vpop.permute.xlu0 %2238 }
 0x34b   :  { %8708 = vmatpush3.bf16.xpose.msra.mxu0 %v2146_v43  ;;  %8709 = vmatprep.mubr.msk.bf16.mxu0 %vm9731_vm0, %v12205_v3 }
 0x34c   :  { %8719 = vmatprep.subr.bf16.mxu0 %v12205_v3 }
 0x34e   :  { %v2341_v49 = vpop.permute.xlu0 %2340 }
 0x34f   :  { %8728 = vmatmul.mubr.msk.bf16.vlgmr.msra.gmra.mrb[72].mxu1 %vm43_vm1, %v2289_v48  ;;  %v2346_v35 = vsel %vm43_vm1, %v2341_v49, 0 }
 0x350   :  { %8738 = vmatpush3.bf16.xpose.msra.mxu1 %v2396_v22  ;;  %8739 = vmatprep.mubr.msk.bf16.mxu1 %vm9731_vm0, %v12205_v3 }
 0x351   :  { %8749 = vmatprep.subr.bf16.mxu1 %v12205_v3 }
 0x352   :  { %8710 = vmatmul.mubr.msk.bf16.vlgmr.msra.gmra.mrb[68].mxu0 %vm43_vm1, %v2139_v28  ;;  %v2339_v11 = vpop.permute.xlu0 %2338 }
 0x353   :  { %8720 = vmatpush3.bf16.xpose.msra.mxu0 %v2246_v6  ;;  %8721 = vmatprep.mubr.msk.bf16.mxu0 %vm9731_vm0, %v12205_v3 }
 0x354   :  { %8731 = vmatprep.subr.bf16.mxu0 %v12205_v3 }
 0x356   :  { %v2441_v19 = vpop.permute.xlu0 %2440 }
 0x357   :  { %8740 = vmatmul.mubr.msk.bf16.vlgmr.msra.gmra.mrb[76].mxu1 %vm43_vm1, %v2389_v34  ;;  %v2446_v7 = vsel %vm43_vm1, %v2441_v19, 0  ;;  %v2891_v34 = vpop.permute.xlu1 %2890 }
 0x358   :  { %8750 = vmatpush3.bf16.xpose.msra.mxu1 %v2496_v13  ;;  %8751 = vmatprep.mubr.msk.bf16.mxu1 %vm9731_vm0, %v12205_v3  ;;  %v2896_v47 = vsel %vm43_vm1, %v2891_v34, 0 }
 0x359   :  { %8761 = vmatprep.subr.bf16.mxu1 %v12205_v3 }
 0x35a   :  { %8722 = vmatmul.mubr.msk.bf16.vlgmr.msra.gmra.mrb[72].mxu0 %vm43_vm1, %v2239_v16  ;;  %v2439_v61 = vpop.permute.xlu0 %2438 }
 0x35b   :  { %8732 = vmatpush3.bf16.xpose.msra.mxu0 %v2346_v35  ;;  %8733 = vmatprep.mubr.msk.bf16.mxu0 %vm9731_vm0, %v12205_v3  ;;  %v2889_v8 = vpop.permute.xlu1 %2888 }
 0x35c   :  { %8743 = vmatprep.subr.bf16.mxu0 %v12205_v3 }
 0x35e   :  { %v2541_v9 = vpop.permute.xlu0 %2540 }
 0x35f   :  { %8752 = vmatmul.mubr.msk.bf16.vlgmr.msra.gmra.mrb[80].mxu1 %vm43_vm1, %v2489_v42  ;;  %v2546_v30 = vsel %vm43_vm1, %v2541_v9, 0 }
 0x360   :  { %8762 = vmatpush3.bf16.xpose.msra.mxu1 %v2596_v62  ;;  %8763 = vmatprep.mubr.msk.bf16.mxu1 %vm9731_vm0, %v12205_v3 }
 0x361   :  { %8773 = vmatprep.subr.bf16.mxu1 %v12205_v3 }
 0x362   :  { %8734 = vmatmul.mubr.msk.bf16.vlgmr.msra.gmra.mrb[76].mxu0 %vm43_vm1, %v2339_v11  ;;  %v2539_v1 = vpop.permute.xlu0 %2538 }
 0x363   :  { %8744 = vmatpush3.bf16.xpose.msra.mxu0 %v2446_v7  ;;  %8745 = vmatprep.mubr.msk.bf16.mxu0 %vm9731_vm0, %v12205_v3 }
 0x364   :  { %8755 = vmatprep.subr.bf16.mxu0 %v12205_v3 }
 0x366   :  { %v2641_v12 = vpop.permute.xlu0 %2640 }
 0x367   :  { %8764 = vmatmul.mubr.msk.bf16.vlgmr.msra.gmra.mrb[84].mxu1 %vm43_vm1, %v2589_v58  ;;  %v2646_v60 = vsel %vm43_vm1, %v2641_v12, 0 }
 0x368   :  { %8774 = vmatpush3.bf16.xpose.msra.mxu1 %v2696_v5  ;;  %8775 = vmatprep.mubr.msk.bf16.mxu1 %vm9731_vm0, %v12205_v3 }
 0x369   :  { %8785 = vmatprep.subr.bf16.mxu1 %v12205_v3 }
 0x36a   :  { %8746 = vmatmul.mubr.msk.bf16.vlgmr.msra.gmra.mrb[80].mxu0 %vm43_vm1, %v2439_v61  ;;  %v2639_v37 = vpop.permute.xlu0 %2638 }
 0x36b   :  { %v10506_v40 = vpop.f32.mrb[32].mxu1  ;;  %8756 = vmatpush3.bf16.xpose.msra.mxu0 %v2546_v30  ;;  %8757 = vmatprep.mubr.msk.bf16.mxu0 %vm9731_vm0, %v12205_v3 }
 0x36c   :  { %12218 = vst [vmem:[#allocation2_spill] sm:$0xff] %v10506_v40  ;;  %v8609_v10 = vpop.f32.mrb[33].mxu1  ;;  %8767 = vmatprep.subr.bf16.mxu0 %v12205_v3 }
 0x36d   :  { %v1367_v23 = vpop.f32.mrb[34].mxu1 }
 0x36e   :  { %v8610_v52 = vpop.f32.mrb[35].mxu1  ;;  %v2741_v28 = vpop.permute.xlu0 %2740 }
 0x36f   :  { %v10516_v53 = vpop.f32.mrb[36].mxu0  ;;  %8776 = vmatmul.mubr.msk.bf16.vlgmr.msra.gmra.mrb[88].mxu1 %vm43_vm1, %v2689_v33  ;;  %v2746_v0 = vsel %vm43_vm1, %v2741_v28, 0 }
 0x370   :  { %12219 = vst [vmem:[#allocation3_spill] sm:$0xff] %v10516_v53  ;;  %v8615_v48 = vpop.f32.mrb[37].mxu0  ;;  %8786 = vmatpush3.bf16.xpose.msra.mxu1 %v2796_v25  ;;  %8787 = vmatprep.mubr.msk.bf16.mxu1 %vm9731_vm0, %v12205_v3 }
 0x371   :  { %v1415_v29 = vpop.f32.mrb[38].mxu0  ;;  %8797 = vmatprep.subr.bf16.mxu1 %v12205_v3 }
 0x372   :  { %v8616_v14 = vpop.f32.mrb[39].mxu0  ;;  %8758 = vmatmul.mubr.msk.bf16.vlgmr.msra.gmra.mrb[84].mxu0 %vm43_vm1, %v2539_v1  ;;  %v2739_v56 = vpop.permute.xlu0 %2738 }
 0x373   :  { %v10528_v46 = vpop.f32.mrb[36].mxu1  ;;  %8768 = vmatpush3.bf16.xpose.msra.mxu0 %v2646_v60  ;;  %8769 = vmatprep.mubr.msk.bf16.mxu0 %vm9731_vm0, %v12205_v3 }
 0x374   :  { %12220 = vst [vmem:[#allocation4_spill] sm:$0xff] %v10528_v46  ;;  %v8621_v36 = vpop.f32.mrb[37].mxu1  ;;  %8779 = vmatprep.subr.bf16.mxu0 %v12205_v3 }
 0x375   :  { %v1463_v2 = vpop.f32.mrb[38].mxu1 }
 0x376   :  { %v8622_v15 = vpop.f32.mrb[39].mxu1  ;;  %v2841_v43 = vpop.permute.xlu0 %2840 }
 0x377   :  { %v10536_v41 = vpop.f32.mrb[40].mxu0  ;;  %8788 = vmatmul.mubr.msk.bf16.vlgmr.msra.gmra.mrb[92].mxu1 %vm43_vm1, %v2789_v24  ;;  %v2846_v35 = vsel %vm43_vm1, %v2841_v43, 0 }
 0x378   :  { %12221 = vst [vmem:[#allocation5_spill] sm:$0xff] %v10536_v41  ;;  %v8627_v63 = vpop.f32.mrb[41].mxu0  ;;  %8798 = vmatpush3.bf16.xpose.msra.mxu1 %v2896_v47  ;;  %8799 = vmatprep.mubr.msk.bf16.mxu1 %vm9731_vm0, %v12205_v3 }
 0x379   :  { %v1511_v42 = vpop.f32.mrb[42].mxu0  ;;  %8809 = vmatprep.subr.bf16.mxu1 %v12205_v3 }
 0x37a   :  { %v8628_v16 = vpop.f32.mrb[43].mxu0  ;;  %8770 = vmatmul.mubr.msk.bf16.vlgmr.msra.gmra.mrb[88].mxu0 %vm43_vm1, %v2639_v37  ;;  %v2839_v13 = vpop.permute.xlu0 %2838 }
 0x37b   :  { %v10544_v22 = vpop.f32.mrb[40].mxu1  ;;  %8780 = vmatpush3.bf16.xpose.msra.mxu0 %v2746_v0  ;;  %8781 = vmatprep.mubr.msk.bf16.mxu0 %vm9731_vm0, %v12205_v3 }
 0x37c   :  { %12222 = vst [vmem:[#allocation6_spill] sm:$0xff] %v10544_v22  ;;  %v8633_v49 = vpop.f32.mrb[41].mxu1  ;;  %8791 = vmatprep.subr.bf16.mxu0 %v12205_v3 }
 0x37d   :  { %v1559_v6 = vpop.f32.mrb[42].mxu1 }
 0x37e   :  { %v8634_v11 = vpop.f32.mrb[43].mxu1  ;;  %v2941_v33 = vpop.permute.xlu0 %2940 }
 0x37f   :  { %v10549_v58 = vpop.f32.mrb[44].mxu0  ;;  %8800 = vmatmul.mubr.msk.bf16.vlgmr.msra.gmra.mrb[96].mxu1 %vm43_vm1, %v2889_v8  ;;  %v2946_v12 = vsel %vm43_vm1, %v2941_v33, 0 }
 0x380   :  { %12223 = vst [vmem:[#allocation7_spill] sm:$0xff] %v10549_v58  ;;  %v8639_v19 = vpop.f32.mrb[45].mxu0  ;;  %8811 = vmatprep.mubr.msk.bf16.mxu1 %vm9731_vm0, %v12205_v3 }
 0x381   :  { %v1607_v61 = vpop.f32.mrb[46].mxu0 }
 0x382   :  { %v8640_v59 = vpop.f32.mrb[47].mxu0  ;;  %8782 = vmatmul.mubr.msk.bf16.vlgmr.msra.gmra.mrb[92].mxu0 %vm43_vm1, %v2739_v56  ;;  %v2939_v10 = vpop.permute.xlu0 %2938 }
 0x383   :  { %v10556_v62 = vpop.f32.mrb[44].mxu1  ;;  %8792 = vmatpush3.bf16.xpose.msra.mxu0 %v2846_v35  ;;  %8793 = vmatprep.mubr.msk.bf16.mxu0 %vm9731_vm0, %v12205_v3 }
 0x384   :  { %12224 = vst [vmem:[#allocation8_spill] sm:$0xff] %v10556_v62  ;;  %v8645_v9 = vpop.f32.mrb[45].mxu1  ;;  %8803 = vmatprep.subr.bf16.mxu0 %v12205_v3 }
 0x385   :  { %v1655_v7 = vpop.f32.mrb[46].mxu1 }
 0x386   :  { %v8646_v1 = vpop.f32.mrb[47].mxu1  ;;  %v3258_v7 = vpop.permute.xlu1 %3257 }
 0x387   :  { %v10561_v5 = vpop.f32.mrb[48].mxu0  ;;  %v3263_v1 = vsel %vm1326_vm2, %v3258_v7, 0 }
 0x388   :  { %12225 = vst [vmem:[#allocation9_spill] sm:$0xff] %v10561_v5  ;;  %v8651_v4 = vpop.f32.mrb[49].mxu0 }
 0x389   :  { %v1703_v30 = vpop.f32.mrb[50].mxu0  ;;  %v3210_v4 = vpop.permute.xlu0 %3209 }
 0x38a   :  { %v8652_v37 = vpop.f32.mrb[51].mxu0  ;;  %8794 = vmatmul.mubr.msk.bf16.vlgmr.msra.gmra.mrb[96].mxu0 %vm43_vm1, %v2839_v13  ;;  %v3215_v30 = vsel %vm1326_vm2, %v3210_v4, 0 }
 0x38b   :  { %8804 = vmatpush3.bf16.xpose.msra.mxu0 %v2946_v12  ;;  %8805 = vmatprep.mubr.msk.bf16.mxu0 %vm9731_vm0, %v12205_v3 }
 0x38c   :  { %8815 = vmatprep.subr.bf16.mxu0 %v12205_v3  ;;  %8810 = vmatpush3.bf16.msra.mxu1 %v3215_v30 }
 0x38d   :  { %8821 = vmatprep.subr.bf16.mxu1 %v12205_v3 }
 0x391   :  { %v10568_v24 = vpop.f32.mrb[52].mxu0 }
 0x392   :  { %12226 = vst [vmem:[#allocation10_spill] sm:$0xff] %v10568_v24  ;;  %v8663_v23 = vpop.f32.mrb[53].mxu0  ;;  %8806 = vmatmul.mubr.msk.bf16.vlgmr.msra.gmra.mrb[100].mxu0 %vm43_vm1, %v2939_v10 }
 0x393   :  { %v1799_v25 = vpop.f32.mrb[54].mxu0  ;;  %8817 = vmatprep.mubr.msk.bf16.mxu0 %vm9731_vm0, %v12205_v3  ;;  %8816 = vmatpush3.bf16.msra.mxu0 %v3263_v1 }
 0x394   :  { %v8664_v52 = vpop.f32.mrb[55].mxu0  ;;  %v10573_v28 = vpop.f32.mrb[48].mxu1  ;;  %8827 = vmatprep.subr.bf16.mxu0 %v12205_v3 }
 0x395   :  { %12227 = vst [vmem:[#allocation11_spill] sm:$0xff] %v10573_v28  ;;  %v8657_v48 = vpop.f32.mrb[49].mxu1 }
 0x396   :  { %v1751_v60 = vpop.f32.mrb[50].mxu1 }
 0x397   :  { %v8658_v29 = vpop.f32.mrb[51].mxu1 }
 0x399   :  { %v10575_v14 = vpop.f32.mrb[56].mxu0 }
 0x39a   :  { %12228 = vst [vmem:[#allocation12_spill] sm:$0xff] %v10575_v14  ;;  %v8675_v34 = vpop.f32.mrb[57].mxu0 }
 0x39b   :  { %v1895_v56 = vpop.f32.mrb[58].mxu0 }
 0x39c   :  { %v8676_v36 = vpop.f32.mrb[59].mxu0  ;;  %v10577_v2 = vpop.f32.mrb[52].mxu1 }
 0x39d   :  { %12229 = vst [vmem:[#allocation13_spill] sm:$0xff] %v10577_v2  ;;  %v8669_v47 = vpop.f32.mrb[53].mxu1 }
 0x39e   :  { %v1847_v15 = vpop.f32.mrb[54].mxu1 }
 0x39f   :  { %v8670_v63 = vpop.f32.mrb[55].mxu1 }
 0x3a4   :  { %v10579_v0 = vpop.f32.mrb[56].mxu1 }
 0x3a5   :  { %12230 = vst [vmem:[#allocation14_spill] sm:$0xff] %v10579_v0  ;;  %v8681_v42 = vpop.f32.mrb[57].mxu1 }
 0x3a6   :  { %v1943_v43 = vpop.f32.mrb[58].mxu1 }
 0x3a7   :  { %v8682_v16 = vpop.f32.mrb[59].mxu1 }
 0x3d0   :  { %v10581_v49 = vpop.f32.mrb[60].mxu1 }
 0x3d1   :  { %12231 = vst [vmem:[#allocation15_spill] sm:$0xff] %v10581_v49  ;;  %v8693_v8 = vpop.f32.mrb[61].mxu1 }
 0x3d2   :  { %v2039_v6 = vpop.f32.mrb[62].mxu1 }
 0x3d3   :  { %v8694_v11 = vpop.f32.mrb[63].mxu1 }
 0x3d8   :  { %v10583_v13 = vpop.f32.mrb[64].mxu1 }
 0x3d9   :  { %12232 = vst [vmem:[#allocation16_spill] sm:$0xff] %v10583_v13  ;;  %v8705_v19 = vpop.f32.mrb[65].mxu1 }
 0x3da   :  { %v2135_v35 = vpop.f32.mrb[66].mxu1 }
 0x3db   :  { %v8706_v61 = vpop.f32.mrb[67].mxu1 }
 0x3e8   :  { %v10585_v59 = vpop.f32.mrb[60].mxu0 }
 0x3e9   :  { %12233 = vst [vmem:[#allocation17_spill] sm:$0xff] %v10585_v59  ;;  %v8687_v9 = vpop.f32.mrb[61].mxu0 }
 0x3ea   :  { %v1991_v33 = vpop.f32.mrb[62].mxu0 }
 0x3eb   :  { %v8688_v12 = vpop.f32.mrb[63].mxu0 }
 0x41a   :  { %v2232_v37 = vpop.f32.mrb[68].mxu1 }
 0x41b   :  { %v10591_v10 = vmul.f32 0.35355338, %v2232_v37  ;;  %v8717_v23 = vpop.f32.mrb[69].mxu1 }
 0x41c   :  { %v2235_v25 = vpop.f32.mrb[70].mxu1 }
 0x41d   :  { %v10593_v52 = vpop.f32.mrb[64].mxu0  ;;  %v3008_v48 = vsel %vm1115_vm3, %v10591_v10, -inf  ;;  %v8718_v60 = vpop.f32.mrb[71].mxu1 }
 0x41e   :  { %12234 = vst [vmem:[#allocation18_spill] sm:$0xff] %v10593_v52  ;;  %v8699_v29 = vpop.f32.mrb[65].mxu0  ;;  %3009 = vmax.xlane.f32.xlu0 %v3008_v48 }
 0x41f   :  { %v2087_v34 = vpop.f32.mrb[66].mxu0 }
 0x420   :  { %v8700_v56 = vpop.f32.mrb[67].mxu0 }
 0x422   :  { %v2332_v36 = vpop.f32.mrb[72].mxu1 }
 0x423   :  { %v8729_v47 = vpop.f32.mrb[73].mxu1  ;;  %v10599_v8 = vmul.f32 0.35355338, %v2332_v36 }
 0x424   :  { %v2335_v15 = vpop.f32.mrb[74].mxu1 }
 0x425   :  { %v2182_v63 = vpop.f32.mrb[68].mxu0  ;;  %v8730_v42 = vpop.f32.mrb[75].mxu1  ;;  %v3014_v35 = vsel %vm1115_vm3, %v10599_v8, -inf }
 0x426   :  { %v10597_v43 = vmul.f32 0.35355338, %v2182_v63  ;;  %v8711_v16 = vpop.f32.mrb[69].mxu0 }
 0x427   :  { %v2185_v6 = vpop.f32.mrb[70].mxu0 }
 0x428   :  { %v8712_v11 = vpop.f32.mrb[71].mxu0  ;;  %v3005_v19 = vsel %vm1115_vm3, %v10597_v43, -inf }
 0x429   :  { %3006 = vmax.xlane.f32.xlu1 %v3005_v19 }
 0x42a   :  { %v2432_v61 = vpop.f32.mrb[76].mxu1 }
 0x42b   :  { %v10605_v9 = vmul.f32 0.35355338, %v2432_v61  ;;  %v8741_v7 = vpop.f32.mrb[77].mxu1 }
 0x42c   :  { %v2435_v33 = vpop.f32.mrb[78].mxu1 }
 0x42d   :  { %3015 = vmax.xlane.f32.xlu1 %v3014_v35  ;;  %v2282_v1 = vpop.f32.mrb[72].mxu0  ;;  %v8742_v4 = vpop.f32.mrb[79].mxu1  ;;  %v3020_v37 = vsel %vm1115_vm3, %v10605_v9, -inf }
 0x42e   :  { %v10607_v12 = vmul.f32 0.35355338, %v2282_v1  ;;  %v8723_v30 = vpop.f32.mrb[73].mxu0 }
 0x42f   :  { %v2285_v23 = vpop.f32.mrb[74].mxu0 }
 0x430   :  { %v8724_v25 = vpop.f32.mrb[75].mxu0  ;;  %v3011_v48 = vsel %vm1115_vm3, %v10607_v12, -inf }
 0x431   :  { %3021 = vmax.xlane.f32.xlu1 %v3020_v37  ;;  %3012 = vmax.xlane.f32.xlu0 %v3011_v48 }
 0x432   :  { %v2532_v60 = vpop.f32.mrb[80].mxu1 }
 0x433   :  { %v10613_v29 = vmul.f32 0.35355338, %v2532_v60  ;;  %v8753_v34 = vpop.f32.mrb[81].mxu1 }
 0x434   :  { %v2535_v56 = vpop.f32.mrb[82].mxu1 }
 0x435   :  { %v2382_v36 = vpop.f32.mrb[76].mxu0  ;;  %v3026_v47 = vsel %vm1115_vm3, %v10613_v29, -inf  ;;  %v8754_v15 = vpop.f32.mrb[83].mxu1 }
 0x436   :  { %v10617_v63 = vmul.f32 0.35355338, %v2382_v36  ;;  %3027 = vmax.xlane.f32.xlu1 %v3026_v47  ;;  %v8735_v42 = vpop.f32.mrb[77].mxu0 }
 0x437   :  { %v2385_v16 = vpop.f32.mrb[78].mxu0 }
 0x438   :  { %v8736_v6 = vpop.f32.mrb[79].mxu0  ;;  %v3017_v11 = vsel %vm1115_vm3, %v10617_v63, -inf }
 0x439   :  { %3018 = vmax.xlane.f32.xlu0 %v3017_v11 }
 0x43a   :  { %v2632_v19 = vpop.f32.mrb[84].mxu1 }
 0x43b   :  { %v10621_v35 = vmul.f32 0.35355338, %v2632_v19  ;;  %v8765_v61 = vpop.f32.mrb[85].mxu1 }
 0x43c   :  { %v2635_v7 = vpop.f32.mrb[86].mxu1 }
 0x43d   :  { %v2482_v33 = vpop.f32.mrb[80].mxu0  ;;  %v3032_v1 = vsel %vm1115_vm3, %v10621_v35, -inf  ;;  %v8766_v4 = vpop.f32.mrb[87].mxu1 }
 0x43e   :  { %v10625_v30 = vmul.f32 0.35355338, %v2482_v33  ;;  %3033 = vmax.xlane.f32.xlu1 %v3032_v1  ;;  %v8747_v37 = vpop.f32.mrb[81].mxu0 }
 0x43f   :  { %v2485_v23 = vpop.f32.mrb[82].mxu0 }
 0x440   :  { %v8748_v25 = vpop.f32.mrb[83].mxu0  ;;  %v3023_v48 = vsel %vm1115_vm3, %v10625_v30, -inf }
 0x441   :  { %3024 = vmax.xlane.f32.xlu0 %v3023_v48 }
 0x442   :  { %v2732_v60 = vpop.f32.mrb[88].mxu1 }
 0x443   :  { %v10629_v34 = vmul.f32 0.35355338, %v2732_v60  ;;  %v8777_v56 = vpop.f32.mrb[89].mxu1 }
 0x444   :  { %v2735_v36 = vpop.f32.mrb[90].mxu1 }
 0x445   :  { %v2582_v47 = vpop.f32.mrb[84].mxu0  ;;  %v3038_v15 = vsel %vm1115_vm3, %v10629_v34, -inf  ;;  %v8778_v42 = vpop.f32.mrb[91].mxu1 }
 0x446   :  { %v10633_v16 = vmul.f32 0.35355338, %v2582_v47  ;;  %3039 = vmax.xlane.f32.xlu1 %v3038_v15  ;;  %v8759_v6 = vpop.f32.mrb[85].mxu0 }
 0x447   :  { %v2585_v11 = vpop.f32.mrb[86].mxu0 }
 0x448   :  { %v8760_v19 = vpop.f32.mrb[87].mxu0  ;;  %v3029_v61 = vsel %vm1115_vm3, %v10633_v16, -inf }
 0x449   :  { %3030 = vmax.xlane.f32.xlu0 %v3029_v61 }
 0x44a   :  { %v2832_v7 = vpop.f32.mrb[92].mxu1 }
 0x44b   :  { %v10637_v33 = vmul.f32 0.35355338, %v2832_v7  ;;  %v8789_v1 = vpop.f32.mrb[93].mxu1 }
 0x44c   :  { %v2835_v4 = vpop.f32.mrb[94].mxu1 }
 0x44d   :  { %v2682_v37 = vpop.f32.mrb[88].mxu0  ;;  %v3044_v23 = vsel %vm1115_vm3, %v10637_v33, -inf  ;;  %v8790_v25 = vpop.f32.mrb[95].mxu1 }
 0x44e   :  { %v10641_v48 = vmul.f32 0.35355338, %v2682_v37  ;;  %3045 = vmax.xlane.f32.xlu1 %v3044_v23  ;;  %v8771_v60 = vpop.f32.mrb[89].mxu0 }
 0x44f   :  { %v2685_v56 = vpop.f32.mrb[90].mxu0 }
 0x450   :  { %v8772_v36 = vpop.f32.mrb[91].mxu0  ;;  %v3035_v47 = vsel %vm1115_vm3, %v10641_v48, -inf }
 0x451   :  { %3036 = vmax.xlane.f32.xlu0 %v3035_v47 }
 0x452   :  { %v2932_v15 = vpop.f32.mrb[96].mxu1 }
 0x453   :  { %v10645_v42 = vmul.f32 0.35355338, %v2932_v15  ;;  %v8801_v6 = vpop.f32.mrb[97].mxu1 }
 0x454   :  { %v2935_v11 = vpop.f32.mrb[98].mxu1 }
 0x455   :  { %v2782_v19 = vpop.f32.mrb[92].mxu0  ;;  %v3050_v61 = vsel %vm1115_vm3, %v10645_v42, -inf  ;;  %v8802_v7 = vpop.f32.mrb[99].mxu1 }
 0x456   :  { %v10649_v1 = vmul.f32 0.35355338, %v2782_v19  ;;  %3051 = vmax.xlane.f32.xlu1 %v3050_v61  ;;  %v8783_v4 = vpop.f32.mrb[93].mxu0 }
 0x457   :  { %v2785_v37 = vpop.f32.mrb[94].mxu0 }
 0x458   :  { %v8784_v23 = vpop.f32.mrb[95].mxu0  ;;  %v3041_v25 = vsel %vm1115_vm3, %v10649_v1, -inf }
 0x459   :  { %3042 = vmax.xlane.f32.xlu0 %v3041_v25  ;;  %v10665_v23 = vpop.permute.xlu0 %3305 }
 0x45d   :  { %v2882_v60 = vpop.f32.mrb[96].mxu0  ;;  %v10667_v25 = vpop.permute.xlu0 %3353 }
 0x45e   :  { %v10653_v56 = vmul.f32 0.35355338, %v2882_v60  ;;  %v8795_v36 = vpop.f32.mrb[97].mxu0 }
 0x45f   :  { %v2885_v47 = vpop.f32.mrb[98].mxu0  ;;  %v10671_v36 = vpop.permute.xlu1 %3401 }
 0x460   :  { %v3047_v15 = vsel %vm1115_vm3, %v10653_v56, -inf  ;;  %v8796_v6 = vpop.f32.mrb[99].mxu0 }
 0x461   :  { %3048 = vmax.xlane.f32.xlu0 %v3047_v15  ;;  %v10669_v60 = vpop.permute.xlu0 %3449 }
 0x463   :  { %v10675_v15 = vpop.permute.xlu1 %3497 }
 0x465   :  { %v2982_v11 = vpop.f32.mrb[100].mxu0  ;;  %v10673_v47 = vpop.permute.xlu0 %3545 }
 0x466   :  { %v10657_v19 = vmul.f32 0.35355338, %v2982_v11  ;;  %v8807_v61 = vpop.f32.mrb[101].mxu0 }
 0x467   :  { %3881 = vrot.lane.b32.xlu1 %v9951_v54, %s9735_s14  ;;  %v2985_v7 = vpop.f32.mrb[102].mxu0  ;;  %v10679_v11 = vpop.permute.xlu1 %3593 }
 0x468   :  { %v3053_v4 = vsel %vm1115_vm3, %v10657_v19, -inf  ;;  %v8808_v37 = vpop.f32.mrb[103].mxu0 }
 0x469   :  { %3054 = vmax.xlane.f32.xlu0 %v3053_v4  ;;  %v10677_v6 = vpop.permute.xlu0 %3641 }
 0x46b   :  { %v10683_v4 = vpop.permute.xlu1 %3689 }
 0x46d   :  { %v10681_v61 = vpop.permute.xlu0 %3737 }
 0x46f   :  { %v10686_v28 = vpop.permute.xlu1 %3785 }
 0x47f   :  { %3833 = vrot.lane.b32.xlu0 %v9937_v51, %s9735_s14 }
 0x4ab   :  { %v3010_v7 = vpop.xlane.xlu0 %3009 }
 0x4ac   :  { %v3057_v37 = vsub.f32 %v10591_v10, %v3010_v7 }
 0x4ae   :  { %v3075_v3 = vmul.f32 1.442695, %v3057_v37 }
 0x4b0   :  { %9524 = vpow2.f32 %v3075_v3 }
 0x4b6   :  { %v3007_v24 = vpop.xlane.xlu1 %3006 }
 0x4b7   :  { %v3056_v62 = vsub.f32 %v10597_v43, %v3007_v24 }
 0x4b9   :  { %v3073_v5 = vmul.f32 1.442695, %v3056_v62 }
 0x4ba   :  { %v10689_v22 = vpop.eup %9524  ;;  %v3016_v58 = vpop.xlane.xlu1 %3015 }
 0x4bb   :  { %9526 = vpow2.f32 %v3073_v5  ;;  %v3059_v46 = vsub.f32 %v10599_v8, %v3016_v58  ;;  %v3110_v41 = vsel %vm1115_vm3, %v10689_v22, 0.0 }
 0x4bc   :  { %3111 = vadd.xlane.f32.xlu0 %v3110_v41 }
 0x4bd   :  { %v3079_v40 = vmul.f32 1.442695, %v3059_v46 }
 0x4be   :  { %v3022_v10 = vpop.xlane.xlu1 %3021  ;;  %v3013_v7 = vpop.xlane.xlu0 %3012 }
 0x4bf   :  { %9528 = vpow2.f32 %v3079_v40  ;;  %v3061_v3 = vsub.f32 %v10605_v9, %v3022_v10  ;;  %v3058_v37 = vsub.f32 %v10607_v12, %v3013_v7 }
 0x4c1   :  { %v3083_v24 = vmul.f32 1.442695, %v3061_v3  ;;  %v3077_v62 = vmul.f32 1.442695, %v3058_v37 }
 0x4c3   :  { %9530 = vpow2.f32 %v3083_v24  ;;  %v3028_v8 = vpop.xlane.xlu1 %3027 }
 0x4c4   :  { %9532 = vpow2.f32 %v3077_v62  ;;  %v3063_v3 = vsub.f32 %v10613_v29, %v3028_v8 }
 0x4c5   :  { %v10696_v43 = vpop.eup %9526 }
 0x4c6   :  { %v3019_v5 = vpop.xlane.xlu0 %3018  ;;  %v3107_v58 = vsel %vm1115_vm3, %v10696_v43, 0.0 }
 0x4c7   :  { %v3060_v46 = vsub.f32 %v10617_v63, %v3019_v5  ;;  %3108 = vadd.xlane.f32.xlu1 %v3107_v58 }
 0x4c9   :  { %v10701_v41 = vpop.eup %9528  ;;  %v3081_v40 = vmul.f32 1.442695, %v3060_v46 }
 0x4ca   :  { %v3116_v9 = vsel %vm1115_vm3, %v10701_v41, 0.0 }
 0x4cb   :  { %9534 = vpow2.f32 %v3081_v40  ;;  %v3034_v12 = vpop.xlane.xlu1 %3033  ;;  %3117 = vadd.xlane.f32.xlu0 %v3116_v9 }
 0x4cc   :  { %v3065_v10 = vsub.f32 %v10621_v35, %v3034_v12  ;;  %v3087_v35 = vmul.f32 1.442695, %v3063_v3 }
 0x4cd   :  { %v10706_v7 = vpop.eup %9530 }
 0x4ce   :  { %v10709_v37 = vpop.eup %9532  ;;  %v3091_v24 = vmul.f32 1.442695, %v3065_v10  ;;  %v3025_v63 = vpop.xlane.xlu0 %3024  ;;  %v3122_v62 = vsel %vm1115_vm3, %v10706_v7, 0.0 }
 0x4cf   :  { %v3062_v5 = vsub.f32 %v10625_v30, %v3025_v63  ;;  %3123 = vadd.xlane.f32.xlu0 %v3122_v62  ;;  %v3113_v58 = vsel %vm1115_vm3, %v10709_v37, 0.0 }
 0x4d0   :  { %9536 = vpow2.f32 %v3091_v24  ;;  %3114 = vadd.xlane.f32.xlu1 %v3113_v58 }
 0x4d1   :  { %v3085_v46 = vmul.f32 1.442695, %v3062_v5 }
 0x4d3   :  { %9538 = vpow2.f32 %v3085_v46  ;;  %v3040_v40 = vpop.xlane.xlu1 %3039 }
 0x4d4   :  { %v3067_v29 = vsub.f32 %v10629_v34, %v3040_v40  ;;  %9540 = vpow2.f32 %v3087_v35 }
 0x4d5   :  { %v10717_v8 = vpop.eup %9534 }
 0x4d6   :  { %v3095_v9 = vmul.f32 1.442695, %v3067_v29  ;;  %v3031_v12 = vpop.xlane.xlu0 %3030  ;;  %v3119_v30 = vsel %vm1115_vm3, %v10717_v8, 0.0 }
 0x4d7   :  { %v3064_v10 = vsub.f32 %v10633_v16, %v3031_v12  ;;  %3120 = vadd.xlane.f32.xlu1 %v3119_v30 }
 0x4d8   :  { %9542 = vpow2.f32 %v3095_v9 }
 0x4d9   :  { %v3089_v24 = vmul.f32 1.442695, %v3064_v10 }
 0x4da   :  { %v10722_v63 = vpop.eup %9536 }
 0x4db   :  { %9544 = vpow2.f32 %v3089_v24  ;;  %v3046_v3 = vpop.xlane.xlu1 %3045  ;;  %v3134_v34 = vsel %vm1115_vm3, %v10722_v63, 0.0 }
 0x4dc   :  { %v3069_v62 = vsub.f32 %v10637_v33, %v3046_v3  ;;  %3135 = vadd.xlane.f32.xlu0 %v3134_v34 }
 0x4dd   :  { %v10727_v5 = vpop.eup %9538 }
 0x4de   :  { %v3099_v58 = vmul.f32 1.442695, %v3069_v62  ;;  %v3037_v35 = vpop.xlane.xlu0 %3036  ;;  %v3125_v16 = vsel %vm1115_vm3, %v10727_v5, 0.0  ;;  %v10731_v46 = vpop.eup %9540 }
 0x4df   :  { %v3066_v40 = vsub.f32 %v10641_v48, %v3037_v35  ;;  %3126 = vadd.xlane.f32.xlu1 %v3125_v16  ;;  %v3128_v33 = vsel %vm1115_vm3, %v10731_v46, 0.0 }
 0x4e0   :  { %9546 = vpow2.f32 %v3099_v58 }
 0x4e1   :  { %v3093_v29 = vmul.f32 1.442695, %v3066_v40 }
 0x4e2   :  { %v10734_v9 = vpop.eup %9542 }
 0x4e3   :  { %9548 = vpow2.f32 %v3093_v29  ;;  %3129 = vadd.xlane.f32.xlu1 %v3128_v33  ;;  %v3140_v12 = vsel %vm1115_vm3, %v10734_v9, 0.0  ;;  %v3052_v40 = vpop.xlane.xlu1 %3051 }
 0x4e4   :  { %3141 = vadd.xlane.f32.xlu0 %v3140_v12  ;;  %v3071_v29 = vsub.f32 %v10645_v42, %v3052_v40 }
 0x4e5   :  { %v10740_v30 = vpop.eup %9544 }
 0x4e6   :  { %v3043_v10 = vpop.xlane.xlu0 %3042  ;;  %v3131_v48 = vsel %vm1115_vm3, %v10740_v30, 0.0  ;;  %v3103_v33 = vmul.f32 1.442695, %v3071_v29 }
 0x4e7   :  { %v3068_v24 = vsub.f32 %v10649_v1, %v3043_v10  ;;  %3132 = vadd.xlane.f32.xlu1 %v3131_v48 }
 0x4e9   :  { %v3097_v3 = vmul.f32 1.442695, %v3068_v24 }
 0x4ea   :  { %v10745_v34 = vpop.eup %9546 }
 0x4eb   :  { %9550 = vpow2.f32 %v3097_v3  ;;  %v3146_v62 = vsel %vm1115_vm3, %v10745_v34, 0.0 }
 0x4ec   :  { %3147 = vadd.xlane.f32.xlu0 %v3146_v62  ;;  %9552 = vpow2.f32 %v3103_v33  ;;  %v10790_v33 = vpop.permute.xlu1 %3881 }
 0x4ed   :  { %v10749_v58 = vpop.eup %9548 }
 0x4ee   :  { %v3137_v35 = vsel %vm1115_vm3, %v10749_v58, 0.0  ;;  %v3049_v12 = vpop.xlane.xlu0 %3048 }
 0x4ef   :  { %3138 = vadd.xlane.f32.xlu1 %v3137_v35  ;;  %v3070_v10 = vsub.f32 %v10653_v56, %v3049_v12 }
 0x4f1   :  { %v3101_v48 = vmul.f32 1.442695, %v3070_v10 }
 0x4f3   :  { %9554 = vpow2.f32 %v3101_v48 }
 0x4f5   :  { %v10753_v16 = vpop.eup %9550 }
 0x4f6   :  { %v3143_v1 = vsel %vm1115_vm3, %v10753_v16, 0.0  ;;  %v10763_v24 = vpop.eup %9552  ;;  %v3055_v42 = vpop.xlane.xlu0 %3054 }
 0x4f7   :  { %3144 = vadd.xlane.f32.xlu1 %v3143_v1  ;;  %v3152_v3 = vsel %vm1115_vm3, %v10763_v24, 0.0  ;;  %v3072_v40 = vsub.f32 %v10657_v19, %v3055_v42  ;;  %v12235_v42 = vmov 0.0  }
 0x4f9   :  { %v3105_v29 = vmul.f32 1.442695, %v3072_v40 }
 0x4fa   :  { %v10779_v56 = vpop.permute.xlu0 %3833 }
 0x4fd   :  { %v10767_v62 = vpop.eup %9554 }
 0x4fe   :  { %v3149_v35 = vsel %vm1115_vm3, %v10767_v62, 0.0 }
 0x502   :  { %3929 = vrot.lane.b32.xlu0 %v9954_v55, %s9735_s14 }
 0x508   :  { %3977 = vrot.lane.b32.xlu1 %v9963_v57, %s9735_s14 }
 0x521   :  { %3153 = vadd.xlane.f32.xlu0 %v3152_v3 }
 0x52c   :  { %3150 = vadd.xlane.f32.xlu1 %v3149_v35  ;;  %v3359_v35 = vsel %vm1326_vm2, %v10667_v25, 0 }
 0x537   :  { %4027 = vrot.lane.b32.xlu0 %v9798_v17, %s9736_s15 }
 0x53b   :  { %4025 = vrot.lane.b32.xlu0 %v9798_v17, %s9737_s16 }
 0x53d   :  { %4077 = vrot.lane.b32.xlu1 %v9808_v20, %s9736_s15 }
 0x53f   :  { %4127 = vrot.lane.b32.xlu0 %v9801_v18, %s9736_s15 }
 0x543   :  { %4125 = vrot.lane.b32.xlu0 %v9801_v18, %s9737_s16 }
 0x547   :  { %4227 = vrot.lane.b32.xlu0 %v9838_v26, %s9736_s15 }
 0x549   :  { %v3112_v1 = vpop.xlane.xlu0 %3111 }
 0x54a   :  { %9556 = vrcp.f32 %v3112_v1 }
 0x54b   :  { %4225 = vrot.lane.b32.xlu0 %v9838_v26, %s9737_s16  ;;  %9558 = vpow2.f32 %v3105_v29 }
 0x54f   :  { %4327 = vrot.lane.b32.xlu0 %v9856_v31, %s9736_s15 }
 0x553   :  { %4325 = vrot.lane.b32.xlu0 %v9856_v31, %s9737_s16 }
 0x554   :  { %v9557_v12 = vpop.eup %9556  ;;  %v3109_v10 = vpop.xlane.xlu1 %3108 }
 0x555   :  { %9560 = vrcp.f32 %v3109_v10  ;;  %v3176_v48 = vmul.f32 %v9557_v12, %v10689_v22  ;;  %v10805_v1 = vpop.eup %9558 }
 0x556   :  { %v3155_v25 = vsel %vm1115_vm3, %v10805_v1, 0.0 }
 0x557   :  { %v3193_v3 = vpack.c.bf16 %v3176_v48, %v3176_v48  ;;  %4427 = vrot.lane.b32.xlu0 %v9886_v38, %s9736_s15 }
 0x558   :  { %v3118_v19 = vpop.xlane.xlu0 %3117 }
 0x559   :  { %9562 = vrcp.f32 %v3118_v19  ;;  %8818 = vmatmul.mubr.msk.bf16.vlgmr.msra.gmra.mrb[104].mxu0 %vm1322_vm4, %v3193_v3  ;;  %v3311_v3 = vsel %vm1326_vm2, %v10665_v23, 0  ;;  %v3455_v23 = vsel %vm1326_vm2, %v10669_v60, 0  ;;  %v3407_v60 = vsel %vm1326_vm2, %v10671_v36, 0 }
 0x55a   :  { %8828 = vmatpush3.bf16.msra.mxu0 %v3359_v35  ;;  %8829 = vmatprep.mubr.msk.bf16.mxu0 %vm9731_vm0, %v12235_v42 }
 0x55b   :  { %8839 = vmatprep.subr.bf16.mxu0 %v12235_v42  ;;  %4425 = vrot.lane.b32.xlu0 %v9886_v38, %s9737_s16 }
 0x55c   :  { %v3124_v22 = vpop.xlane.xlu0 %3123 }
 0x55d   :  { %v3115_v40 = vpop.xlane.xlu1 %3114  ;;  %9564 = vrcp.f32 %v3124_v22 }
 0x55e   :  { %9566 = vrcp.f32 %v3115_v40 }
 0x55f   :  { %v9561_v29 = vpop.eup %9560  ;;  %4527 = vrot.lane.b32.xlu0 %v9910_v44, %s9736_s15 }
 0x560   :  { %v3175_v12 = vmul.f32 %v9561_v29, %v10696_v43 }
 0x561   :  { %3156 = vadd.xlane.f32.xlu1 %v3155_v25 }
 0x562   :  { %v3192_v10 = vpack.c.bf16 %v3175_v12, %v3175_v12 }
 0x563   :  { %v9563_v48 = vpop.eup %9562  ;;  %4525 = vrot.lane.b32.xlu0 %v9910_v44, %s9737_s16 }
 0x564   :  { %8812 = vmatmul.mubr.msk.bf16.vlgmr.msra.gmra.mrb[100].mxu1 %vm1322_vm4, %v3192_v10  ;;  %v3121_v19 = vpop.xlane.xlu1 %3120  ;;  %v3178_v35 = vmul.f32 %v9563_v48, %v10701_v41 }
 0x565   :  { %8822 = vmatpush3.bf16.msra.mxu1 %v3311_v3  ;;  %9568 = vrcp.f32 %v3121_v19  ;;  %8823 = vmatprep.mubr.msk.bf16.mxu1 %vm9731_vm0, %v12235_v42 }
 0x566   :  { %v3195_v43 = vpack.c.bf16 %v3178_v35, %v3178_v35  ;;  %8833 = vmatprep.subr.bf16.mxu1 %v12235_v42 }
 0x567   :  { %v9565_v22 = vpop.eup %9564  ;;  %4627 = vrot.lane.b32.xlu0 %v9934_v50, %s9736_s15 }
 0x568   :  { %v9567_v40 = vpop.eup %9566  ;;  %8830 = vmatmul.mubr.msk.bf16.vlgmr.msra.gmra.mrb[108].mxu0 %vm1322_vm4, %v3195_v43  ;;  %v3180_v29 = vmul.f32 %v9565_v22, %v10706_v7  ;;  %v3551_v7 = vsel %vm1326_vm2, %v10673_v47, 0 }
 0x569   :  { %8840 = vmatpush3.bf16.msra.mxu0 %v3455_v23  ;;  %v3177_v41 = vmul.f32 %v9567_v40, %v10709_v37  ;;  %8841 = vmatprep.mubr.msk.bf16.mxu0 %vm9731_vm0, %v12235_v42  ;;  %v3136_v3 = vpop.xlane.xlu0 %3135 }
 0x56a   :  { %8851 = vmatprep.subr.bf16.mxu0 %v12235_v42  ;;  %v3197_v37 = vpack.c.bf16 %v3180_v29, %v3180_v29  ;;  %v3599_v29 = vsel %vm1326_vm2, %v10679_v11, 0 }
 0x56b   :  { %v3194_v25 = vpack.c.bf16 %v3177_v41, %v3177_v41  ;;  %4625 = vrot.lane.b32.xlu0 %v9934_v50, %s9737_s16 }
 0x56c   :  { %v3127_v12 = vpop.xlane.xlu1 %3126 }
 0x56d   :  { %8824 = vmatmul.mubr.msk.bf16.vlgmr.msra.gmra.mrb[104].mxu1 %vm1322_vm4, %v3194_v25  ;;  %9570 = vrcp.f32 %v3127_v12 }
 0x56e   :  { %8834 = vmatpush3.bf16.msra.mxu1 %v3407_v60  ;;  %8835 = vmatprep.mubr.msk.bf16.mxu1 %vm9731_vm0, %v12235_v42 }
 0x56f   :  { %v9569_v10 = vpop.eup %9568  ;;  %8845 = vmatprep.subr.bf16.mxu1 %v12235_v42  ;;  %4727 = vrot.lane.b32.xlu0 %v9951_v54, %s9736_s15 }
 0x570   :  { %v3130_v48 = vpop.xlane.xlu1 %3129  ;;  %8842 = vmatmul.mubr.msk.bf16.vlgmr.msra.gmra.mrb[112].mxu0 %vm1322_vm4, %v3197_v37  ;;  %v3179_v36 = vmul.f32 %v9569_v10, %v10717_v8  ;;  %v3503_v8 = vsel %vm1326_vm2, %v10675_v15, 0 }
 0x571   :  { %9572 = vrcp.f32 %v3130_v48  ;;  %8852 = vmatpush3.bf16.msra.mxu0 %v3551_v7  ;;  %8853 = vmatprep.mubr.msk.bf16.mxu0 %vm9731_vm0, %v12235_v42  ;;  %v3142_v22 = vpop.xlane.xlu0 %3141 }
 0x572   :  { %v3196_v19 = vpack.c.bf16 %v3179_v36, %v3179_v36  ;;  %8863 = vmatprep.subr.bf16.mxu0 %v12235_v42  ;;  %4075 = vrot.lane.b32.xlu1 %v9808_v20, %s9737_s16  ;;  %9574 = vrcp.f32 %v3136_v3 }
 0x573   :  { %4725 = vrot.lane.b32.xlu0 %v9951_v54, %s9737_s16 }
 0x574   :  { %v3133_v47 = vpop.xlane.xlu1 %3132 }
 0x575   :  { %8836 = vmatmul.mubr.msk.bf16.vlgmr.msra.gmra.mrb[108].mxu1 %vm1322_vm4, %v3196_v19  ;;  %9576 = vrcp.f32 %v3133_v47  ;;  %v3791_v47 = vsel %vm1326_vm2, %v10686_v28, 0 }
 0x576   :  { %8846 = vmatpush3.bf16.msra.mxu1 %v3503_v8  ;;  %8847 = vmatprep.mubr.msk.bf16.mxu1 %vm9731_vm0, %v12235_v42  ;;  %9578 = vrcp.f32 %v3142_v22  ;;  %v3887_v22 = vsel %vm1326_vm2, %v10790_v33, 0 }
 0x577   :  { %v9571_v35 = vpop.eup %9570  ;;  %8857 = vmatprep.subr.bf16.mxu1 %v12235_v42  ;;  %4177 = vrot.lane.b32.xlu1 %v9813_v21, %s9736_s15 }
 0x578   :  { %v3181_v43 = vmul.f32 %v9571_v35, %v10727_v5  ;;  %4827 = vrot.lane.b32.xlu0 %v9963_v57, %s9736_s15 }
 0x579   :  { %v3148_v60 = vpop.xlane.xlu0 %3147 }
 0x57a   :  { %v3198_v15 = vpack.c.bf16 %v3181_v43, %v3181_v43 }
 0x57b   :  { %v9573_v40 = vpop.eup %9572  ;;  %4175 = vrot.lane.b32.xlu1 %v9813_v21, %s9737_s16 }
 0x57c   :  { %v3139_v23 = vpop.xlane.xlu1 %3138  ;;  %v3182_v41 = vmul.f32 %v9573_v40, %v10731_v46  ;;  %v9575_v5 = vpop.eup %9574  ;;  %v3647_v46 = vsel %vm1326_vm2, %v10677_v6, 0  ;;  %v3695_v6 = vsel %vm1326_vm2, %v10683_v4, 0  ;;  %5096 = vrot.lane.b32.xlu0 %v9798_v17, %s9738_s17 }
 0x57d   :  { %8848 = vmatmul.mubr.msk.bf16.vlgmr.msra.gmra.mrb[112].mxu1 %vm1322_vm4, %v3198_v15  ;;  %9580 = vrcp.f32 %v3139_v23  ;;  %v3184_v10 = vmul.f32 %v9575_v5, %v10722_v63  ;;  %v3743_v63 = vsel %vm1326_vm2, %v10681_v61, 0 }
 0x57e   :  { %8858 = vmatpush3.bf16.msra.mxu1 %v3599_v29  ;;  %v3199_v25 = vpack.c.bf16 %v3182_v41, %v3182_v41  ;;  %8859 = vmatprep.mubr.msk.bf16.mxu1 %vm9731_vm0, %v12235_v42  ;;  %9582 = vrcp.f32 %v3148_v60 }
 0x57f   :  { %v9577_v12 = vpop.eup %9576  ;;  %8869 = vmatprep.subr.bf16.mxu1 %v12235_v42  ;;  %4277 = vrot.lane.b32.xlu1 %v9841_v27, %s9736_s15  ;;  %v3201_v48 = vpack.c.bf16 %v3184_v10, %v3184_v10 }
 0x580   :  { %8854 = vmatmul.mubr.msk.bf16.vlgmr.msra.gmra.mrb[116].mxu0 %vm1322_vm4, %v3199_v25  ;;  %v3183_v11 = vmul.f32 %v9577_v12, %v10740_v30  ;;  %v9579_v30 = vpop.eup %9578  ;;  %5192 = vrot.lane.b32.xlu0 %v9801_v18, %s9738_s17 }
 0x581   :  { %8864 = vmatpush3.bf16.msra.mxu0 %v3647_v46  ;;  %8865 = vmatprep.mubr.msk.bf16.mxu0 %vm9731_vm0, %v12235_v42  ;;  %v3186_v19 = vmul.f32 %v9579_v30, %v10734_v9  ;;  %v3839_v9 = vsel %vm1326_vm2, %v10779_v56, 0  ;;  %v3930_v56 = vpop.permute.xlu0 %3929 }
 0x582   :  { %v3200_v37 = vpack.c.bf16 %v3183_v11, %v3183_v11  ;;  %8875 = vmatprep.subr.bf16.mxu0 %v12235_v42  ;;  %v3935_v15 = vsel %vm1326_vm2, %v3930_v56, 0 }
 0x583   :  { %4275 = vrot.lane.b32.xlu1 %v9841_v27, %s9737_s16 }
 0x584   :  { %v3145_v7 = vpop.xlane.xlu1 %3144  ;;  %5288 = vrot.lane.b32.xlu0 %v9838_v26, %s9738_s17 }
 0x585   :  { %8860 = vmatmul.mubr.msk.bf16.vlgmr.msra.gmra.mrb[116].mxu1 %vm1322_vm4, %v3200_v37  ;;  %9584 = vrcp.f32 %v3145_v7 }
 0x586   :  { %8870 = vmatpush3.bf16.msra.mxu1 %v3695_v6  ;;  %8871 = vmatprep.mubr.msk.bf16.mxu1 %vm9731_vm0, %v12235_v42 }
 0x587   :  { %v9581_v36 = vpop.eup %9580  ;;  %8881 = vmatprep.subr.bf16.mxu1 %v12235_v42  ;;  %4377 = vrot.lane.b32.xlu1 %v9863_v32, %s9736_s15 }
 0x588   :  { %8866 = vmatmul.mubr.msk.bf16.vlgmr.msra.gmra.mrb[120].mxu0 %vm1322_vm4, %v3201_v48  ;;  %v3185_v4 = vmul.f32 %v9581_v36, %v10749_v58  ;;  %v9583_v61 = vpop.eup %9582  ;;  %v3203_v58 = vpack.c.bf16 %v3186_v19, %v3186_v19  ;;  %v3978_v40 = vpop.permute.xlu1 %3977  ;;  %5384 = vrot.lane.b32.xlu0 %v9856_v31, %s9738_s17 }
 0x589   :  { %8876 = vmatpush3.bf16.msra.mxu0 %v3743_v63  ;;  %8877 = vmatprep.mubr.msk.bf16.mxu0 %vm9731_vm0, %v12235_v42  ;;  %v3188_v43 = vmul.f32 %v9583_v61, %v10745_v34  ;;  %v3983_v30 = vsel %vm1326_vm2, %v3978_v40, 0 }
 0x58a   :  { %v3202_v3 = vpack.c.bf16 %v3185_v4, %v3185_v4  ;;  %8887 = vmatprep.subr.bf16.mxu0 %v12235_v42 }
 0x58b   :  { %4375 = vrot.lane.b32.xlu1 %v9863_v32, %s9737_s16 }
 0x58d   :  { %8872 = vmatmul.mubr.msk.bf16.vlgmr.msra.gmra.mrb[120].mxu1 %vm1322_vm4, %v3202_v3 }
 0x58e   :  { %8882 = vmatpush3.bf16.msra.mxu1 %v3791_v47  ;;  %8883 = vmatprep.mubr.msk.bf16.mxu1 %vm9731_vm0, %v12235_v42 }
 0x58f   :  { %v9585_v8 = vpop.eup %9584  ;;  %8893 = vmatprep.subr.bf16.mxu1 %v12235_v42  ;;  %4477 = vrot.lane.b32.xlu1 %v9889_v39, %s9736_s15 }
 0x590   :  { %8878 = vmatmul.mubr.msk.bf16.vlgmr.msra.gmra.mrb[124].mxu0 %vm1322_vm4, %v3203_v58  ;;  %v3187_v28 = vmul.f32 %v9585_v8, %v10753_v16  ;;  %v3205_v16 = vpack.c.bf16 %v3188_v43, %v3188_v43 }
 0x591   :  { %8888 = vmatpush3.bf16.msra.mxu0 %v3839_v9  ;;  %8889 = vmatprep.mubr.msk.bf16.mxu0 %vm9731_vm0, %v12235_v42 }
 0x592   :  { %v3204_v35 = vpack.c.bf16 %v3187_v28, %v3187_v28  ;;  %8899 = vmatprep.subr.bf16.mxu0 %v12235_v42 }
 0x593   :  { %4475 = vrot.lane.b32.xlu1 %v9889_v39, %s9737_s16 }
 0x595   :  { %8884 = vmatmul.mubr.msk.bf16.vlgmr.msra.gmra.mrb[124].mxu1 %vm1322_vm4, %v3204_v35 }
 0x596   :  { %8894 = vmatpush3.bf16.msra.mxu1 %v3887_v22  ;;  %8895 = vmatprep.mubr.msk.bf16.mxu1 %vm9731_vm0, %v12235_v42 }
 0x597   :  { %4577 = vrot.lane.b32.xlu1 %v9913_v45, %s9736_s15  ;;  %8905 = vmatprep.subr.bf16.mxu1 %v12235_v42 }
 0x598   :  { %8890 = vmatmul.mubr.msk.bf16.vlgmr.msra.gmra.mrb[128].mxu0 %vm1322_vm4, %v3205_v16 }
 0x599   :  { %8900 = vmatpush3.bf16.msra.mxu0 %v3935_v15  ;;  %8901 = vmatprep.mubr.msk.bf16.mxu0 %vm9731_vm0, %v12235_v42 }
 0x59a   :  { %8911 = vmatprep.subr.bf16.mxu0 %v12235_v42 }
 0x59b   :  { %4575 = vrot.lane.b32.xlu1 %v9913_v45, %s9737_s16 }
 0x59f   :  { %4677 = vrot.lane.b32.xlu1 %v9937_v51, %s9736_s15 }
 0x5a3   :  { %4675 = vrot.lane.b32.xlu1 %v9937_v51, %s9737_s16 }
 0x5a7   :  { %4777 = vrot.lane.b32.xlu1 %v9954_v55, %s9736_s15 }
 0x5ab   :  { %4775 = vrot.lane.b32.xlu1 %v9954_v55, %s9737_s16 }
 0x5ae   :  { %v3154_v34 = vpop.xlane.xlu0 %3153 }
 0x5af   :  { %9586 = vrcp.f32 %v3154_v34  ;;  %4825 = vrot.lane.b32.xlu1 %v9963_v57, %s9737_s16 }
 0x5b2   :  { %v4028_v33 = vpop.permute.xlu0 %4027 }
 0x5b3   :  { %v4033_v12 = vsel %vm43_vm1, %v4028_v33, 0  ;;  %5144 = vrot.lane.b32.xlu1 %v9808_v20, %s9738_s17 }
 0x5b6   :  { %v4026_v23 = vpop.permute.xlu0 %4025 }
 0x5b7   :  { %5240 = vrot.lane.b32.xlu1 %v9813_v21, %s9738_s17 }
 0x5b9   :  { %v9587_v41 = vpop.eup %9586  ;;  %v3151_v29 = vpop.xlane.xlu1 %3150 }
 0x5ba   :  { %9588 = vrcp.f32 %v3151_v29  ;;  %v3190_v5 = vmul.f32 %v9587_v41, %v10763_v24  ;;  %v4128_v25 = vpop.permute.xlu0 %4127 }
 0x5bb   :  { %v4133_v10 = vsel %vm43_vm1, %v4128_v25, 0  ;;  %5336 = vrot.lane.b32.xlu1 %v9841_v27, %s9738_s17 }
 0x5bc   :  { %v3207_v46 = vpack.c.bf16 %v3190_v5, %v3190_v5 }
 0x5bd   :  { %v4078_v9 = vpop.permute.xlu1 %4077 }
 0x5be   :  { %8902 = vmatmul.mubr.msk.bf16.vlgmr.msra.gmra.mrb[132].mxu0 %vm1322_vm4, %v3207_v46  ;;  %v4126_v11 = vpop.permute.xlu0 %4125  ;;  %v4083_v25 = vsel %vm43_vm1, %v4078_v9, 0 }
 0x5bf   :  { %8912 = vmatpush3.bf16.xpose.msra.mxu0 %v4033_v12  ;;  %8913 = vmatprep.mubr.msk.bf16.mxu0 %vm9731_vm0, %v12235_v42 }
 0x5c0   :  { %8923 = vmatprep.subr.bf16.mxu0 %v12235_v42 }
 0x5c2   :  { %v4228_v60 = vpop.permute.xlu0 %4227 }
 0x5c4   :  { %v9589_v37 = vpop.eup %9588 }
 0x5c5   :  { %v3189_v7 = vmul.f32 %v9589_v37, %v10767_v62  ;;  %v4233_v62 = vsel %vm43_vm1, %v4228_v60, 0 }
 0x5c6   :  { %8914 = vmatmul.mubr.msk.bf16.vlgmr.msra.gmra.mrb[136].mxu0 %vm43_vm1, %v4026_v23  ;;  %v4226_v24 = vpop.permute.xlu0 %4225 }
 0x5c7   :  { %8924 = vmatpush3.bf16.xpose.msra.mxu0 %v4133_v10  ;;  %v3206_v6 = vpack.c.bf16 %v3189_v7, %v3189_v7  ;;  %8925 = vmatprep.mubr.msk.bf16.mxu0 %vm9731_vm0, %v12235_v42 }
 0x5c8   :  { %8935 = vmatprep.subr.bf16.mxu0 %v12235_v42 }
 0x5c9   :  { %8896 = vmatmul.mubr.msk.bf16.vlgmr.msra.gmra.mrb[128].mxu1 %vm1322_vm4, %v3206_v6 }
 0x5ca   :  { %8906 = vmatpush3.bf16.msra.mxu1 %v3983_v30  ;;  %v4328_v48 = vpop.permute.xlu0 %4327  ;;  %8907 = vmatprep.mubr.msk.bf16.mxu1 %vm9731_vm0, %v12235_v42 }
 0x5cb   :  { %8917 = vmatprep.subr.bf16.mxu1 %v12235_v42  ;;  %v4333_v4 = vsel %vm43_vm1, %v4328_v48, 0 }
 0x5ce   :  { %8926 = vmatmul.mubr.msk.bf16.vlgmr.msra.gmra.mrb[140].mxu0 %vm43_vm1, %v4126_v11  ;;  %v4326_v36 = vpop.permute.xlu0 %4325 }
 0x5cf   :  { %8936 = vmatpush3.bf16.xpose.msra.mxu0 %v4233_v62  ;;  %8937 = vmatprep.mubr.msk.bf16.mxu0 %vm9731_vm0, %v12235_v42 }
 0x5d0   :  { %8947 = vmatprep.subr.bf16.mxu0 %v12235_v42 }
 0x5d2   :  { %v4428_v63 = vpop.permute.xlu0 %4427 }
 0x5d3   :  { %v4433_v47 = vsel %vm43_vm1, %v4428_v63, 0 }
 0x5d6   :  { %8938 = vmatmul.mubr.msk.bf16.vlgmr.msra.gmra.mrb[144].mxu0 %vm43_vm1, %v4226_v24  ;;  %v4426_v3 = vpop.permute.xlu0 %4425 }
 0x5d7   :  { %8948 = vmatpush3.bf16.xpose.msra.mxu0 %v4333_v4  ;;  %8949 = vmatprep.mubr.msk.bf16.mxu0 %vm9731_vm0, %v12235_v42 }
 0x5d8   :  { %8959 = vmatprep.subr.bf16.mxu0 %v12235_v42 }
 0x5da   :  { %v4528_v19 = vpop.permute.xlu0 %4527 }
 0x5db   :  { %v4533_v58 = vsel %vm43_vm1, %v4528_v19, 0 }
 0x5de   :  { %8950 = vmatmul.mubr.msk.bf16.vlgmr.msra.gmra.mrb[148].mxu0 %vm43_vm1, %v4326_v36  ;;  %v4526_v61 = vpop.permute.xlu0 %4525 }
 0x5df   :  { %8960 = vmatpush3.bf16.xpose.msra.mxu0 %v4433_v47  ;;  %8961 = vmatprep.mubr.msk.bf16.mxu0 %vm9731_vm0, %v12235_v42 }
 0x5e0   :  { %8971 = vmatprep.subr.bf16.mxu0 %v12235_v42 }
 0x5e2   :  { %v4628_v8 = vpop.permute.xlu0 %4627 }
 0x5e3   :  { %v4633_v35 = vsel %vm43_vm1, %v4628_v8, 0 }
 0x5e6   :  { %8962 = vmatmul.mubr.msk.bf16.vlgmr.msra.gmra.mrb[152].mxu0 %vm43_vm1, %v4426_v3  ;;  %v4626_v28 = vpop.permute.xlu0 %4625 }
 0x5e7   :  { %8972 = vmatpush3.bf16.xpose.msra.mxu0 %v4533_v58  ;;  %8973 = vmatprep.mubr.msk.bf16.mxu0 %vm9731_vm0, %v12235_v42 }
 0x5e8   :  { %8983 = vmatprep.subr.bf16.mxu0 %v12235_v42 }
 0x5ea   :  { %v4728_v22 = vpop.permute.xlu0 %4727 }
 0x5eb   :  { %v4733_v16 = vsel %vm43_vm1, %v4728_v22, 0 }
 0x5ee   :  { %v3157_v43 = vpop.xlane.xlu1 %3156  ;;  %8974 = vmatmul.mubr.msk.bf16.vlgmr.msra.gmra.mrb[156].mxu0 %vm43_vm1, %v4526_v61  ;;  %v4726_v15 = vpop.permute.xlu0 %4725 }
 0x5ef   :  { %9590 = vrcp.f32 %v3157_v43  ;;  %8984 = vmatpush3.bf16.xpose.msra.mxu0 %v4633_v35  ;;  %8985 = vmatprep.mubr.msk.bf16.mxu0 %vm9731_vm0, %v12235_v42 }
 0x5f0   :  { %8995 = vmatprep.subr.bf16.mxu0 %v12235_v42 }
 0x5f2   :  { %v4076_v56 = vpop.permute.xlu1 %4075  ;;  %v4828_v41 = vpop.permute.xlu0 %4827 }
 0x5f3   :  { %v4833_v5 = vsel %vm43_vm1, %v4828_v41, 0 }
 0x5f6   :  { %v4178_v34 = vpop.permute.xlu1 %4177  ;;  %8986 = vmatmul.mubr.msk.bf16.vlgmr.msra.gmra.mrb[160].mxu0 %vm43_vm1, %v4626_v28 }
 0x5f7   :  { %8996 = vmatpush3.bf16.xpose.msra.mxu0 %v4733_v16  ;;  %8997 = vmatprep.mubr.msk.bf16.mxu0 %vm9731_vm0, %v12235_v42  ;;  %v4183_v46 = vsel %vm43_vm1, %v4178_v34, 0 }
 0x5f8   :  { %9007 = vmatprep.subr.bf16.mxu0 %v12235_v42 }
 0x5f9   :  { %v9591_v33 = vpop.eup %9590 }
 0x5fa   :  { %v3191_v40 = vmul.f32 %v9591_v33, %v10805_v1  ;;  %v4176_v23 = vpop.permute.xlu1 %4175 }
 0x5fc   :  { %v3208_v29 = vpack.c.bf16 %v3191_v40, %v3191_v40 }
 0x5fe   :  { %8908 = vmatmul.mubr.msk.bf16.vlgmr.msra.gmra.mrb[132].mxu1 %vm1322_vm4, %v3208_v29  ;;  %v4278_v12 = vpop.permute.xlu1 %4277  ;;  %8998 = vmatmul.mubr.msk.bf16.vlgmr.msra.gmra.mrb[164].mxu0 %vm43_vm1, %v4726_v15 }
 0x5ff   :  { %8918 = vmatpush3.bf16.xpose.msra.mxu1 %v4083_v25  ;;  %8919 = vmatprep.mubr.msk.bf16.mxu1 %vm9731_vm0, %v12235_v42  ;;  %v4283_v37 = vsel %vm43_vm1, %v4278_v12, 0 }
 0x600   :  { %8929 = vmatprep.subr.bf16.mxu1 %v12235_v42  ;;  %9008 = vmatpush3.bf16.xpose.msra.mxu0 %v4833_v5 }
 0x601   :  { %9009 = vmatprep.mubr.msk.bf16.mxu0 %vm9731_vm0, %v12235_v42  ;;  %9019 = vmatprep.subr.bf16.mxu0 %v12235_v42 }
 0x602   :  { %v4276_v1 = vpop.permute.xlu1 %4275 }
 0x606   :  { %8920 = vmatmul.mubr.msk.bf16.vlgmr.msra.gmra.mrb[136].mxu1 %vm43_vm1, %v4076_v56  ;;  %v4378_v11 = vpop.permute.xlu1 %4377 }
 0x607   :  { %8930 = vmatpush3.bf16.xpose.msra.mxu1 %v4183_v46  ;;  %8931 = vmatprep.mubr.msk.bf16.mxu1 %vm9731_vm0, %v12235_v42  ;;  %v4383_v24 = vsel %vm43_vm1, %v4378_v11, 0 }
 0x608   :  { %8941 = vmatprep.subr.bf16.mxu1 %v12235_v42 }
 0x60a   :  { %v4376_v60 = vpop.permute.xlu1 %4375 }
 0x60e   :  { %8932 = vmatmul.mubr.msk.bf16.vlgmr.msra.gmra.mrb[140].mxu1 %vm43_vm1, %v4176_v23  ;;  %v4478_v10 = vpop.permute.xlu1 %4477 }
 0x60f   :  { %8942 = vmatpush3.bf16.xpose.msra.mxu1 %v4283_v37  ;;  %8943 = vmatprep.mubr.msk.bf16.mxu1 %vm9731_vm0, %v12235_v42  ;;  %v4483_v48 = vsel %vm43_vm1, %v4478_v10, 0 }
 0x610   :  { %8953 = vmatprep.subr.bf16.mxu1 %v12235_v42 }
 0x612   :  { %v4476_v7 = vpop.permute.xlu1 %4475 }
 0x616   :  { %8944 = vmatmul.mubr.msk.bf16.vlgmr.msra.gmra.mrb[144].mxu1 %vm43_vm1, %v4276_v1  ;;  %v4578_v6 = vpop.permute.xlu1 %4577 }
 0x617   :  { %8954 = vmatpush3.bf16.xpose.msra.mxu1 %v4383_v24  ;;  %8955 = vmatprep.mubr.msk.bf16.mxu1 %vm9731_vm0, %v12235_v42  ;;  %v4583_v63 = vsel %vm43_vm1, %v4578_v6, 0 }
 0x618   :  { %8965 = vmatprep.subr.bf16.mxu1 %v12235_v42 }
 0x61a   :  { %v4576_v30 = vpop.permute.xlu1 %4575 }
 0x61e   :  { %8956 = vmatmul.mubr.msk.bf16.vlgmr.msra.gmra.mrb[148].mxu1 %vm43_vm1, %v4376_v60  ;;  %v4678_v62 = vpop.permute.xlu1 %4677 }
 0x61f   :  { %8966 = vmatpush3.bf16.xpose.msra.mxu1 %v4483_v48  ;;  %8967 = vmatprep.mubr.msk.bf16.mxu1 %vm9731_vm0, %v12235_v42  ;;  %v4683_v47 = vsel %vm43_vm1, %v4678_v62, 0 }
 0x620   :  { %8977 = vmatprep.subr.bf16.mxu1 %v12235_v42 }
 0x622   :  { %v4676_v36 = vpop.permute.xlu1 %4675 }
 0x626   :  { %8968 = vmatmul.mubr.msk.bf16.vlgmr.msra.gmra.mrb[152].mxu1 %vm43_vm1, %v4476_v7  ;;  %v4778_v4 = vpop.permute.xlu1 %4777 }
 0x627   :  { %8978 = vmatpush3.bf16.xpose.msra.mxu1 %v4583_v63  ;;  %8979 = vmatprep.mubr.msk.bf16.mxu1 %vm9731_vm0, %v12235_v42  ;;  %v4783_v28 = vsel %vm43_vm1, %v4778_v4, 0 }
 0x628   :  { %8989 = vmatprep.subr.bf16.mxu1 %v12235_v42 }
 0x62a   :  { %v4776_v3 = vpop.permute.xlu1 %4775 }
 0x62c   :  { %v11042_v19 = vpop.f32.mrb[104].mxu0 }
 0x62d   :  { %v8819_v61 = vpop.f32.mrb[105].mxu0 }
 0x62e   :  { %v3302_v58 = vpop.f32.mrb[106].mxu0  ;;  %8980 = vmatmul.mubr.msk.bf16.vlgmr.msra.gmra.mrb[156].mxu1 %vm43_vm1, %v4576_v30  ;;  %v4826_v8 = vpop.permute.xlu1 %4825 }
 0x62f   :  { %v8820_v9 = vpop.f32.mrb[107].mxu0  ;;  %9010 = vmatmul.mubr.msk.bf16.vlgmr.msra.gmra.mrb[168].mxu0 %vm43_vm1, %v4826_v8  ;;  %8990 = vmatpush3.bf16.xpose.msra.mxu1 %v4683_v47 }
 0x630   :  { %8991 = vmatprep.mubr.msk.bf16.mxu1 %vm9731_vm0, %v12235_v42  ;;  %9001 = vmatprep.subr.bf16.mxu1 %v12235_v42 }
 0x631   :  { %9021 = vmatprep.mubr.msk.bf16.mxu0 %vm9731_vm0, %v12235_v42 }
 0x632   :  { %v5145_v41 = vpop.permute.xlu1 %5144 }
 0x636   :  { %8992 = vmatmul.mubr.msk.bf16.vlgmr.msra.gmra.mrb[160].mxu1 %vm43_vm1, %v4676_v36 }
 0x637   :  { %v11054_v35 = vpop.f32.mrb[100].mxu1  ;;  %9002 = vmatpush3.bf16.xpose.msra.mxu1 %v4783_v28  ;;  %9003 = vmatprep.mubr.msk.bf16.mxu1 %vm9731_vm0, %v12235_v42 }
 0x638   :  { %v8813_v22 = vpop.f32.mrb[101].mxu1  ;;  %9013 = vmatprep.subr.bf16.mxu1 %v12235_v42 }
 0x639   :  { %v3254_v56 = vpop.f32.mrb[102].mxu1 }
 0x63a   :  { %v8814_v16 = vpop.f32.mrb[103].mxu1 }
 0x63b   :  { %v11061_v15 = vpop.f32.mrb[108].mxu0 }
 0x63c   :  { %v8831_v34 = vpop.f32.mrb[109].mxu0 }
 0x63d   :  { %v3398_v33 = vpop.f32.mrb[110].mxu0 }
 0x63e   :  { %v8832_v40 = vpop.f32.mrb[111].mxu0  ;;  %9004 = vmatmul.mubr.msk.bf16.vlgmr.msra.gmra.mrb[164].mxu1 %vm43_vm1, %v4776_v3 }
 0x63f   :  { %9015 = vmatprep.mubr.msk.bf16.mxu1 %vm9731_vm0, %v12235_v42 }
 0x640   :  { %v11066_v23 = vpop.f32.mrb[104].mxu1 }
 0x641   :  { %12236 = vst [vmem:[#allocation19_spill] sm:$0xff] %v11066_v23  ;;  %v8825_v29 = vpop.f32.mrb[105].mxu1 }
 0x642   :  { %v3350_v5 = vpop.f32.mrb[106].mxu1 }
 0x643   :  { %v8826_v25 = vpop.f32.mrb[107].mxu1  ;;  %v11070_v12 = vpop.f32.mrb[112].mxu0 }
 0x644   :  { %v8843_v1 = vpop.f32.mrb[113].mxu0 }
 0x645   :  { %v3494_v46 = vpop.f32.mrb[114].mxu0 }
 0x646   :  { %v8844_v11 = vpop.f32.mrb[115].mxu0 }
 0x648   :  { %v11072_v60 = vpop.f32.mrb[108].mxu1 }
 0x649   :  { %v8837_v10 = vpop.f32.mrb[109].mxu1 }
 0x64a   :  { %v3446_v7 = vpop.f32.mrb[110].mxu1 }
 0x64b   :  { %v8838_v24 = vpop.f32.mrb[111].mxu1 }
 0x650   :  { %v11076_v6 = vpop.f32.mrb[112].mxu1 }
 0x651   :  { %12237 = vst [vmem:[#allocation20_spill] sm:$0xff] %v11076_v6  ;;  %v8849_v30 = vpop.f32.mrb[113].mxu1 }
 0x652   :  { %v3542_v48 = vpop.f32.mrb[114].mxu1 }
 0x653   :  { %v8850_v62 = vpop.f32.mrb[115].mxu1  ;;  %v11078_v36 = vpop.f32.mrb[116].mxu0 }
 0x654   :  { %12238 = vst [vmem:[#allocation21_spill] sm:$0xff] %v11078_v36  ;;  %v8855_v4 = vpop.f32.mrb[117].mxu0 }
 0x655   :  { %v3590_v3 = vpop.f32.mrb[118].mxu0 }
 0x656   :  { %v8856_v47 = vpop.f32.mrb[119].mxu0 }
 0x658   :  { %v11082_v61 = vpop.f32.mrb[116].mxu1 }
 0x659   :  { %v8861_v58 = vpop.f32.mrb[117].mxu1 }
 0x65a   :  { %v3638_v8 = vpop.f32.mrb[118].mxu1 }
 0x65b   :  { %v8862_v9 = vpop.f32.mrb[119].mxu1  ;;  %v11084_v28 = vpop.f32.mrb[120].mxu0 }
 0x65c   :  { %v8867_v56 = vpop.f32.mrb[121].mxu0  ;;  %v5097_v8 = vpop.permute.xlu0 %5096 }
 0x65d   :  { %v3686_v16 = vpop.f32.mrb[122].mxu0  ;;  %v5102_v9 = vsel %vm1326_vm2, %v5097_v8, 0 }
 0x65e   :  { %v8868_v34 = vpop.f32.mrb[123].mxu0  ;;  %9014 = vmatpush3.bf16.msra.mxu1 %v5102_v9 }
 0x65f   :  { %9025 = vmatprep.subr.bf16.mxu1 %v12235_v42 }
 0x660   :  { %v11088_v33 = vpop.f32.mrb[120].mxu1 }
 0x661   :  { %12239 = vst [vmem:[#allocation22_spill] sm:$0xff] %v11088_v33  ;;  %v8873_v40 = vpop.f32.mrb[121].mxu1 }
 0x662   :  { %v3734_v29 = vpop.f32.mrb[122].mxu1 }
 0x663   :  { %v8874_v5 = vpop.f32.mrb[123].mxu1  ;;  %v11090_v25 = vpop.f32.mrb[124].mxu0 }
 0x664   :  { %12240 = vst [vmem:[#allocation23_spill] sm:$0xff] %v11090_v25  ;;  %v8879_v46 = vpop.f32.mrb[125].mxu0 }
 0x665   :  { %v3782_v11 = vpop.f32.mrb[126].mxu0 }
 0x666   :  { %v8880_v10 = vpop.f32.mrb[127].mxu0 }
 0x668   :  { %v11094_v7 = vpop.f32.mrb[124].mxu1 }
 0x669   :  { %v8885_v24 = vpop.f32.mrb[125].mxu1 }
 0x66a   :  { %v3830_v30 = vpop.f32.mrb[126].mxu1 }
 0x66b   :  { %v8886_v48 = vpop.f32.mrb[127].mxu1  ;;  %v11096_v62 = vpop.f32.mrb[128].mxu0 }
 0x66c   :  { %v8891_v3 = vpop.f32.mrb[129].mxu0 }
 0x66d   :  { %v3878_v47 = vpop.f32.mrb[130].mxu0 }
 0x66e   :  { %v8892_v58 = vpop.f32.mrb[131].mxu0 }
 0x691   :  { %v11102_v56 = vpop.f32.mrb[132].mxu0 }
 0x692   :  { %12241 = vst [vmem:[#allocation24_spill] sm:$0xff] %v11102_v56  ;;  %v8903_v16 = vpop.f32.mrb[133].mxu0 }
 0x693   :  { %v3974_v34 = vpop.f32.mrb[134].mxu0 }
 0x694   :  { %v8904_v40 = vpop.f32.mrb[135].mxu0 }
 0x699   :  { %v4069_v29 = vpop.f32.mrb[136].mxu0 }
 0x69a   :  { %v11104_v5 = vmul.f32 0.35355338, %v4069_v29  ;;  %v8915_v46 = vpop.f32.mrb[137].mxu0 }
 0x69b   :  { %v4072_v11 = vpop.f32.mrb[138].mxu0 }
 0x69c   :  { %v11106_v10 = vpop.f32.mrb[128].mxu1  ;;  %v4892_v24 = vsel %vm1115_vm3, %v11104_v5, -inf  ;;  %v8916_v30 = vpop.f32.mrb[139].mxu0 }
 0x69d   :  { %12242 = vst [vmem:[#allocation25_spill] sm:$0xff] %v11106_v10  ;;  %v8897_v3 = vpop.f32.mrb[129].mxu1  ;;  %4893 = vmax.xlane.f32.xlu0 %v4892_v24  ;;  %v11168_v10 = vpop.permute.xlu0 %5192 }
 0x69e   :  { %v3926_v47 = vpop.f32.mrb[130].mxu1  ;;  %v5198_v23 = vsel %vm1326_vm2, %v11168_v10, 0 }
 0x69f   :  { %v8898_v58 = vpop.f32.mrb[131].mxu1 }
 0x6a1   :  { %v4169_v8 = vpop.f32.mrb[140].mxu0 }
 0x6a2   :  { %v11112_v9 = vmul.f32 0.35355338, %v4169_v8  ;;  %v8927_v16 = vpop.f32.mrb[141].mxu0 }
 0x6a3   :  { %v4172_v34 = vpop.f32.mrb[142].mxu0  ;;  %v5150_v16 = vsel %vm1326_vm2, %v5145_v41, 0 }
 0x6a4   :  { %v4898_v40 = vsel %vm1115_vm3, %v11112_v9, -inf  ;;  %v8928_v29 = vpop.f32.mrb[143].mxu0  ;;  %9020 = vmatpush3.bf16.msra.mxu0 %v5150_v16 }
 0x6a5   :  { %4899 = vmax.xlane.f32.xlu0 %v4898_v40  ;;  %9031 = vmatprep.subr.bf16.mxu0 %v12235_v42 }
 0x6a9   :  { %v4269_v46 = vpop.f32.mrb[144].mxu0 }
 0x6aa   :  { %v8939_v11 = vpop.f32.mrb[145].mxu0 }
 0x6ab   :  { %v4272_v30 = vpop.f32.mrb[146].mxu0 }
 0x6ac   :  { %v8940_v1 = vpop.f32.mrb[147].mxu0 }
 0x6b1   :  { %v4369_v63 = vpop.f32.mrb[148].mxu0 }
 0x6b2   :  { %v8951_v48 = vpop.f32.mrb[149].mxu0 }
 0x6b3   :  { %v4372_v3 = vpop.f32.mrb[150].mxu0 }
 0x6b4   :  { %v8952_v24 = vpop.f32.mrb[151].mxu0 }
 0x6b9   :  { %v4469_v47 = vpop.f32.mrb[152].mxu0 }
 0x6ba   :  { %v8963_v58 = vpop.f32.mrb[153].mxu0 }
 0x6bb   :  { %v4472_v8 = vpop.f32.mrb[154].mxu0 }
 0x6bc   :  { %v8964_v34 = vpop.f32.mrb[155].mxu0 }
 0x6c1   :  { %v4569_v29 = vpop.f32.mrb[156].mxu0 }
 0x6c2   :  { %v8975_v40 = vpop.f32.mrb[157].mxu0 }
 0x6c3   :  { %v4572_v4 = vpop.f32.mrb[158].mxu0 }
 0x6c4   :  { %v8976_v11 = vpop.f32.mrb[159].mxu0  ;;  %v11124_v4 = vmul.f32 0.35355338, %v4269_v46 }
 0x6c9   :  { %v4669_v30 = vpop.f32.mrb[160].mxu0 }
 0x6ca   :  { %v8987_v1 = vpop.f32.mrb[161].mxu0 }
 0x6cb   :  { %v4672_v22 = vpop.f32.mrb[162].mxu0 }
 0x6cc   :  { %v8988_v48 = vpop.f32.mrb[163].mxu0 }
 0x6cd   :  { %v4904_v48 = vsel %vm1115_vm3, %v11124_v4, -inf }
 0x6d1   :  { %v11118_v3 = vpop.f32.mrb[132].mxu1  ;;  %v11120_v24 = vpop.f32.mrb[164].mxu0 }
 0x6d2   :  { %v8909_v58 = vpop.f32.mrb[133].mxu1  ;;  %v8999_v8 = vpop.f32.mrb[165].mxu0 }
 0x6d3   :  { %v4022_v37 = vpop.f32.mrb[134].mxu1  ;;  %v4772_v41 = vpop.f32.mrb[166].mxu0  ;;  %v11130_v58 = vmul.f32 0.35355338, %v4369_v63 }
 0x6d4   :  { %v8910_v34 = vpop.f32.mrb[135].mxu1  ;;  %v9000_v16 = vpop.f32.mrb[167].mxu0  ;;  %v11136_v41 = vmul.f32 0.35355338, %v4469_v47 }
 0x6d5   :  { %v4910_v46 = vsel %vm1115_vm3, %v11130_v58, -inf }
 0x6d6   :  { %v4916_v63 = vsel %vm1115_vm3, %v11136_v41, -inf }
 0x6d9   :  { %v4119_v43 = vpop.f32.mrb[136].mxu1 }
 0x6da   :  { %v11122_v53 = vmul.f32 0.35355338, %v4119_v43  ;;  %v8921_v40 = vpop.f32.mrb[137].mxu1 }
 0x6db   :  { %v4122_v11 = vpop.f32.mrb[138].mxu1 }
 0x6dc   :  { %v8922_v1 = vpop.f32.mrb[139].mxu1  ;;  %v4895_v22 = vsel %vm1115_vm3, %v11122_v53, -inf  ;;  %v11142_v11 = vmul.f32 0.35355338, %v4569_v29 }
 0x6dd   :  { %4896 = vmax.xlane.f32.xlu1 %v4895_v22 }
 0x6de   :  { %v4922_v47 = vsel %vm1115_vm3, %v11142_v11, -inf }
 0x6e1   :  { %v4219_v37 = vpop.f32.mrb[140].mxu1  ;;  %4905 = vmax.xlane.f32.xlu1 %v4904_v48 }
 0x6e2   :  { %v11132_v8 = vmul.f32 0.35355338, %v4219_v37  ;;  %v8933_v43 = vpop.f32.mrb[141].mxu1  ;;  %v11148_v37 = vmul.f32 0.35355338, %v4669_v30 }
 0x6e3   :  { %v4222_v34 = vpop.f32.mrb[142].mxu1 }
 0x6e4   :  { %v8934_v16 = vpop.f32.mrb[143].mxu1  ;;  %v4901_v40 = vsel %vm1115_vm3, %v11132_v8, -inf  ;;  %v4928_v29 = vsel %vm1115_vm3, %v11148_v37, -inf }
 0x6e5   :  { %4902 = vmax.xlane.f32.xlu0 %v4901_v40  ;;  %4911 = vmax.xlane.f32.xlu1 %v4910_v46 }
 0x6e9   :  { %v4319_v1 = vpop.f32.mrb[144].mxu1  ;;  %4917 = vmax.xlane.f32.xlu1 %v4916_v63 }
 0x6ea   :  { %v11144_v22 = vmul.f32 0.35355338, %v4319_v1  ;;  %v8945_v48 = vpop.f32.mrb[145].mxu1 }
 0x6eb   :  { %v4322_v43 = vpop.f32.mrb[146].mxu1 }
 0x6ec   :  { %v8946_v34 = vpop.f32.mrb[147].mxu1  ;;  %v4907_v46 = vsel %vm1115_vm3, %v11144_v22, -inf }
 0x6ed   :  { %4908 = vmax.xlane.f32.xlu0 %v4907_v46  ;;  %4923 = vmax.xlane.f32.xlu1 %v4922_v47 }
 0x6f1   :  { %v4419_v16 = vpop.f32.mrb[148].mxu1  ;;  %4929 = vmax.xlane.f32.xlu1 %v4928_v29 }
 0x6f2   :  { %v11154_v40 = vmul.f32 0.35355338, %v4419_v16  ;;  %v8957_v63 = vpop.f32.mrb[149].mxu1 }
 0x6f3   :  { %v4422_v1 = vpop.f32.mrb[150].mxu1 }
 0x6f4   :  { %v8958_v48 = vpop.f32.mrb[151].mxu1  ;;  %v4913_v30 = vsel %vm1115_vm3, %v11154_v40, -inf }
 0x6f5   :  { %4914 = vmax.xlane.f32.xlu0 %v4913_v30 }
 0x6f9   :  { %v4519_v43 = vpop.f32.mrb[152].mxu1 }
 0x6fa   :  { %v11158_v34 = vmul.f32 0.35355338, %v4519_v43  ;;  %v8969_v49 = vpop.f32.mrb[153].mxu1 }
 0x6fb   :  { %v4522_v46 = vpop.f32.mrb[154].mxu1 }
 0x6fc   :  { %v8970_v47 = vpop.f32.mrb[155].mxu1  ;;  %v4919_v52 = vsel %vm1115_vm3, %v11158_v34, -inf }
 0x6fd   :  { %4920 = vmax.xlane.f32.xlu0 %v4919_v52 }
 0x701   :  { %v4619_v29 = vpop.f32.mrb[156].mxu1 }
 0x702   :  { %v11162_v16 = vmul.f32 0.35355338, %v4619_v29  ;;  %v8981_v63 = vpop.f32.mrb[157].mxu1  ;;  %5432 = vrot.lane.b32.xlu1 %v9863_v32, %s9738_s17  ;;  %v4869_v1 = vpop.f32.mrb[168].mxu0 }
 0x703   :  { %v4622_v48 = vpop.f32.mrb[158].mxu1  ;;  %v9011_v30 = vpop.f32.mrb[169].mxu0 }
 0x704   :  { %v8982_v2 = vpop.f32.mrb[159].mxu1  ;;  %v4925_v49 = vsel %vm1115_vm3, %v11162_v16, -inf  ;;  %v4872_v43 = vpop.f32.mrb[170].mxu0  ;;  %v11175_v48 = vmul.f32 0.35355338, %v11120_v24 }
 0x705   :  { %4926 = vmax.xlane.f32.xlu0 %v4925_v49  ;;  %v9012_v46 = vpop.f32.mrb[171].mxu0  ;;  %v11172_v2 = vpop.permute.xlu0 %5288 }
 0x706   :  { %v4934_v30 = vsel %vm1115_vm3, %v11175_v48, -inf }
 0x709   :  { %v4719_v47 = vpop.f32.mrb[160].mxu1 }
 0x70a   :  { %v8993_v14 = vpop.f32.mrb[161].mxu1 }
 0x70b   :  { %v4722_v52 = vpop.f32.mrb[162].mxu1  ;;  %v11179_v14 = vmul.f32 0.35355338, %v4869_v1 }
 0x70c   :  { %v8994_v13 = vpop.f32.mrb[163].mxu1  ;;  %v11187_v52 = vmul.f32 0.35355338, %v4719_v47 }
 0x70d   :  { %v11181_v13 = vpop.permute.xlu0 %5384 }
 0x711   :  { %v4819_v29 = vpop.f32.mrb[164].mxu1 }
 0x712   :  { %v9005_v0 = vpop.f32.mrb[165].mxu1  ;;  %v11189_v1 = vmul.f32 0.35355338, %v4819_v29  ;;  %v11203_v29 = vpop.permute.xlu1 %5240 }
 0x713   :  { %v4822_v63 = vpop.f32.mrb[166].mxu1  ;;  %v4940_v0 = vsel %vm1115_vm3, %v11179_v14, -inf }
 0x714   :  { %v9006_v59 = vpop.f32.mrb[167].mxu1 }
 0x71b   :  { %5480 = vrot.lane.b32.xlu0 %v9886_v38, %s9738_s17 }
 0x726   :  { %4935 = vmax.xlane.f32.xlu1 %v4934_v30  ;;  %v4931_v30 = vsel %vm1115_vm3, %v11187_v52, -inf }
 0x72a   :  { %4941 = vmax.xlane.f32.xlu1 %v4940_v0  ;;  %v4894_v59 = vpop.xlane.xlu0 %4893  ;;  %v4937_v0 = vsel %vm1115_vm3, %v11189_v1, -inf }
 0x72b   :  { %v4943_v49 = vsub.f32 %v11104_v5, %v4894_v59  ;;  %v11205_v59 = vpop.permute.xlu1 %5336 }
 0x72d   :  { %v4960_v43 = vmul.f32 1.442695, %v4943_v49 }
 0x72f   :  { %9592 = vpow2.f32 %v4960_v43 }
 0x732   :  { %v4900_v46 = vpop.xlane.xlu0 %4899 }
 0x733   :  { %v4945_v24 = vsub.f32 %v11112_v9, %v4900_v46 }
 0x735   :  { %v4964_v63 = vmul.f32 1.442695, %v4945_v24 }
 0x737   :  { %9594 = vpow2.f32 %v4964_v63 }
 0x739   :  { %v11195_v56 = vpop.eup %9592 }
 0x73a   :  { %4932 = vmax.xlane.f32.xlu0 %v4931_v30  ;;  %v4994_v5 = vsel %vm1115_vm3, %v11195_v56, 0.0 }
 0x73e   :  { %4938 = vmax.xlane.f32.xlu0 %v4937_v0 }
 0x741   :  { %v11199_v9 = vpop.eup %9594 }
 0x742   :  { %4995 = vadd.xlane.f32.xlu0 %v4994_v5  ;;  %v5000_v47 = vsel %vm1115_vm3, %v11199_v9, 0.0 }
 0x746   :  { %5001 = vadd.xlane.f32.xlu0 %v5000_v47 }
 0x76a   :  { %v4897_v49 = vpop.xlane.xlu1 %4896 }
 0x76b   :  { %v4944_v43 = vsub.f32 %v11122_v53, %v4897_v49 }
 0x76d   :  { %v4962_v46 = vmul.f32 1.442695, %v4944_v43 }
 0x76e   :  { %v4906_v24 = vpop.xlane.xlu1 %4905 }
 0x76f   :  { %9596 = vpow2.f32 %v4962_v46  ;;  %v4947_v63 = vsub.f32 %v11124_v4, %v4906_v24 }
 0x771   :  { %v4968_v30 = vmul.f32 1.442695, %v4947_v63 }
 0x772   :  { %v4912_v0 = vpop.xlane.xlu1 %4911  ;;  %v4903_v33 = vpop.xlane.xlu0 %4902 }
 0x773   :  { %9598 = vpow2.f32 %v4968_v30  ;;  %v4949_v5 = vsub.f32 %v11130_v58, %v4912_v0  ;;  %v4946_v47 = vsub.f32 %v11132_v8, %v4903_v33 }
 0x775   :  { %v4972_v25 = vmul.f32 1.442695, %v4949_v5  ;;  %v4966_v6 = vmul.f32 1.442695, %v4946_v47 }
 0x776   :  { %v4918_v53 = vpop.xlane.xlu1 %4917 }
 0x777   :  { %9600 = vpow2.f32 %v4972_v25  ;;  %v4951_v25 = vsub.f32 %v11136_v41, %v4918_v53 }
 0x778   :  { %9602 = vpow2.f32 %v4966_v6 }
 0x779   :  { %v11211_v36 = vpop.eup %9596  ;;  %v4976_v5 = vmul.f32 1.442695, %v4951_v25 }
 0x77a   :  { %v4909_v49 = vpop.xlane.xlu0 %4908  ;;  %v4997_v43 = vsel %vm1115_vm3, %v11211_v36, 0.0  ;;  %v4924_v58 = vpop.xlane.xlu1 %4923 }
 0x77b   :  { %v4948_v4 = vsub.f32 %v11144_v22, %v4909_v49  ;;  %4998 = vadd.xlane.f32.xlu1 %v4997_v43  ;;  %v4953_v47 = vsub.f32 %v11142_v11, %v4924_v58 }
 0x77d   :  { %v11216_v46 = vpop.eup %9598  ;;  %v4970_v24 = vmul.f32 1.442695, %v4948_v4  ;;  %v4980_v41 = vmul.f32 1.442695, %v4953_v47 }
 0x77e   :  { %v5006_v33 = vsel %vm1115_vm3, %v11216_v46, 0.0  ;;  %v4930_v43 = vpop.xlane.xlu1 %4929 }
 0x77f   :  { %5007 = vadd.xlane.f32.xlu0 %v5006_v33  ;;  %9604 = vpow2.f32 %v4970_v24  ;;  %v4955_v53 = vsub.f32 %v11148_v37, %v4930_v43 }
 0x781   :  { %v11220_v6 = vpop.eup %9600  ;;  %v4984_v25 = vmul.f32 1.442695, %v4955_v53 }
 0x782   :  { %v11223_v8 = vpop.eup %9602  ;;  %v4915_v63 = vpop.xlane.xlu0 %4914  ;;  %v5012_v22 = vsel %vm1115_vm3, %v11220_v6, 0.0 }
 0x783   :  { %v4950_v30 = vsub.f32 %v11154_v40, %v4915_v63  ;;  %5013 = vadd.xlane.f32.xlu0 %v5012_v22  ;;  %v5003_v0 = vsel %vm1115_vm3, %v11223_v8, 0.0 }
 0x784   :  { %5004 = vadd.xlane.f32.xlu1 %v5003_v0 }
 0x785   :  { %v4974_v49 = vmul.f32 1.442695, %v4950_v30 }
 0x787   :  { %9606 = vpow2.f32 %v4974_v49 }
 0x788   :  { %9608 = vpow2.f32 %v4976_v5 }
 0x789   :  { %v11232_v4 = vpop.eup %9604  ;;  %9610 = vpow2.f32 %v4980_v41 }
 0x78a   :  { %v4921_v24 = vpop.xlane.xlu0 %4920  ;;  %v5009_v33 = vsel %vm1115_vm3, %v11232_v4, 0.0 }
 0x78b   :  { %v4952_v40 = vsub.f32 %v11158_v34, %v4921_v24  ;;  %5010 = vadd.xlane.f32.xlu1 %v5009_v33 }
 0x78d   :  { %v4978_v63 = vmul.f32 1.442695, %v4952_v40  ;;  %v11264_v40 = vpop.permute.xlu1 %5432 }
 0x78f   :  { %9612 = vpow2.f32 %v4978_v63 }
 0x790   :  { %9614 = vpow2.f32 %v4984_v25 }
 0x791   :  { %v11237_v11 = vpop.eup %9606 }
 0x792   :  { %v4927_v58 = vpop.xlane.xlu0 %4926  ;;  %v5015_v37 = vsel %vm1115_vm3, %v11237_v11, 0.0  ;;  %v11241_v22 = vpop.eup %9608 }
 0x793   :  { %v4954_v30 = vsub.f32 %v11162_v16, %v4927_v58  ;;  %5016 = vadd.xlane.f32.xlu1 %v5015_v37  ;;  %v5018_v0 = vsel %vm1115_vm3, %v11241_v22, 0.0  ;;  %v11246_v5 = vpop.eup %9610 }
 0x794   :  { %v5024_v49 = vsel %vm1115_vm3, %v11246_v5, 0.0 }
 0x795   :  { %v4982_v34 = vmul.f32 1.442695, %v4954_v30 }
 0x796   :  { %v11274_v30 = vpop.permute.xlu0 %5480 }
 0x797   :  { %9616 = vpow2.f32 %v4982_v34  ;;  %5019 = vadd.xlane.f32.xlu1 %v5018_v0 }
 0x799   :  { %v11248_v47 = vpop.eup %9612 }
 0x79a   :  { %v5021_v43 = vsel %vm1115_vm3, %v11248_v47, 0.0  ;;  %v11254_v41 = vpop.eup %9614 }
 0x79b   :  { %5025 = vadd.xlane.f32.xlu1 %v5024_v49  ;;  %5022 = vadd.xlane.f32.xlu0 %v5021_v43  ;;  %v5030_v16 = vsel %vm1115_vm3, %v11254_v41, 0.0 }
 0x79f   :  { %5031 = vadd.xlane.f32.xlu1 %v5030_v16 }
 0x7a1   :  { %v11258_v53 = vpop.eup %9616 }
 0x7a2   :  { %v5027_v24 = vsel %vm1115_vm3, %v11258_v53, 0.0 }
 0x7a3   :  { %5028 = vadd.xlane.f32.xlu0 %v5027_v24 }
 0x7b0   :  { %5528 = vrot.lane.b32.xlu1 %v9889_v39, %s9738_s17 }
 0x7b3   :  { %v4936_v33 = vpop.xlane.xlu1 %4935 }
 0x7b4   :  { %v4957_v25 = vsub.f32 %v11175_v48, %v4936_v33 }
 0x7b6   :  { %v4988_v58 = vmul.f32 1.442695, %v4957_v25 }
 0x7b7   :  { %v4942_v63 = vpop.xlane.xlu1 %4941 }
 0x7b8   :  { %v4959_v37 = vsub.f32 %v11179_v14, %v4942_v63  ;;  %9618 = vpow2.f32 %v4988_v58 }
 0x7b9   :  { %5576 = vrot.lane.b32.xlu0 %v9910_v44, %s9738_s17 }
 0x7ba   :  { %v4992_v34 = vmul.f32 1.442695, %v4959_v37 }
 0x7bc   :  { %9620 = vpow2.f32 %v4992_v34 }
 0x7bd   :  { %5624 = vrot.lane.b32.xlu0 %v9913_v45, %s9738_s17 }
 0x7c1   :  { %5720 = vrot.lane.b32.xlu0 %v9937_v51, %s9738_s17 }
 0x7c2   :  { %v11282_v43 = vpop.eup %9618 }
 0x7c3   :  { %v5036_v16 = vsel %vm1115_vm3, %v11282_v43, 0.0 }
 0x7c5   :  { %5672 = vrot.lane.b32.xlu0 %v9934_v50, %s9738_s17 }
 0x7c6   :  { %v11288_v24 = vpop.eup %9620 }
 0x7c7   :  { %v4933_v0 = vpop.xlane.xlu0 %4932  ;;  %v5042_v33 = vsel %vm1115_vm3, %v11288_v24, 0.0 }
 0x7c8   :  { %v4956_v25 = vsub.f32 %v11187_v52, %v4933_v0 }
 0x7c9   :  { %5816 = vrot.lane.b32.xlu0 %v9954_v55, %s9738_s17 }
 0x7ca   :  { %v4986_v37 = vmul.f32 1.442695, %v4956_v25 }
 0x7cb   :  { %v4939_v48 = vpop.xlane.xlu0 %4938 }
 0x7cd   :  { %5768 = vrot.lane.b32.xlu0 %v9951_v54, %s9738_s17 }
 0x7cf   :  { %v4996_v49 = vpop.xlane.xlu0 %4995 }
 0x7d0   :  { %9622 = vrcp.f32 %v4996_v49 }
 0x7d1   :  { %5864 = vrot.lane.b32.xlu0 %v9963_v57, %s9738_s17 }
 0x7d3   :  { %v5002_v14 = vpop.xlane.xlu0 %5001 }
 0x7d4   :  { %5037 = vadd.xlane.f32.xlu1 %v5036_v16  ;;  %9624 = vrcp.f32 %v5002_v14  ;;  %v4958_v14 = vsub.f32 %v11189_v1, %v4939_v48  ;;  %v5246_v1 = vsel %vm1326_vm2, %v11203_v29, 0  ;;  %v5390_v29 = vsel %vm1326_vm2, %v11181_v13, 0 }
 0x7d5   :  { %9626 = vpow2.f32 %v4986_v37  ;;  %v5342_v13 = vsel %vm1326_vm2, %v11205_v59, 0 }
 0x7d8   :  { %5043 = vadd.xlane.f32.xlu1 %v5042_v33 }
 0x7da   :  { %v9623_v63 = vpop.eup %9622 }
 0x7db   :  { %v5062_v58 = vmul.f32 %v9623_v63, %v11195_v56  ;;  %v5294_v56 = vsel %vm1326_vm2, %v11172_v2, 0  ;;  %v4990_v63 = vmul.f32 1.442695, %v4958_v14  ;;  %v5486_v14 = vsel %vm1326_vm2, %v11274_v30, 0 }
 0x7dc   :  { %v5438_v30 = vsel %vm1326_vm2, %v11264_v40, 0 }
 0x7dd   :  { %v5079_v34 = vpack.c.bf16 %v5062_v58, %v5062_v58 }
 0x7de   :  { %v9625_v49 = vpop.eup %9624 }
 0x7df   :  { %9016 = vmatmul.mubr.msk.bf16.vlgmr.msra.gmra.mrb[168].mxu1 %vm1322_vm4, %v5079_v34  ;;  %v5064_v52 = vmul.f32 %v9625_v49, %v11199_v9 }
 0x7e0   :  { %9026 = vmatpush3.bf16.msra.mxu1 %v5198_v23  ;;  %9027 = vmatprep.mubr.msk.bf16.mxu1 %vm9731_vm0, %v12235_v42  ;;  %v11309_v23 = vpop.eup %9626 }
 0x7e1   :  { %9037 = vmatprep.subr.bf16.mxu1 %v12235_v42  ;;  %v5081_v0 = vpack.c.bf16 %v5064_v52, %v5064_v52  ;;  %v5033_v10 = vsel %vm1115_vm3, %v11309_v23, 0.0 }
 0x7e7   :  { %9028 = vmatmul.mubr.msk.bf16.vlgmr.msra.gmra.mrb[172].mxu1 %vm1322_vm4, %v5081_v0 }
 0x7e8   :  { %9038 = vmatpush3.bf16.msra.mxu1 %v5294_v56  ;;  %9039 = vmatprep.mubr.msk.bf16.mxu1 %vm9731_vm0, %v12235_v42 }
 0x7e9   :  { %9049 = vmatprep.subr.bf16.mxu1 %v12235_v42  ;;  %5964 = vrot.lane.b32.xlu1 %v9808_v20, %s9739_s18 }
 0x7ed   :  { %6114 = vrot.lane.b32.xlu1 %v9838_v26, %s9739_s18 }
 0x7f0   :  { %5034 = vadd.xlane.f32.xlu0 %v5033_v10 }
 0x7f1   :  { %6112 = vrot.lane.b32.xlu1 %v9838_v26, %s9740_s19 }
 0x7f5   :  { %6214 = vrot.lane.b32.xlu1 %v9856_v31, %s9739_s18 }
 0x7f9   :  { %6212 = vrot.lane.b32.xlu1 %v9856_v31, %s9740_s19 }
 0x7fd   :  { %6314 = vrot.lane.b32.xlu1 %v9886_v38, %s9739_s18 }
 0x801   :  { %6312 = vrot.lane.b32.xlu1 %v9886_v38, %s9740_s19 }
 0x805   :  { %6414 = vrot.lane.b32.xlu1 %v9910_v44, %s9739_s18 }
 0x806   :  { %5914 = vrot.lane.b32.xlu0 %v9798_v17, %s9739_s18 }
 0x808   :  { %v4999_v2 = vpop.xlane.xlu1 %4998 }
 0x809   :  { %9628 = vrcp.f32 %v4999_v2  ;;  %6412 = vrot.lane.b32.xlu1 %v9910_v44, %s9740_s19 }
 0x80c   :  { %v5008_v9 = vpop.xlane.xlu0 %5007 }
 0x80d   :  { %9630 = vrcp.f32 %v5008_v9  ;;  %6514 = vrot.lane.b32.xlu1 %v9934_v50, %s9739_s18 }
 0x810   :  { %v5014_v16 = vpop.xlane.xlu0 %5013 }
 0x811   :  { %v5005_v33 = vpop.xlane.xlu1 %5004  ;;  %9632 = vrcp.f32 %v5014_v16  ;;  %6512 = vrot.lane.b32.xlu1 %v9934_v50, %s9740_s19 }
 0x812   :  { %9634 = vrcp.f32 %v5005_v33 }
 0x813   :  { %v9629_v25 = vpop.eup %9628  ;;  %9636 = vpow2.f32 %v4990_v63 }
 0x814   :  { %v5063_v58 = vmul.f32 %v9629_v25, %v11211_v36 }
 0x815   :  { %6614 = vrot.lane.b32.xlu1 %v9951_v54, %s9739_s18 }
 0x816   :  { %v5080_v37 = vpack.c.bf16 %v5063_v58, %v5063_v58 }
 0x817   :  { %v9631_v34 = vpop.eup %9630 }
 0x818   :  { %9022 = vmatmul.mubr.msk.bf16.vlgmr.msra.gmra.mrb[172].mxu0 %vm1322_vm4, %v5080_v37  ;;  %v5066_v48 = vmul.f32 %v9631_v34, %v11216_v46  ;;  %v5011_v49 = vpop.xlane.xlu1 %5010 }
 0x819   :  { %9032 = vmatpush3.bf16.msra.mxu0 %v5246_v1  ;;  %9033 = vmatprep.mubr.msk.bf16.mxu0 %vm9731_vm0, %v12235_v42  ;;  %9638 = vrcp.f32 %v5011_v49 }
 0x81a   :  { %v5083_v36 = vpack.c.bf16 %v5066_v48, %v5066_v48  ;;  %9043 = vmatprep.subr.bf16.mxu0 %v12235_v42  ;;  %6612 = vrot.lane.b32.xlu1 %v9951_v54, %s9740_s19 }
 0x81b   :  { %v9633_v52 = vpop.eup %9632 }
 0x81c   :  { %v9635_v0 = vpop.eup %9634  ;;  %9040 = vmatmul.mubr.msk.bf16.vlgmr.msra.gmra.mrb[176].mxu1 %vm1322_vm4, %v5083_v36  ;;  %v5068_v56 = vmul.f32 %v9633_v52, %v11220_v6 }
 0x81d   :  { %9050 = vmatpush3.bf16.msra.mxu1 %v5390_v29  ;;  %v5065_v46 = vmul.f32 %v9635_v0, %v11223_v8  ;;  %9051 = vmatprep.mubr.msk.bf16.mxu1 %vm9731_vm0, %v12235_v42  ;;  %v11358_v9 = vpop.eup %9636 }
 0x81e   :  { %9061 = vmatprep.subr.bf16.mxu1 %v12235_v42  ;;  %6714 = vrot.lane.b32.xlu1 %v9963_v57, %s9739_s18  ;;  %v5085_v8 = vpack.c.bf16 %v5068_v56, %v5068_v56  ;;  %v5039_v59 = vsel %vm1115_vm3, %v11358_v9, 0.0 }
 0x81f   :  { %v5082_v10 = vpack.c.bf16 %v5065_v46, %v5065_v46 }
 0x820   :  { %v5017_v2 = vpop.xlane.xlu1 %5016 }
 0x821   :  { %9034 = vmatmul.mubr.msk.bf16.vlgmr.msra.gmra.mrb[176].mxu0 %vm1322_vm4, %v5082_v10  ;;  %9640 = vrcp.f32 %v5017_v2 }
 0x822   :  { %9044 = vmatpush3.bf16.msra.mxu0 %v5342_v13  ;;  %9045 = vmatprep.mubr.msk.bf16.mxu0 %vm9731_vm0, %v12235_v42 }
 0x823   :  { %9055 = vmatprep.subr.bf16.mxu0 %v12235_v42  ;;  %6712 = vrot.lane.b32.xlu1 %v9963_v57, %s9740_s19  ;;  %v9639_v6 = vpop.eup %9638 }
 0x824   :  { %v5020_v16 = vpop.xlane.xlu1 %5019  ;;  %9052 = vmatmul.mubr.msk.bf16.vlgmr.msra.gmra.mrb[180].mxu1 %vm1322_vm4, %v5085_v8  ;;  %v5067_v33 = vmul.f32 %v9639_v6, %v11232_v4 }
 0x825   :  { %9642 = vrcp.f32 %v5020_v16  ;;  %9062 = vmatpush3.bf16.msra.mxu1 %v5486_v14  ;;  %5040 = vadd.xlane.f32.xlu0 %v5039_v59 }
 0x826   :  { %9063 = vmatprep.mubr.msk.bf16.mxu1 %vm9731_vm0, %v12235_v42  ;;  %9073 = vmatprep.subr.bf16.mxu1 %v12235_v42  ;;  %v5084_v25 = vpack.c.bf16 %v5067_v33, %v5067_v33 }
 0x827   :  { %6983 = vrot.lane.b32.xlu1 %v9798_v17, %s9741_s20 }
 0x828   :  { %v5026_v63 = vpop.xlane.xlu1 %5025  ;;  %v5023_v58 = vpop.xlane.xlu0 %5022 }
 0x829   :  { %9046 = vmatmul.mubr.msk.bf16.vlgmr.msra.gmra.mrb[180].mxu0 %vm1322_vm4, %v5084_v25  ;;  %9644 = vrcp.f32 %v5026_v63 }
 0x82a   :  { %9056 = vmatpush3.bf16.msra.mxu0 %v5438_v30  ;;  %9646 = vrcp.f32 %v5023_v58  ;;  %9057 = vmatprep.mubr.msk.bf16.mxu0 %vm9731_vm0, %v12235_v42 }
 0x82b   :  { %v9641_v4 = vpop.eup %9640  ;;  %9067 = vmatprep.subr.bf16.mxu0 %v12235_v42  ;;  %7079 = vrot.lane.b32.xlu1 %v9801_v18, %s9741_s20 }
 0x82c   :  { %v5032_v37 = vpop.xlane.xlu1 %5031  ;;  %v5069_v34 = vmul.f32 %v9641_v4, %v11237_v11 }
 0x82e   :  { %v5086_v1 = vpack.c.bf16 %v5069_v34, %v5069_v34 }
 0x82f   :  { %v9643_v48 = vpop.eup %9642  ;;  %7127 = vrot.lane.b32.xlu1 %v9813_v21, %s9741_s20 }
 0x830   :  { %v5029_v49 = vpop.xlane.xlu0 %5028  ;;  %v5529_v36 = vpop.permute.xlu1 %5528  ;;  %v5070_v40 = vmul.f32 %v9643_v48, %v11241_v22 }
 0x831   :  { %9058 = vmatmul.mubr.msk.bf16.vlgmr.msra.gmra.mrb[184].mxu0 %vm1322_vm4, %v5086_v1  ;;  %9648 = vrcp.f32 %v5029_v49  ;;  %v5534_v52 = vsel %vm1326_vm2, %v5529_v36, 0 }
 0x832   :  { %9650 = vrcp.f32 %v5032_v37  ;;  %v5087_v0 = vpack.c.bf16 %v5070_v40, %v5070_v40  ;;  %9068 = vmatpush3.bf16.msra.mxu0 %v5534_v52  ;;  %9069 = vmatprep.mubr.msk.bf16.mxu0 %vm9731_vm0, %v12235_v42 }
 0x833   :  { %v9645_v29 = vpop.eup %9644  ;;  %9079 = vmatprep.subr.bf16.mxu0 %v12235_v42  ;;  %7223 = vrot.lane.b32.xlu1 %v9841_v27, %s9741_s20 }
 0x834   :  { %v9647_v11 = vpop.eup %9646  ;;  %9064 = vmatmul.mubr.msk.bf16.vlgmr.msra.gmra.mrb[184].mxu1 %vm1322_vm4, %v5087_v0  ;;  %v5577_v46 = vpop.permute.xlu0 %5576  ;;  %v5072_v10 = vmul.f32 %v9645_v29, %v11246_v5 }
 0x835   :  { %v5582_v22 = vsel %vm1326_vm2, %v5577_v46, 0  ;;  %v5071_v56 = vmul.f32 %v9647_v11, %v11248_v47  ;;  %9075 = vmatprep.mubr.msk.bf16.mxu1 %vm9731_vm0, %v12235_v42 }
 0x836   :  { %9074 = vmatpush3.bf16.msra.mxu1 %v5582_v22  ;;  %v5089_v6 = vpack.c.bf16 %v5072_v10, %v5072_v10 }
 0x837   :  { %v5088_v2 = vpack.c.bf16 %v5071_v56, %v5071_v56  ;;  %9085 = vmatprep.subr.bf16.mxu1 %v12235_v42  ;;  %7319 = vrot.lane.b32.xlu1 %v9863_v32, %s9741_s20 }
 0x838   :  { %v5625_v13 = vpop.permute.xlu0 %5624 }
 0x839   :  { %9070 = vmatmul.mubr.msk.bf16.vlgmr.msra.gmra.mrb[188].mxu0 %vm1322_vm4, %v5088_v2  ;;  %v5630_v8 = vsel %vm1326_vm2, %v5625_v13, 0 }
 0x83a   :  { %9080 = vmatpush3.bf16.msra.mxu0 %v5630_v8  ;;  %9081 = vmatprep.mubr.msk.bf16.mxu0 %vm9731_vm0, %v12235_v42 }
 0x83b   :  { %v9649_v47 = vpop.eup %9648  ;;  %9091 = vmatprep.subr.bf16.mxu0 %v12235_v42  ;;  %5912 = vrot.lane.b32.xlu0 %v9798_v17, %s9740_s19 }
 0x83c   :  { %v9651_v5 = vpop.eup %9650  ;;  %9076 = vmatmul.mubr.msk.bf16.vlgmr.msra.gmra.mrb[188].mxu1 %vm1322_vm4, %v5089_v6  ;;  %v5721_v14 = vpop.permute.xlu0 %5720  ;;  %v5073_v16 = vmul.f32 %v9649_v47, %v11258_v53  ;;  %7415 = vrot.lane.b32.xlu1 %v9889_v39, %s9741_s20 }
 0x83d   :  { %9087 = vmatprep.mubr.msk.bf16.mxu1 %vm9731_vm0, %v12235_v42  ;;  %v5074_v33 = vmul.f32 %v9651_v5, %v11254_v41  ;;  %v5726_v63 = vsel %vm1326_vm2, %v5721_v14, 0 }
 0x83e   :  { %v5090_v59 = vpack.c.bf16 %v5073_v16, %v5073_v16 }
 0x83f   :  { %6014 = vrot.lane.b32.xlu0 %v9801_v18, %s9739_s18  ;;  %v5091_v30 = vpack.c.bf16 %v5074_v33, %v5074_v33 }
 0x840   :  { %v5673_v25 = vpop.permute.xlu0 %5672 }
 0x841   :  { %9082 = vmatmul.mubr.msk.bf16.vlgmr.msra.gmra.mrb[192].mxu0 %vm1322_vm4, %v5090_v59  ;;  %v5678_v58 = vsel %vm1326_vm2, %v5673_v25, 0 }
 0x842   :  { %9092 = vmatpush3.bf16.msra.mxu0 %v5726_v63  ;;  %9086 = vmatpush3.bf16.msra.mxu1 %v5678_v58 }
 0x843   :  { %9097 = vmatprep.subr.bf16.mxu1 %v12235_v42  ;;  %5962 = vrot.lane.b32.xlu0 %v9808_v20, %s9740_s19 }
 0x844   :  { %v5817_v53 = vpop.permute.xlu0 %5816  ;;  %9093 = vmatprep.mubr.msk.bf16.mxu0 %vm9731_vm0, %v12235_v42  ;;  %9103 = vmatprep.subr.bf16.mxu0 %v12235_v42 }
 0x845   :  { %9088 = vmatmul.mubr.msk.bf16.vlgmr.msra.gmra.mrb[192].mxu1 %vm1322_vm4, %v5091_v30  ;;  %v5822_v10 = vsel %vm1326_vm2, %v5817_v53, 0 }
 0x846   :  { %9099 = vmatprep.mubr.msk.bf16.mxu1 %vm9731_vm0, %v12235_v42 }
 0x847   :  { %6012 = vrot.lane.b32.xlu0 %v9801_v18, %s9740_s19 }
 0x848   :  { %v5769_v41 = vpop.permute.xlu0 %5768 }
 0x849   :  { %v5774_v4 = vsel %vm1326_vm2, %v5769_v41, 0 }
 0x84a   :  { %9098 = vmatpush3.bf16.msra.mxu1 %v5774_v4 }
 0x84b   :  { %6064 = vrot.lane.b32.xlu0 %v9813_v21, %s9739_s18  ;;  %9109 = vmatprep.subr.bf16.mxu1 %v12235_v42 }
 0x84c   :  { %v5865_v49 = vpop.permute.xlu0 %5864 }
 0x84d   :  { %v5870_v52 = vsel %vm1326_vm2, %v5865_v49, 0 }
 0x84f   :  { %6062 = vrot.lane.b32.xlu0 %v9813_v21, %s9740_s19 }
 0x853   :  { %6164 = vrot.lane.b32.xlu0 %v9841_v27, %s9739_s18 }
 0x857   :  { %6162 = vrot.lane.b32.xlu0 %v9841_v27, %s9740_s19 }
 0x85b   :  { %6264 = vrot.lane.b32.xlu0 %v9863_v32, %s9739_s18 }
 0x85f   :  { %6262 = vrot.lane.b32.xlu0 %v9863_v32, %s9740_s19 }
 0x861   :  { %v5038_v37 = vpop.xlane.xlu1 %5037 }
 0x862   :  { %9652 = vrcp.f32 %v5038_v37 }
 0x863   :  { %6364 = vrot.lane.b32.xlu0 %v9889_v39, %s9739_s18 }
 0x865   :  { %v5044_v34 = vpop.xlane.xlu1 %5043 }
 0x866   :  { %9654 = vrcp.f32 %v5044_v34 }
 0x867   :  { %6362 = vrot.lane.b32.xlu0 %v9889_v39, %s9740_s19 }
 0x86b   :  { %6464 = vrot.lane.b32.xlu0 %v9913_v45, %s9739_s18 }
 0x86c   :  { %v9653_v1 = vpop.eup %9652 }
 0x86d   :  { %v5076_v48 = vmul.f32 %v9653_v1, %v11282_v43  ;;  %v5965_v43 = vpop.permute.xlu1 %5964 }
 0x86e   :  { %v5970_v11 = vsel %vm43_vm1, %v5965_v43, 0 }
 0x86f   :  { %v5093_v36 = vpack.c.bf16 %v5076_v48, %v5076_v48  ;;  %6462 = vrot.lane.b32.xlu0 %v9913_v45, %s9740_s19 }
 0x870   :  { %v9655_v40 = vpop.eup %9654 }
 0x871   :  { %9100 = vmatmul.mubr.msk.bf16.vlgmr.msra.gmra.mrb[196].mxu1 %vm1322_vm4, %v5093_v36  ;;  %v5078_v0 = vmul.f32 %v9655_v40, %v11288_v24  ;;  %v6115_v53 = vpop.permute.xlu1 %6114 }
 0x872   :  { %9110 = vmatpush3.bf16.msra.mxu1 %v5870_v52  ;;  %9111 = vmatprep.mubr.msk.bf16.mxu1 %vm9731_vm0, %v12235_v42 }
 0x873   :  { %6564 = vrot.lane.b32.xlu0 %v9937_v51, %s9739_s18  ;;  %9121 = vmatprep.subr.bf16.mxu1 %v12235_v42  ;;  %v5095_v29 = vpack.c.bf16 %v5078_v0, %v5078_v0  ;;  %v6120_v0 = vsel %vm43_vm1, %v6115_v53, 0 }
 0x875   :  { %v6113_v34 = vpop.permute.xlu1 %6112 }
 0x877   :  { %6562 = vrot.lane.b32.xlu0 %v9937_v51, %s9740_s19 }
 0x879   :  { %9112 = vmatmul.mubr.msk.bf16.vlgmr.msra.gmra.mrb[200].mxu1 %vm1322_vm4, %v5095_v29  ;;  %v6215_v36 = vpop.permute.xlu1 %6214 }
 0x87a   :  { %9123 = vmatprep.mubr.msk.bf16.mxu1 %vm9731_vm0, %v12235_v42 }
 0x87b   :  { %6664 = vrot.lane.b32.xlu0 %v9954_v55, %s9739_s18  ;;  %9122 = vmatpush3.bf16.xpose.msra.mxu1 %v5970_v11 }
 0x87c   :  { %9133 = vmatprep.subr.bf16.mxu1 %v12235_v42 }
 0x87d   :  { %v5035_v24 = vpop.xlane.xlu0 %5034  ;;  %v6213_v43 = vpop.permute.xlu1 %6212 }
 0x87e   :  { %9656 = vrcp.f32 %v5035_v24 }
 0x87f   :  { %6662 = vrot.lane.b32.xlu0 %v9954_v55, %s9740_s19 }
 0x881   :  { %v5915_v2 = vpop.permute.xlu0 %5914  ;;  %v6315_v24 = vpop.permute.xlu1 %6314 }
 0x882   :  { %v5920_v4 = vsel %vm43_vm1, %v5915_v2, 0 }
 0x883   :  { %7031 = vrot.lane.b32.xlu0 %v9808_v20, %s9741_s20  ;;  %v6220_v20 = vsel %vm43_vm1, %v6215_v36, 0 }
 0x887   :  { %7175 = vrot.lane.b32.xlu0 %v9838_v26, %s9741_s20  ;;  %v6313_v26 = vpop.permute.xlu1 %6312 }
 0x888   :  { %v9657_v46 = vpop.eup %9656 }
 0x889   :  { %v5075_v22 = vmul.f32 %v9657_v46, %v11309_v23 }
 0x88b   :  { %v5092_v56 = vpack.c.bf16 %v5075_v22, %v5075_v22  ;;  %7271 = vrot.lane.b32.xlu0 %v9856_v31, %s9741_s20  ;;  %v6320_v31 = vsel %vm43_vm1, %v6315_v24, 0 }
 0x88d   :  { %9094 = vmatmul.mubr.msk.bf16.vlgmr.msra.gmra.mrb[196].mxu0 %vm1322_vm4, %v5092_v56 }
 0x88e   :  { %9104 = vmatpush3.bf16.msra.mxu0 %v5822_v10  ;;  %9105 = vmatprep.mubr.msk.bf16.mxu0 %vm9731_vm0, %v12235_v42 }
 0x88f   :  { %9115 = vmatprep.subr.bf16.mxu0 %v12235_v42  ;;  %7367 = vrot.lane.b32.xlu0 %v9886_v38, %s9741_s20  ;;  %v6415_v38 = vpop.permute.xlu1 %6414 }
 0x890   :  { %v6420_v32 = vsel %vm43_vm1, %v6415_v38, 0 }
 0x893   :  { %v6413_v10 = vpop.permute.xlu1 %6412 }
 0x897   :  { %v6515_v39 = vpop.permute.xlu1 %6514 }
 0x8b2   :  { %v5041_v13 = vpop.xlane.xlu0 %5040  ;;  %v11473_v8 = vpop.f32.mrb[168].mxu1 }
 0x8b3   :  { %9658 = vrcp.f32 %v5041_v13  ;;  %v9017_v6 = vpop.f32.mrb[169].mxu1 }
 0x8b4   :  { %v5141_v47 = vpop.f32.mrb[170].mxu1 }
 0x8b5   :  { %v9018_v5 = vpop.f32.mrb[171].mxu1 }
 0x8b6   :  { %v5913_v23 = vpop.permute.xlu0 %5912 }
 0x8ba   :  { %v6015_v14 = vpop.permute.xlu0 %6014  ;;  %v11475_v16 = vpop.f32.mrb[172].mxu1 }
 0x8bb   :  { %v9029_v59 = vpop.f32.mrb[173].mxu1  ;;  %v6020_v48 = vsel %vm43_vm1, %v6015_v14, 0 }
 0x8bc   :  { %v5237_v25 = vpop.f32.mrb[174].mxu1 }
 0x8bd   :  { %v9659_v33 = vpop.eup %9658  ;;  %v9030_v63 = vpop.f32.mrb[175].mxu1 }
 0x8be   :  { %v5963_v58 = vpop.permute.xlu0 %5962  ;;  %v5077_v30 = vmul.f32 %v9659_v33, %v11358_v9  ;;  %v6513_v25 = vpop.permute.xlu1 %6512 }
 0x8bf   :  { %9124 = vmatmul.mubr.msk.bf16.vlgmr.msra.gmra.mrb[204].mxu1 %vm43_vm1, %v5963_v58  ;;  %v6520_v58 = vsel %vm43_vm1, %v6515_v39, 0 }
 0x8c0   :  { %v5094_v41 = vpack.c.bf16 %v5077_v30, %v5077_v30  ;;  %9135 = vmatprep.mubr.msk.bf16.mxu1 %vm9731_vm0, %v12235_v42 }
 0x8c2   :  { %9106 = vmatmul.mubr.msk.bf16.vlgmr.msra.gmra.mrb[200].mxu0 %vm1322_vm4, %v5094_v41  ;;  %v6013_v37 = vpop.permute.xlu0 %6012 }
 0x8c3   :  { %9116 = vmatpush3.bf16.xpose.msra.mxu0 %v5920_v4  ;;  %9117 = vmatprep.mubr.msk.bf16.mxu0 %vm9731_vm0, %v12235_v42 }
 0x8c4   :  { %9127 = vmatprep.subr.bf16.mxu0 %v12235_v42 }
 0x8c6   :  { %v6065_v9 = vpop.permute.xlu0 %6064 }
 0x8c7   :  { %v6070_v1 = vsel %vm43_vm1, %v6065_v9, 0  ;;  %v6615_v9 = vpop.permute.xlu1 %6614 }
 0x8c8   :  { %9134 = vmatpush3.bf16.xpose.msra.mxu1 %v6070_v1 }
 0x8c9   :  { %9145 = vmatprep.subr.bf16.mxu1 %v12235_v42 }
 0x8ca   :  { %9118 = vmatmul.mubr.msk.bf16.vlgmr.msra.gmra.mrb[204].mxu0 %vm43_vm1, %v5913_v23  ;;  %v6063_v49 = vpop.permute.xlu0 %6062 }
 0x8cb   :  { %9128 = vmatpush3.bf16.xpose.msra.mxu0 %v6020_v48  ;;  %9129 = vmatprep.mubr.msk.bf16.mxu0 %vm9731_vm0, %v12235_v42 }
 0x8cc   :  { %9139 = vmatprep.subr.bf16.mxu0 %v12235_v42 }
 0x8ce   :  { %v6165_v40 = vpop.permute.xlu0 %6164 }
 0x8cf   :  { %v6170_v52 = vsel %vm43_vm1, %v6165_v40, 0  ;;  %9136 = vmatmul.mubr.msk.bf16.vlgmr.msra.gmra.mrb[208].mxu1 %vm43_vm1, %v6063_v49 }
 0x8d0   :  { %9146 = vmatpush3.bf16.xpose.msra.mxu1 %v6170_v52  ;;  %9147 = vmatprep.mubr.msk.bf16.mxu1 %vm9731_vm0, %v12235_v42 }
 0x8d1   :  { %9157 = vmatprep.subr.bf16.mxu1 %v12235_v42 }
 0x8d2   :  { %9130 = vmatmul.mubr.msk.bf16.vlgmr.msra.gmra.mrb[208].mxu0 %vm43_vm1, %v6013_v37  ;;  %v6163_v29 = vpop.permute.xlu0 %6162 }
 0x8d3   :  { %9140 = vmatpush3.bf16.xpose.msra.mxu0 %v6120_v0  ;;  %9141 = vmatprep.mubr.msk.bf16.mxu0 %vm9731_vm0, %v12235_v42  ;;  %v6620_v0 = vsel %vm43_vm1, %v6615_v9, 0 }
 0x8d4   :  { %9151 = vmatprep.subr.bf16.mxu0 %v12235_v42 }
 0x8d6   :  { %v6265_v11 = vpop.permute.xlu0 %6264 }
 0x8d7   :  { %v6270_v17 = vsel %vm43_vm1, %v6265_v11, 0  ;;  %9148 = vmatmul.mubr.msk.bf16.vlgmr.msra.gmra.mrb[212].mxu1 %vm43_vm1, %v6163_v29  ;;  %v6613_v29 = vpop.permute.xlu1 %6612 }
 0x8d8   :  { %9158 = vmatpush3.bf16.xpose.msra.mxu1 %v6270_v17  ;;  %9159 = vmatprep.mubr.msk.bf16.mxu1 %vm9731_vm0, %v12235_v42 }
 0x8d9   :  { %9169 = vmatprep.subr.bf16.mxu1 %v12235_v42 }
 0x8da   :  { %9142 = vmatmul.mubr.msk.bf16.vlgmr.msra.gmra.mrb[212].mxu0 %vm43_vm1, %v6113_v34  ;;  %v6263_v18 = vpop.permute.xlu0 %6262 }
 0x8db   :  { %9152 = vmatpush3.bf16.xpose.msra.mxu0 %v6220_v20  ;;  %9153 = vmatprep.mubr.msk.bf16.mxu0 %vm9731_vm0, %v12235_v42 }
 0x8dc   :  { %9163 = vmatprep.subr.bf16.mxu0 %v12235_v42 }
 0x8de   :  { %v6365_v46 = vpop.permute.xlu0 %6364 }
 0x8df   :  { %v6370_v21 = vsel %vm43_vm1, %v6365_v46, 0  ;;  %9160 = vmatmul.mubr.msk.bf16.vlgmr.msra.gmra.mrb[216].mxu1 %vm43_vm1, %v6263_v18 }
 0x8e0   :  { %9170 = vmatpush3.bf16.xpose.msra.mxu1 %v6370_v21  ;;  %9171 = vmatprep.mubr.msk.bf16.mxu1 %vm9731_vm0, %v12235_v42 }
 0x8e1   :  { %9181 = vmatprep.subr.bf16.mxu1 %v12235_v42 }
 0x8e2   :  { %9154 = vmatmul.mubr.msk.bf16.vlgmr.msra.gmra.mrb[216].mxu0 %vm43_vm1, %v6213_v43  ;;  %v6363_v27 = vpop.permute.xlu0 %6362 }
 0x8e3   :  { %9164 = vmatpush3.bf16.xpose.msra.mxu0 %v6320_v31  ;;  %9165 = vmatprep.mubr.msk.bf16.mxu0 %vm9731_vm0, %v12235_v42 }
 0x8e4   :  { %9175 = vmatprep.subr.bf16.mxu0 %v12235_v42 }
 0x8e6   :  { %v6465_v22 = vpop.permute.xlu0 %6464 }
 0x8e7   :  { %v6470_v56 = vsel %vm43_vm1, %v6465_v22, 0  ;;  %9172 = vmatmul.mubr.msk.bf16.vlgmr.msra.gmra.mrb[220].mxu1 %vm43_vm1, %v6363_v27 }
 0x8e8   :  { %9182 = vmatpush3.bf16.xpose.msra.mxu1 %v6470_v56  ;;  %9183 = vmatprep.mubr.msk.bf16.mxu1 %vm9731_vm0, %v12235_v42 }
 0x8e9   :  { %9193 = vmatprep.subr.bf16.mxu1 %v12235_v42 }
 0x8ea   :  { %9166 = vmatmul.mubr.msk.bf16.vlgmr.msra.gmra.mrb[220].mxu0 %vm43_vm1, %v6313_v26  ;;  %v6463_v2 = vpop.permute.xlu0 %6462  ;;  %v6715_v26 = vpop.permute.xlu1 %6714 }
 0x8eb   :  { %v11550_v13 = vpop.f32.mrb[172].mxu0  ;;  %9176 = vmatpush3.bf16.xpose.msra.mxu0 %v6420_v32  ;;  %9177 = vmatprep.mubr.msk.bf16.mxu0 %vm9731_vm0, %v12235_v42  ;;  %v6720_v31 = vsel %vm43_vm1, %v6715_v26, 0 }
 0x8ec   :  { %v9023_v47 = vpop.f32.mrb[173].mxu0  ;;  %9187 = vmatprep.subr.bf16.mxu0 %v12235_v42 }
 0x8ed   :  { %v5189_v5 = vpop.f32.mrb[174].mxu0 }
 0x8ee   :  { %v9024_v23 = vpop.f32.mrb[175].mxu0  ;;  %v6565_v14 = vpop.permute.xlu0 %6564 }
 0x8ef   :  { %v11557_v59 = vpop.f32.mrb[176].mxu1  ;;  %9184 = vmatmul.mubr.msk.bf16.vlgmr.msra.gmra.mrb[224].mxu1 %vm43_vm1, %v6463_v2  ;;  %v6570_v33 = vsel %vm43_vm1, %v6565_v14, 0 }
 0x8f0   :  { %v9041_v63 = vpop.f32.mrb[177].mxu1  ;;  %9194 = vmatpush3.bf16.xpose.msra.mxu1 %v6570_v33  ;;  %9195 = vmatprep.mubr.msk.bf16.mxu1 %vm9731_vm0, %v12235_v42 }
 0x8f1   :  { %v5333_v30 = vpop.f32.mrb[178].mxu1  ;;  %9205 = vmatprep.subr.bf16.mxu1 %v12235_v42 }
 0x8f2   :  { %v9042_v53 = vpop.f32.mrb[179].mxu1  ;;  %9178 = vmatmul.mubr.msk.bf16.vlgmr.msra.gmra.mrb[224].mxu0 %vm43_vm1, %v6413_v10  ;;  %v6563_v41 = vpop.permute.xlu0 %6562 }
 0x8f3   :  { %9188 = vmatpush3.bf16.xpose.msra.mxu0 %v6520_v58  ;;  %9189 = vmatprep.mubr.msk.bf16.mxu0 %vm9731_vm0, %v12235_v42  ;;  %v6713_v10 = vpop.permute.xlu1 %6712 }
 0x8f4   :  { %v11568_v4 = vpop.f32.mrb[176].mxu0  ;;  %9199 = vmatprep.subr.bf16.mxu0 %v12235_v42 }
 0x8f5   :  { %v9035_v34 = vpop.f32.mrb[177].mxu0 }
 0x8f6   :  { %v5285_v1 = vpop.f32.mrb[178].mxu0  ;;  %v6665_v48 = vpop.permute.xlu0 %6664 }
 0x8f7   :  { %v9036_v49 = vpop.f32.mrb[179].mxu0  ;;  %v11573_v36 = vpop.f32.mrb[180].mxu1  ;;  %v6670_v40 = vsel %vm43_vm1, %v6665_v48, 0  ;;  %9196 = vmatmul.mubr.msk.bf16.vlgmr.msra.gmra.mrb[228].mxu1 %vm43_vm1, %v6563_v41 }
 0x8f8   :  { %v9053_v52 = vpop.f32.mrb[181].mxu1  ;;  %9206 = vmatpush3.bf16.xpose.msra.mxu1 %v6670_v40  ;;  %9207 = vmatprep.mubr.msk.bf16.mxu1 %vm9731_vm0, %v12235_v42 }
 0x8f9   :  { %v5429_v43 = vpop.f32.mrb[182].mxu1  ;;  %9217 = vmatprep.subr.bf16.mxu1 %v12235_v42 }
 0x8fa   :  { %v9054_v11 = vpop.f32.mrb[183].mxu1  ;;  %9190 = vmatmul.mubr.msk.bf16.vlgmr.msra.gmra.mrb[228].mxu0 %vm43_vm1, %v6513_v25  ;;  %v6663_v24 = vpop.permute.xlu0 %6662 }
 0x8fb   :  { %9200 = vmatpush3.bf16.xpose.msra.mxu0 %v6620_v0  ;;  %9201 = vmatprep.mubr.msk.bf16.mxu0 %vm9731_vm0, %v12235_v42 }
 0x8fc   :  { %v11584_v17 = vpop.f32.mrb[180].mxu0  ;;  %9211 = vmatprep.subr.bf16.mxu0 %v12235_v42 }
 0x8fd   :  { %v9047_v18 = vpop.f32.mrb[181].mxu0 }
 0x8fe   :  { %v5381_v46 = vpop.f32.mrb[182].mxu0 }
 0x8ff   :  { %v9048_v21 = vpop.f32.mrb[183].mxu0  ;;  %9208 = vmatmul.mubr.msk.bf16.vlgmr.msra.gmra.mrb[232].mxu1 %vm43_vm1, %v6663_v24 }
 0x900   :  { %9219 = vmatprep.mubr.msk.bf16.mxu1 %vm9731_vm0, %v12235_v42 }
 0x902   :  { %9202 = vmatmul.mubr.msk.bf16.vlgmr.msra.gmra.mrb[232].mxu0 %vm43_vm1, %v6613_v29 }
 0x903   :  { %9212 = vmatpush3.bf16.xpose.msra.mxu0 %v6720_v31  ;;  %9213 = vmatprep.mubr.msk.bf16.mxu0 %vm9731_vm0, %v12235_v42 }
 0x904   :  { %v11596_v27 = vpop.f32.mrb[184].mxu0  ;;  %9223 = vmatprep.subr.bf16.mxu0 %v12235_v42 }
 0x905   :  { %v9059_v22 = vpop.f32.mrb[185].mxu0 }
 0x906   :  { %v5477_v56 = vpop.f32.mrb[186].mxu0  ;;  %v6984_v22 = vpop.permute.xlu1 %6983 }
 0x907   :  { %v9060_v32 = vpop.f32.mrb[187].mxu0  ;;  %v11601_v2 = vpop.f32.mrb[184].mxu1  ;;  %v6989_v56 = vsel %vm1326_vm2, %v6984_v22, 0 }
 0x908   :  { %12243 = vst [vmem:[#allocation26_spill] sm:$0xff] %v11601_v2  ;;  %v9065_v39 = vpop.f32.mrb[185].mxu1  ;;  %9218 = vmatpush3.bf16.msra.mxu1 %v6989_v56 }
 0x909   :  { %v5525_v47 = vpop.f32.mrb[186].mxu1  ;;  %9229 = vmatprep.subr.bf16.mxu1 %v12235_v42 }
 0x90a   :  { %v9066_v5 = vpop.f32.mrb[187].mxu1  ;;  %9214 = vmatmul.mubr.msk.bf16.vlgmr.msra.gmra.mrb[236].mxu0 %vm43_vm1, %v6713_v10 }
 0x90b   :  { %9225 = vmatprep.mubr.msk.bf16.mxu0 %vm9731_vm0, %v12235_v42 }
 0x90c   :  { %v11606_v23 = vpop.f32.mrb[188].mxu0 }
 0x90d   :  { %12244 = vst [vmem:[#allocation27_spill] sm:$0xff] %v11606_v23  ;;  %v9071_v33 = vpop.f32.mrb[189].mxu0 }
 0x90e   :  { %v5573_v25 = vpop.f32.mrb[190].mxu0 }
 0x90f   :  { %v9072_v63 = vpop.f32.mrb[191].mxu0  ;;  %v11610_v58 = vpop.f32.mrb[188].mxu1 }
 0x910   :  { %v9077_v30 = vpop.f32.mrb[189].mxu1 }
 0x911   :  { %v5621_v53 = vpop.f32.mrb[190].mxu1  ;;  %v7032_v30 = vpop.permute.xlu0 %7031 }
 0x912   :  { %v9078_v41 = vpop.f32.mrb[191].mxu1 }
 0x913   :  { %v7037_v41 = vsel %vm1326_vm2, %v7032_v30, 0 }
 0x914   :  { %v11612_v34 = vpop.f32.mrb[192].mxu0  ;;  %9224 = vmatpush3.bf16.msra.mxu0 %v7037_v41 }
 0x915   :  { %v9083_v1 = vpop.f32.mrb[193].mxu0  ;;  %9235 = vmatprep.subr.bf16.mxu0 %v12235_v42 }
 0x916   :  { %v5669_v48 = vpop.f32.mrb[194].mxu0 }
 0x917   :  { %v9084_v49 = vpop.f32.mrb[195].mxu0 }
 0x918   :  { %v11616_v40 = vpop.f32.mrb[192].mxu1 }
 0x919   :  { %12245 = vst [vmem:[#allocation28_spill] sm:$0xff] %v11616_v40  ;;  %v9089_v52 = vpop.f32.mrb[193].mxu1 }
 0x91a   :  { %v5717_v0 = vpop.f32.mrb[194].mxu1 }
 0x91b   :  { %v9090_v43 = vpop.f32.mrb[195].mxu1 }
 0x944   :  { %v11618_v29 = vpop.f32.mrb[196].mxu1 }
 0x945   :  { %v9101_v11 = vpop.f32.mrb[197].mxu1 }
 0x946   :  { %v5813_v24 = vpop.f32.mrb[198].mxu1 }
 0x947   :  { %v9102_v18 = vpop.f32.mrb[199].mxu1 }
 0x94c   :  { %v11620_v26 = vpop.f32.mrb[200].mxu1 }
 0x94d   :  { %12246 = vst [vmem:[#allocation29_spill] sm:$0xff] %v11620_v26  ;;  %v9113_v46 = vpop.f32.mrb[201].mxu1 }
 0x94e   :  { %v5909_v21 = vpop.f32.mrb[202].mxu1 }
 0x94f   :  { %v9114_v31 = vpop.f32.mrb[203].mxu1 }
 0x960   :  { %v11624_v10 = vpop.f32.mrb[196].mxu0 }
 0x961   :  { %12247 = vst [vmem:[#allocation30_spill] sm:$0xff] %v11624_v10  ;;  %v9095_v39 = vpop.f32.mrb[197].mxu0 }
 0x962   :  { %v5765_v47 = vpop.f32.mrb[198].mxu0 }
 0x963   :  { %v9096_v5 = vpop.f32.mrb[199].mxu0 }
 0x992   :  { %v6006_v33 = vpop.f32.mrb[204].mxu1 }
 0x993   :  { %v11628_v25 = vmul.f32 0.35355338, %v6006_v33  ;;  %v9125_v63 = vpop.f32.mrb[205].mxu1 }
 0x994   :  { %v6009_v53 = vpop.f32.mrb[206].mxu1 }
 0x995   :  { %v11631_v1 = vpop.f32.mrb[200].mxu0  ;;  %v6782_v48 = vsel %vm1115_vm3, %v11628_v25, -inf  ;;  %v9126_v49 = vpop.f32.mrb[207].mxu1 }
 0x996   :  { %v9107_v0 = vpop.f32.mrb[201].mxu0  ;;  %6783 = vmax.xlane.f32.xlu1 %v6782_v48 }
 0x997   :  { %v5861_v43 = vpop.f32.mrb[202].mxu0 }
 0x998   :  { %v9108_v11 = vpop.f32.mrb[203].mxu0 }
 0x99d   :  { %v5956_v24 = vpop.f32.mrb[204].mxu0 }
 0x99e   :  { %v11638_v18 = vmul.f32 0.35355338, %v5956_v24  ;;  %v9119_v46 = vpop.f32.mrb[205].mxu0 }
 0x99f   :  { %v5959_v21 = vpop.f32.mrb[206].mxu0 }
 0x9a0   :  { %v9120_v31 = vpop.f32.mrb[207].mxu0  ;;  %v6779_v22 = vsel %vm1115_vm3, %v11638_v18, -inf }
 0x9a1   :  { %6780 = vmax.xlane.f32.xlu0 %v6779_v22 }
 0x9a2   :  { %v6106_v56 = vpop.f32.mrb[208].mxu1 }
 0x9a3   :  { %v9137_v39 = vpop.f32.mrb[209].mxu1  ;;  %v11644_v53 = vmul.f32 0.35355338, %v6106_v56 }
 0x9a4   :  { %v6109_v47 = vpop.f32.mrb[210].mxu1 }
 0x9a5   :  { %v6056_v5 = vpop.f32.mrb[208].mxu0  ;;  %v9138_v33 = vpop.f32.mrb[211].mxu1  ;;  %v6788_v0 = vsel %vm1115_vm3, %v11644_v53, -inf }
 0x9a6   :  { %v11642_v63 = vmul.f32 0.35355338, %v6056_v5  ;;  %v9131_v30 = vpop.f32.mrb[209].mxu0 }
 0x9a7   :  { %v6059_v41 = vpop.f32.mrb[210].mxu0 }
 0x9a8   :  { %v9132_v48 = vpop.f32.mrb[211].mxu0  ;;  %v6785_v49 = vsel %vm1115_vm3, %v11642_v63, -inf }
 0x9a9   :  { %6786 = vmax.xlane.f32.xlu0 %v6785_v49 }
 0x9aa   :  { %v6206_v43 = vpop.f32.mrb[212].mxu1 }
 0x9ab   :  { %v11650_v11 = vmul.f32 0.35355338, %v6206_v43  ;;  %v9149_v24 = vpop.f32.mrb[213].mxu1 }
 0x9ac   :  { %v6209_v46 = vpop.f32.mrb[214].mxu1 }
 0x9ad   :  { %v6156_v21 = vpop.f32.mrb[212].mxu0  ;;  %6789 = vmax.xlane.f32.xlu0 %v6788_v0  ;;  %v9150_v31 = vpop.f32.mrb[215].mxu1  ;;  %v6794_v39 = vsel %vm1115_vm3, %v11650_v11, -inf }
 0x9ae   :  { %v11652_v22 = vmul.f32 0.35355338, %v6156_v21  ;;  %v9143_v56 = vpop.f32.mrb[213].mxu0 }
 0x9af   :  { %v6159_v47 = vpop.f32.mrb[214].mxu0 }
 0x9b0   :  { %v9144_v5 = vpop.f32.mrb[215].mxu0  ;;  %v6791_v33 = vsel %vm1115_vm3, %v11652_v22, -inf }
 0x9b1   :  { %6792 = vmax.xlane.f32.xlu1 %v6791_v33  ;;  %6795 = vmax.xlane.f32.xlu0 %v6794_v39 }
 0x9b2   :  { %v6306_v30 = vpop.f32.mrb[216].mxu1 }
 0x9b3   :  { %v11658_v41 = vmul.f32 0.35355338, %v6306_v30  ;;  %v9161_v48 = vpop.f32.mrb[217].mxu1 }
 0x9b4   :  { %v6309_v49 = vpop.f32.mrb[218].mxu1 }
 0x9b5   :  { %v6256_v0 = vpop.f32.mrb[216].mxu0  ;;  %v6800_v43 = vsel %vm1115_vm3, %v11658_v41, -inf  ;;  %v9162_v24 = vpop.f32.mrb[219].mxu1 }
 0x9b6   :  { %v11662_v46 = vmul.f32 0.35355338, %v6256_v0  ;;  %v9155_v21 = vpop.f32.mrb[217].mxu0  ;;  %6801 = vmax.xlane.f32.xlu0 %v6800_v43 }
 0x9b7   :  { %v6259_v31 = vpop.f32.mrb[218].mxu0 }
 0x9b8   :  { %v9156_v56 = vpop.f32.mrb[219].mxu0  ;;  %v6797_v47 = vsel %vm1115_vm3, %v11662_v46, -inf }
 0x9b9   :  { %6798 = vmax.xlane.f32.xlu1 %v6797_v47 }
 0x9ba   :  { %v6406_v39 = vpop.f32.mrb[220].mxu1 }
 0x9bb   :  { %v11666_v5 = vmul.f32 0.35355338, %v6406_v39  ;;  %v9173_v33 = vpop.f32.mrb[221].mxu1 }
 0x9bc   :  { %v6409_v30 = vpop.f32.mrb[222].mxu1 }
 0x9bd   :  { %v6356_v48 = vpop.f32.mrb[220].mxu0  ;;  %v6806_v49 = vsel %vm1115_vm3, %v11666_v5, -inf  ;;  %v9174_v24 = vpop.f32.mrb[223].mxu1 }
 0x9be   :  { %v11670_v0 = vmul.f32 0.35355338, %v6356_v48  ;;  %v9167_v21 = vpop.f32.mrb[221].mxu0  ;;  %6807 = vmax.xlane.f32.xlu0 %v6806_v49 }
 0x9bf   :  { %v6359_v43 = vpop.f32.mrb[222].mxu0 }
 0x9c0   :  { %v9168_v31 = vpop.f32.mrb[223].mxu0  ;;  %v6803_v56 = vsel %vm1115_vm3, %v11670_v0, -inf }
 0x9c1   :  { %6804 = vmax.xlane.f32.xlu1 %v6803_v56 }
 0x9c2   :  { %v6506_v47 = vpop.f32.mrb[224].mxu1 }
 0x9c3   :  { %v11674_v39 = vmul.f32 0.35355338, %v6506_v47  ;;  %v9185_v33 = vpop.f32.mrb[225].mxu1 }
 0x9c4   :  { %v6509_v30 = vpop.f32.mrb[226].mxu1 }
 0x9c5   :  { %v6456_v32 = vpop.f32.mrb[224].mxu0  ;;  %v6812_v14 = vsel %vm1115_vm3, %v11674_v39, -inf  ;;  %v9186_v24 = vpop.f32.mrb[227].mxu1 }
 0x9c6   :  { %v11678_v48 = vmul.f32 0.35355338, %v6456_v32  ;;  %v9179_v21 = vpop.f32.mrb[225].mxu0  ;;  %6813 = vmax.xlane.f32.xlu0 %v6812_v14 }
 0x9c7   :  { %v6459_v49 = vpop.f32.mrb[226].mxu0 }
 0x9c8   :  { %v9180_v43 = vpop.f32.mrb[227].mxu0  ;;  %v6809_v31 = vsel %vm1115_vm3, %v11678_v48, -inf }
 0x9c9   :  { %6810 = vmax.xlane.f32.xlu1 %v6809_v31 }
 0x9ca   :  { %v6606_v56 = vpop.f32.mrb[228].mxu1 }
 0x9cb   :  { %v9197_v47 = vpop.f32.mrb[229].mxu1 }
 0x9cc   :  { %v6609_v20 = vpop.f32.mrb[230].mxu1 }
 0x9cd   :  { %v6556_v33 = vpop.f32.mrb[228].mxu0  ;;  %v9198_v30 = vpop.f32.mrb[231].mxu1 }
 0x9ce   :  { %v9191_v6 = vpop.f32.mrb[229].mxu0 }
 0x9cf   :  { %v6559_v52 = vpop.f32.mrb[230].mxu0 }
 0x9d0   :  { %v9192_v9 = vpop.f32.mrb[231].mxu0  ;;  %v11686_v52 = vmul.f32 0.35355338, %v6606_v56 }
 0x9d2   :  { %v6706_v38 = vpop.f32.mrb[232].mxu1  ;;  %v6818_v9 = vsel %vm1115_vm3, %v11686_v52, -inf }
 0x9d3   :  { %v9209_v24 = vpop.f32.mrb[233].mxu1  ;;  %v11690_v30 = vmul.f32 0.35355338, %v6706_v38 }
 0x9d4   :  { %v6709_v32 = vpop.f32.mrb[234].mxu1  ;;  %v11692_v24 = vmul.f32 0.35355338, %v6556_v33 }
 0x9d5   :  { %v6656_v37 = vpop.f32.mrb[232].mxu0  ;;  %v9210_v21 = vpop.f32.mrb[235].mxu1 }
 0x9d6   :  { %v9203_v14 = vpop.f32.mrb[233].mxu0  ;;  %v11694_v32 = vmul.f32 0.35355338, %v6656_v37  ;;  %v11702_v21 = vpop.permute.xlu1 %7079 }
 0x9d7   :  { %v6659_v49 = vpop.f32.mrb[234].mxu0  ;;  %v11712_v14 = vpop.permute.xlu0 %7175 }
 0x9d8   :  { %v9204_v43 = vpop.f32.mrb[235].mxu0  ;;  %v6821_v56 = vsel %vm1115_vm3, %v11694_v32, -inf }
 0x9da   :  { %7511 = vrot.lane.b32.xlu1 %v9913_v45, %s9741_s20  ;;  %v6824_v45 = vsel %vm1115_vm3, %v11690_v30, -inf  ;;  %v11704_v38 = vpop.permute.xlu1 %7127 }
 0x9db   :  { %v11716_v43 = vpop.permute.xlu0 %7271 }
 0x9dc   :  { %7463 = vrot.lane.b32.xlu0 %v9910_v44, %s9741_s20  ;;  %v6815_v44 = vsel %vm1115_vm3, %v11692_v24, -inf }
 0x9dd   :  { %v6756_v20 = vpop.f32.mrb[236].mxu0 }
 0x9de   :  { %v9215_v31 = vpop.f32.mrb[237].mxu0  ;;  %v11706_v33 = vpop.permute.xlu1 %7223 }
 0x9df   :  { %v6759_v47 = vpop.f32.mrb[238].mxu0 }
 0x9e0   :  { %v9216_v6 = vpop.f32.mrb[239].mxu0 }
 0x9e1   :  { %v11719_v6 = vpop.permute.xlu0 %7367 }
 0x9e2   :  { %v11710_v37 = vpop.permute.xlu1 %7319 }
 0x9e6   :  { %v11714_v49 = vpop.permute.xlu1 %7415 }
 0x9fb   :  { %6819 = vmax.xlane.f32.xlu0 %v6818_v9 }
 0x9fe   :  { %6816 = vmax.xlane.f32.xlu1 %v6815_v44 }
 0x9ff   :  { %6825 = vmax.xlane.f32.xlu0 %v6824_v45 }
 0xa02   :  { %6822 = vmax.xlane.f32.xlu1 %v6821_v56  ;;  %v11722_v56 = vmul.f32 0.35355338, %v6756_v20 }
 0xa04   :  { %v6827_v26 = vsel %vm1115_vm3, %v11722_v56, -inf }
 0xa13   :  { %7559 = vrot.lane.b32.xlu1 %v9934_v50, %s9741_s20 }
 0xa23   :  { %v6784_v31 = vpop.xlane.xlu1 %6783 }
 0xa24   :  { %v6831_v47 = vsub.f32 %v11628_v25, %v6784_v31 }
 0xa26   :  { %v6849_v9 = vmul.f32 1.442695, %v6831_v47 }
 0xa28   :  { %9660 = vpow2.f32 %v6849_v9 }
 0xa2e   :  { %v6781_v45 = vpop.xlane.xlu0 %6780 }
 0xa2f   :  { %v6830_v44 = vsub.f32 %v11638_v18, %v6781_v45 }
 0xa31   :  { %v6847_v50 = vmul.f32 1.442695, %v6830_v44 }
 0xa32   :  { %v11726_v10 = vpop.eup %9660 }
 0xa33   :  { %9662 = vpow2.f32 %v6847_v50  ;;  %v6884_v47 = vsel %vm1115_vm3, %v11726_v10, 0.0 }
 0xa36   :  { %v6787_v40 = vpop.xlane.xlu0 %6786 }
 0xa37   :  { %v6832_v2 = vsub.f32 %v11642_v63, %v6787_v40  ;;  %6828 = vmax.xlane.f32.xlu1 %v6827_v26 }
 0xa39   :  { %v6851_v25 = vmul.f32 1.442695, %v6832_v2 }
 0xa3a   :  { %v6790_v31 = vpop.xlane.xlu0 %6789 }
 0xa3b   :  { %9664 = vpow2.f32 %v6851_v25  ;;  %v6833_v18 = vsub.f32 %v11644_v53, %v6790_v31  ;;  %6885 = vadd.xlane.f32.xlu1 %v6884_v47 }
 0xa3d   :  { %v11732_v20 = vpop.eup %9662  ;;  %v6853_v9 = vmul.f32 1.442695, %v6833_v18 }
 0xa3e   :  { %v6793_v45 = vpop.xlane.xlu1 %6792  ;;  %v6796_v44 = vpop.xlane.xlu0 %6795  ;;  %v6881_v50 = vsel %vm1115_vm3, %v11732_v20, 0.0 }
 0xa3f   :  { %9666 = vpow2.f32 %v6853_v9  ;;  %v6834_v40 = vsub.f32 %v11652_v22, %v6793_v45  ;;  %v6835_v2 = vsub.f32 %v11650_v11, %v6796_v44  ;;  %6882 = vadd.xlane.f32.xlu0 %v6881_v50 }
 0xa41   :  { %v6855_v26 = vmul.f32 1.442695, %v6834_v40  ;;  %v6857_v63 = vmul.f32 1.442695, %v6835_v2 }
 0xa43   :  { %9668 = vpow2.f32 %v6855_v26  ;;  %v6802_v25 = vpop.xlane.xlu0 %6801 }
 0xa44   :  { %9670 = vpow2.f32 %v6857_v63  ;;  %v6837_v31 = vsub.f32 %v11658_v41, %v6802_v25 }
 0xa45   :  { %v11738_v53 = vpop.eup %9664 }
 0xa46   :  { %v6799_v47 = vpop.xlane.xlu1 %6798  ;;  %v6887_v18 = vsel %vm1115_vm3, %v11738_v53, 0.0  ;;  %v6861_v11 = vmul.f32 1.442695, %v6837_v31 }
 0xa47   :  { %v6836_v9 = vsub.f32 %v11662_v46, %v6799_v47  ;;  %6888 = vadd.xlane.f32.xlu0 %v6887_v18 }
 0xa49   :  { %v11744_v22 = vpop.eup %9666  ;;  %v6859_v45 = vmul.f32 1.442695, %v6836_v9 }
 0xa4a   :  { %v6890_v44 = vsel %vm1115_vm3, %v11744_v22, 0.0 }
 0xa4b   :  { %9672 = vpow2.f32 %v6859_v45  ;;  %6891 = vadd.xlane.f32.xlu1 %v6890_v44  ;;  %v6808_v50 = vpop.xlane.xlu0 %6807 }
 0xa4c   :  { %v6839_v40 = vsub.f32 %v11666_v5, %v6808_v50  ;;  %9674 = vpow2.f32 %v6861_v11 }
 0xa4d   :  { %v11749_v41 = vpop.eup %9668 }
 0xa4e   :  { %v11751_v2 = vpop.eup %9670  ;;  %v6865_v26 = vmul.f32 1.442695, %v6839_v40  ;;  %v6805_v46 = vpop.xlane.xlu1 %6804  ;;  %v6893_v63 = vsel %vm1115_vm3, %v11749_v41, 0.0 }
 0xa4f   :  { %v6838_v25 = vsub.f32 %v11670_v0, %v6805_v46  ;;  %6894 = vadd.xlane.f32.xlu0 %v6893_v63  ;;  %v6896_v31 = vsel %vm1115_vm3, %v11751_v2, 0.0 }
 0xa50   :  { %9676 = vpow2.f32 %v6865_v26  ;;  %6897 = vadd.xlane.f32.xlu1 %v6896_v31 }
 0xa51   :  { %v6863_v47 = vmul.f32 1.442695, %v6838_v25 }
 0xa53   :  { %9678 = vpow2.f32 %v6863_v47  ;;  %v6814_v25 = vpop.xlane.xlu0 %6813 }
 0xa54   :  { %v6841_v31 = vsub.f32 %v11674_v39, %v6814_v25 }
 0xa55   :  { %v11758_v5 = vpop.eup %9672 }
 0xa56   :  { %v6811_v18 = vpop.xlane.xlu1 %6810  ;;  %v6899_v9 = vsel %vm1115_vm3, %v11758_v5, 0.0  ;;  %v11762_v11 = vpop.eup %9674  ;;  %v6869_v47 = vmul.f32 1.442695, %v6841_v31 }
 0xa57   :  { %v6840_v45 = vsub.f32 %v11678_v48, %v6811_v18  ;;  %6900 = vadd.xlane.f32.xlu0 %v6899_v9  ;;  %v6902_v50 = vsel %vm1115_vm3, %v11762_v11, 0.0  ;;  %v11782_v18 = vpop.permute.xlu0 %7463 }
 0xa59   :  { %v6867_v0 = vmul.f32 1.442695, %v6840_v45 }
 0xa5a   :  { %v11765_v44 = vpop.eup %9676  ;;  %v11784_v9 = vpop.permute.xlu1 %7511 }
 0xa5b   :  { %9680 = vpow2.f32 %v6867_v0  ;;  %6903 = vadd.xlane.f32.xlu0 %v6902_v50  ;;  %v6908_v40 = vsel %vm1115_vm3, %v11765_v44, 0.0 }
 0xa5c   :  { %6909 = vadd.xlane.f32.xlu1 %v6908_v40  ;;  %9682 = vpow2.f32 %v6869_v47 }
 0xa5d   :  { %v11771_v26 = vpop.eup %9678 }
 0xa5e   :  { %v6905_v46 = vsel %vm1115_vm3, %v11771_v26, 0.0 }
 0xa5f   :  { %6906 = vadd.xlane.f32.xlu0 %v6905_v46 }
 0xa65   :  { %v11775_v48 = vpop.eup %9680 }
 0xa66   :  { %v6911_v63 = vsel %vm1115_vm3, %v11775_v48, 0.0  ;;  %v11788_v23 = vpop.eup %9682 }
 0xa67   :  { %6912 = vadd.xlane.f32.xlu0 %v6911_v63  ;;  %v6914_v31 = vsel %vm1115_vm3, %v11788_v23, 0.0 }
 0xa6d   :  { %7607 = vrot.lane.b32.xlu1 %v9937_v51, %s9741_s20 }
 0xa88   :  { %v6820_v45 = vpop.xlane.xlu0 %6819 }
 0xa89   :  { %v6843_v0 = vsub.f32 %v11686_v52, %v6820_v45 }
 0xa8b   :  { %v6873_v50 = vmul.f32 1.442695, %v6843_v0  ;;  %v6817_v40 = vpop.xlane.xlu1 %6816 }
 0xa8c   :  { %v6842_v46 = vsub.f32 %v11692_v24, %v6817_v40  ;;  %v6826_v63 = vpop.xlane.xlu0 %6825  ;;  %v12249_v40 = vpack.i.bf16 %v11070_v12, %v11072_v60 }
 0xa8d   :  { %9684 = vpow2.f32 %v6873_v50  ;;  %v6845_v51 = vsub.f32 %v11690_v30, %v6826_v63  ;;  %v12248_v50 = vpack.i.bf16 %v11042_v19, %v11054_v35  ;;  %v12250_v63 = vpack.i.bf16 %v11084_v28, %v11082_v61 }
 0xa8e   :  { %v6871_v39 = vmul.f32 1.442695, %v6842_v46  ;;  %v12252_v61 = vpack.i.bf16 %v11568_v4, %v11475_v16  ;;  %v12255_v4 = vpack.i.bf16 %v11631_v1, %v11618_v29  ;;  %v7133_v29 = vsel %vm1326_vm2, %v11704_v38, 0 }
 0xa8f   :  { %v6877_v25 = vmul.f32 1.442695, %v6845_v51  ;;  %v6823_v46 = vpop.xlane.xlu1 %6822 }
 0xa90   :  { %9686 = vpow2.f32 %v6871_v39 }
 0xa91   :  { %9688 = vpow2.f32 %v6877_v25  ;;  %6915 = vadd.xlane.f32.xlu1 %v6914_v31 }
 0xa93   :  { %v11826_v35 = vpop.permute.xlu1 %7559 }
 0xa97   :  { %v11793_v47 = vpop.eup %9684 }
 0xa98   :  { %v6920_v52 = vsel %vm1115_vm3, %v11793_v47, 0.0 }
 0xa99   :  { %6921 = vadd.xlane.f32.xlu1 %v6920_v52 }
 0xa9a   :  { %v11797_v24 = vpop.eup %9686 }
 0xa9b   :  { %v11799_v45 = vpop.eup %9688  ;;  %v6917_v30 = vsel %vm1115_vm3, %v11797_v24, 0.0 }
 0xa9c   :  { %6918 = vadd.xlane.f32.xlu0 %v6917_v30  ;;  %v6926_v0 = vsel %vm1115_vm3, %v11799_v45, 0.0 }
 0xa9d   :  { %6927 = vadd.xlane.f32.xlu1 %v6926_v0 }
 0xaae   :  { %7703 = vrot.lane.b32.xlu1 %v9954_v55, %s9741_s20  ;;  %v6844_v55 = vsub.f32 %v11694_v32, %v6823_v46 }
 0xab0   :  { %v6875_v19 = vmul.f32 1.442695, %v6844_v55 }
 0xab2   :  { %7655 = vrot.lane.b32.xlu0 %v9951_v54, %s9741_s20  ;;  %9337 = vrot.lane.b32.xlu1 %v12248_v50, %s9742_s21  ;;  %v12251_v54 = vpack.i.bf16 %v11096_v62, %v11094_v7  ;;  %9690 = vpow2.f32 %v6875_v19  ;;  %v12253_v7 = vpack.i.bf16 %v11596_v27, %v11573_v36  ;;  %v7229_v19 = vsel %vm1326_vm2, %v11706_v33, 0 }
 0xab3   :  { %v7277_v33 = vsel %vm1326_vm2, %v11716_v43, 0  ;;  %v7325_v43 = vsel %vm1326_vm2, %v11710_v37, 0  ;;  %v7373_v37 = vsel %vm1326_vm2, %v11719_v6, 0  ;;  %v7421_v6 = vsel %vm1326_vm2, %v11714_v49, 0 }
 0xab4   :  { %v7469_v49 = vsel %vm1326_vm2, %v11782_v18, 0 }
 0xab6   :  { %9347 = vrot.lane.b32.xlu1 %v12249_v40, %s9742_s21 }
 0xaba   :  { %9357 = vrot.lane.b32.xlu1 %v12250_v63, %s9742_s21 }
 0xabe   :  { %9367 = vrot.lane.b32.xlu1 %v12251_v54, %s9742_s21 }
 0xac2   :  { %7848 = vrot.lane.b32.xlu1 %v11118_v3, %s9742_s21  ;;  %v11839_v3 = vpop.eup %9690 }
 0xac3   :  { %v6923_v16 = vsel %vm1115_vm3, %v11839_v3, 0.0 }
 0xac4   :  { %v6829_v12 = vpop.xlane.xlu1 %6828 }
 0xac5   :  { %v6846_v60 = vsub.f32 %v11722_v56, %v6829_v12  ;;  %v12254_v56 = vpack.i.bf16 %v11612_v34, %v11610_v58 }
 0xac6   :  { %9382 = vrot.lane.b32.xlu1 %v12252_v61, %s9743_s22 }
 0xac7   :  { %v6879_v28 = vmul.f32 1.442695, %v6846_v60 }
 0xac8   :  { %v6886_v32 = vpop.xlane.xlu1 %6885 }
 0xac9   :  { %9692 = vpow2.f32 %v6879_v28 }
 0xaca   :  { %9694 = vrcp.f32 %v6886_v32  ;;  %9392 = vrot.lane.b32.xlu1 %v12253_v7, %s9743_s22  ;;  %v12256_v32 = vld [vmem:[#allocation19_spill] sm:$0xff] }
 0xacc   :  { %v6883_v62 = vpop.xlane.xlu0 %6882 }
 0xacd   :  { %9696 = vrcp.f32 %v6883_v62 }
 0xace   :  { %9402 = vrot.lane.b32.xlu1 %v12254_v56, %s9743_s22 }
 0xad1   :  { %6924 = vadd.xlane.f32.xlu0 %v6923_v16  ;;  %v12258_v16 = vld [vmem:[#allocation21_spill] sm:$0xff] }
 0xad2   :  { %9412 = vrot.lane.b32.xlu1 %v12255_v4, %s9743_s22  ;;  %v12259_v4 = vld [vmem:[#allocation20_spill] sm:$0xff] }
 0xad3   :  { %v11851_v36 = vpop.eup %9692 }
 0xad4   :  { %v9695_v27 = vpop.eup %9694  ;;  %v6889_v51 = vpop.xlane.xlu0 %6888  ;;  %v6929_v39 = vsel %vm1115_vm3, %v11851_v36, 0.0 }
 0xad5   :  { %v6950_v25 = vmul.f32 %v9695_v27, %v11726_v10  ;;  %9698 = vrcp.f32 %v6889_v51  ;;  %6930 = vadd.xlane.f32.xlu0 %v6929_v39  ;;  %v7085_v10 = vsel %vm1326_vm2, %v11702_v21, 0  ;;  %v7181_v21 = vsel %vm1326_vm2, %v11712_v14, 0 }
 0xad7   :  { %v9697_v58 = vpop.eup %9696  ;;  %v6967_v34 = vpack.c.bf16 %v6950_v25, %v6950_v25 }
 0xad8   :  { %v6949_v31 = vmul.f32 %v9697_v58, %v11732_v20  ;;  %v6892_v52 = vpop.xlane.xlu1 %6891  ;;  %v12261_v58 = vld [vmem:[#allocation23_spill] sm:$0xff] }
 0xad9   :  { %9226 = vmatmul.mubr.msk.bf16.vlgmr.msra.gmra.mrb[240].mxu0 %vm1322_vm4, %v6967_v34  ;;  %9700 = vrcp.f32 %v6892_v52  ;;  %v12262_v34 = vld [vmem:[#allocation22_spill] sm:$0xff] }
 0xada   :  { %9236 = vmatpush3.bf16.msra.mxu0 %v7133_v29  ;;  %v6966_v1 = vpack.c.bf16 %v6949_v31, %v6949_v31  ;;  %9237 = vmatprep.mubr.msk.bf16.mxu0 %vm9731_vm0, %v12235_v42  ;;  %v12263_v31 = vpack.i.bf16 %v12261_v58, %v12262_v34 }
 0xadb   :  { %9247 = vmatprep.subr.bf16.mxu0 %v12235_v42 }
 0xadc   :  { %9220 = vmatmul.mubr.msk.bf16.vlgmr.msra.gmra.mrb[236].mxu1 %vm1322_vm4, %v6966_v1  ;;  %v6895_v20 = vpop.xlane.xlu0 %6894  ;;  %v12264_v1 = vld [vmem:[#allocation24_spill] sm:$0xff] }
 0xadd   :  { %v6898_v30 = vpop.xlane.xlu1 %6897  ;;  %9230 = vmatpush3.bf16.msra.mxu1 %v7085_v10  ;;  %9702 = vrcp.f32 %v6895_v20  ;;  %9231 = vmatprep.mubr.msk.bf16.mxu1 %vm9731_vm0, %v12235_v42  ;;  %v12265_v10 = vld [vmem:[#allocation25_spill] sm:$0xff] }
 0xade   :  { %9704 = vrcp.f32 %v6898_v30  ;;  %9241 = vmatprep.subr.bf16.mxu1 %v12235_v42  ;;  %v12266_v20 = vpack.i.bf16 %v12264_v1, %v12265_v10  ;;  %v12267_v30 = vpack.i.bf16 %v11550_v13, %v11473_v8  ;;  %v7565_v8 = vsel %vm1326_vm2, %v11826_v35, 0  ;;  %v12269_v13 = vld [vmem:[#allocation27_spill] sm:$0xff]  ;;  %v12275_v35 = vld [vmem:[#allocation29_spill] sm:$0xff] }
 0xadf   :  { %v9699_v38 = vpop.eup %9698 }
 0xae0   :  { %v6951_v0 = vmul.f32 %v9699_v38, %v11738_v53  ;;  %v7517_v38 = vsel %vm1326_vm2, %v11784_v9, 0 }
 0xae2   :  { %v6968_v50 = vpack.c.bf16 %v6951_v0, %v6951_v0 }
 0xae3   :  { %v9701_v40 = vpop.eup %9700 }
 0xae4   :  { %v6952_v46 = vmul.f32 %v9701_v40, %v11744_v22  ;;  %9232 = vmatmul.mubr.msk.bf16.vlgmr.msra.gmra.mrb[240].mxu1 %vm1322_vm4, %v6968_v50  ;;  %v6901_v63 = vpop.xlane.xlu0 %6900  ;;  %v12268_v50 = vpack.i.bf16 %v11584_v17, %v11557_v59  ;;  %v12272_v40 = vld [vmem:[#allocation30_spill] sm:$0xff]  ;;  %v12273_v59 = vld [vmem:[#allocation28_spill] sm:$0xff] }
 0xae5   :  { %9242 = vmatpush3.bf16.msra.mxu1 %v7181_v21  ;;  %9706 = vrcp.f32 %v6901_v63  ;;  %9243 = vmatprep.mubr.msk.bf16.mxu1 %vm9731_vm0, %v12235_v42  ;;  %v12274_v17 = vpack.i.bf16 %v12272_v40, %v12273_v59  ;;  %v12280_v40 = vld [vmem:[#allocation13_spill] sm:$0xff] }
 0xae6   :  { %v6969_v55 = vpack.c.bf16 %v6952_v46, %v6952_v46  ;;  %9253 = vmatprep.subr.bf16.mxu1 %v12235_v42 }
 0xae7   :  { %v9703_v54 = vpop.eup %9702 }
 0xae8   :  { %v9705_v53 = vpop.eup %9704  ;;  %v6953_v14 = vmul.f32 %v9703_v54, %v11749_v41  ;;  %9238 = vmatmul.mubr.msk.bf16.vlgmr.msra.gmra.mrb[244].mxu0 %vm1322_vm4, %v6969_v55  ;;  %v6904_v22 = vpop.xlane.xlu0 %6903 }
 0xae9   :  { %9248 = vmatpush3.bf16.msra.mxu0 %v7229_v19  ;;  %9708 = vrcp.f32 %v6904_v22  ;;  %v6910_v12 = vpop.xlane.xlu1 %6909  ;;  %9249 = vmatprep.mubr.msk.bf16.mxu0 %vm9731_vm0, %v12235_v42  ;;  %v6954_v60 = vmul.f32 %v9705_v53, %v11751_v2 }
 0xaea   :  { %v6970_v61 = vpack.c.bf16 %v6953_v14, %v6953_v14  ;;  %9259 = vmatprep.subr.bf16.mxu0 %v12235_v42  ;;  %9710 = vrcp.f32 %v6910_v12 }
 0xaeb   :  { %7751 = vrot.lane.b32.xlu0 %v9963_v57, %s9741_s20  ;;  %v6971_v28 = vpack.c.bf16 %v6954_v60, %v6954_v60  ;;  %v12257_v57 = vpack.i.bf16 %v11061_v15, %v12256_v32  ;;  %v12260_v15 = vpack.i.bf16 %v12258_v16, %v12259_v4 }
 0xaec   :  { %9244 = vmatmul.mubr.msk.bf16.vlgmr.msra.gmra.mrb[244].mxu1 %vm1322_vm4, %v6970_v61  ;;  %v6907_v41 = vpop.xlane.xlu0 %6906 }
 0xaed   :  { %9254 = vmatpush3.bf16.msra.mxu1 %v7277_v33  ;;  %9712 = vrcp.f32 %v6907_v41  ;;  %9255 = vmatprep.mubr.msk.bf16.mxu1 %vm9731_vm0, %v12235_v42  ;;  %v7608_v21 = vpop.permute.xlu1 %7607 }
 0xaee   :  { %9265 = vmatprep.subr.bf16.mxu1 %v12235_v42  ;;  %v7613_v22 = vsel %vm1326_vm2, %v7608_v21, 0 }
 0xaef   :  { %v9707_v2 = vpop.eup %9706  ;;  %9342 = vrot.lane.b32.xlu0 %v12257_v57, %s9742_s21 }
 0xaf0   :  { %v6955_v7 = vmul.f32 %v9707_v2, %v11758_v5  ;;  %9250 = vmatmul.mubr.msk.bf16.vlgmr.msra.gmra.mrb[248].mxu0 %vm1322_vm4, %v6971_v28 }
 0xaf1   :  { %9260 = vmatpush3.bf16.msra.mxu0 %v7325_v43  ;;  %9261 = vmatprep.mubr.msk.bf16.mxu0 %vm9731_vm0, %v12235_v42 }
 0xaf2   :  { %v6972_v62 = vpack.c.bf16 %v6955_v7, %v6955_v7  ;;  %9271 = vmatprep.subr.bf16.mxu0 %v12235_v42 }
 0xaf3   :  { %v9709_v56 = vpop.eup %9708  ;;  %9352 = vrot.lane.b32.xlu0 %v12260_v15, %s9742_s21 }
 0xaf4   :  { %v6956_v5 = vmul.f32 %v9709_v56, %v11762_v11  ;;  %9256 = vmatmul.mubr.msk.bf16.vlgmr.msra.gmra.mrb[248].mxu1 %vm1322_vm4, %v6972_v62  ;;  %v6913_v27 = vpop.xlane.xlu0 %6912  ;;  %v9711_v51 = vpop.eup %9710 }
 0xaf5   :  { %9266 = vmatpush3.bf16.msra.mxu1 %v7373_v37  ;;  %9714 = vrcp.f32 %v6913_v27  ;;  %9267 = vmatprep.mubr.msk.bf16.mxu1 %vm9731_vm0, %v12235_v42  ;;  %v6958_v52 = vmul.f32 %v9711_v51, %v11765_v44  ;;  %v12276_v37 = vld [vmem:[#allocation17_spill] sm:$0xff] }
 0xaf6   :  { %v6973_v39 = vpack.c.bf16 %v6956_v5, %v6956_v5  ;;  %9277 = vmatprep.subr.bf16.mxu1 %v12235_v42  ;;  %v12277_v5 = vld [vmem:[#allocation14_spill] sm:$0xff] }
 0xaf7   :  { %v9713_v25 = vpop.eup %9712  ;;  %9362 = vrot.lane.b32.xlu0 %v12263_v31, %s9742_s21 }
 0xaf8   :  { %v6957_v11 = vmul.f32 %v9713_v25, %v11771_v26  ;;  %9262 = vmatmul.mubr.msk.bf16.vlgmr.msra.gmra.mrb[252].mxu0 %vm1322_vm4, %v6973_v39  ;;  %v6975_v26 = vpack.c.bf16 %v6958_v52, %v6958_v52  ;;  %v12278_v39 = vld [vmem:[#allocation16_spill] sm:$0xff] }
 0xaf9   :  { %9272 = vmatpush3.bf16.msra.mxu0 %v7421_v6  ;;  %9273 = vmatprep.mubr.msk.bf16.mxu0 %vm9731_vm0, %v12235_v42 }
 0xafa   :  { %v6974_v29 = vpack.c.bf16 %v6957_v11, %v6957_v11  ;;  %9283 = vmatprep.subr.bf16.mxu0 %v12235_v42 }
 0xafb   :  { %9372 = vrot.lane.b32.xlu0 %v12266_v20, %s9742_s21 }
 0xafc   :  { %9268 = vmatmul.mubr.msk.bf16.vlgmr.msra.gmra.mrb[252].mxu1 %vm1322_vm4, %v6974_v29 }
 0xafd   :  { %9278 = vmatpush3.bf16.msra.mxu1 %v7469_v49  ;;  %9279 = vmatprep.mubr.msk.bf16.mxu1 %vm9731_vm0, %v12235_v42 }
 0xafe   :  { %9289 = vmatprep.subr.bf16.mxu1 %v12235_v42 }
 0xaff   :  { %v9715_v44 = vpop.eup %9714  ;;  %9377 = vrot.lane.b32.xlu0 %v12267_v30, %s9743_s22 }
 0xb00   :  { %v6959_v18 = vmul.f32 %v9715_v44, %v11775_v48  ;;  %9274 = vmatmul.mubr.msk.bf16.vlgmr.msra.gmra.mrb[0].mxu0 %vm1322_vm4, %v6975_v26  ;;  %v12270_v48 = vld [vmem:[#allocation26_spill] sm:$0xff] }
 0xb01   :  { %9284 = vmatpush3.bf16.msra.mxu0 %v7517_v38  ;;  %9285 = vmatprep.mubr.msk.bf16.mxu0 %vm9731_vm0, %v12235_v42  ;;  %v12271_v9 = vpack.i.bf16 %v12269_v13, %v12270_v48  ;;  %v12279_v48 = vld [vmem:[#allocation12_spill] sm:$0xff] }
 0xb02   :  { %v6976_v0 = vpack.c.bf16 %v6959_v18, %v6959_v18  ;;  %9295 = vmatprep.subr.bf16.mxu0 %v12235_v42 }
 0xb03   :  { %9387 = vrot.lane.b32.xlu0 %v12268_v50, %s9743_s22 }
 0xb04   :  { %9280 = vmatmul.mubr.msk.bf16.vlgmr.msra.gmra.mrb[0].mxu1 %vm1322_vm4, %v6976_v0 }
 0xb05   :  { %9290 = vmatpush3.bf16.msra.mxu1 %v7565_v8  ;;  %9291 = vmatprep.mubr.msk.bf16.mxu1 %vm9731_vm0, %v12235_v42 }
 0xb06   :  { %9301 = vmatprep.subr.bf16.mxu1 %v12235_v42 }
 0xb07   :  { %9397 = vrot.lane.b32.xlu0 %v12271_v9, %s9743_s22 }
 0xb0b   :  { %9407 = vrot.lane.b32.xlu0 %v12274_v17, %s9743_s22 }
 0xb0f   :  { %7916 = vrot.lane.b32.xlu0 %v12275_v35, %s9743_s22 }
 0xb1e   :  { %v6916_v46 = vpop.xlane.xlu1 %6915 }
 0xb1f   :  { %9716 = vrcp.f32 %v6916_v46 }
 0xb26   :  { %v6922_v63 = vpop.xlane.xlu1 %6921 }
 0xb27   :  { %9718 = vrcp.f32 %v6922_v63 }
 0xb29   :  { %v9717_v55 = vpop.eup %9716  ;;  %v6919_v54 = vpop.xlane.xlu0 %6918 }
 0xb2a   :  { %v6960_v53 = vmul.f32 %v9717_v55, %v11788_v23  ;;  %9720 = vrcp.f32 %v6919_v54  ;;  %v6928_v19 = vpop.xlane.xlu1 %6927  ;;  %v12281_v55 = vld [vmem:[#allocation18_spill] sm:$0xff] }
 0xb2b   :  { %9722 = vrcp.f32 %v6928_v19 }
 0xb2c   :  { %v6977_v14 = vpack.c.bf16 %v6960_v53, %v6960_v53  ;;  %v12282_v53 = vld [vmem:[#allocation15_spill] sm:$0xff] }
 0xb2d   :  { %v7656_v57 = vpop.permute.xlu0 %7655 }
 0xb2e   :  { %v7704_v12 = vpop.permute.xlu1 %7703  ;;  %9286 = vmatmul.mubr.msk.bf16.vlgmr.msra.gmra.mrb[4].mxu0 %vm1322_vm4, %v6977_v14  ;;  %v7661_v62 = vsel %vm1326_vm2, %v7656_v57, 0 }
 0xb2f   :  { %9296 = vmatpush3.bf16.msra.mxu0 %v7613_v22  ;;  %9297 = vmatprep.mubr.msk.bf16.mxu0 %vm9731_vm0, %v12235_v42  ;;  %v7709_v28 = vsel %vm1326_vm2, %v7704_v12, 0 }
 0xb30   :  { %9307 = vmatprep.subr.bf16.mxu0 %v12235_v42 }
 0xb31   :  { %v9719_v60 = vpop.eup %9718 }
 0xb32   :  { %v6962_v61 = vmul.f32 %v9719_v60, %v11793_v47  ;;  %v11975_v33 = vpop.permute.xlu1 %9337 }
 0xb34   :  { %v9721_v23 = vpop.eup %9720  ;;  %v6979_v41 = vpack.c.bf16 %v6962_v61, %v6962_v61 }
 0xb35   :  { %v9723_v2 = vpop.eup %9722  ;;  %v6961_v32 = vmul.f32 %v9721_v23, %v11797_v24 }
 0xb36   :  { %v11979_v43 = vpop.permute.xlu1 %9347  ;;  %9298 = vmatmul.mubr.msk.bf16.vlgmr.msra.gmra.mrb[8].mxu0 %vm1322_vm4, %v6979_v41  ;;  %v6964_v47 = vmul.f32 %v9723_v2, %v11799_v45 }
 0xb37   :  { %v6978_v7 = vpack.c.bf16 %v6961_v32, %v6961_v32  ;;  %9308 = vmatpush3.bf16.msra.mxu0 %v7709_v28  ;;  %9309 = vmatprep.mubr.msk.bf16.mxu0 %vm9731_vm0, %v12235_v42 }
 0xb38   :  { %v6981_v24 = vpack.c.bf16 %v6964_v47, %v6964_v47 }
 0xb39   :  { %9292 = vmatmul.mubr.msk.bf16.vlgmr.msra.gmra.mrb[4].mxu1 %vm1322_vm4, %v6978_v7 }
 0xb3a   :  { %9302 = vmatpush3.bf16.msra.mxu1 %v7661_v62  ;;  %v11987_v56 = vpop.permute.xlu1 %9357  ;;  %9303 = vmatprep.mubr.msk.bf16.mxu1 %vm9731_vm0, %v12235_v42 }
 0xb3b   :  { %9313 = vmatprep.subr.bf16.mxu1 %v12235_v42 }
 0xb3e   :  { %v9368_v16 = vpop.permute.xlu1 %9367  ;;  %9310 = vmatmul.mubr.msk.bf16.vlgmr.msra.gmra.mrb[12].mxu0 %vm1322_vm4, %v6981_v24 }
 0xb3f   :  { %v9370_v4 = vunpack.i.h.bf16 %v9368_v16  ;;  %v9369_v15 = vunpack.i.l.bf16 %v9368_v16 }
 0xb41   :  { %v8016_v45 = vsel %vm43_vm1, %v12276_v37, %v9370_v4  ;;  %v8015_v27 = vsel %vm43_vm1, %v12277_v5, %v9369_v15 }
 0xb42   :  { %v7849_v51 = vpop.permute.xlu1 %7848 }
 0xb43   :  { %v8019_v25 = vsel %vm43_vm1, %v12278_v39, %v7849_v51 }
 0xb46   :  { %v11999_v31 = vpop.permute.xlu1 %9382 }
 0xb4a   :  { %v12001_v52 = vpop.permute.xlu1 %9392 }
 0xb4e   :  { %v9403_v44 = vpop.permute.xlu1 %9402 }
 0xb4f   :  { %v9405_v0 = vunpack.i.h.bf16 %v9403_v44  ;;  %v9404_v50 = vunpack.i.l.bf16 %v9403_v44 }
 0xb52   :  { %v9413_v13 = vpop.permute.xlu1 %9412 }
 0xb53   :  { %v9415_v46 = vunpack.i.h.bf16 %v9413_v13  ;;  %v9414_v63 = vunpack.i.l.bf16 %v9413_v13 }
 0xb5e   :  { %v6925_v58 = vpop.xlane.xlu0 %6924 }
 0xb5f   :  { %9724 = vrcp.f32 %v6925_v58 }
 0xb62   :  { %v6931_v34 = vpop.xlane.xlu0 %6930 }
 0xb63   :  { %9726 = vrcp.f32 %v6931_v34 }
 0xb66   :  { %v7752_v6 = vpop.permute.xlu0 %7751 }
 0xb67   :  { %v7757_v20 = vsel %vm1326_vm2, %v7752_v6, 0 }
 0xb69   :  { %v9725_v11 = vpop.eup %9724 }
 0xb6a   :  { %v6963_v29 = vmul.f32 %v9725_v11, %v11839_v3  ;;  %v12004_v1 = vpop.permute.xlu0 %9342 }
 0xb6c   :  { %v6980_v10 = vpack.c.bf16 %v6963_v29, %v6963_v29 }
 0xb6d   :  { %v9727_v49 = vpop.eup %9726 }
 0xb6e   :  { %9304 = vmatmul.mubr.msk.bf16.vlgmr.msra.gmra.mrb[8].mxu1 %vm1322_vm4, %v6980_v10  ;;  %v12008_v26 = vpop.permute.xlu0 %9352  ;;  %v6965_v30 = vmul.f32 %v9727_v49, %v11851_v36 }
 0xb6f   :  { %9314 = vmatpush3.bf16.msra.mxu1 %v7757_v20  ;;  %9315 = vmatprep.mubr.msk.bf16.mxu1 %vm9731_vm0, %v12235_v42 }
 0xb70   :  { %v6982_v8 = vpack.c.bf16 %v6965_v30, %v6965_v30 }
 0xb72   :  { %v9363_v38 = vpop.permute.xlu0 %9362 }
 0xb73   :  { %v9365_v18 = vunpack.i.h.bf16 %v9363_v38  ;;  %v9364_v3 = vunpack.i.l.bf16 %v9363_v38 }
 0xb75   :  { %v8014_v9 = vsel %vm43_vm1, %v12279_v48, %v9365_v18  ;;  %v8013_v59 = vsel %vm43_vm1, %v12280_v40, %v9364_v3 }
 0xb76   :  { %9316 = vmatmul.mubr.msk.bf16.vlgmr.msra.gmra.mrb[12].mxu1 %vm1322_vm4, %v6982_v8  ;;  %v9373_v17 = vpop.permute.xlu0 %9372  ;;  %v12019_v42 = vsel %vm8020_vm5, %v8013_v59, %v9404_v50  ;;  %v12022_v36 = vsel %vm8020_vm5, %v8014_v9, %v9405_v0 }
 0xb77   :  { %v9375_v35 = vunpack.i.h.bf16 %v9373_v17  ;;  %v9374_v21 = vunpack.i.l.bf16 %v9373_v17 }
 0xb79   :  { %v8018_v54 = vsel %vm43_vm1, %v12281_v55, %v9375_v35  ;;  %v8017_v19 = vsel %vm43_vm1, %v12282_v53, %v9374_v21 }
 0xb7a   :  { %v12028_v14 = vpop.permute.xlu0 %9377  ;;  %v12031_v22 = vsel %vm8020_vm5, %v8017_v19, %v9414_v63  ;;  %v12034_v12 = vsel %vm8020_vm5, %v8018_v54, %v9415_v46 }
 0xb7e   :  { %v12036_v60 = vpop.permute.xlu0 %9387 }
 0xb82   :  { %v12038_v61 = vpop.permute.xlu0 %9397 }
 0xb86   :  { %v9408_v23 = vpop.permute.xlu0 %9407 }
 0xb87   :  { %v9410_v41 = vunpack.i.h.bf16 %v9408_v23  ;;  %v9409_v28 = vunpack.i.l.bf16 %v9408_v23 }
 0xb89   :  { %v12041_v2 = vsel %vm8020_vm5, %v8016_v45, %v9410_v41  ;;  %v12044_v32 = vsel %vm8020_vm5, %v8015_v27, %v9409_v28 }
 0xb8a   :  { %v7917_v57 = vpop.permute.xlu0 %7916 }
 0xb8b   :  { %v12047_v7 = vsel %vm8020_vm5, %v8019_v25, %v7917_v57 }
 0xbac   :  { %v7073_v47 = vpop.f32.mrb[240].mxu0 }
 0xbad   :  { %v9227_v62 = vpop.f32.mrb[241].mxu0 }
 0xbae   :  { %v7076_v24 = vpop.f32.mrb[242].mxu0 }
 0xbaf   :  { %v9228_v16 = vpop.f32.mrb[243].mxu0  ;;  %v7025_v4 = vpop.f32.mrb[236].mxu1 }
 0xbb0   :  { %v9416_v15 = vpack.i.bf16 %v7073_v47, %v7025_v4  ;;  %v9221_v37 = vpop.f32.mrb[237].mxu1 }
 0xbb1   :  { %v7028_v5 = vpop.f32.mrb[238].mxu1 }
 0xbb2   :  { %9417 = vrot.lane.b32.xlu1 %v9416_v15, %s9744_s23  ;;  %v9222_v45 = vpop.f32.mrb[239].mxu1 }
 0xbb7   :  { %v7121_v51 = vpop.f32.mrb[240].mxu1 }
 0xbb8   :  { %v9233_v39 = vpop.f32.mrb[241].mxu1 }
 0xbb9   :  { %v7124_v27 = vpop.f32.mrb[242].mxu1 }
 0xbba   :  { %v9234_v58 = vpop.f32.mrb[243].mxu1 }
 0xbbb   :  { %v7169_v34 = vpop.f32.mrb[244].mxu0 }
 0xbbc   :  { %v9421_v6 = vpack.i.bf16 %v7169_v34, %v7121_v51  ;;  %v9239_v25 = vpop.f32.mrb[245].mxu0 }
 0xbbd   :  { %v7172_v11 = vpop.f32.mrb[246].mxu0 }
 0xbbe   :  { %v9240_v29 = vpop.f32.mrb[247].mxu0  ;;  %9422 = vrot.lane.b32.xlu0 %v9421_v6, %s9744_s23 }
 0xbbf   :  { %v7217_v10 = vpop.f32.mrb[244].mxu1 }
 0xbc0   :  { %v9245_v20 = vpop.f32.mrb[245].mxu1 }
 0xbc1   :  { %v7220_v49 = vpop.f32.mrb[246].mxu1 }
 0xbc2   :  { %v9246_v44 = vpop.f32.mrb[247].mxu1  ;;  %v9340_v49 = vunpack.i.h.bf16 %v11975_v33 }
 0xbc3   :  { %v7265_v30 = vpop.f32.mrb[248].mxu0  ;;  %v9339_v44 = vunpack.i.l.bf16 %v11975_v33 }
 0xbc4   :  { %v9426_v38 = vpack.i.bf16 %v7265_v30, %v7217_v10  ;;  %v9251_v18 = vpop.f32.mrb[249].mxu0  ;;  %v9380_v30 = vunpack.i.h.bf16 %v12028_v14 }
 0xbc5   :  { %v7268_v3 = vpop.f32.mrb[250].mxu0 }
 0xbc6   :  { %v9252_v0 = vpop.f32.mrb[251].mxu0  ;;  %9427 = vrot.lane.b32.xlu1 %v9426_v38, %s9744_s23  ;;  %v9379_v38 = vunpack.i.l.bf16 %v12028_v14  ;;  %v12283_v3 = vld [vmem:[#allocation3_spill] sm:$0xff] }
 0xbc7   :  { %v7313_v50 = vpop.f32.mrb[248].mxu1  ;;  %v8004_v0 = vsel %vm43_vm1, %v12283_v3, %v9340_v49  ;;  %v9394_v3 = vunpack.i.l.bf16 %v12001_v52 }
 0xbc8   :  { %v9257_v8 = vpop.f32.mrb[249].mxu1 }
 0xbc9   :  { %v7316_v13 = vpop.f32.mrb[250].mxu1 }
 0xbca   :  { %v9258_v48 = vpop.f32.mrb[251].mxu1 }
 0xbcb   :  { %v7361_v9 = vpop.f32.mrb[252].mxu0 }
 0xbcc   :  { %v9431_v40 = vpack.i.bf16 %v7361_v9, %v7313_v50  ;;  %v9263_v59 = vpop.f32.mrb[253].mxu0  ;;  %v12284_v50 = vld [vmem:[#allocation2_spill] sm:$0xff]  ;;  %v8022_v9 = vsel %vm8020_vm5, %v8004_v0, %v9380_v30 }
 0xbcd   :  { %v7364_v17 = vpop.f32.mrb[254].mxu0  ;;  %v8003_v8 = vsel %vm43_vm1, %v12284_v50, %v9339_v44  ;;  %v12289_v44 = vld [vmem:[#allocation9_spill] sm:$0xff] }
 0xbce   :  { %9432 = vrot.lane.b32.xlu0 %v9431_v40, %s9744_s23  ;;  %v9264_v35 = vpop.f32.mrb[255].mxu0  ;;  %v8021_v40 = vsel %vm8020_vm5, %v8003_v8, %v9379_v38 }
 0xbcf   :  { %v7409_v21 = vpop.f32.mrb[252].mxu1  ;;  %v9345_v35 = vunpack.i.h.bf16 %v12004_v1 }
 0xbd0   :  { %v9269_v46 = vpop.f32.mrb[253].mxu1 }
 0xbd1   :  { %v7412_v63 = vpop.f32.mrb[254].mxu1  ;;  %v12285_v46 = vld [vmem:[#allocation5_spill] sm:$0xff] }
 0xbd2   :  { %v9270_v55 = vpop.f32.mrb[255].mxu1  ;;  %v8006_v63 = vsel %vm43_vm1, %v12285_v46, %v9345_v35  ;;  %v9360_v46 = vunpack.i.h.bf16 %v11987_v56 }
 0xbd3   :  { %v7457_v54 = vpop.f32.mrb[0].mxu0  ;;  %v12286_v55 = vld [vmem:[#allocation4_spill] sm:$0xff] }
 0xbd4   :  { %v9436_v53 = vpack.i.bf16 %v7457_v54, %v7409_v21  ;;  %v9275_v19 = vpop.f32.mrb[1].mxu0  ;;  %v9344_v21 = vunpack.i.l.bf16 %v12004_v1 }
 0xbd5   :  { %v7460_v23 = vpop.f32.mrb[2].mxu0  ;;  %v9384_v19 = vunpack.i.l.bf16 %v11999_v31 }
 0xbd6   :  { %v9276_v41 = vpop.f32.mrb[3].mxu0  ;;  %9437 = vrot.lane.b32.xlu1 %v9436_v53, %s9744_s23  ;;  %v8005_v54 = vsel %vm43_vm1, %v12286_v55, %v9344_v21  ;;  %v9385_v53 = vunpack.i.h.bf16 %v11999_v31  ;;  %v9389_v31 = vunpack.i.l.bf16 %v12036_v60  ;;  %v9400_v55 = vunpack.i.h.bf16 %v12038_v61 }
 0xbd7   :  { %v7505_v28 = vpop.f32.mrb[0].mxu1 }
 0xbd8   :  { %v9281_v57 = vpop.f32.mrb[1].mxu1 }
 0xbd9   :  { %v7508_v47 = vpop.f32.mrb[2].mxu1  ;;  %v8023_v57 = vsel %vm8020_vm5, %v8005_v54, %v9384_v19  ;;  %v9399_v54 = vunpack.i.l.bf16 %v12038_v61 }
 0xbda   :  { %v9282_v62 = vpop.f32.mrb[3].mxu1  ;;  %v8024_v47 = vsel %vm8020_vm5, %v8006_v63, %v9385_v53  ;;  %v9359_v63 = vunpack.i.l.bf16 %v11987_v56  ;;  %v12291_v53 = vld [vmem:[#allocation10_spill] sm:$0xff] }
 0xbdb   :  { %v8012_v19 = vsel %vm43_vm1, %v12291_v53, %v9360_v46 }
 0xc01   :  { %v7553_v24 = vpop.f32.mrb[4].mxu0 }
 0xc02   :  { %v9441_v16 = vpack.i.bf16 %v7553_v24, %v7505_v28  ;;  %v9287_v4 = vpop.f32.mrb[5].mxu0 }
 0xc03   :  { %v7556_v15 = vpop.f32.mrb[6].mxu0  ;;  %v9350_v4 = vunpack.i.h.bf16 %v11979_v43 }
 0xc04   :  { %v9288_v37 = vpop.f32.mrb[7].mxu0  ;;  %9442 = vrot.lane.b32.xlu0 %v9441_v16, %s9744_s23  ;;  %v9349_v15 = vunpack.i.l.bf16 %v11979_v43 }
 0xc05   :  { %v9390_v37 = vunpack.i.h.bf16 %v12036_v60 }
 0xc09   :  { %v7649_v5 = vpop.f32.mrb[8].mxu0 }
 0xc0a   :  { %v9299_v45 = vpop.f32.mrb[9].mxu0 }
 0xc0b   :  { %v7652_v51 = vpop.f32.mrb[10].mxu0  ;;  %v12287_v45 = vld [vmem:[#allocation7_spill] sm:$0xff] }
 0xc0c   :  { %v7601_v39 = vpop.f32.mrb[4].mxu1  ;;  %v9300_v27 = vpop.f32.mrb[11].mxu0  ;;  %v8008_v51 = vsel %vm43_vm1, %v12287_v45, %v9350_v4 }
 0xc0d   :  { %v9446_v58 = vpack.i.bf16 %v7649_v5, %v7601_v39  ;;  %v9293_v34 = vpop.f32.mrb[5].mxu1  ;;  %v12288_v39 = vld [vmem:[#allocation6_spill] sm:$0xff]  ;;  %v8026_v60 = vsel %vm8020_vm5, %v8008_v51, %v9390_v37 }
 0xc0e   :  { %v7604_v6 = vpop.f32.mrb[6].mxu1  ;;  %v8007_v43 = vsel %vm43_vm1, %v12288_v39, %v9349_v15 }
 0xc0f   :  { %9447 = vrot.lane.b32.xlu1 %v9446_v58, %s9744_s23  ;;  %v9294_v25 = vpop.f32.mrb[7].mxu1  ;;  %v8025_v34 = vsel %vm8020_vm5, %v8007_v43, %v9389_v31  ;;  %v9355_v6 = vunpack.i.h.bf16 %v12008_v26 }
 0xc10   :  { %v9354_v25 = vunpack.i.l.bf16 %v12008_v26  ;;  %v12290_v26 = vld [vmem:[#allocation8_spill] sm:$0xff] }
 0xc11   :  { %v12056_v11 = vpop.f32.mrb[12].mxu0  ;;  %v8010_v30 = vsel %vm43_vm1, %v12289_v44, %v9355_v6 }
 0xc12   :  { %v9311_v29 = vpop.f32.mrb[13].mxu0  ;;  %v8009_v38 = vsel %vm43_vm1, %v12290_v26, %v9354_v25 }
 0xc13   :  { %v7748_v10 = vpop.f32.mrb[14].mxu0 }
 0xc14   :  { %v9312_v20 = vpop.f32.mrb[15].mxu0 }
 0xc24   :  { %v9418_v18 = vpop.permute.xlu1 %9417 }
 0xc25   :  { %v9420_v13 = vunpack.i.h.bf16 %v9418_v18  ;;  %v9419_v48 = vunpack.i.l.bf16 %v9418_v18  ;;  %v9395_v18 = vunpack.i.h.bf16 %v12001_v52 }
 0xc27   :  { %v8039_v33 = vsel %vm8038_vm6, %v8021_v40, %v9419_v48  ;;  %v8040_v59 = vsel %vm8038_vm6, %v8022_v9, %v9420_v13  ;;  %v8027_v48 = vsel %vm8020_vm5, %v8009_v38, %v9394_v3  ;;  %v8028_v9 = vsel %vm8020_vm5, %v8010_v30, %v9395_v18 }
 0xc28   :  { %v8056_v14 = vpack.c.bf16 %v8039_v33, %v8039_v33  ;;  %v8057_v17 = vpack.c.bf16 %v8040_v59, %v8040_v59 }
 0xc2a   :  { %8074 = vst.msk [vmem:[%s12204_s1] sm:$0x1] %vm8073_vm7, %v8056_v14  ;;  %8075 = vst.msk [vmem:[%s12204_s1 + $0x1] sm:$0x1] %vm8073_vm7, %v8057_v17 }
 0xc30   :  { %v9423_v23 = vpop.permute.xlu0 %9422 }
 0xc31   :  { %v9425_v41 = vunpack.i.h.bf16 %v9423_v23  ;;  %v9424_v28 = vunpack.i.l.bf16 %v9423_v23  ;;  %v12292_v23 = vld [vmem:[#allocation11_spill] sm:$0xff] }
 0xc32   :  { %v8011_v56 = vsel %vm43_vm1, %v12292_v23, %v9359_v63 }
 0xc33   :  { %v8041_v62 = vsel %vm8038_vm6, %v8023_v57, %v9424_v28  ;;  %v8042_v1 = vsel %vm8038_vm6, %v8024_v47, %v9425_v41  ;;  %v8030_v57 = vsel %vm8020_vm5, %v8012_v19, %v9400_v55  ;;  %v8029_v47 = vsel %vm8020_vm5, %v8011_v56, %v9399_v54 }
 0xc34   :  { %v8058_v24 = vpack.c.bf16 %v8041_v62, %v8041_v62  ;;  %v8059_v16 = vpack.c.bf16 %v8042_v1, %v8042_v1 }
 0xc36   :  { %8076 = vst.msk [vmem:[%s12204_s1 + $0x2] sm:$0x1] %vm8073_vm7, %v8058_v24  ;;  %8077 = vst.msk [vmem:[%s12204_s1 + $0x3] sm:$0x1] %vm8073_vm7, %v8059_v16 }
 0xc38   :  { %v9428_v5 = vpop.permute.xlu1 %9427 }
 0xc39   :  { %v9430_v27 = vunpack.i.h.bf16 %v9428_v5  ;;  %v9429_v58 = vunpack.i.l.bf16 %v9428_v5 }
 0xc3b   :  { %v8043_v29 = vsel %vm8038_vm6, %v8025_v34, %v9429_v58  ;;  %v8044_v10 = vsel %vm8038_vm6, %v8026_v60, %v9430_v27 }
 0xc3c   :  { %v8060_v20 = vpack.c.bf16 %v8043_v29, %v8043_v29  ;;  %v8061_v49 = vpack.c.bf16 %v8044_v10, %v8044_v10 }
 0xc3e   :  { %8078 = vst.msk [vmem:[%s12204_s1 + $0x4] sm:$0x1] %vm8073_vm7, %v8060_v20  ;;  %8079 = vst.msk [vmem:[%s12204_s1 + $0x5] sm:$0x1] %vm8073_vm7, %v8061_v49 }
 0xc40   :  { %v9433_v0 = vpop.permute.xlu0 %9432 }
 0xc41   :  { %v9435_v50 = vunpack.i.h.bf16 %v9433_v0  ;;  %v9434_v8 = vunpack.i.l.bf16 %v9433_v0  ;;  %v7697_v13 = vpop.f32.mrb[8].mxu1 }
 0xc42   :  { %v9451_v40 = vpack.i.bf16 %v12056_v11, %v7697_v13  ;;  %v9305_v33 = vpop.f32.mrb[9].mxu1 }
 0xc43   :  { %v8045_v59 = vsel %vm8038_vm6, %v8027_v48, %v9434_v8  ;;  %v8046_v14 = vsel %vm8038_vm6, %v8028_v9, %v9435_v50  ;;  %v7700_v17 = vpop.f32.mrb[10].mxu1 }
 0xc44   :  { %v8062_v35 = vpack.c.bf16 %v8045_v59, %v8045_v59  ;;  %v8063_v21 = vpack.c.bf16 %v8046_v14, %v8046_v14  ;;  %9452 = vrot.lane.b32.xlu0 %v9451_v40, %s9744_s23  ;;  %v9306_v52 = vpop.f32.mrb[11].mxu1 }
 0xc46   :  { %8080 = vst.msk [vmem:[%s12204_s1 + $0x6] sm:$0x1] %vm8073_vm7, %v8062_v35  ;;  %8081 = vst.msk [vmem:[%s12204_s1 + $0x7] sm:$0x1] %vm8073_vm7, %v8063_v21 }
 0xc48   :  { %v9438_v11 = vpop.permute.xlu1 %9437 }
 0xc49   :  { %v9440_v41 = vunpack.i.h.bf16 %v9438_v11  ;;  %v9439_v28 = vunpack.i.l.bf16 %v9438_v11  ;;  %v7793_v61 = vpop.f32.mrb[12].mxu1 }
 0xc4a   :  { %7984 = vrot.lane.b32.xlu1 %v7793_v61, %s9744_s23  ;;  %v9317_v62 = vpop.f32.mrb[13].mxu1 }
 0xc4b   :  { %v8047_v1 = vsel %vm8038_vm6, %v8029_v47, %v9439_v28  ;;  %v8048_v24 = vsel %vm8038_vm6, %v8030_v57, %v9440_v41  ;;  %v7796_v16 = vpop.f32.mrb[14].mxu1 }
 0xc4c   :  { %v8064_v4 = vpack.c.bf16 %v8047_v1, %v8047_v1  ;;  %v8065_v15 = vpack.c.bf16 %v8048_v24, %v8048_v24  ;;  %v9318_v37 = vpop.f32.mrb[15].mxu1 }
 0xc4e   :  { %8082 = vst.msk [vmem:[%s12204_s1 + $0x8] sm:$0x1] %vm8073_vm7, %v8064_v4  ;;  %8083 = vst.msk [vmem:[%s12204_s1 + $0x9] sm:$0x1] %vm8073_vm7, %v8065_v15 }
 0xc76   :  { %v9443_v31 = vpop.permute.xlu0 %9442 }
 0xc77   :  { %v9445_v5 = vunpack.i.h.bf16 %v9443_v31  ;;  %v9444_v45 = vunpack.i.l.bf16 %v9443_v31 }
 0xc79   :  { %v8049_v51 = vsel %vm8038_vm6, %v12019_v42, %v9444_v45  ;;  %v8050_v39 = vsel %vm8038_vm6, %v12022_v36, %v9445_v5 }
 0xc7a   :  { %v8066_v43 = vpack.c.bf16 %v8049_v51, %v8049_v51  ;;  %v8067_v27 = vpack.c.bf16 %v8050_v39, %v8050_v39 }
 0xc7c   :  { %8084 = vst.msk [vmem:[%s12204_s1 + $0xa] sm:$0x1] %vm8073_vm7, %v8066_v43  ;;  %8085 = vst.msk [vmem:[%s12204_s1 + $0xb] sm:$0x1] %vm8073_vm7, %v8067_v27 }
 0xc81   :  { %v9448_v58 = vpop.permute.xlu1 %9447 }
 0xc82   :  { %v9450_v60 = vunpack.i.h.bf16 %v9448_v58  ;;  %v9449_v34 = vunpack.i.l.bf16 %v9448_v58 }
 0xc84   :  { %v8051_v42 = vsel %vm8038_vm6, %v12044_v32, %v9449_v34  ;;  %v8052_v36 = vsel %vm8038_vm6, %v12041_v2, %v9450_v60 }
 0xc85   :  { %v8068_v6 = vpack.c.bf16 %v8051_v42, %v8051_v42  ;;  %v8069_v25 = vpack.c.bf16 %v8052_v36, %v8052_v36 }
 0xc87   :  { %8086 = vst.msk [vmem:[%s12204_s1 + $0xc] sm:$0x1] %vm8073_vm7, %v8068_v6  ;;  %8087 = vst.msk [vmem:[%s12204_s1 + $0xd] sm:$0x1] %vm8073_vm7, %v8069_v25 }
 0xcb6   :  { %v9453_v29 = vpop.permute.xlu0 %9452 }
 0xcb7   :  { %v9455_v10 = vunpack.i.h.bf16 %v9453_v29  ;;  %v9454_v20 = vunpack.i.l.bf16 %v9453_v29 }
 0xcb9   :  { %v8053_v32 = vsel %vm8038_vm6, %v12031_v22, %v9454_v20  ;;  %v8054_v2 = vsel %vm8038_vm6, %v12034_v12, %v9455_v10 }
 0xcba   :  { %v8070_v49 = vpack.c.bf16 %v8053_v32, %v8053_v32  ;;  %v8071_v44 = vpack.c.bf16 %v8054_v2, %v8054_v2 }
 0xcbc   :  { %8088 = vst.msk [vmem:[%s12204_s1 + $0xe] sm:$0x1] %vm8073_vm7, %v8070_v49  ;;  %8089 = vst.msk [vmem:[%s12204_s1 + $0xf] sm:$0x1] %vm8073_vm7, %v8071_v44  ;;  %v7985_v30 = vpop.permute.xlu1 %7984 }
 0xcbd   :  { %v8055_v26 = vsel %vm8038_vm6, %v12047_v7, %v7985_v30 }
 0xcbe   :  { %v8072_v22 = vpack.c.bf16 %v8055_v26, %v8055_v26 }
 0xcc0   :  { %8090 = vst.msk [vmem:[%s12204_s1 + $0x10] sm:$0x1] %vm8073_vm7, %v8072_v22 }

</bundles_post_ra>
